<compile_context>
chip_gen: v7x
topology: tpu7x:2x2x1
jax: 0.10.0
libtpu: 0.0.40
codegen_flags: <defaults>
</compile_context>

<pallas_src>
import functools

import jax
import jax.numpy as jnp
from jax.experimental import pallas as pl
from jax.experimental.pallas import tpu as pltpu


# ----------------------------------------------------------------------------
# Fused kernel.
#   grid = (n_blocks,) over blocks of LB VMattention layers ("arbitrary").
#   step 0       : Hattention(x0)            -> hout scratch
#   every step g : LB VMattention layers     -> vmout scratch [g*LB + l]
#   last step    : Vattention over vmout, + hout + x1, ReLU, classifier Linear
# ----------------------------------------------------------------------------
def _fused_vh_kernel(
    x0_ref, x1_ref, x2_ref,
    wh_ref, bh_ref, ch_ref,
    wvm_ref, bvm_ref, cvm_ref,
    wv_ref, bv_ref, cv_ref,
    wc_ref, bc_ref,
    out_ref,
    hout_ref, vmout_ref,
    *, lb,
):
    g = pl.program_id(0)
    last = pl.num_programs(0) - 1

    def attn_ctx(x3, w_bf16, b_row, c_row):
        # AttentionWithContext on one (B, S, H) slab -> (B, H).
        bb, ss, hh = x3.shape
        u = jnp.tanh(
            jnp.dot(x3.reshape(bb * ss, hh).astype(jnp.bfloat16), w_bf16,
                    preferred_element_type=jnp.float32)
            + b_row                                           # (1, H) broadcast
        ).reshape(bb, ss, hh)                                 # f32
        sc = jnp.sum(u * c_row, axis=-1, keepdims=True)       # (B, S, 1)
        m = jnp.max(sc, axis=1, keepdims=True)
        e = jnp.exp(sc - m)
        a = e / jnp.sum(e, axis=1, keepdims=True)             # softmax over S
        return jnp.sum(a * x3, axis=1)                        # (B, H)

    # ---- Hattention on x0 (computed exactly once, at the first grid step) ----
    @pl.when(g == 0)
    def _():
        hout_ref[...] = attn_ctx(x0_ref[...], wh_ref[...], bh_ref[...], ch_ref[...])

    # ---- LB VMattention layers of this block (static unroll) ----
    for l in range(lb):
        s = attn_ctx(x2_ref[l], wvm_ref[l], bvm_ref[l], cvm_ref[l])   # (B, H)
        vmout_ref[g * lb + l] = s                                      # persistent scratch

    # ---- Epilogue: V-attention + residual + ReLU + classifier ----
    @pl.when(g == last)
    def _():
        vm = vmout_ref[...]                                   # (L_vm, B, H) f32
        nL, bb, hh = vm.shape
        u = jnp.tanh(
            jnp.dot(vm.reshape(nL * bb, hh).astype(jnp.bfloat16), wv_ref[...],
                    preferred_element_type=jnp.float32)
            + bv_ref[...]
        ).reshape(nL, bb, hh)
        sc = jnp.sum(u * cv_ref[...], axis=-1, keepdims=True)  # (L_vm, B, 1)
        m = jnp.max(sc, axis=0, keepdims=True)
        e = jnp.exp(sc - m)
        a = e / jnp.sum(e, axis=0, keepdims=True)               # softmax over layers
        att_v = jnp.sum(a * vm, axis=0)                          # (B, H)

        # Dropout is an inference-time identity -> just ReLU + Linear.
        att = jnp.maximum(hout_ref[...] + att_v + x1_ref[...], 0.0)

        if wc_ref.shape[0] == 1:
            # class_num == 1: classifier weight packed as a (1, H) row -> VPU reduce.
            logits = jnp.sum(att * wc_ref[...], axis=-1, keepdims=True) + bc_ref[...]
        else:
            logits = jnp.dot(att, wc_ref[...],
                             preferred_element_type=jnp.float32) + bc_ref[...]
        out_ref[...] = logits.astype(out_ref.dtype)


def vh_classifier_forward(packed, x0, x1, x2):
    nl = packed["nl"]
    lb = packed["lb"]
    n_vm = 12 - nl
    n_blocks = n_vm // lb
    nl_blk = nl // lb

    B, S, H = x0.shape
    C = packed["bc"].shape[-1]
    n_layers = 1 + n_vm

    cost = pl.CostEstimate(
        flops=int(2 * (n_layers * B * S + n_vm * B) * H * H),
        transcendentals=int((n_layers * B * S + n_vm * B) * (H + 1)),
        bytes_accessed=int(
            (packed["wvm"].size + packed["wh"].size + packed["wv"].size) * 2
            + (B * S * H + n_vm * B * S * H + B * H) * 4 + B * C * 4),
    )

    kernel = functools.partial(_fused_vh_kernel, lb=lb)

    return pl.pallas_call(
        kernel,
        out_shape=jax.ShapeDtypeStruct((B, C), jnp.float32),
        grid=(n_blocks,),
        in_specs=[
            pl.BlockSpec((B, S, H), lambda g: (0, 0, 0)),                  # x0 (resident)
            pl.BlockSpec((B, H), lambda g: (0, 0)),                        # x1 (resident)
            pl.BlockSpec((lb, B, S, H), lambda g: (nl_blk + g, 0, 0, 0)),  # x2 layer block
            pl.BlockSpec((H, H), lambda g: (0, 0)),                        # W_H  (bf16, resident)
            pl.BlockSpec((1, H), lambda g: (0, 0)),                        # b_H
            pl.BlockSpec((1, H), lambda g: (0, 0)),                        # ctx_H
            pl.BlockSpec((lb, H, H), lambda g: (g, 0, 0)),                 # W_VM block (bf16)
            pl.BlockSpec((lb, 1, H), lambda g: (g, 0, 0)),                 # b_VM block
            pl.BlockSpec((lb, 1, H), lambda g: (g, 0, 0)),                 # ctx_VM block
            pl.BlockSpec((H, H), lambda g: (0, 0)),                        # W_V  (bf16, resident)
            pl.BlockSpec((1, H), lambda g: (0, 0)),                        # b_V
            pl.BlockSpec((1, H), lambda g: (0, 0)),                        # ctx_V
            pl.BlockSpec(packed["wc"].shape, lambda g: (0, 0)),            # classifier W
            pl.BlockSpec((1, C), lambda g: (0, 0)),                        # classifier b
        ],
        out_specs=pl.BlockSpec((B, C), lambda g: (0, 0)),
        scratch_shapes=[
            pltpu.VMEM((B, H), jnp.float32),        # Hattention output
            pltpu.VMEM((n_vm, B, H), jnp.float32),  # VMattention outputs (persist across steps)
        ],
        compiler_params=pltpu.CompilerParams(
            dimension_semantics=("arbitrary",),      # epilogue needs all layers (see header)
            vmem_limit_bytes=32 * 1024 * 1024,
        ),
        cost_estimate=cost,
    )(x0, x1, x2,
      packed["wh"], packed["bh"], packed["ch"],
      packed["wvm"], packed["bvm"], packed["cvm"],
      packed["wv"], packed["bv"], packed["cv"],
      packed["wc"], packed["bc"])


# ----------------------------------------------------------------------------
# Parameter construction (deterministic, mimics init_weights):
#   Linear weights -> xavier_normal, biases -> zeros.
# Weights are stored as (in, out) so kernels compute x @ W directly.
# ----------------------------------------------------------------------------
def _xavier_normal(key, fan_in, fan_out, shape):
    std = (2.0 / (fan_in + fan_out)) ** 0.5
    return std * jax.random.normal(key, shape, dtype=jnp.float32)


def make_attention_params(key, hidden):
    k1, k2 = jax.random.split(key)
    return {
        "w_attn": _xavier_normal(k1, hidden, hidden, (hidden, hidden)),
        "b_attn": jnp.zeros((hidden,), jnp.float32),
        "w_ctx": _xavier_normal(k2, hidden, 1, (hidden, 1)),
    }


def make_vh_classifier_params(key, in_feature=768, class_num=1, nl=6):
    n_vm = 12 - nl
    keys = jax.random.split(key, n_vm + 3)
    return {
        "H": make_attention_params(keys[0], in_feature),
        "V": make_attention_params(keys[1], in_feature),
        "VM": [make_attention_params(keys[2 + k], in_feature) for k in range(n_vm)],
        "cls_w": _xavier_normal(keys[2 + n_vm], 768, class_num, (768, class_num)),
        "cls_b": jnp.zeros((class_num,), jnp.float32),
        "nl": nl,
    }


def pack_vh_params(params, lb=3):
    """Stack the 6 VM layers, cast all 768x768 matmul weights to bf16 once
    (halves the dominant HBM stream), reshape bias/context vectors to rows."""
    nl = params["nl"]
    n_vm = 12 - nl
    assert n_vm % lb == 0 and nl % lb == 0, "layer-block size must divide nl and 12-nl"
    H = params["H"]["w_attn"].shape[0]
    C = params["cls_w"].shape[1]
    wc = (params["cls_w"].reshape(1, H) if C == 1 else params["cls_w"]).astype(jnp.float32)
    return {
        "nl": nl, "lb": lb,
        "wh": params["H"]["w_attn"].astype(jnp.bfloat16),
        "bh": params["H"]["b_attn"].reshape(1, H),
        "ch": params["H"]["w_ctx"].reshape(1, H),
        "wvm": jnp.stack([p["w_attn"] for p in params["VM"]]).astype(jnp.bfloat16),
        "bvm": jnp.stack([p["b_attn"].reshape(1, H) for p in params["VM"]]),
        "cvm": jnp.stack([p["w_ctx"].reshape(1, H) for p in params["VM"]]),
        "wv": params["V"]["w_attn"].astype(jnp.bfloat16),
        "bv": params["V"]["b_attn"].reshape(1, H),
        "cv": params["V"]["w_ctx"].reshape(1, H),
        "wc": wc,
        "bc": params["cls_b"].reshape(1, C),
    }


# ----------------------------------------------------------------------------
# Pure-JAX reference (same bf16 weight casts) for a correctness sanity check.
# ----------------------------------------------------------------------------
def vh_classifier_reference(packed, x0, x1, x2):
    nl = packed["nl"]

    def attn(x, w, b, c):
        u = jnp.tanh(jnp.einsum("...h,hk->...k", x.astype(jnp.bfloat16), w,
                                preferred_element_type=jnp.float32) + b[0])
        sc = jnp.sum(u * c[0], axis=-1, keepdims=True)
        a = jax.nn.softmax(sc, axis=-2)
        return jnp.sum(a * x, axis=-2)

    att_h = attn(x0, packed["wh"], packed["bh"], packed["ch"])
    vm = jnp.stack(
        [attn(x2[nl + k], packed["wvm"][k], packed["bvm"][k], packed["cvm"][k])
         for k in range(12 - nl)], axis=1)                       # (B, L_vm, H)
    att_v = attn(vm, packed["wv"], packed["bv"], packed["cv"])
    att = jax.nn.relu(att_h + att_v + x1)
    if packed["wc"].shape[0] == 1:
        return jnp.sum(att * packed["wc"], axis=-1, keepdims=True) + packed["bc"]
    return att @ packed["wc"] + packed["bc"]


if __name__ == "__main__":
    # The classifier Linear hard-codes 768 input features, so hidden must be 768.
    B, S, H = 2, 8, 768
    class_num, nl = 1, 6

    key = jax.random.PRNGKey(0)
    kp, k0, k1, k2 = jax.random.split(key, 4)

    params = make_vh_classifier_params(kp, in_feature=H, class_num=class_num, nl=nl)
    packed = pack_vh_params(params, lb=3)

    x0 = jax.random.normal(k0, (B, S, H), dtype=jnp.float32)
    x1 = jax.random.normal(k1, (B, H), dtype=jnp.float32)
    x2 = jax.random.normal(k2, (12, B, S, H), dtype=jnp.float32)

    out = vh_classifier_forward(packed, x0, x1, x2)
    out = jax.block_until_ready(out)

    assert out.shape == (B, class_num), out.shape
    assert bool(jnp.all(jnp.isfinite(out)))

    ref = jax.block_until_ready(vh_classifier_reference(packed, x0, x1, x2))
    assert bool(jnp.allclose(out, ref, atol=2e-2, rtol=2e-2)), (out, ref)

    print("KERNEL_OK")
</pallas_src>

<mosaic_0001>
module attributes {stable_mosaic.version = 11 : i64} {
  func.func @_fused_vh_kernel(%arg0: i32, %arg1: memref<2x8x768xf32, #tpu.memory_space<vmem>>, %arg2: memref<2x768xf32, #tpu.memory_space<vmem>>, %arg3: memref<3x2x8x768xf32, #tpu.memory_space<vmem>>, %arg4: memref<768x768xbf16, #tpu.memory_space<vmem>>, %arg5: memref<1x768xf32, #tpu.memory_space<vmem>>, %arg6: memref<1x768xf32, #tpu.memory_space<vmem>>, %arg7: memref<3x768x768xbf16, #tpu.memory_space<vmem>>, %arg8: memref<3x1x768xf32, #tpu.memory_space<vmem>>, %arg9: memref<3x1x768xf32, #tpu.memory_space<vmem>>, %arg10: memref<768x768xbf16, #tpu.memory_space<vmem>>, %arg11: memref<1x768xf32, #tpu.memory_space<vmem>>, %arg12: memref<1x768xf32, #tpu.memory_space<vmem>>, %arg13: memref<1x768xf32, #tpu.memory_space<vmem>>, %arg14: memref<1x1xf32, #tpu.memory_space<vmem>>, %arg15: memref<2x1xf32, #tpu.memory_space<vmem>>, %arg16: memref<2x768xf32, #tpu.memory_space<vmem>>, %arg17: memref<6x2x768xf32, #tpu.memory_space<vmem>>) attributes {dimension_semantics = [#tpu.dimension_semantics<arbitrary>], iteration_bounds = array<i64: 2>, scalar_prefetch = 0 : i64, scratch_operands = 2 : i64, tpu.core_type = #tpu.core_type<tc>, window_params = [{pipeline_mode = #tpu.pipeline_mode<synchronous>, transform_indices = @transform_0, window_bounds = array<i64: 2, 8, 768>}, {pipeline_mode = #tpu.pipeline_mode<synchronous>, transform_indices = @transform_1, window_bounds = array<i64: 2, 768>}, {transform_indices = @transform_2, window_bounds = array<i64: 3, 2, 8, 768>}, {pipeline_mode = #tpu.pipeline_mode<synchronous>, transform_indices = @transform_3, window_bounds = array<i64: 768, 768>}, {pipeline_mode = #tpu.pipeline_mode<synchronous>, transform_indices = @transform_4, window_bounds = array<i64: 1, 768>}, {pipeline_mode = #tpu.pipeline_mode<synchronous>, transform_indices = @transform_5, window_bounds = array<i64: 1, 768>}, {transform_indices = @transform_6, window_bounds = array<i64: 3, 768, 768>}, {transform_indices = @transform_7, window_bounds = array<i64: 3, 1, 768>}, {transform_indices = @transform_8, window_bounds = array<i64: 3, 1, 768>}, {pipeline_mode = #tpu.pipeline_mode<synchronous>, transform_indices = @transform_9, window_bounds = array<i64: 768, 768>}, {pipeline_mode = #tpu.pipeline_mode<synchronous>, transform_indices = @transform_10, window_bounds = array<i64: 1, 768>}, {pipeline_mode = #tpu.pipeline_mode<synchronous>, transform_indices = @transform_11, window_bounds = array<i64: 1, 768>}, {pipeline_mode = #tpu.pipeline_mode<synchronous>, transform_indices = @transform_12, window_bounds = array<i64: 1, 768>}, {pipeline_mode = #tpu.pipeline_mode<synchronous>, transform_indices = @transform_13, window_bounds = array<i64: 1, 1>}, {pipeline_mode = #tpu.pipeline_mode<synchronous>, transform_indices = @transform_14, window_bounds = array<i64: 2, 1>}]} {
    %c0_i32 = arith.constant 0 : i32
    %0 = arith.cmpi eq, %arg0, %c0_i32 : i32
    %1 = arith.extui %0 : i1 to i32
    %c0_i32_0 = arith.constant 0 : i32
    %2 = arith.cmpi ne, %1, %c0_i32_0 : i32
    scf.if %2 {
      %c0_62 = arith.constant 0 : index
      %c0_63 = arith.constant 0 : index
      %c0_64 = arith.constant 0 : index
      %120 = vector.load %arg1[%c0_62, %c0_63, %c0_64] : memref<2x8x768xf32, #tpu.memory_space<vmem>>, vector<2x8x768xf32>
      %c0_65 = arith.constant 0 : index
      %c0_66 = arith.constant 0 : index
      %121 = vector.load %arg4[%c0_65, %c0_66] : memref<768x768xbf16, #tpu.memory_space<vmem>>, vector<768x768xbf16>
      %c0_67 = arith.constant 0 : index
      %c0_68 = arith.constant 0 : index
      %122 = vector.load %arg5[%c0_67, %c0_68] : memref<1x768xf32, #tpu.memory_space<vmem>>, vector<1x768xf32>
      %c0_69 = arith.constant 0 : index
      %c0_70 = arith.constant 0 : index
      %123 = vector.load %arg6[%c0_69, %c0_70] : memref<1x768xf32, #tpu.memory_space<vmem>>, vector<1x768xf32>
      %124 = vector.shape_cast %120 : vector<2x8x768xf32> to vector<16x768xf32>
      %125 = arith.truncf %124 : vector<16x768xf32> to vector<16x768xbf16>
      %cst_71 = arith.constant dense<0.000000e+00> : vector<16x768xf32>
      %126 = tpu.matmul %125, %121, %cst_71 {dimension_numbers = #tpu.dot_dimension_numbers<[1], [0], [0], [1], [0, 0, 1, 1], [], []>} : vector<16x768xbf16>, vector<768x768xbf16>, vector<16x768xf32> -> vector<16x768xf32>
      %127 = vector.broadcast %122 : vector<1x768xf32> to vector<16x768xf32>
      %128 = arith.addf %126, %127 : vector<16x768xf32>
      %129 = math.tanh %128 : vector<16x768xf32>
      %130 = vector.shape_cast %129 : vector<16x768xf32> to vector<2x8x768xf32>
      %131 = vector.shape_cast %123 : vector<1x768xf32> to vector<1x1x768xf32>
      %132 = vector.broadcast %131 : vector<1x1x768xf32> to vector<2x8x768xf32>
      %133 = arith.mulf %130, %132 : vector<2x8x768xf32>
      %cst_72 = arith.constant dense<0.000000e+00> : vector<2x8xf32>
      %134 = vector.multi_reduction <add>, %133, %cst_72 [2] : vector<2x8x768xf32> to vector<2x8xf32>
      %135 = vector.shape_cast %134 : vector<2x8xf32> to vector<2x8x1xf32>
      %cst_73 = arith.constant dense<0xFF800000> : vector<2x1xf32>
      %136 = vector.multi_reduction <maximumf>, %135, %cst_73 [1] : vector<2x8x1xf32> to vector<2x1xf32>
      %137 = vector.shape_cast %136 : vector<2x1xf32> to vector<2x1x1xf32>
      %138 = vector.broadcast %137 : vector<2x1x1xf32> to vector<2x8x1xf32>
      %139 = arith.subf %135, %138 : vector<2x8x1xf32>
      %140 = math.exp %139 : vector<2x8x1xf32>
      %cst_74 = arith.constant dense<0.000000e+00> : vector<2x1xf32>
      %141 = vector.multi_reduction <add>, %140, %cst_74 [1] : vector<2x8x1xf32> to vector<2x1xf32>
      %142 = vector.shape_cast %141 : vector<2x1xf32> to vector<2x1x1xf32>
      %143 = vector.broadcast %142 : vector<2x1x1xf32> to vector<2x8x1xf32>
      %144 = arith.divf %140, %143 : vector<2x8x1xf32>
      %145 = vector.broadcast %144 : vector<2x8x1xf32> to vector<2x8x768xf32>
      %146 = arith.mulf %145, %120 : vector<2x8x768xf32>
      %cst_75 = arith.constant dense<0.000000e+00> : vector<2x768xf32>
      %147 = vector.multi_reduction <add>, %146, %cst_75 [1] : vector<2x8x768xf32> to vector<2x768xf32>
      %c0_76 = arith.constant 0 : index
      %c0_77 = arith.constant 0 : index
      %148 = vector.load %arg16[%c0_76, %c0_77] : memref<2x768xf32, #tpu.memory_space<vmem>>, vector<2x768xf32>
      tpu.vector_store %arg16[%c0_76, %c0_77], %147 {strides = array<i32>} : memref<2x768xf32, #tpu.memory_space<vmem>>, vector<2x768xf32>,
    } else {
    }
    %c0 = arith.constant 0 : index
    %c0_1 = arith.constant 0 : index
    %c0_2 = arith.constant 0 : index
    %c0_3 = arith.constant 0 : index
    %3 = vector.load %arg3[%c0, %c0_1, %c0_2, %c0_3] : memref<3x2x8x768xf32, #tpu.memory_space<vmem>>, vector<1x2x8x768xf32>
    %4 = vector.shape_cast %3 : vector<1x2x8x768xf32> to vector<2x8x768xf32>
    %c0_4 = arith.constant 0 : index
    %c0_5 = arith.constant 0 : index
    %c0_6 = arith.constant 0 : index
    %5 = vector.load %arg7[%c0_4, %c0_5, %c0_6] : memref<3x768x768xbf16, #tpu.memory_space<vmem>>, vector<1x768x768xbf16>
    %6 = vector.shape_cast %5 : vector<1x768x768xbf16> to vector<768x768xbf16>
    %c0_7 = arith.constant 0 : index
    %c0_8 = arith.constant 0 : index
    %c0_9 = arith.constant 0 : index
    %7 = vector.load %arg8[%c0_7, %c0_8, %c0_9] : memref<3x1x768xf32, #tpu.memory_space<vmem>>, vector<1x1x768xf32>
    %8 = vector.shape_cast %7 : vector<1x1x768xf32> to vector<1x768xf32>
    %c0_10 = arith.constant 0 : index
    %c0_11 = arith.constant 0 : index
    %c0_12 = arith.constant 0 : index
    %9 = vector.load %arg9[%c0_10, %c0_11, %c0_12] : memref<3x1x768xf32, #tpu.memory_space<vmem>>, vector<1x1x768xf32>
    %10 = vector.shape_cast %9 : vector<1x1x768xf32> to vector<1x768xf32>
    %11 = vector.shape_cast %4 : vector<2x8x768xf32> to vector<16x768xf32>
    %12 = arith.truncf %11 : vector<16x768xf32> to vector<16x768xbf16>
    %cst = arith.constant dense<0.000000e+00> : vector<16x768xf32>
    %13 = tpu.matmul %12, %6, %cst {dimension_numbers = #tpu.dot_dimension_numbers<[1], [0], [0], [1], [0, 0, 1, 1], [], []>} : vector<16x768xbf16>, vector<768x768xbf16>, vector<16x768xf32> -> vector<16x768xf32>
    %14 = vector.broadcast %8 : vector<1x768xf32> to vector<16x768xf32>
    %15 = arith.addf %13, %14 : vector<16x768xf32>
    %16 = math.tanh %15 : vector<16x768xf32>
    %17 = vector.shape_cast %16 : vector<16x768xf32> to vector<2x8x768xf32>
    %18 = vector.shape_cast %10 : vector<1x768xf32> to vector<1x1x768xf32>
    %19 = vector.broadcast %18 : vector<1x1x768xf32> to vector<2x8x768xf32>
    %20 = arith.mulf %17, %19 : vector<2x8x768xf32>
    %cst_13 = arith.constant dense<0.000000e+00> : vector<2x8xf32>
    %21 = vector.multi_reduction <add>, %20, %cst_13 [2] : vector<2x8x768xf32> to vector<2x8xf32>
    %22 = vector.shape_cast %21 : vector<2x8xf32> to vector<2x8x1xf32>
    %cst_14 = arith.constant dense<0xFF800000> : vector<2x1xf32>
    %23 = vector.multi_reduction <maximumf>, %22, %cst_14 [1] : vector<2x8x1xf32> to vector<2x1xf32>
    %24 = vector.shape_cast %23 : vector<2x1xf32> to vector<2x1x1xf32>
    %25 = vector.broadcast %24 : vector<2x1x1xf32> to vector<2x8x1xf32>
    %26 = arith.subf %22, %25 : vector<2x8x1xf32>
    %27 = math.exp %26 : vector<2x8x1xf32>
    %cst_15 = arith.constant dense<0.000000e+00> : vector<2x1xf32>
    %28 = vector.multi_reduction <add>, %27, %cst_15 [1] : vector<2x8x1xf32> to vector<2x1xf32>
    %29 = vector.shape_cast %28 : vector<2x1xf32> to vector<2x1x1xf32>
    %30 = vector.broadcast %29 : vector<2x1x1xf32> to vector<2x8x1xf32>
    %31 = arith.divf %27, %30 : vector<2x8x1xf32>
    %32 = vector.broadcast %31 : vector<2x8x1xf32> to vector<2x8x768xf32>
    %33 = arith.mulf %32, %4 : vector<2x8x768xf32>
    %cst_16 = arith.constant dense<0.000000e+00> : vector<2x768xf32>
    %34 = vector.multi_reduction <add>, %33, %cst_16 [1] : vector<2x8x768xf32> to vector<2x768xf32>
    %c3_i32 = arith.constant 3 : i32
    %35 = arith.muli %arg0, %c3_i32 : i32
    %c0_i32_17 = arith.constant 0 : i32
    %36 = arith.addi %35, %c0_i32_17 : i32
    %37 = arith.index_cast %36 : i32 to index
    %c0_18 = arith.constant 0 : index
    %c0_19 = arith.constant 0 : index
    %38 = vector.load %arg17[%37, %c0_18, %c0_19] : memref<6x2x768xf32, #tpu.memory_space<vmem>>, vector<1x2x768xf32>
    %39 = vector.shape_cast %38 : vector<1x2x768xf32> to vector<2x768xf32>
    %40 = vector.shape_cast %34 : vector<2x768xf32> to vector<1x2x768xf32>
    tpu.vector_store %arg17[%37, %c0_18, %c0_19], %40 {strides = array<i32>} : memref<6x2x768xf32, #tpu.memory_space<vmem>>, vector<1x2x768xf32>,
    %c1 = arith.constant 1 : index
    %c0_20 = arith.constant 0 : index
    %c0_21 = arith.constant 0 : index
    %c0_22 = arith.constant 0 : index
    %41 = vector.load %arg3[%c1, %c0_20, %c0_21, %c0_22] : memref<3x2x8x768xf32, #tpu.memory_space<vmem>>, vector<1x2x8x768xf32>
    %42 = vector.shape_cast %41 : vector<1x2x8x768xf32> to vector<2x8x768xf32>
    %c1_23 = arith.constant 1 : index
    %c0_24 = arith.constant 0 : index
    %c0_25 = arith.constant 0 : index
    %43 = vector.load %arg7[%c1_23, %c0_24, %c0_25] : memref<3x768x768xbf16, #tpu.memory_space<vmem>>, vector<1x768x768xbf16>
    %44 = vector.shape_cast %43 : vector<1x768x768xbf16> to vector<768x768xbf16>
    %c1_26 = arith.constant 1 : index
    %c0_27 = arith.constant 0 : index
    %c0_28 = arith.constant 0 : index
    %45 = vector.load %arg8[%c1_26, %c0_27, %c0_28] : memref<3x1x768xf32, #tpu.memory_space<vmem>>, vector<1x1x768xf32>
    %46 = vector.shape_cast %45 : vector<1x1x768xf32> to vector<1x768xf32>
    %c1_29 = arith.constant 1 : index
    %c0_30 = arith.constant 0 : index
    %c0_31 = arith.constant 0 : index
    %47 = vector.load %arg9[%c1_29, %c0_30, %c0_31] : memref<3x1x768xf32, #tpu.memory_space<vmem>>, vector<1x1x768xf32>
    %48 = vector.shape_cast %47 : vector<1x1x768xf32> to vector<1x768xf32>
    %49 = vector.shape_cast %42 : vector<2x8x768xf32> to vector<16x768xf32>
    %50 = arith.truncf %49 : vector<16x768xf32> to vector<16x768xbf16>
    %cst_32 = arith.constant dense<0.000000e+00> : vector<16x768xf32>
    %51 = tpu.matmul %50, %44, %cst_32 {dimension_numbers = #tpu.dot_dimension_numbers<[1], [0], [0], [1], [0, 0, 1, 1], [], []>} : vector<16x768xbf16>, vector<768x768xbf16>, vector<16x768xf32> -> vector<16x768xf32>
    %52 = vector.broadcast %46 : vector<1x768xf32> to vector<16x768xf32>
    %53 = arith.addf %51, %52 : vector<16x768xf32>
    %54 = math.tanh %53 : vector<16x768xf32>
    %55 = vector.shape_cast %54 : vector<16x768xf32> to vector<2x8x768xf32>
    %56 = vector.shape_cast %48 : vector<1x768xf32> to vector<1x1x768xf32>
    %57 = vector.broadcast %56 : vector<1x1x768xf32> to vector<2x8x768xf32>
    %58 = arith.mulf %55, %57 : vector<2x8x768xf32>
    %cst_33 = arith.constant dense<0.000000e+00> : vector<2x8xf32>
    %59 = vector.multi_reduction <add>, %58, %cst_33 [2] : vector<2x8x768xf32> to vector<2x8xf32>
    %60 = vector.shape_cast %59 : vector<2x8xf32> to vector<2x8x1xf32>
    %cst_34 = arith.constant dense<0xFF800000> : vector<2x1xf32>
    %61 = vector.multi_reduction <maximumf>, %60, %cst_34 [1] : vector<2x8x1xf32> to vector<2x1xf32>
    %62 = vector.shape_cast %61 : vector<2x1xf32> to vector<2x1x1xf32>
    %63 = vector.broadcast %62 : vector<2x1x1xf32> to vector<2x8x1xf32>
    %64 = arith.subf %60, %63 : vector<2x8x1xf32>
    %65 = math.exp %64 : vector<2x8x1xf32>
    %cst_35 = arith.constant dense<0.000000e+00> : vector<2x1xf32>
    %66 = vector.multi_reduction <add>, %65, %cst_35 [1] : vector<2x8x1xf32> to vector<2x1xf32>
    %67 = vector.shape_cast %66 : vector<2x1xf32> to vector<2x1x1xf32>
    %68 = vector.broadcast %67 : vector<2x1x1xf32> to vector<2x8x1xf32>
    %69 = arith.divf %65, %68 : vector<2x8x1xf32>
    %70 = vector.broadcast %69 : vector<2x8x1xf32> to vector<2x8x768xf32>
    %71 = arith.mulf %70, %42 : vector<2x8x768xf32>
    %cst_36 = arith.constant dense<0.000000e+00> : vector<2x768xf32>
    %72 = vector.multi_reduction <add>, %71, %cst_36 [1] : vector<2x8x768xf32> to vector<2x768xf32>
    %c3_i32_37 = arith.constant 3 : i32
    %73 = arith.muli %arg0, %c3_i32_37 : i32
    %c1_i32 = arith.constant 1 : i32
    %74 = arith.addi %73, %c1_i32 : i32
    %75 = arith.index_cast %74 : i32 to index
    %c0_38 = arith.constant 0 : index
    %c0_39 = arith.constant 0 : index
    %76 = vector.load %arg17[%75, %c0_38, %c0_39] : memref<6x2x768xf32, #tpu.memory_space<vmem>>, vector<1x2x768xf32>
    %77 = vector.shape_cast %76 : vector<1x2x768xf32> to vector<2x768xf32>
    %78 = vector.shape_cast %72 : vector<2x768xf32> to vector<1x2x768xf32>
    tpu.vector_store %arg17[%75, %c0_38, %c0_39], %78 {strides = array<i32>} : memref<6x2x768xf32, #tpu.memory_space<vmem>>, vector<1x2x768xf32>,
    %c2 = arith.constant 2 : index
    %c0_40 = arith.constant 0 : index
    %c0_41 = arith.constant 0 : index
    %c0_42 = arith.constant 0 : index
    %79 = vector.load %arg3[%c2, %c0_40, %c0_41, %c0_42] : memref<3x2x8x768xf32, #tpu.memory_space<vmem>>, vector<1x2x8x768xf32>
    %80 = vector.shape_cast %79 : vector<1x2x8x768xf32> to vector<2x8x768xf32>
    %c2_43 = arith.constant 2 : index
    %c0_44 = arith.constant 0 : index
    %c0_45 = arith.constant 0 : index
    %81 = vector.load %arg7[%c2_43, %c0_44, %c0_45] : memref<3x768x768xbf16, #tpu.memory_space<vmem>>, vector<1x768x768xbf16>
    %82 = vector.shape_cast %81 : vector<1x768x768xbf16> to vector<768x768xbf16>
    %c2_46 = arith.constant 2 : index
    %c0_47 = arith.constant 0 : index
    %c0_48 = arith.constant 0 : index
    %83 = vector.load %arg8[%c2_46, %c0_47, %c0_48] : memref<3x1x768xf32, #tpu.memory_space<vmem>>, vector<1x1x768xf32>
    %84 = vector.shape_cast %83 : vector<1x1x768xf32> to vector<1x768xf32>
    %c2_49 = arith.constant 2 : index
    %c0_50 = arith.constant 0 : index
    %c0_51 = arith.constant 0 : index
    %85 = vector.load %arg9[%c2_49, %c0_50, %c0_51] : memref<3x1x768xf32, #tpu.memory_space<vmem>>, vector<1x1x768xf32>
    %86 = vector.shape_cast %85 : vector<1x1x768xf32> to vector<1x768xf32>
    %87 = vector.shape_cast %80 : vector<2x8x768xf32> to vector<16x768xf32>
    %88 = arith.truncf %87 : vector<16x768xf32> to vector<16x768xbf16>
    %cst_52 = arith.constant dense<0.000000e+00> : vector<16x768xf32>
    %89 = tpu.matmul %88, %82, %cst_52 {dimension_numbers = #tpu.dot_dimension_numbers<[1], [0], [0], [1], [0, 0, 1, 1], [], []>} : vector<16x768xbf16>, vector<768x768xbf16>, vector<16x768xf32> -> vector<16x768xf32>
    %90 = vector.broadcast %84 : vector<1x768xf32> to vector<16x768xf32>
    %91 = arith.addf %89, %90 : vector<16x768xf32>
    %92 = math.tanh %91 : vector<16x768xf32>
    %93 = vector.shape_cast %92 : vector<16x768xf32> to vector<2x8x768xf32>
    %94 = vector.shape_cast %86 : vector<1x768xf32> to vector<1x1x768xf32>
    %95 = vector.broadcast %94 : vector<1x1x768xf32> to vector<2x8x768xf32>
    %96 = arith.mulf %93, %95 : vector<2x8x768xf32>
    %cst_53 = arith.constant dense<0.000000e+00> : vector<2x8xf32>
    %97 = vector.multi_reduction <add>, %96, %cst_53 [2] : vector<2x8x768xf32> to vector<2x8xf32>
    %98 = vector.shape_cast %97 : vector<2x8xf32> to vector<2x8x1xf32>
    %cst_54 = arith.constant dense<0xFF800000> : vector<2x1xf32>
    %99 = vector.multi_reduction <maximumf>, %98, %cst_54 [1] : vector<2x8x1xf32> to vector<2x1xf32>
    %100 = vector.shape_cast %99 : vector<2x1xf32> to vector<2x1x1xf32>
    %101 = vector.broadcast %100 : vector<2x1x1xf32> to vector<2x8x1xf32>
    %102 = arith.subf %98, %101 : vector<2x8x1xf32>
    %103 = math.exp %102 : vector<2x8x1xf32>
    %cst_55 = arith.constant dense<0.000000e+00> : vector<2x1xf32>
    %104 = vector.multi_reduction <add>, %103, %cst_55 [1] : vector<2x8x1xf32> to vector<2x1xf32>
    %105 = vector.shape_cast %104 : vector<2x1xf32> to vector<2x1x1xf32>
    %106 = vector.broadcast %105 : vector<2x1x1xf32> to vector<2x8x1xf32>
    %107 = arith.divf %103, %106 : vector<2x8x1xf32>
    %108 = vector.broadcast %107 : vector<2x8x1xf32> to vector<2x8x768xf32>
    %109 = arith.mulf %108, %80 : vector<2x8x768xf32>
    %cst_56 = arith.constant dense<0.000000e+00> : vector<2x768xf32>
    %110 = vector.multi_reduction <add>, %109, %cst_56 [1] : vector<2x8x768xf32> to vector<2x768xf32>
    %c3_i32_57 = arith.constant 3 : i32
    %111 = arith.muli %arg0, %c3_i32_57 : i32
    %c2_i32 = arith.constant 2 : i32
    %112 = arith.addi %111, %c2_i32 : i32
    %113 = arith.index_cast %112 : i32 to index
    %c0_58 = arith.constant 0 : index
    %c0_59 = arith.constant 0 : index
    %114 = vector.load %arg17[%113, %c0_58, %c0_59] : memref<6x2x768xf32, #tpu.memory_space<vmem>>, vector<1x2x768xf32>
    %115 = vector.shape_cast %114 : vector<1x2x768xf32> to vector<2x768xf32>
    %116 = vector.shape_cast %110 : vector<2x768xf32> to vector<1x2x768xf32>
    tpu.vector_store %arg17[%113, %c0_58, %c0_59], %116 {strides = array<i32>} : memref<6x2x768xf32, #tpu.memory_space<vmem>>, vector<1x2x768xf32>,
    %c1_i32_60 = arith.constant 1 : i32
    %117 = arith.cmpi eq, %arg0, %c1_i32_60 : i32
    %118 = arith.extui %117 : i1 to i32
    %c0_i32_61 = arith.constant 0 : i32
    %119 = arith.cmpi ne, %118, %c0_i32_61 : i32
    scf.if %119 {
      %c0_62 = arith.constant 0 : index
      %c0_63 = arith.constant 0 : index
      %c0_64 = arith.constant 0 : index
      %120 = vector.load %arg17[%c0_62, %c0_63, %c0_64] : memref<6x2x768xf32, #tpu.memory_space<vmem>>, vector<6x2x768xf32>
      %121 = vector.shape_cast %120 : vector<6x2x768xf32> to vector<12x768xf32>
      %122 = arith.truncf %121 : vector<12x768xf32> to vector<12x768xbf16>
      %c0_65 = arith.constant 0 : index
      %c0_66 = arith.constant 0 : index
      %123 = vector.load %arg10[%c0_65, %c0_66] : memref<768x768xbf16, #tpu.memory_space<vmem>>, vector<768x768xbf16>
      %cst_67 = arith.constant dense<0.000000e+00> : vector<12x768xf32>
      %124 = tpu.matmul %122, %123, %cst_67 {dimension_numbers = #tpu.dot_dimension_numbers<[1], [0], [0], [1], [0, 0, 1, 1], [], []>} : vector<12x768xbf16>, vector<768x768xbf16>, vector<12x768xf32> -> vector<12x768xf32>
      %c0_68 = arith.constant 0 : index
      %c0_69 = arith.constant 0 : index
      %125 = vector.load %arg11[%c0_68, %c0_69] : memref<1x768xf32, #tpu.memory_space<vmem>>, vector<1x768xf32>
      %126 = vector.broadcast %125 : vector<1x768xf32> to vector<12x768xf32>
      %127 = arith.addf %124, %126 : vector<12x768xf32>
      %128 = math.tanh %127 : vector<12x768xf32>
      %129 = vector.shape_cast %128 : vector<12x768xf32> to vector<6x2x768xf32>
      %c0_70 = arith.constant 0 : index
      %c0_71 = arith.constant 0 : index
      %130 = vector.load %arg12[%c0_70, %c0_71] : memref<1x768xf32, #tpu.memory_space<vmem>>, vector<1x768xf32>
      %131 = vector.shape_cast %130 : vector<1x768xf32> to vector<1x1x768xf32>
      %132 = vector.broadcast %131 : vector<1x1x768xf32> to vector<6x2x768xf32>
      %133 = arith.mulf %129, %132 : vector<6x2x768xf32>
      %cst_72 = arith.constant dense<0.000000e+00> : vector<6x2xf32>
      %134 = vector.multi_reduction <add>, %133, %cst_72 [2] : vector<6x2x768xf32> to vector<6x2xf32>
      %135 = vector.shape_cast %134 : vector<6x2xf32> to vector<6x2x1xf32>
      %cst_73 = arith.constant dense<0xFF800000> : vector<2x1xf32>
      %136 = vector.multi_reduction <maximumf>, %135, %cst_73 [0] : vector<6x2x1xf32> to vector<2x1xf32>
      %137 = vector.shape_cast %136 : vector<2x1xf32> to vector<1x2x1xf32>
      %138 = vector.broadcast %137 : vector<1x2x1xf32> to vector<6x2x1xf32>
      %139 = arith.subf %135, %138 : vector<6x2x1xf32>
      %140 = math.exp %139 : vector<6x2x1xf32>
      %cst_74 = arith.constant dense<0.000000e+00> : vector<2x1xf32>
      %141 = vector.multi_reduction <add>, %140, %cst_74 [0] : vector<6x2x1xf32> to vector<2x1xf32>
      %142 = vector.shape_cast %141 : vector<2x1xf32> to vector<1x2x1xf32>
      %143 = vector.broadcast %142 : vector<1x2x1xf32> to vector<6x2x1xf32>
      %144 = arith.divf %140, %143 : vector<6x2x1xf32>
      %145 = vector.broadcast %144 : vector<6x2x1xf32> to vector<6x2x768xf32>
      %146 = arith.mulf %145, %120 : vector<6x2x768xf32>
      %cst_75 = arith.constant dense<0.000000e+00> : vector<2x768xf32>
      %147 = vector.multi_reduction <add>, %146, %cst_75 [0] : vector<6x2x768xf32> to vector<2x768xf32>
      %c0_76 = arith.constant 0 : index
      %c0_77 = arith.constant 0 : index
      %148 = vector.load %arg16[%c0_76, %c0_77] : memref<2x768xf32, #tpu.memory_space<vmem>>, vector<2x768xf32>
      %149 = arith.addf %148, %147 : vector<2x768xf32>
      %c0_78 = arith.constant 0 : index
      %c0_79 = arith.constant 0 : index
      %150 = vector.load %arg2[%c0_78, %c0_79] : memref<2x768xf32, #tpu.memory_space<vmem>>, vector<2x768xf32>
      %151 = arith.addf %149, %150 : vector<2x768xf32>
      %cst_80 = arith.constant 0.000000e+00 : f32
      %152 = vector.broadcast %cst_80 : f32 to vector<2x768xf32>
      %153 = arith.maximumf %151, %152 : vector<2x768xf32>
      %c0_81 = arith.constant 0 : index
      %c0_82 = arith.constant 0 : index
      %154 = vector.load %arg13[%c0_81, %c0_82] : memref<1x768xf32, #tpu.memory_space<vmem>>, vector<1x768xf32>
      %155 = vector.broadcast %154 : vector<1x768xf32> to vector<2x768xf32>
      %156 = arith.mulf %153, %155 : vector<2x768xf32>
      %cst_83 = arith.constant dense<0.000000e+00> : vector<2xf32>
      %157 = vector.multi_reduction <add>, %156, %cst_83 [1] : vector<2x768xf32> to vector<2xf32>
      %158 = vector.shape_cast %157 : vector<2xf32> to vector<2x1xf32>
      %c0_84 = arith.constant 0 : index
      %c0_85 = arith.constant 0 : index
      %159 = vector.load %arg14[%c0_84, %c0_85] : memref<1x1xf32, #tpu.memory_space<vmem>>, vector<1x1xf32>
      %160 = vector.broadcast %159 : vector<1x1xf32> to vector<2x1xf32>
      %161 = arith.addf %158, %160 : vector<2x1xf32>
      %c0_86 = arith.constant 0 : index
      %c0_87 = arith.constant 0 : index
      %162 = vector.load %arg15[%c0_86, %c0_87] : memref<2x1xf32, #tpu.memory_space<vmem>>, vector<2x1xf32>
      tpu.vector_store %arg15[%c0_86, %c0_87], %161 {strides = array<i32>} : memref<2x1xf32, #tpu.memory_space<vmem>>, vector<2x1xf32>,
    } else {
    }
    return
  }
  func.func @transform_0(%arg0: i32) -> (i32, i32, i32) {
    %c0_i32 = arith.constant 0 : i32
    %c0_i32_0 = arith.constant 0 : i32
    %c0_i32_1 = arith.constant 0 : i32
    %c0_i32_2 = arith.constant 0 : i32
    return %c0_i32, %c0_i32_0, %c0_i32_1 : i32, i32, i32
  }
  func.func @transform_1(%arg0: i32) -> (i32, i32) {
    %c0_i32 = arith.constant 0 : i32
    %c0_i32_0 = arith.constant 0 : i32
    %c0_i32_1 = arith.constant 0 : i32
    return %c0_i32, %c0_i32_0 : i32, i32
  }
  func.func @transform_2(%arg0: i32) -> (i32, i32, i32, i32) {
    %c2_i32 = arith.constant 2 : i32
    %0 = arith.addi %c2_i32, %arg0 : i32
    %c0_i32 = arith.constant 0 : i32
    %c0_i32_0 = arith.constant 0 : i32
    %c0_i32_1 = arith.constant 0 : i32
    %c0_i32_2 = arith.constant 0 : i32
    return %0, %c0_i32, %c0_i32_0, %c0_i32_1 : i32, i32, i32, i32
  }
  func.func @transform_3(%arg0: i32) -> (i32, i32) {
    %c0_i32 = arith.constant 0 : i32
    %c0_i32_0 = arith.constant 0 : i32
    %c0_i32_1 = arith.constant 0 : i32
    return %c0_i32, %c0_i32_0 : i32, i32
  }
  func.func @transform_4(%arg0: i32) -> (i32, i32) {
    %c0_i32 = arith.constant 0 : i32
    %c0_i32_0 = arith.constant 0 : i32
    %c0_i32_1 = arith.constant 0 : i32
    return %c0_i32, %c0_i32_0 : i32, i32
  }
  func.func @transform_5(%arg0: i32) -> (i32, i32) {
    %c0_i32 = arith.constant 0 : i32
    %c0_i32_0 = arith.constant 0 : i32
    %c0_i32_1 = arith.constant 0 : i32
    return %c0_i32, %c0_i32_0 : i32, i32
  }
  func.func @transform_6(%arg0: i32) -> (i32, i32, i32) {
    %c0_i32 = arith.constant 0 : i32
    %c0_i32_0 = arith.constant 0 : i32
    %c0_i32_1 = arith.constant 0 : i32
    return %arg0, %c0_i32, %c0_i32_0 : i32, i32, i32
  }
  func.func @transform_7(%arg0: i32) -> (i32, i32, i32) {
    %c0_i32 = arith.constant 0 : i32
    %c0_i32_0 = arith.constant 0 : i32
    %c0_i32_1 = arith.constant 0 : i32
    return %arg0, %c0_i32, %c0_i32_0 : i32, i32, i32
  }
  func.func @transform_8(%arg0: i32) -> (i32, i32, i32) {
    %c0_i32 = arith.constant 0 : i32
    %c0_i32_0 = arith.constant 0 : i32
    %c0_i32_1 = arith.constant 0 : i32
    return %arg0, %c0_i32, %c0_i32_0 : i32, i32, i32
  }
  func.func @transform_9(%arg0: i32) -> (i32, i32) {
    %c0_i32 = arith.constant 0 : i32
    %c0_i32_0 = arith.constant 0 : i32
    %c0_i32_1 = arith.constant 0 : i32
    return %c0_i32, %c0_i32_0 : i32, i32
  }
  func.func @transform_10(%arg0: i32) -> (i32, i32) {
    %c0_i32 = arith.constant 0 : i32
    %c0_i32_0 = arith.constant 0 : i32
    %c0_i32_1 = arith.constant 0 : i32
    return %c0_i32, %c0_i32_0 : i32, i32
  }
  func.func @transform_11(%arg0: i32) -> (i32, i32) {
    %c0_i32 = arith.constant 0 : i32
    %c0_i32_0 = arith.constant 0 : i32
    %c0_i32_1 = arith.constant 0 : i32
    return %c0_i32, %c0_i32_0 : i32, i32
  }
  func.func @transform_12(%arg0: i32) -> (i32, i32) {
    %c0_i32 = arith.constant 0 : i32
    %c0_i32_0 = arith.constant 0 : i32
    %c0_i32_1 = arith.constant 0 : i32
    return %c0_i32, %c0_i32_0 : i32, i32
  }
  func.func @transform_13(%arg0: i32) -> (i32, i32) {
    %c0_i32 = arith.constant 0 : i32
    %c0_i32_0 = arith.constant 0 : i32
    %c0_i32_1 = arith.constant 0 : i32
    return %c0_i32, %c0_i32_0 : i32, i32
  }
  func.func @transform_14(%arg0: i32) -> (i32, i32) {
    %c0_i32 = arith.constant 0 : i32
    %c0_i32_0 = arith.constant 0 : i32
    %c0_i32_1 = arith.constant 0 : i32
    return %c0_i32, %c0_i32_0 : i32, i32
  }
}

</mosaic_0001>

<bundles_post_ra>
// kernel: tpu_custom_call.1
= control target key start
LH: loop header
LB: loop body
LE: loop exit
PB: predicated region body
PF: predicated region fallthrough
CT: control target
= control target key end

     0   :  { %s21525_s0 = inlined_call_operand.hbm [shape: f32[2,8,768], index: 0, kind: input, shape index: {}]   ;;  %s21526_s1 = inlined_call_operand.hbm [shape: f32[2,768], index: 1, kind: input, shape index: {}]   ;;  %s21527_s2 = inlined_call_operand.hbm [shape: f32[12,2,8,768], index: 2, kind: input, shape index: {}]   ;;  %s21528_s3 = inlined_call_operand.hbm [shape: bf16[768,768], index: 3, kind: input, shape index: {}]   ;;  %s21529_s4 = inlined_call_operand.hbm [shape: f32[1,768], index: 4, kind: input, shape index: {}]   ;;  %s21530_s5 = inlined_call_operand.hbm [shape: f32[1,768], index: 5, kind: input, shape index: {}]   ;;  %s21531_s6 = inlined_call_operand.hbm [shape: bf16[6,768,768], index: 6, kind: input, shape index: {}]   ;;  %s21532_s7 = inlined_call_operand.hbm [shape: f32[6,1,768], index: 7, kind: input, shape index: {}]   ;;  %s21533_s8 = inlined_call_operand.hbm [shape: f32[6,1,768], index: 8, kind: input, shape index: {}]   ;;  %s21534_s9 = inlined_call_operand.hbm [shape: bf16[768,768], index: 9, kind: input, shape index: {}]   ;;  %s21535_s10 = inlined_call_operand.hbm [shape: f32[1,768], index: 10, kind: input, shape index: {}]   ;;  %s21536_s11 = inlined_call_operand.hbm [shape: f32[1,768], index: 11, kind: input, shape index: {}]   ;;  %s21537_s12 = inlined_call_operand.hbm [shape: f32[1,768], index: 12, kind: input, shape index: {}]   ;;  %s21538_s13 = inlined_call_operand.<no memory space> [shape: f32[1,1], index: 13, kind: input, shape index: {}]   ;;  %s21539_s14 = inlined_call_operand.vmem [shape: f32[2,1], index: 14, kind: output, shape index: {}]  }
   0x1   :  { %21569 = sst [smem:[#allocation43_spill]] %s21525_s0  ;;  %v19_v0 = vstv %s21538_s13 }
   0x2   :  { %21570 = sst [smem:[#allocation44_spill]] %s21526_s1  ;;  %20 = vst [vmem:[#allocation4] sm:$0x1] %v19_v0 }
   0x3   :  { %21571 = sst [smem:[#allocation45_spill]] %s21527_s2 }
   0x4   :  { %21572 = sst [smem:[#allocation46_spill]] %s21529_s4 }
   0x5   :  { %21573 = sst [smem:[#allocation47_spill]] %s21531_s6 }
   0x6   :  { %21574 = sst [smem:[#allocation48_spill]] %s21532_s7 }
   0x7   :  { %21575 = sst [smem:[#allocation49_spill]] %s21533_s8 }
   0x8   :  { %21576 = sst [smem:[#allocation50_spill]] %s21534_s9 }
   0x9   :  { %21577 = sst [smem:[#allocation51_spill]] %s21535_s10 }
   0xa   :  { %21578 = sst [smem:[#allocation52_spill]] %s21539_s14 }
   0xb   :  { %21 = vsyncpa [#allocation6], 0 }
   0xc   :  { %22 = vsyncpa [#allocation8], 0 }
   0xd   :  { %23 = vsyncpa [#allocation12], 0 }
   0xe   :  { %24 = vsyncpa [#allocation15], 0 }
   0xf   :  { %26 = vsyncpa [#allocation15 + $0x1], 0 }
  0x10   :  { %27 = vsyncpa [#allocation18], 0 }
  0x11   :  { %29 = vsyncpa [#allocation18 + $0x1], 0 }
  0x12   :  { %30 = vsyncpa [#allocation21], 0 }
  0x13   :  { %31 = vsyncpa [#allocation24], 0  ;;  %s19343_s15 = smov 0   ;;  %s19345_s16 = smov 0  }
  0x14   :  { %s19347_s17 = smov 0   ;;  %s19349_s18 = smov 0  }
  0x15   :  { %s19351_s19 = smov 0   ;;  %s19353_s13 = smov 0  }
  0x16   :  { %s19355_s20 = smov 0  }
  0x17 LB: > { %21579 = sst [smem:[#allocation35_spill]] %s19226_s17  ;;  %s19244_s21 = smov [#allocation5]   ;;  %s19242_s20 = sphi %s19355_s20, %s21656_s20   ;;  %s19238_s13 = sphi %s19353_s13, %s21655_s13   ;;  %s19234_s19 = sphi %s19351_s19, %s21651_s19   ;;  %s19230_s18 = sphi %s19349_s18, %s21650_s18   ;;  %s19226_s17 = sphi %s19347_s17, %s21649_s17   ;;  %s19222_s16 = sphi %s19345_s16, %s21654_s16   ;;  %s19218_s15 = sphi %s19343_s15, %s21653_s15  }
  0x18   : > { %21580 = sst [smem:[#allocation36_spill]] %s19230_s18  ;;  %s391_s22 = sshll.u32 %s19244_s21, 4  ;;  %s19385_s22 = int_to_ptr.vmem [resolvable:$true] %s391_s22 }
  0x19   : > { %21581 = sst [smem:[#allocation37_spill]] %s19234_s19  ;;  %s19379_s23 = sadd.s32 4294967295, %s19242_s20  }
  0x1a   : > { %21582 = sst [smem:[#allocation38_spill]] %s19238_s13  ;;  %p13912_p0 = scmp.ge.s32.totalorder %s19242_s20, 1 }
  0x1b   : > { %p21546_p1 = scmp.eq.s32.totalorder %s19379_s23, 0  ;;  %p379_p2 = scmp.lt.s32.totalorder %s19242_s20, 3 }
  0x1c   : > { %s19245_s26 = smov [#allocation7]   ;;  %s19246_s28 = smov [#allocation11]  }
  0x1d   : > { %p19387_p4 = pnand %p13912_p0, %p379_p2  ;;  %s405_s27 = sshll.u32 %s19245_s26, 4  ;;  %s19399_s27 = int_to_ptr.vmem [resolvable:$true] %s405_s27 }
  0x1e   : > { %s429_s29 = sshll.u32 %s19246_s28, 4  ;;  %s21586_s0 = sld [smem:[#allocation43_spill]]  ;;  %s19401_s29 = int_to_ptr.vmem [resolvable:$true] %s429_s29 }
  0x1f   : > { %s21583_s24 = scalar_select %p19387_p4, 1, 0 }
  0x20   : > { %p16228_p5 = pneg %p19387_p4 }
  0x21   : > { %21584 = sst [smem:[#allocation39_spill]] %s21583_s24 }
  0x22   : > { %p19395_p6 = pnand %p16228_p5, %p21546_p1 }
  0x24   : > { %s21585_s25 = scalar_select %p19395_p6, 1, 0 }
  0x25   : > { %s18775_s14 = scalar_lea.hbm %s21586_s0, 1536  ;;  %p19411_p8 = pneg %p19395_p6 }
  0x26   : > { %p18776_p7 = scmp.ne.s32.totalorder %s21586_s0, %s18775_s14  ;;  %p18782_p11 = scmp.lt.u32.totalorder %s18775_s14, %s21586_s0 }
  0x27   : > { %s21587_s7 = scalar_select %p19411_p8, 1, 0 }
  0x28   : > { %p18778_p9 = pnand %p19411_p8, %p18776_p7 }
  0x2a   : > { %p18779_p10 = pneg %p18778_p9 }
  0x2c   : > { %p18784_p12 = pnand %p18782_p11, %p18779_p10 }
  0x2e   : > { %18787 = shalt.err (!%p18784_p12)
}
  0x2f   : > { %s18788_s8 = scalar_lea.vmem %s19385_s22, 1536  ;;  %p18796_p5 = scmp.lt.s32.totalorder %s19385_s22, %s19385_s22 }
  0x30   : > { %p18789_p13 = scmp.ne.s32.totalorder %s19385_s22, %s18788_s8  ;;  %p18797_p3 = scmp.lt.s32.totalorder %s18788_s8, %s18788_s8 }
  0x32   : > { %p18791_p0 = pnand %p18789_p13, %p19411_p8  ;;  %p18798_p7 = por %p18797_p3, %p18796_p5 }
  0x34   : > { %p18792_p2 = pneg %p18791_p0 }
  0x36   : > { %p18799_p9 = pnand %p18798_p7, %p18792_p2 }
  0x38   : > { %18802 = shalt.err (!%p18799_p9)
}
  0x39   : > { %s21548_s24 = smov 768   ;;  %s21549_s14 = smov 48  }
  0x3a   : > { %16231 = dma.hbm_to_vmem [thread:$0]  (!%p19395_p6), %s21586_s0, 1536, %s19385_s22, [#allocation6], %s21548_s24, %s21548_s24, %s21549_s14  }
  0x3b   : > { %s21588_s1 = sld [smem:[#allocation44_spill]] }
  0x41   : > { %s18803_s8 = scalar_lea.hbm %s21588_s1, 192 }
  0x42   : > { %p18804_p3 = scmp.ne.s32.totalorder %s21588_s1, %s18803_s8  ;;  %p18810_p12 = scmp.lt.u32.totalorder %s18803_s8, %s21588_s1 }
  0x44   : > { %p18806_p10 = pnand %p18804_p3, %p19411_p8 }
  0x46   : > { %p18807_p11 = pneg %p18806_p10 }
  0x48   : > { %p18812_p13 = pnand %p18810_p12, %p18807_p11 }
  0x4a   : > { %18815 = shalt.err (!%p18812_p13)
}
  0x4b   : > { %s18816_s22 = scalar_lea.vmem %s19399_s27, 192  ;;  %p18824_p7 = scmp.lt.s32.totalorder %s19399_s27, %s19399_s27 }
  0x4c   : > { %p18817_p0 = scmp.ne.s32.totalorder %s19399_s27, %s18816_s22  ;;  %p18825_p9 = scmp.lt.s32.totalorder %s18816_s22, %s18816_s22 }
  0x4e   : > { %p18819_p2 = pnand %p18817_p0, %p19411_p8  ;;  %p18826_p3 = por %p18825_p9, %p18824_p7 }
  0x50   : > { %p18820_p5 = pneg %p18819_p2 }
  0x52   : > { %p18827_p10 = pnand %p18826_p3, %p18820_p5 }
  0x54   : > { %18830 = shalt.err (!%p18827_p10)
}
  0x55   : > { %16234 = dma.hbm_to_vmem [thread:$0]  (!%p19395_p6), %s21588_s1, 192, %s19399_s27, [#allocation8]  }
  0x56   : > { %s21589_s4 = sld [smem:[#allocation46_spill]] }
  0x5c   : > { %s18831_s30 = scalar_lea.hbm %s21589_s4, 96 }
  0x5d   : > { %p18832_p11 = scmp.ne.s32.totalorder %s21589_s4, %s18831_s30  ;;  %p18838_p0 = scmp.lt.u32.totalorder %s18831_s30, %s21589_s4 }
  0x5f   : > { %p18834_p12 = pnand %p18832_p11, %p19411_p8 }
  0x61   : > { %p18835_p13 = pneg %p18834_p12 }
  0x63   : > { %p18840_p2 = pnand %p18838_p0, %p18835_p13 }
  0x65   : > { %18843 = shalt.err (!%p18840_p2)
}
  0x66   : > { %s18844_s27 = scalar_lea.vmem %s19401_s29, 96  ;;  %p18852_p3 = scmp.lt.s32.totalorder %s19401_s29, %s19401_s29 }
  0x67   : > { %p18845_p5 = scmp.ne.s32.totalorder %s19401_s29, %s18844_s27  ;;  %p18853_p10 = scmp.lt.s32.totalorder %s18844_s27, %s18844_s27 }
  0x69   : > { %p18847_p7 = pnand %p18845_p5, %p19411_p8  ;;  %p18854_p11 = por %p18853_p10, %p18852_p3 }
  0x6b   : > { %p18848_p9 = pneg %p18847_p7 }
  0x6d   : > { %p18855_p12 = pnand %p18854_p11, %p18848_p9 }
  0x6f   : > { %18858 = shalt.err (!%p18855_p12)
}
  0x70   : > { %16240 = dma.hbm_to_vmem [thread:$0]  (!%p19395_p6), %s21589_s4, 96, %s19401_s29, [#allocation12]  }
  0x71   : > { %s19249_s18 = smov [#allocation19]   ;;  %s19250_s13 = smov [#allocation20]  }
  0x72   : > { %s450_s19 = sshll.u32 %s19249_s18, 4  ;;  %s464_s30 = sshll.u32 %s19250_s13, 4  ;;  %s451_s19 = int_to_ptr.vmem [resolvable:$true] %s450_s19  ;;  %s19481_s30 = int_to_ptr.vmem [resolvable:$true] %s464_s30 }
  0x73   : > { %s21590_s9 = sld [smem:[#allocation50_spill]] }
  0x79   : > { %s18859_s28 = scalar_lea.hbm %s21590_s9, 36864 }
  0x7a   : > { %p18860_p13 = scmp.ne.s32.totalorder %s21590_s9, %s18859_s28  ;;  %p18866_p5 = scmp.lt.u32.totalorder %s18859_s28, %s21590_s9 }
  0x7c   : > { %p18862_p0 = pnand %p18860_p13, %p19411_p8 }
  0x7e   : > { %p18863_p2 = pneg %p18862_p0 }
  0x80   : > { %p18868_p7 = pnand %p18866_p5, %p18863_p2 }
  0x82   : > { %18871 = shalt.err (!%p18868_p7)
}
  0x83   : > { %s18872_s2 = scalar_lea.vmem %s451_s19, 36864  ;;  %p18880_p11 = scmp.lt.s32.totalorder %s451_s19, %s451_s19 }
  0x84   : > { %p18873_p9 = scmp.ne.s32.totalorder %s451_s19, %s18872_s2  ;;  %p18881_p12 = scmp.lt.s32.totalorder %s18872_s2, %s18872_s2 }
  0x86   : > { %p18875_p3 = pnand %p18873_p9, %p19411_p8  ;;  %p18882_p1 = por %p18881_p12, %p18880_p11 }
  0x88   : > { %p18876_p10 = pneg %p18875_p3 }
  0x8a   : > { %p18883_p4 = pnand %p18882_p1, %p18876_p10 }
  0x8c   : > { %18886 = shalt.err (!%p18883_p4)
}
  0x8d   : > { %s21550_s18 = smov 384   ;;  %s21552_s13 = smov 24  }
  0x8e   : > { %16246 = dma.hbm_to_vmem [thread:$0]  (!%p19395_p6), %s21590_s9, 36864, %s451_s19, [#allocation18], %s21550_s18, %s21550_s18, %s21552_s13  }
  0x8f   : > { %s21591_s10 = sld [smem:[#allocation51_spill]] }
  0x95   : > { %s18887_s27 = scalar_lea.hbm %s21591_s10, 96 }
  0x96   : > { %p18888_p1 = scmp.ne.s32.totalorder %s21591_s10, %s18887_s27  ;;  %p18894_p0 = scmp.lt.u32.totalorder %s18887_s27, %s21591_s10 }
  0x98   : > { %p18890_p4 = pnand %p18888_p1, %p19411_p8 }
  0x9a   : > { %p18891_p13 = pneg %p18890_p4 }
  0x9c   : > { %p18896_p2 = pnand %p18894_p0, %p18891_p13 }
  0x9e   : > { %18899 = shalt.err (!%p18896_p2)
}
  0x9f   : > { %s18900_s19 = scalar_lea.vmem %s19481_s30, 96  ;;  %p18908_p3 = scmp.lt.s32.totalorder %s19481_s30, %s19481_s30 }
  0xa0   : > { %p18901_p5 = scmp.ne.s32.totalorder %s19481_s30, %s18900_s19  ;;  %p18909_p10 = scmp.lt.s32.totalorder %s18900_s19, %s18900_s19 }
  0xa2   : > { %p18903_p7 = pnand %p18901_p5, %p19411_p8  ;;  %p18910_p11 = por %p18909_p10, %p18908_p3 }
  0xa4   : > { %p18904_p9 = pneg %p18903_p7 }
  0xa6   : > { %p18911_p12 = pnand %p18910_p11, %p18904_p9 }
  0xa8   : > { %18914 = shalt.err (!%p18911_p12)
}
  0xa9   : > { %16249 = dma.hbm_to_vmem [thread:$0]  (!%p19395_p6), %s21591_s10, 96, %s19481_s30, [#allocation21]  }
  0xaa   : > { %s19528_s26 = sadd.s32 1, %s19242_s20   ;;  %p21555_p1 = scmp.eq.s32.totalorder %s19242_s20, 0 }
  0xab   : > { %s174_s8 = ssub.s32 %s19242_s20, %s19528_s26  ;;  %s177_s27 = sadd.s32 1, %s19226_s17 }
  0xac   : > { %p175_p4 = scmp.eq.s32.totalorder %s174_s8, 0  ;;  %p184_p13 = scmp.ne.s32.totalorder %s19226_s17, %s19222_s16 }
  0xad   : > { %p190_p0 = scmp.ne.s32.totalorder %s19222_s16, %s19218_s15  ;;  %p21593_p5 = scmp.eq.s32.totalorder %s19379_s23, 0 }
  0xae   : > { %s19540_s22 = scalar_select %p175_p4, %s19226_s17, %s177_s27  }
  0xaf   : > { %p186_p2 = por %p184_p13, %p21555_p1  ;;  %p19546_p7 = por %p190_p0, %p21593_p5 }
  0xb0   : > { %21592 = sst [smem:[#allocation40_spill]] %s19540_s22  ;;  %p21554_p9 = scmp.lt.s32.totalorder %s19242_s20, 2 }
  0xb1   : > { %s21594_s30 = scalar_select %p19546_p7, 1, 0 }
  0xb2   : > { %s19552_s29 = sand.u32 1, %s19242_s20   ;;  %s525_s2 = sand.u32 1, %s19226_s17  }
  0xb3   : > { %s16175_s19 = smul.u32 6912, %s525_s2  ;;  %p19557_p3 = pnand %p21554_p9, %p186_p2 }
  0xb4   : > { %s16279_s15 = smul.u32 110592, %s19242_s20  ;;  %s21596_s6 = sld [smem:[#allocation47_spill]] }
  0xb5   : > { %s21595_s24 = scalar_select %p19557_p3, 1, 0 }
  0xb6   : > { %s527_s14 = scalar_lea.vmem [#allocation14], %s16175_s19  ;;  %s19569_s18 = smul.u32 18, %s525_s2 }
  0xb7   : > { %s535_s28 = sshll.u32 %s527_s14, 4  ;;  %s524_s13 = scalar_lea.sflag [#allocation15], %s19552_s29  ;;  %s19567_s28 = int_to_ptr.vmem [resolvable:$true] %s535_s28 }
  0xb8   : > { %p19576_p11 = pneg %p19557_p3 }
  0xba   : > { %s19565_s27 = scalar_lea.hbm %s21596_s6, %s16279_s15  ;;  %s18920_s14 = scalar_lea.hbm %s21596_s6, 221184 }
  0xbb   : > { %s18915_s0 = scalar_lea.hbm %s19565_s27, 110592  ;;  %p18921_p13 = scmp.lt.u32.totalorder %s19565_s27, %s21596_s6 }
  0xbc   : > { %p18916_p10 = scmp.ne.s32.totalorder %s19565_s27, %s18915_s0  ;;  %p18922_p0 = scmp.lt.u32.totalorder %s18920_s14, %s18915_s0 }
  0xbd   : > { %s21597_s1 = scalar_select %p19576_p11, 1, 0 }
  0xbe   : > { %p18918_p12 = pnand %p19576_p11, %p18916_p10  ;;  %p18923_p2 = por %p18922_p0, %p18921_p13 }
  0xbf   : > { %p18924_p5 = scmp.lt.u32.totalorder %s18915_s0, %s19565_s27 }
  0xc0   : > { %p18919_p4 = pneg %p18918_p12 }
  0xc1   : > { %p18925_p9 = por %p18924_p5, %p18923_p2 }
  0xc3   : > { %p18926_p1 = pnand %p18925_p9, %p18919_p4 }
  0xc5   : > { %18929 = shalt.err (!%p18926_p1)
}
  0xc6   : > { %s18930_s2 = scalar_lea.vmem %s19567_s28, 110592  ;;  %s19253_s15 = smov [#allocation14]  }
  0xc7   : > { %p18931_p10 = scmp.ne.s32.totalorder %s19567_s28, %s18930_s2  ;;  %s18935_s21 = sshll.u32 %s19253_s15, 4  ;;  %s18936_s21 = int_to_ptr.vmem [resolvable:$false] %s18935_s21 }
  0xc8   : > { %s18937_s19 = scalar_lea.vmem %s18936_s21, 221184  ;;  %p18938_p6 = scmp.lt.s32.totalorder %s19567_s28, %s18936_s21 }
  0xc9   : > { %p18933_p12 = pnand %p18931_p10, %p19576_p11  ;;  %p18939_p8 = scmp.lt.s32.totalorder %s18937_s19, %s18930_s2 }
  0xcb   : > { %p18934_p7 = pneg %p18933_p12  ;;  %p18940_p13 = por %p18939_p8, %p18938_p6 }
  0xcd   : > { %p18941_p0 = pnand %p18940_p13, %p18934_p7 }
  0xcf   : > { %18944 = shalt.err (!%p18941_p0)
}
  0xd0   : > { %s21598_s0 = smov 24   ;;  %s21599_s14 = smov 384  }
  0xd1   : > { %16262 = dma.hbm_to_vmem [thread:$0]  (!%p19557_p3), %s19565_s27, 110592, %s19567_s28, %s524_s13, %s21599_s14, %s21599_s14, %s21598_s0  }
  0xd2   : > { %s19254_s8 = smov [#allocation10]   ;;  %s19255_s4 = smov [#allocation13]  }
  0xd3   : > { %s415_s15 = sshll.u32 %s19254_s8, 4  ;;  %s440_s21 = sshll.u32 %s19255_s4, 4  ;;  %s416_s15 = int_to_ptr.vmem [resolvable:$true] %s415_s15  ;;  %s441_s21 = int_to_ptr.vmem [resolvable:$true] %s440_s21 }
  0xd4   : > { %s18945_s6 = scalar_lea.hbm %s21528_s3, 36864  ;;  %p21600_p8 = scmp.ne.s32.totalorder %s21587_s7, 0 }
  0xd5   : > { %p18946_p6 = scmp.ne.s32.totalorder %s21528_s3, %s18945_s6  ;;  %p18952_p9 = scmp.lt.u32.totalorder %s18945_s6, %s21528_s3 }
  0xd7   : > { %p18948_p1 = pnand %p18946_p6, %p21600_p8 }
  0xd9   : > { %p18949_p7 = pneg %p18948_p1 }
  0xdb   : > { %p18954_p4 = pnand %p18952_p9, %p18949_p7 }
  0xdd   : > { %18957 = shalt.err (!%p18954_p4)
}
  0xde   : > { %s18958_s28 = scalar_lea.vmem %s416_s15, 36864  ;;  %p18966_p12 = scmp.lt.s32.totalorder %s416_s15, %s416_s15 }
  0xdf   : > { %p18959_p2 = scmp.ne.s32.totalorder %s416_s15, %s18958_s28  ;;  %p18967_p13 = scmp.lt.s32.totalorder %s18958_s28, %s18958_s28 }
  0xe1   : > { %p18961_p5 = pnand %p18959_p2, %p21600_p8  ;;  %p18968_p0 = por %p18967_p13, %p18966_p12 }
  0xe3   : > { %p18962_p10 = pneg %p18961_p5 }
  0xe5   : > { %p18969_p3 = pnand %p18968_p0, %p18962_p10 }
  0xe7   : > { %18972 = shalt.err (!%p18969_p3)
}
  0xe8   : > { %p21601_p6 = scmp.ne.s32.totalorder %s21585_s25, 0  ;;  %s18973_s17 = scalar_lea.hbm %s21530_s5, 96 }
  0xe9   : > { %p18974_p1 = scmp.ne.s32.totalorder %s21530_s5, %s18973_s17  ;;  %p18980_p9 = scmp.lt.u32.totalorder %s18973_s17, %s21530_s5 }
  0xea   : > { %16237 = dma.hbm_to_vmem [thread:$0]  (!%p21601_p6), %s21528_s3, 36864, %s416_s15, [#allocation8], %s21599_s14, %s21599_s14, %s21598_s0  }
  0xeb   : > { %p18976_p3 = pnand %p18974_p1, %p21600_p8 }
  0xed   : > { %p18977_p7 = pneg %p18976_p3 }
  0xef   : > { %p18982_p4 = pnand %p18980_p9, %p18977_p7 }
  0xf1   : > { %18985 = shalt.err (!%p18982_p4)
}
  0xf2   : > { %s18986_s19 = scalar_lea.vmem %s441_s21, 96  ;;  %p18994_p12 = scmp.lt.s32.totalorder %s441_s21, %s441_s21 }
  0xf3   : > { %p18987_p2 = scmp.ne.s32.totalorder %s441_s21, %s18986_s19  ;;  %p18995_p13 = scmp.lt.s32.totalorder %s18986_s19, %s18986_s19 }
  0xf5   : > { %p18989_p5 = pnand %p18987_p2, %p21600_p8  ;;  %p18996_p0 = por %p18995_p13, %p18994_p12 }
  0xf7   : > { %p18990_p10 = pneg %p18989_p5 }
  0xf9   : > { %p18997_p11 = pnand %p18996_p0, %p18990_p10 }
  0xfb   : > { %19000 = shalt.err (!%p18997_p11)
}
  0xfc   : > { %16243 = dma.hbm_to_vmem [thread:$0]  (!%p21601_p6), %s21530_s5, 96, %s441_s21, [#allocation12]  }
  0xfd   : > { %s19256_s15 = smov [#allocation22]   ;;  %s19257_s4 = smov [#allocation23]  }
  0xfe   : > { %s475_s28 = sshll.u32 %s19256_s15, 4  ;;  %s486_s6 = sshll.u32 %s19257_s4, 4  ;;  %s476_s28 = int_to_ptr.vmem [resolvable:$true] %s475_s28  ;;  %s487_s6 = int_to_ptr.vmem [resolvable:$true] %s486_s6 }
  0xff   : > { %s19001_s17 = scalar_lea.hbm %s21536_s11, 96 }
 0x100   : > { %p19002_p11 = scmp.ne.s32.totalorder %s21536_s11, %s19001_s17  ;;  %p19008_p7 = scmp.lt.u32.totalorder %s19001_s17, %s21536_s11 }
 0x102   : > { %p19004_p1 = pnand %p19002_p11, %p21600_p8 }
 0x104   : > { %p19005_p3 = pneg %p19004_p1 }
 0x106   : > { %p19010_p9 = pnand %p19008_p7, %p19005_p3 }
 0x108   : > { %19013 = shalt.err (!%p19010_p9)
}
 0x109   : > { %s19014_s21 = scalar_lea.vmem %s476_s28, 96  ;;  %p19022_p10 = scmp.lt.s32.totalorder %s476_s28, %s476_s28 }
 0x10a   : > { %p19015_p4 = scmp.ne.s32.totalorder %s476_s28, %s19014_s21  ;;  %p19023_p12 = scmp.lt.s32.totalorder %s19014_s21, %s19014_s21 }
 0x10c   : > { %p19017_p2 = pnand %p19015_p4, %p21600_p8  ;;  %p19024_p13 = por %p19023_p12, %p19022_p10 }
 0x10e   : > { %p19018_p5 = pneg %p19017_p2 }
 0x110   : > { %p19025_p0 = pnand %p19024_p13, %p19018_p5 }
 0x112   : > { %19028 = shalt.err (!%p19025_p0)
}
 0x113   : > { %16252 = dma.hbm_to_vmem [thread:$0]  (!%p21601_p6), %s21536_s11, 96, %s476_s28, [#allocation21]  }
 0x114   : > { %s19029_s4 = scalar_lea.hbm %s21537_s12, 96 }
 0x115   : > { %p19030_p11 = scmp.ne.s32.totalorder %s21537_s12, %s19029_s4  ;;  %p19036_p7 = scmp.lt.u32.totalorder %s19029_s4, %s21537_s12 }
 0x117   : > { %p19032_p1 = pnand %p19030_p11, %p21600_p8 }
 0x119   : > { %p19033_p3 = pneg %p19032_p1 }
 0x11b   : > { %p19038_p9 = pnand %p19036_p7, %p19033_p3 }
 0x11d   : > { %19041 = shalt.err (!%p19038_p9)
}
 0x11e   : > { %s19042_s27 = scalar_lea.vmem %s487_s6, 96  ;;  %p19050_p10 = scmp.lt.s32.totalorder %s487_s6, %s487_s6 }
 0x11f   : > { %p19043_p4 = scmp.ne.s32.totalorder %s487_s6, %s19042_s27  ;;  %p19051_p12 = scmp.lt.s32.totalorder %s19042_s27, %s19042_s27 }
 0x121   : > { %p19045_p2 = pnand %p19043_p4, %p21600_p8  ;;  %p19052_p13 = por %p19051_p12, %p19050_p10 }
 0x123   : > { %p19046_p5 = pneg %p19045_p2 }
 0x125   : > { %p19053_p0 = pnand %p19052_p13, %p19046_p5 }
 0x127   : > { %19056 = shalt.err (!%p19053_p0)
}
 0x128   : > { %s21602_s2 = sld [smem:[#allocation38_spill]]  ;;  %s21603_s21 = sld [smem:[#allocation37_spill]] }
 0x129   : > { %s21604_s19 = sld [smem:[#allocation36_spill]]  ;;  %s83_s7 = sadd.s32 2, %s19242_s20 }
 0x12a   : > { %16255 = dma.hbm_to_vmem [thread:$0]  (!%p21601_p6), %s21537_s12, 96, %s487_s6, [#allocation24]  }
 0x12b   : > { %s21605_s0 = sadd.s32 2, %s19528_s26  ;;  %p21606_p3 = scmp.eq.s32.totalorder %s19242_s20, 0 }
 0x12c   : > { %s85_s25 = ssub.s32 %s83_s7, %s21605_s0  ;;  %p21607_p9 = scmp.eq.s32.totalorder %s19379_s23, 0 }
 0x12d   : > { %p86_p8 = scmp.eq.s32.totalorder %s85_s25, 0  ;;  %s13737_s6 = smul.u32 4608, %s19242_s20 }
 0x12e   : > { %s88_s14 = sadd.s32 1, %s21602_s2  ;;  %p95_p11 = scmp.ne.s32.totalorder %s21602_s2, %s21603_s21 }
 0x12f   : > { %p101_p1 = scmp.ne.s32.totalorder %s21603_s21, %s21604_s19  ;;  %s502_s9 = sand.u32 1, %s21602_s2  }
 0x130   : > { %s19688_s15 = scalar_select %p86_p8, %s21602_s2, %s88_s14  }
 0x131   : > { %p97_p7 = por %p21606_p3, %p95_p11  ;;  %p19694_p4 = por %p21607_p9, %p101_p1 }
 0x132   : > { %s16174_s10 = smul.u32 288, %s502_s9  ;;  %p21609_p6 = scmp.lt.s32.totalorder %s19242_s20, 2 }
 0x133   : > { %s21608_s4 = scalar_select %p19694_p4, 1, 0 }
 0x134   : > { %p19702_p2 = pnand %p21609_p6, %p97_p7  ;;  %s21611_s28 = sld [smem:[#allocation45_spill]] }
 0x135   : > { %s504_s19 = scalar_lea.vmem [#allocation9], %s16174_s10  ;;  %s16280_s7 = smul.u32 288, %s19242_s20 }
 0x136   : > { %s513_s2 = sshll.u32 %s504_s19, 4  ;;  %s501_s0 = scalar_lea.sflag [#allocation6], %s19552_s29  ;;  %s19711_s2 = int_to_ptr.vmem [resolvable:$true] %s513_s2 }
 0x137   : > { %p19059_p10 = pneg %p19702_p2 }
 0x13a   : > { %s13738_s8 = scalar_lea.hbm %s21611_s28, %s13737_s6  ;;  %s19062_s6 = scalar_lea.hbm %s21611_s28, 18432 }
 0x13b   : > { %s19709_s21 = scalar_lea.hbm %s13738_s8, 9216  ;;  %s19087_s25 = scalar_lea.hbm %s13738_s8, 13824 }
 0x13c   : > { %p19058_p5 = scmp.ne.s32.totalorder %s19709_s21, %s19087_s25  ;;  %p19063_p0 = scmp.lt.u32.totalorder %s19709_s21, %s21611_s28 }
 0x13d   : > { %p19064_p8 = scmp.lt.u32.totalorder %s19062_s6, %s19087_s25  ;;  %p19066_p1 = scmp.lt.u32.totalorder %s19087_s25, %s19709_s21 }
 0x13e   : > { %p19060_p12 = pnand %p19059_p10, %p19058_p5 }
 0x13f   : > { %p19065_p11 = por %p19064_p8, %p19063_p0 }
 0x140   : > { %p19061_p13 = pneg %p19060_p12 }
 0x141   : > { %p19067_p3 = por %p19066_p1, %p19065_p11 }
 0x143   : > { %p19068_p7 = pnand %p19067_p3, %p19061_p13 }
 0x145   : > { %19071 = shalt.err (!%p19068_p7)
}
 0x146   : > { %s19072_s10 = scalar_lea.vmem %s19711_s2, 4608  ;;  %s19258_s8 = smov [#allocation9]  }
 0x147   : > { %p19073_p9 = scmp.ne.s32.totalorder %s19711_s2, %s19072_s10  ;;  %s19077_s19 = sshll.u32 %s19258_s8, 4  ;;  %s19078_s19 = int_to_ptr.vmem [resolvable:$false] %s19077_s19 }
 0x148   : > { %s19079_s14 = scalar_lea.vmem %s19078_s19, 9216  ;;  %p19080_p12 = scmp.lt.s32.totalorder %s19711_s2, %s19078_s19 }
 0x149   : > { %p19075_p6 = pnand %p19073_p9, %p19059_p10  ;;  %p19081_p0 = scmp.lt.s32.totalorder %s19079_s14, %s19072_s10 }
 0x14b   : > { %p19076_p5 = pneg %p19075_p6  ;;  %p19082_p8 = por %p19081_p0, %p19080_p12 }
 0x14d   : > { %p19083_p11 = pnand %p19082_p8, %p19076_p5 }
 0x14f   : > { %19086 = shalt.err (!%p19083_p11)
}
 0x150   : > { %s21612_s25 = smov 48   ;;  %s21613_s9 = smov 768  }
 0x151   : > { %16259 = dma.hbm_to_vmem [thread:$0]  (!%p19702_p2), %s19709_s21, 4608, %s19711_s2, %s501_s0, %s21613_s9, %s21613_s9, %s21612_s25  }
 0x152   : > { %s21614_s27 = sld [smem:[#allocation48_spill]]  ;;  %s549_s17 = scalar_lea.vmem [#allocation16], %s19569_s18 }
 0x153   : > { %s557_s8 = sshll.u32 %s549_s17, 4  ;;  %p21615_p13 = scmp.ne.s32.totalorder %s21597_s1, 0  ;;  %s19752_s8 = int_to_ptr.vmem [resolvable:$true] %s557_s8 }
 0x158   : > { %s19749_s10 = scalar_lea.hbm %s21614_s27, %s16280_s7  ;;  %s19093_s0 = scalar_lea.hbm %s21614_s27, 576 }
 0x159   : > { %s19088_s19 = scalar_lea.hbm %s19749_s10, 288  ;;  %p19094_p2 = scmp.lt.u32.totalorder %s19749_s10, %s21614_s27 }
 0x15a   : > { %p19089_p10 = scmp.ne.s32.totalorder %s19749_s10, %s19088_s19  ;;  %p19095_p7 = scmp.lt.u32.totalorder %s19093_s0, %s19088_s19 }
 0x15b   : > { %p19097_p6 = scmp.lt.u32.totalorder %s19088_s19, %s19749_s10 }
 0x15c   : > { %p19091_p1 = pnand %p19089_p10, %p21615_p13  ;;  %p19096_p9 = por %p19095_p7, %p19094_p2 }
 0x15e   : > { %p19092_p3 = pneg %p19091_p1  ;;  %p19098_p5 = por %p19097_p6, %p19096_p9 }
 0x160   : > { %p19099_p12 = pnand %p19098_p5, %p19092_p3 }
 0x162   : > { %19102 = shalt.err (!%p19099_p12)
}
 0x163   : > { %s19103_s9 = scalar_lea.vmem %s19752_s8, 288  ;;  %s19259_s6 = smov [#allocation16]  }
 0x164   : > { %p19104_p0 = scmp.ne.s32.totalorder %s19752_s8, %s19103_s9  ;;  %s19108_s22 = sshll.u32 %s19259_s6, 4  ;;  %s19109_s22 = int_to_ptr.vmem [resolvable:$false] %s19108_s22 }
 0x165   : > { %s19110_s17 = scalar_lea.vmem %s19109_s22, 576  ;;  %p19111_p10 = scmp.lt.s32.totalorder %s19752_s8, %s19109_s22 }
 0x166   : > { %p19106_p8 = pnand %p19104_p0, %p21615_p13  ;;  %p19112_p1 = scmp.lt.s32.totalorder %s19110_s17, %s19103_s9 }
 0x168   : > { %p19107_p11 = pneg %p19106_p8  ;;  %p19113_p2 = por %p19112_p1, %p19111_p10 }
 0x16a   : > { %p19114_p7 = pnand %p19113_p2, %p19107_p11 }
 0x16c   : > { %19117 = shalt.err (!%p19114_p7)
}
 0x16d   : > { %s19260_s19 = smov 96   ;;  %s19261_s21 = smov 6  }
 0x16e   : > { %p21616_p3 = scmp.ne.s32.totalorder %s21595_s24, 0  ;;  %s21617_s14 = sld [smem:[#allocation49_spill]] }
 0x16f   : > { %s571_s9 = scalar_lea.vmem [#allocation17], %s19569_s18  ;;  %s568_s22 = scalar_lea.sflag [#allocation18], %s19552_s29 }
 0x170   : > { %16265 = dma.hbm_to_vmem [thread:$0]  (!%p21616_p3), %s19749_s10, 288, %s19752_s8, %s524_s13, %s19260_s19, %s19260_s19, %s19261_s21  }
 0x171   : > { %s579_s6 = sshll.u32 %s571_s9, 4  ;;  %s19788_s6 = int_to_ptr.vmem [resolvable:$true] %s579_s6 }
 0x174   : > { %s19785_s25 = scalar_lea.hbm %s21617_s14, %s16280_s7  ;;  %s19123_s10 = scalar_lea.hbm %s21617_s14, 576 }
 0x175   : > { %s19118_s17 = scalar_lea.hbm %s19785_s25, 288  ;;  %p19124_p12 = scmp.lt.u32.totalorder %s19785_s25, %s21617_s14 }
 0x176   : > { %p19119_p9 = scmp.ne.s32.totalorder %s19785_s25, %s19118_s17  ;;  %p19125_p0 = scmp.lt.u32.totalorder %s19123_s10, %s19118_s17 }
 0x177   : > { %p19127_p11 = scmp.lt.u32.totalorder %s19118_s17, %s19785_s25 }
 0x178   : > { %p19121_p6 = pnand %p19119_p9, %p21615_p13  ;;  %p19126_p8 = por %p19125_p0, %p19124_p12 }
 0x17a   : > { %p19122_p5 = pneg %p19121_p6  ;;  %p19128_p10 = por %p19127_p11, %p19126_p8 }
 0x17c   : > { %p19129_p1 = pnand %p19128_p10, %p19122_p5 }
 0x17e   : > { %19132 = shalt.err (!%p19129_p1)
}
 0x17f   : > { %s19133_s18 = scalar_lea.vmem %s19788_s6, 288  ;;  %s19262_s2 = smov [#allocation17]  }
 0x180   : > { %p19134_p2 = scmp.ne.s32.totalorder %s19788_s6, %s19133_s18  ;;  %s19138_s0 = sshll.u32 %s19262_s2, 4  ;;  %s19139_s0 = int_to_ptr.vmem [resolvable:$false] %s19138_s0 }
 0x181   : > { %s19140_s9 = scalar_lea.vmem %s19139_s0, 576  ;;  %p19141_p6 = scmp.lt.s32.totalorder %s19788_s6, %s19139_s0 }
 0x182   : > { %p19136_p7 = pnand %p19134_p2, %p21615_p13  ;;  %p19142_p4 = scmp.lt.s32.totalorder %s19140_s9, %s19133_s18 }
 0x184   : > { %p19137_p9 = pneg %p19136_p7  ;;  %p19143_p12 = por %p19142_p4, %p19141_p6 }
 0x186   : > { %p19144_p0 = pnand %p19143_p12, %p19137_p9 }
 0x188   : > { %19147 = shalt.err (!%p19144_p0)
}
 0x189   : > { %16268 = dma.hbm_to_vmem [thread:$0]  (!%p21616_p3), %s19785_s25, 288, %s19788_s6, %s568_s22, %s19260_s19, %s19260_s19, %s19261_s21  }
 0x18a   : > { %s21618_s1 = sld [smem:[#allocation39_spill]] }
 0x190   : > { %p21619_p13 = scmp.ne.s32.totalorder %s21618_s1, 0 }
 0x192   : > { %591 = sbr.rel (%p21619_p13) target bundleno = 3537 (0xdd1), region = 76 }
 0x199   : > { %p21620_p5 = scmp.eq.s32.totalorder %s19379_s23, 0 }
 0x19b   : > { %19177 = dma.done.wait (%p21620_p5), [#allocation6], 1536   ;;  %p21621_p4 = pmov %p21620_p5 }
 0x19d   : > { %19179 = vsyncadd (%p21621_p4), [#allocation6], 4294965760  ;;  %p21622_p8 = pmov %p21621_p4 }
 0x19e   : > { %p21623_p11 = pmov %p21621_p4 }
 0x19f   : > { %19181 = dma.done.wait (%p21622_p8), [#allocation8], 192  }
 0x1a0   : > { %19183 = vsyncadd (%p21623_p11), [#allocation8], 4294967104  ;;  %s21624_s29 = sld [smem:[#allocation37_spill]]  ;;  %s601_s24 = sand.u32 1, %s19379_s23  }
 0x1a1   : > { %s602_s25 = scalar_lea.sflag [#allocation6], %s601_s24  ;;  %p21625_p3 = scmp.ne.s32.totalorder %s21608_s4, 0 }
 0x1a6   : > { %s603_s19 = sand.u32 1, %s21624_s29  }
 0x1a7   : > { %s16181_s21 = smul.u32 288, %s603_s19 }
 0x1a9   : > { %s19829_s6 = scalar_lea.vmem [#allocation9], %s16181_s21 }
 0x1aa   : > { %19185 = dma.done.wait (%p21625_p3), %s602_s25, 4608  }
 0x1ab   : > { %19187 = vsyncadd (%p21625_p3), %s602_s25, 4294962688  ;;  %p21626_p10 = pmov %p21621_p4 }
 0x1ac   : > { %p21627_p1 = pmov %p21621_p4 }
 0x1ad   : > { %19189 = dma.done.wait (%p21626_p10), [#allocation8], 36864  }
 0x1ae   : > { %19191 = vsyncadd (%p21627_p1), [#allocation8], 4294930432  ;;  %p21628_p2 = pmov %p21627_p1 }
 0x1af   : > { %p21629_p7 = pmov %p21627_p1 }
 0x1b0   : > { %19193 = dma.done.wait (%p21628_p2), [#allocation12], 192  }
 0x1b1   : > { %19195 = vsyncadd (%p21629_p7), [#allocation12], 4294967104  ;;  %s624_s22 = sand.u32 1, %s19222_s16   ;;  %s623_s20 = scalar_lea.sflag [#allocation15], %s601_s24 }
 0x1b2   : > { %s16182_s17 = smul.u32 6912, %s624_s22  ;;  %p21630_p9 = scmp.ne.s32.totalorder %s21594_s30, 0 }
 0x1b4   : > { %s19844_s13 = scalar_lea.vmem [#allocation14], %s16182_s17 }
 0x1b5   : > { %19197 = dma.done.wait (%p21630_p9), %s623_s20, 110880  }
 0x1b6   : > { %19199 = vsyncadd (%p21630_p9), %s623_s20, 4294856416  ;;  %s16183_s4 = smul.u32 18, %s624_s22  ;;  %s641_s7 = scalar_lea.sflag [#allocation18], %s601_s24 }
 0x1b8   : > { %s19850_s10 = scalar_lea.vmem [#allocation16], %s16183_s4  ;;  %s19852_s8 = scalar_lea.vmem [#allocation17], %s16183_s4 }
 0x1b9   : > { %19201 = dma.done.wait (%p21630_p9), %s641_s7, 288  }
 0x1ba   : > { %19203 = vsyncadd (%p21630_p9), %s641_s7, 4294967008  ;;  %p21631_p6 = pmov %p21627_p1 }
 0x1bb   : > { %p21632_p12 = pmov %p21627_p1 }
 0x1bc   : > { %19205 = dma.done.wait (%p21631_p6), [#allocation18], 36864  }
 0x1bd   : > { %19207 = vsyncadd (%p21632_p12), [#allocation18], 4294930432  ;;  %p21633_p0 = pmov %p21627_p1 }
 0x1bf   : > { %19209 = dma.done.wait (%p21633_p0), [#allocation21], 192   ;;  %p21634_p13 = pmov %p21633_p0 }
 0x1c0   : > { %p21635_p5 = pmov %p21633_p0 }
 0x1c1   : > { %19211 = vsyncadd (%p21634_p13), [#allocation21], 4294967104 }
 0x1c2   : > { %19213 = dma.done.wait (%p21635_p5), [#allocation24], 96   ;;  %p21636_p4 = pmov %p21633_p0 }
 0x1c3   : > { %p21637_p8 = scmp.ne.s32.totalorder %s19379_s23, 0 }
 0x1c4   : > { %19215 = vsyncadd (%p21636_p4), [#allocation24], 4294967200  ;;  %v16364_v1 = vld [vmem:[#allocation10 + $0x4] ss:$24 sps:$4 sm:$0xff] (!%p21637_p8)   ;;  %v16368_v3 = vld [vmem:[#allocation10] ss:$24 sps:$4 sm:$0xff] (!%p21637_p8)  }
 0x1c5   : > { %723 = sbr.rel (%p21637_p8) target bundleno = 1238 (0x4d6), region = 132  ;;  %v16366_v2 = vld [vmem:[#allocation10 + $0x304] ss:$24 sps:$4 sm:$0xff] (!%p21637_p8)   ;;  %2503 = vmatprep.subr.bf16.mxu1 (!%p21637_p8), %v16364_v1  ;;  %v16369_v4 = vld [vmem:[#allocation10 + $0x300] ss:$24 sps:$4 sm:$0xff] (!%p21637_p8)   ;;  %v731_v50 = vld [vmem:[#allocation5 + $0x38] sm:$0xff] (!%p21637_p8) }
 0x1c6   : > { %2546 = vmatprep.subr.bf16.mxu0 (!%p21637_p8), %v16366_v2  ;;  %v16370_v5 = vld [vmem:[#allocation10 + $0x34] ss:$24 sps:$4 sm:$0xff] (!%p21637_p8)   ;;  %2504 = vmatpush1.bf16.msra.mxu1 (!%p21637_p8), %v16368_v3  ;;  %v16374_v7 = vld [vmem:[#allocation10 + $0x30] ss:$24 sps:$4 sm:$0xff] (!%p21637_p8)   ;;  %v16376_v9 = vld [vmem:[#allocation10 + $0x64] ss:$24 sps:$4 sm:$0xff] (!%p21637_p8)  }
 0x1c7   : > { %2547 = vmatpush1.bf16.msra.mxu0 (!%p21637_p8), %v16369_v4  ;;  %v16372_v6 = vld [vmem:[#allocation10 + $0x334] ss:$24 sps:$4 sm:$0xff] (!%p21637_p8)   ;;  %2505 = vmatprep.subr.bf16.mxu1 (!%p21637_p8), %v16370_v5  ;;  %v16375_v8 = vld [vmem:[#allocation10 + $0x330] ss:$24 sps:$4 sm:$0xff] (!%p21637_p8)   ;;  %v16378_v10 = vld [vmem:[#allocation10 + $0x364] ss:$24 sps:$4 sm:$0xff] (!%p21637_p8)  }
 0x1c8   : > { %2548 = vmatprep.subr.bf16.mxu0 (!%p21637_p8), %v16372_v6  ;;  %v16380_v11 = vld [vmem:[#allocation10 + $0x60] ss:$24 sps:$4 sm:$0xff] (!%p21637_p8)   ;;  %v16382_v13 = vld [vmem:[#allocation10 + $0x94] ss:$24 sps:$4 sm:$0xff] (!%p21637_p8)   ;;  %v16386_v15 = vld [vmem:[#allocation10 + $0x90] ss:$24 sps:$4 sm:$0xff] (!%p21637_p8)  }
 0x1c9   : > { %v16381_v12 = vld [vmem:[#allocation10 + $0x360] ss:$24 sps:$4 sm:$0xff] (!%p21637_p8)   ;;  %v16384_v14 = vld [vmem:[#allocation10 + $0x394] ss:$24 sps:$4 sm:$0xff] (!%p21637_p8)   ;;  %v16387_v16 = vld [vmem:[#allocation10 + $0x390] ss:$24 sps:$4 sm:$0xff] (!%p21637_p8)  }
 0x1ca   : > { %2506 = vmatpush1.bf16.msra.mxu1 (!%p21637_p8), %v16374_v7  ;;  %v16388_v17 = vld [vmem:[#allocation10 + $0xc4] ss:$24 sps:$4 sm:$0xff] (!%p21637_p8)   ;;  %v16392_v19 = vld [vmem:[#allocation10 + $0xc0] ss:$24 sps:$4 sm:$0xff] (!%p21637_p8)   ;;  %v16394_v21 = vld [vmem:[#allocation10 + $0xf4] ss:$24 sps:$4 sm:$0xff] (!%p21637_p8)  }
 0x1cb   : > { %2549 = vmatpush1.bf16.msra.mxu0 (!%p21637_p8), %v16375_v8  ;;  %2507 = vmatprep.subr.bf16.mxu1 (!%p21637_p8), %v16376_v9  ;;  %v16390_v18 = vld [vmem:[#allocation10 + $0x3c4] ss:$24 sps:$4 sm:$0xff] (!%p21637_p8)   ;;  %v16393_v20 = vld [vmem:[#allocation10 + $0x3c0] ss:$24 sps:$4 sm:$0xff] (!%p21637_p8)   ;;  %v16396_v22 = vld [vmem:[#allocation10 + $0x3f4] ss:$24 sps:$4 sm:$0xff] (!%p21637_p8)  }
 0x1cc   : > { %2550 = vmatprep.subr.bf16.mxu0 %v16378_v10  ;;  %v16398_v23 = vld [vmem:[#allocation10 + $0xf0] ss:$24 sps:$4 sm:$0xff]   ;;  %v16400_v25 = vld [vmem:[#allocation10 + $0x124] ss:$24 sps:$4 sm:$0xff]   ;;  %v16404_v27 = vld [vmem:[#allocation10 + $0x120] ss:$24 sps:$4 sm:$0xff]  }
 0x1cd   : > { %v16399_v24 = vld [vmem:[#allocation10 + $0x3f0] ss:$24 sps:$4 sm:$0xff]   ;;  %v16402_v26 = vld [vmem:[#allocation10 + $0x424] ss:$24 sps:$4 sm:$0xff]   ;;  %v16405_v28 = vld [vmem:[#allocation10 + $0x420] ss:$24 sps:$4 sm:$0xff]  }
 0x1ce   : > { %2508 = vmatpush1.bf16.msra.mxu1 %v16380_v11  ;;  %v16406_v29 = vld [vmem:[#allocation10 + $0x154] ss:$24 sps:$4 sm:$0xff]   ;;  %v16410_v31 = vld [vmem:[#allocation10 + $0x150] ss:$24 sps:$4 sm:$0xff]   ;;  %v16412_v33 = vld [vmem:[#allocation10 + $0x184] ss:$24 sps:$4 sm:$0xff]  }
 0x1cf   : > { %2551 = vmatpush1.bf16.msra.mxu0 %v16381_v12  ;;  %2509 = vmatprep.subr.bf16.mxu1 %v16382_v13  ;;  %v16408_v30 = vld [vmem:[#allocation10 + $0x454] ss:$24 sps:$4 sm:$0xff]   ;;  %v16411_v32 = vld [vmem:[#allocation10 + $0x450] ss:$24 sps:$4 sm:$0xff]   ;;  %v16414_v34 = vld [vmem:[#allocation10 + $0x484] ss:$24 sps:$4 sm:$0xff]  }
 0x1d0   : > { %2552 = vmatprep.subr.bf16.mxu0 %v16384_v14  ;;  %v16416_v35 = vld [vmem:[#allocation10 + $0x180] ss:$24 sps:$4 sm:$0xff]   ;;  %v16418_v37 = vld [vmem:[#allocation10 + $0x1b4] ss:$24 sps:$4 sm:$0xff]   ;;  %v16422_v39 = vld [vmem:[#allocation10 + $0x1b0] ss:$24 sps:$4 sm:$0xff]  }
 0x1d1   : > { %v16417_v36 = vld [vmem:[#allocation10 + $0x480] ss:$24 sps:$4 sm:$0xff]   ;;  %v16420_v38 = vld [vmem:[#allocation10 + $0x4b4] ss:$24 sps:$4 sm:$0xff]   ;;  %v16423_v40 = vld [vmem:[#allocation10 + $0x4b0] ss:$24 sps:$4 sm:$0xff]  }
 0x1d2   : > { %2510 = vmatpush1.bf16.msra.mxu1 %v16386_v15  ;;  %v16424_v41 = vld [vmem:[#allocation10 + $0x1e4] ss:$24 sps:$4 sm:$0xff]   ;;  %v16428_v43 = vld [vmem:[#allocation10 + $0x1e0] ss:$24 sps:$4 sm:$0xff]   ;;  %v16430_v45 = vld [vmem:[#allocation10 + $0x214] ss:$24 sps:$4 sm:$0xff]  }
 0x1d3   : > { %2553 = vmatpush1.bf16.msra.mxu0 %v16387_v16  ;;  %2511 = vmatprep.subr.bf16.mxu1 %v16388_v17  ;;  %v16426_v42 = vld [vmem:[#allocation10 + $0x4e4] ss:$24 sps:$4 sm:$0xff]   ;;  %v16429_v44 = vld [vmem:[#allocation10 + $0x4e0] ss:$24 sps:$4 sm:$0xff]   ;;  %v16432_v46 = vld [vmem:[#allocation10 + $0x514] ss:$24 sps:$4 sm:$0xff]  }
 0x1d4   : > { %2554 = vmatprep.subr.bf16.mxu0 %v16390_v18  ;;  %v16434_v47 = vld [vmem:[#allocation10 + $0x210] ss:$24 sps:$4 sm:$0xff]   ;;  %v725_v49 = vld [vmem:[#allocation5 + $0x8] sm:$0xff]  ;;  %v16442_v59 = vld [vmem:[#allocation10 + $0x274] ss:$24 sps:$4 sm:$0xff]   ;;  %vm3144_vm0 = vcmask 1041409  }
 0x1d5   : > { %v16435_v48 = vld [vmem:[#allocation10 + $0x510] ss:$24 sps:$4 sm:$0xff]   ;;  %v733_v52 = vld [vmem:[#allocation5 + $0x48] sm:$0xff]  ;;  %v19872_v54 = vpack.c.bf16 %v731_v50, %v725_v49  ;;  %v16444_v60 = vld [vmem:[#allocation10 + $0x574] ss:$24 sps:$4 sm:$0xff]   ;;  %vm3146_vm1 = vcmask 1043459  }
 0x1d6   : > { %2512 = vmatpush1.bf16.msra.mxu1 %v16392_v19  ;;  %v727_v51 = vld [vmem:[#allocation5 + $0x18] sm:$0xff]  ;;  %v16436_v53 = vld [vmem:[#allocation10 + $0x244] ss:$24 sps:$4 sm:$0xff]   ;;  %v16440_v57 = vld [vmem:[#allocation10 + $0x240] ss:$24 sps:$4 sm:$0xff]   ;;  %vm3148_vm2 = vcmask 1045509  }
 0x1d7   : > { %2555 = vmatpush1.bf16.msra.mxu0 %v16393_v20  ;;  %2513 = vmatprep.subr.bf16.mxu1 %v16394_v21  ;;  %v19874_v55 = vpack.c.bf16 %v733_v52, %v727_v51  ;;  %v16438_v56 = vld [vmem:[#allocation10 + $0x544] ss:$24 sps:$4 sm:$0xff]   ;;  %v16441_v58 = vld [vmem:[#allocation10 + $0x540] ss:$24 sps:$4 sm:$0xff]   ;;  %v16446_v61 = vld [vmem:[#allocation10 + $0x270] ss:$24 sps:$4 sm:$0xff]  }
 0x1d8   : > { %2556 = vmatprep.subr.bf16.mxu0 %v16396_v22  ;;  %2535 = vmatprep.mubr.bf16.mxu1 %v19872_v54  ;;  %v16447_v62 = vld [vmem:[#allocation10 + $0x570] ss:$24 sps:$4 sm:$0xff]   ;;  %v16448_v63 = vld [vmem:[#allocation10 + $0x2a4] ss:$24 sps:$4 sm:$0xff]   ;;  %v16452_v1 = vld [vmem:[#allocation10 + $0x2a0] ss:$24 sps:$4 sm:$0xff]  }
 0x1d9   : > { %2578 = vmatprep.mubr.bf16.mxu0 %v19874_v55  ;;  %v16450_v0 = vld [vmem:[#allocation10 + $0x5a4] ss:$24 sps:$4 sm:$0xff]   ;;  %v16453_v2 = vld [vmem:[#allocation10 + $0x5a0] ss:$24 sps:$4 sm:$0xff]   ;;  %v16454_v3 = vld [vmem:[#allocation10 + $0x2d4] ss:$24 sps:$4 sm:$0xff]  }
 0x1da   : > { %2514 = vmatpush1.bf16.msra.mxu1 %v16398_v23  ;;  %v16456_v4 = vld [vmem:[#allocation10 + $0x5d4] ss:$24 sps:$4 sm:$0xff]   ;;  %v16458_v5 = vld [vmem:[#allocation10 + $0x2d0] ss:$24 sps:$4 sm:$0xff]   ;;  %v16462_v8 = vld [vmem:[#allocation10 + $0x604] ss:$24 sps:$4 sm:$0xff]  }
 0x1db   : > { %2557 = vmatpush1.bf16.msra.mxu0 %v16399_v24  ;;  %2515 = vmatprep.subr.bf16.mxu1 %v16400_v25  ;;  %v16459_v6 = vld [vmem:[#allocation10 + $0x5d0] ss:$24 sps:$4 sm:$0xff]   ;;  %v724_v7 = vld [vmem:[#allocation5] sm:$0xff]  ;;  %v16465_v12 = vld [vmem:[#allocation10 + $0xc] ss:$24 sps:$4 sm:$0xff]   ;;  %vm3150_vm3 = vcmask 1047559  }
 0x1dc   : > { %2558 = vmatprep.subr.bf16.mxu0 %v16402_v26  ;;  %v730_v9 = vld [vmem:[#allocation5 + $0x30] sm:$0xff]  ;;  %v732_v11 = vld [vmem:[#allocation5 + $0x40] sm:$0xff] }
 0x1dd   : > { %v726_v10 = vld [vmem:[#allocation5 + $0x10] sm:$0xff]  ;;  %v16460_v13 = vld [vmem:[#allocation10 + $0x600] ss:$24 sps:$4 sm:$0xff]   ;;  %v19878_v15 = vpack.c.bf16 %v730_v9, %v724_v7  ;;  %v16468_v17 = vld [vmem:[#allocation10 + $0x634] ss:$24 sps:$4 sm:$0xff]  }
 0x1de   : > { %2516 = vmatpush1.bf16.msra.mxu1 %v16404_v27  ;;  %v16463_v14 = vld [vmem:[#allocation10 + $0x8] ss:$24 sps:$4 sm:$0xff]   ;;  %v19880_v16 = vpack.c.bf16 %v732_v11, %v726_v10  ;;  %v16471_v18 = vld [vmem:[#allocation10 + $0x3c] ss:$24 sps:$4 sm:$0xff]   ;;  %v16469_v20 = vld [vmem:[#allocation10 + $0x38] ss:$24 sps:$4 sm:$0xff]  }
 0x1df   : > { %2559 = vmatpush1.bf16.msra.mxu0 %v16405_v28  ;;  %2517 = vmatprep.subr.bf16.mxu1 %v16406_v29  ;;  %v16466_v19 = vld [vmem:[#allocation10 + $0x630] ss:$24 sps:$4 sm:$0xff]   ;;  %v16474_v21 = vld [vmem:[#allocation10 + $0x664] ss:$24 sps:$4 sm:$0xff]   ;;  %v16472_v23 = vld [vmem:[#allocation10 + $0x660] ss:$24 sps:$4 sm:$0xff]  }
 0x1e0   : > { %2560 = vmatprep.subr.bf16.mxu0 %v16408_v30  ;;  %v16477_v22 = vld [vmem:[#allocation10 + $0x6c] ss:$24 sps:$4 sm:$0xff]   ;;  %v16475_v24 = vld [vmem:[#allocation10 + $0x68] ss:$24 sps:$4 sm:$0xff]   ;;  %v16483_v26 = vld [vmem:[#allocation10 + $0x9c] ss:$24 sps:$4 sm:$0xff]  }
 0x1e1   : > { %v16480_v25 = vld [vmem:[#allocation10 + $0x694] ss:$24 sps:$4 sm:$0xff]   ;;  %v16478_v27 = vld [vmem:[#allocation10 + $0x690] ss:$24 sps:$4 sm:$0xff]   ;;  %v16486_v29 = vld [vmem:[#allocation10 + $0x6c4] ss:$24 sps:$4 sm:$0xff]  }
 0x1e2   : > { %2518 = vmatpush1.bf16.msra.mxu1 %v16410_v31  ;;  %v16481_v28 = vld [vmem:[#allocation10 + $0x98] ss:$24 sps:$4 sm:$0xff]   ;;  %v16489_v30 = vld [vmem:[#allocation10 + $0xcc] ss:$24 sps:$4 sm:$0xff]   ;;  %v16511_v51 = vld [vmem:[#allocation10 + $0x188] ss:$24 sps:$4 sm:$0xff]  }
 0x1e3   : > { %2561 = vmatpush1.bf16.msra.mxu0 %v16411_v32  ;;  %2519 = vmatprep.subr.bf16.mxu1 %v16412_v33  ;;  %v16484_v31 = vld [vmem:[#allocation10 + $0x6c0] ss:$24 sps:$4 sm:$0xff]   ;;  %v16492_v33 = vld [vmem:[#allocation10 + $0x6f4] ss:$24 sps:$4 sm:$0xff]   ;;  %v16546_v10 = vld [vmem:[#allocation10 + $0x8a4] ss:$24 sps:$4 sm:$0xff]  }
 0x1e4   : > { %2562 = vmatprep.subr.bf16.mxu0 %v16414_v34  ;;  %v16487_v32 = vld [vmem:[#allocation10 + $0xc8] ss:$24 sps:$4 sm:$0xff]   ;;  %v16495_v34 = vld [vmem:[#allocation10 + $0xfc] ss:$24 sps:$4 sm:$0xff]   ;;  %v16513_v49 = vld [vmem:[#allocation10 + $0x18c] ss:$24 sps:$4 sm:$0xff]  }
 0x1e5   : > { %v16508_v50 = vld [vmem:[#allocation10 + $0x780] ss:$24 sps:$4 sm:$0xff]   ;;  %v16516_v52 = vld [vmem:[#allocation10 + $0x7b4] ss:$24 sps:$4 sm:$0xff]  }
 0x1e6   : > { %2520 = vmatpush1.bf16.msra.mxu1 %v16416_v35  ;;  %v16490_v35 = vld [vmem:[#allocation10 + $0x6f0] ss:$24 sps:$4 sm:$0xff]   ;;  %v16543_v7 = vld [vmem:[#allocation10 + $0x27c] ss:$24 sps:$4 sm:$0xff]   ;;  %v16549_v11 = vld [vmem:[#allocation10 + $0x2ac] ss:$24 sps:$4 sm:$0xff]  }
 0x1e7   : > { %2563 = vmatpush1.bf16.msra.mxu0 %v16417_v36  ;;  %2521 = vmatprep.subr.bf16.mxu1 %v16418_v37  ;;  %v16493_v36 = vld [vmem:[#allocation10 + $0xf8] ss:$24 sps:$4 sm:$0xff]   ;;  %v16498_v37 = vld [vmem:[#allocation10 + $0x724] ss:$24 sps:$4 sm:$0xff]  }
 0x1e8   : > { %2564 = vmatprep.subr.bf16.mxu0 %v16420_v38  ;;  %v16501_v38 = vld [vmem:[#allocation10 + $0x12c] ss:$24 sps:$4 sm:$0xff]   ;;  %v16541_v9 = vld [vmem:[#allocation10 + $0x278] ss:$24 sps:$4 sm:$0xff]  }
 0x1ea   : > { %2522 = vmatpush1.bf16.msra.mxu1 %v16422_v39  ;;  %v16496_v39 = vld [vmem:[#allocation10 + $0x720] ss:$24 sps:$4 sm:$0xff]  }
 0x1eb   : > { %2565 = vmatpush1.bf16.msra.mxu0 %v16423_v40  ;;  %2523 = vmatprep.subr.bf16.mxu1 %v16424_v41  ;;  %v16499_v40 = vld [vmem:[#allocation10 + $0x128] ss:$24 sps:$4 sm:$0xff]   ;;  %v16504_v41 = vld [vmem:[#allocation10 + $0x754] ss:$24 sps:$4 sm:$0xff]  }
 0x1ec   : > { %2566 = vmatprep.subr.bf16.mxu0 %v16426_v42  ;;  %v729_v42 = vld [vmem:[#allocation5 + $0x28] sm:$0xff] }
 0x1ee   : > { %2524 = vmatpush1.bf16.msra.mxu1 %v16428_v43  ;;  %v735_v43 = vld [vmem:[#allocation5 + $0x58] sm:$0xff] }
 0x1ef   : > { %2567 = vmatpush1.bf16.msra.mxu0 %v16429_v44  ;;  %2525 = vmatprep.subr.bf16.mxu1 %v16430_v45  ;;  %v16507_v44 = vld [vmem:[#allocation10 + $0x15c] ss:$24 sps:$4 sm:$0xff]   ;;  %v19885_v45 = vpack.c.bf16 %v735_v43, %v729_v42  ;;  %v16583_v42 = vld [vmem:[#allocation10 + $0xd0] ss:$24 sps:$4 sm:$0xff]  }
 0x1f0   : > { %2568 = vmatprep.subr.bf16.mxu0 %v16432_v46  ;;  %v16502_v46 = vld [vmem:[#allocation10 + $0x750] ss:$24 sps:$4 sm:$0xff]   ;;  %v16591_v43 = vld [vmem:[#allocation10 + $0x104] ss:$24 sps:$4 sm:$0xff]  }
 0x1f2   : > { %2526 = vmatpush1.bf16.msra.mxu1 %v16434_v47  ;;  %v16505_v47 = vld [vmem:[#allocation10 + $0x158] ss:$24 sps:$4 sm:$0xff]  }
 0x1f3   : > { %2569 = vmatpush1.bf16.msra.mxu0 %v16435_v48  ;;  %2527 = vmatprep.subr.bf16.mxu1 %v16436_v53  ;;  %v16510_v48 = vld [vmem:[#allocation10 + $0x784] ss:$24 sps:$4 sm:$0xff]  }
 0x1f4   : > { %2570 = vmatprep.subr.bf16.mxu0 %v16438_v56  ;;  %v16519_v53 = vld [vmem:[#allocation10 + $0x1bc] ss:$24 sps:$4 sm:$0xff]   ;;  %v16514_v56 = vld [vmem:[#allocation10 + $0x7b0] ss:$24 sps:$4 sm:$0xff]  }
 0x1f6   : > { %2528 = vmatpush1.bf16.msra.mxu1 %v16440_v57  ;;  %v16517_v57 = vld [vmem:[#allocation10 + $0x1b8] ss:$24 sps:$4 sm:$0xff]  }
 0x1f7   : > { %2571 = vmatpush1.bf16.msra.mxu0 %v16441_v58  ;;  %2529 = vmatprep.subr.bf16.mxu1 %v16442_v59  ;;  %v16522_v58 = vld [vmem:[#allocation10 + $0x7e4] ss:$24 sps:$4 sm:$0xff]  }
 0x1f8   : > { %2572 = vmatprep.subr.bf16.mxu0 %v16444_v60  ;;  %v16525_v59 = vld [vmem:[#allocation10 + $0x1ec] ss:$24 sps:$4 sm:$0xff]   ;;  %v16520_v60 = vld [vmem:[#allocation10 + $0x7e0] ss:$24 sps:$4 sm:$0xff]  }
 0x1fa   : > { %2530 = vmatpush1.bf16.msra.mxu1 %v16446_v61  ;;  %v16523_v61 = vld [vmem:[#allocation10 + $0x1e8] ss:$24 sps:$4 sm:$0xff]  }
 0x1fb   : > { %2573 = vmatpush1.bf16.msra.mxu0 %v16447_v62  ;;  %2531 = vmatprep.subr.bf16.mxu1 %v16448_v63  ;;  %v16528_v62 = vld [vmem:[#allocation10 + $0x814] ss:$24 sps:$4 sm:$0xff]  }
 0x1fc   : > { %2574 = vmatprep.subr.bf16.mxu0 %v16450_v0  ;;  %v16531_v63 = vld [vmem:[#allocation10 + $0x21c] ss:$24 sps:$4 sm:$0xff]   ;;  %v16526_v0 = vld [vmem:[#allocation10 + $0x810] ss:$24 sps:$4 sm:$0xff]  }
 0x1fe   : > { %2532 = vmatpush1.bf16.msra.mxu1 %v16452_v1  ;;  %v16529_v1 = vld [vmem:[#allocation10 + $0x218] ss:$24 sps:$4 sm:$0xff]  }
 0x1ff   : > { %2575 = vmatpush1.bf16.msra.mxu0 %v16453_v2  ;;  %2533 = vmatprep.subr.bf16.mxu1 %v16454_v3  ;;  %v16534_v2 = vld [vmem:[#allocation10 + $0x844] ss:$24 sps:$4 sm:$0xff]  }
 0x200   : > { %2576 = vmatprep.subr.bf16.mxu0 %v16456_v4  ;;  %v16537_v3 = vld [vmem:[#allocation10 + $0x24c] ss:$24 sps:$4 sm:$0xff]   ;;  %v16532_v4 = vld [vmem:[#allocation10 + $0x840] ss:$24 sps:$4 sm:$0xff]  }
 0x202   : > { %2534 = vmatpush1.bf16.msra.mxu1 %v16458_v5  ;;  %v16535_v5 = vld [vmem:[#allocation10 + $0x248] ss:$24 sps:$4 sm:$0xff]  }
 0x203   : > { %2577 = vmatpush1.bf16.msra.mxu0 %v16459_v6  ;;  %2632 = vmatprep.subr.bf16.mxu1 %v16465_v12  ;;  %v16540_v6 = vld [vmem:[#allocation10 + $0x874] ss:$24 sps:$4 sm:$0xff]   ;;  %v16544_v12 = vld [vmem:[#allocation10 + $0x8a0] ss:$24 sps:$4 sm:$0xff]  }
 0x204   : > { %2589 = vmatprep.subr.bf16.mxu0 %v16462_v8  ;;  %v16538_v8 = vld [vmem:[#allocation10 + $0x870] ss:$24 sps:$4 sm:$0xff]  }
 0x205   : > { %2536 = vmatmul.mubr.bf16.vlgmr.msra.gmra.mrb[0].mxu1 %v19878_v15 }
 0x206   : > { %2579 = vmatmul.mubr.bf16.vlgmr.msra.gmra.mrb[0].mxu0 %v19880_v16  ;;  %2633 = vmatpush1.bf16.msra.mxu1 %v16463_v14  ;;  %v16552_v14 = vld [vmem:[#allocation10 + $0x8d4] ss:$24 sps:$4 sm:$0xff]  }
 0x207   : > { %2590 = vmatpush1.bf16.msra.mxu0 %v16460_v13  ;;  %2634 = vmatprep.subr.bf16.mxu1 %v16471_v18  ;;  %v16547_v13 = vld [vmem:[#allocation10 + $0x2a8] ss:$24 sps:$4 sm:$0xff]  }
 0x208   : > { %2591 = vmatprep.subr.bf16.mxu0 %v16468_v17  ;;  %2664 = vmatprep.mubr.bf16.mxu1 %v19872_v54  ;;  %v16555_v17 = vld [vmem:[#allocation10 + $0x2dc] ss:$24 sps:$4 sm:$0xff]   ;;  %v16550_v18 = vld [vmem:[#allocation10 + $0x8d0] ss:$24 sps:$4 sm:$0xff]  }
 0x209   : > { %2621 = vmatprep.mubr.bf16.mxu0 %v19885_v45 }
 0x20a   : > { %2635 = vmatpush1.bf16.msra.mxu1 %v16469_v20  ;;  %v728_v20 = vld [vmem:[#allocation5 + $0x20] sm:$0xff] }
 0x20b   : > { %2592 = vmatpush1.bf16.msra.mxu0 %v16466_v19  ;;  %2636 = vmatprep.subr.bf16.mxu1 %v16477_v22  ;;  %v16553_v19 = vld [vmem:[#allocation10 + $0x2d8] ss:$24 sps:$4 sm:$0xff]   ;;  %v16558_v22 = vld [vmem:[#allocation10 + $0x30c] ss:$24 sps:$4 sm:$0xff]  }
 0x20c   : > { %2593 = vmatprep.subr.bf16.mxu0 %v16474_v21  ;;  %v734_v21 = vld [vmem:[#allocation5 + $0x50] sm:$0xff] }
 0x20e   : > { %2637 = vmatpush1.bf16.msra.mxu1 %v16475_v24  ;;  %v19888_v24 = vpack.c.bf16 %v734_v21, %v728_v20  ;;  %v16645_v20 = vld [vmem:[#allocation10 + $0x2b4] ss:$24 sps:$4 sm:$0xff]   ;;  %v16640_v21 = vld [vmem:[#allocation10 + $0x5a8] ss:$24 sps:$4 sm:$0xff]  }
 0x20f   : > { %2594 = vmatpush1.bf16.msra.mxu0 %v16472_v23  ;;  %2638 = vmatprep.subr.bf16.mxu1 %v16483_v26  ;;  %v16561_v23 = vld [vmem:[#allocation10 + $0x14] ss:$24 sps:$4 sm:$0xff]   ;;  %v16559_v26 = vld [vmem:[#allocation10 + $0x10] ss:$24 sps:$4 sm:$0xff]  }
 0x210   : > { %2595 = vmatprep.subr.bf16.mxu0 %v16480_v25  ;;  %v16556_v25 = vld [vmem:[#allocation10 + $0x308] ss:$24 sps:$4 sm:$0xff]  }
 0x212   : > { %2639 = vmatpush1.bf16.msra.mxu1 %v16481_v28  ;;  %v16567_v28 = vld [vmem:[#allocation10 + $0x44] ss:$24 sps:$4 sm:$0xff]  }
 0x213   : > { %2596 = vmatpush1.bf16.msra.mxu0 %v16478_v27  ;;  %2640 = vmatprep.subr.bf16.mxu1 %v16489_v30  ;;  %v16564_v27 = vld [vmem:[#allocation10 + $0x33c] ss:$24 sps:$4 sm:$0xff]   ;;  %v16565_v30 = vld [vmem:[#allocation10 + $0x40] ss:$24 sps:$4 sm:$0xff]  }
 0x214   : > { %2597 = vmatprep.subr.bf16.mxu0 %v16486_v29  ;;  %v16562_v29 = vld [vmem:[#allocation10 + $0x338] ss:$24 sps:$4 sm:$0xff]  }
 0x216   : > { %2641 = vmatpush1.bf16.msra.mxu1 %v16487_v32  ;;  %v16573_v32 = vld [vmem:[#allocation10 + $0x74] ss:$24 sps:$4 sm:$0xff]  }
 0x217   : > { %2598 = vmatpush1.bf16.msra.mxu0 %v16484_v31  ;;  %2642 = vmatprep.subr.bf16.mxu1 %v16495_v34  ;;  %v16570_v31 = vld [vmem:[#allocation10 + $0x36c] ss:$24 sps:$4 sm:$0xff]   ;;  %v16571_v34 = vld [vmem:[#allocation10 + $0x70] ss:$24 sps:$4 sm:$0xff]  }
 0x218   : > { %2599 = vmatprep.subr.bf16.mxu0 %v16492_v33  ;;  %v16568_v33 = vld [vmem:[#allocation10 + $0x368] ss:$24 sps:$4 sm:$0xff]  }
 0x21a   : > { %2643 = vmatpush1.bf16.msra.mxu1 %v16493_v36  ;;  %v16579_v36 = vld [vmem:[#allocation10 + $0xa4] ss:$24 sps:$4 sm:$0xff]  }
 0x21b   : > { %2600 = vmatpush1.bf16.msra.mxu0 %v16490_v35  ;;  %2644 = vmatprep.subr.bf16.mxu1 %v16501_v38  ;;  %v16576_v35 = vld [vmem:[#allocation10 + $0x39c] ss:$24 sps:$4 sm:$0xff]   ;;  %v16577_v38 = vld [vmem:[#allocation10 + $0xa0] ss:$24 sps:$4 sm:$0xff]  }
 0x21c   : > { %2601 = vmatprep.subr.bf16.mxu0 %v16498_v37  ;;  %v16574_v37 = vld [vmem:[#allocation10 + $0x398] ss:$24 sps:$4 sm:$0xff]  }
 0x21e   : > { %2645 = vmatpush1.bf16.msra.mxu1 %v16499_v40  ;;  %v16585_v40 = vld [vmem:[#allocation10 + $0xd4] ss:$24 sps:$4 sm:$0xff]  }
 0x21f   : > { %2602 = vmatpush1.bf16.msra.mxu0 %v16496_v39  ;;  %2646 = vmatprep.subr.bf16.mxu1 %v16507_v44  ;;  %v16582_v39 = vld [vmem:[#allocation10 + $0x3cc] ss:$24 sps:$4 sm:$0xff]   ;;  %v16586_v44 = vld [vmem:[#allocation10 + $0x3f8] ss:$24 sps:$4 sm:$0xff]  }
 0x220   : > { %2603 = vmatprep.subr.bf16.mxu0 %v16504_v41  ;;  %v16580_v41 = vld [vmem:[#allocation10 + $0x3c8] ss:$24 sps:$4 sm:$0xff]  }
 0x222   : > { %2647 = vmatpush1.bf16.msra.mxu1 %v16505_v47  ;;  %v16594_v47 = vld [vmem:[#allocation10 + $0x42c] ss:$24 sps:$4 sm:$0xff]  }
 0x223   : > { %2604 = vmatpush1.bf16.msra.mxu0 %v16502_v46  ;;  %2648 = vmatprep.subr.bf16.mxu1 %v16513_v49  ;;  %v16589_v46 = vld [vmem:[#allocation10 + $0x100] ss:$24 sps:$4 sm:$0xff]  }
 0x224   : > { %2605 = vmatprep.subr.bf16.mxu0 %v16510_v48  ;;  %v16597_v48 = vld [vmem:[#allocation10 + $0x134] ss:$24 sps:$4 sm:$0xff]   ;;  %v16592_v49 = vld [vmem:[#allocation10 + $0x428] ss:$24 sps:$4 sm:$0xff]  }
 0x226   : > { %2649 = vmatpush1.bf16.msra.mxu1 %v16511_v51  ;;  %v16600_v51 = vld [vmem:[#allocation10 + $0x45c] ss:$24 sps:$4 sm:$0xff]  }
 0x227   : > { %2606 = vmatpush1.bf16.msra.mxu0 %v16508_v50  ;;  %2650 = vmatprep.subr.bf16.mxu1 %v16519_v53  ;;  %v16595_v50 = vld [vmem:[#allocation10 + $0x130] ss:$24 sps:$4 sm:$0xff]  }
 0x228   : > { %2607 = vmatprep.subr.bf16.mxu0 %v16516_v52  ;;  %v16603_v52 = vld [vmem:[#allocation10 + $0x164] ss:$24 sps:$4 sm:$0xff]   ;;  %v16598_v53 = vld [vmem:[#allocation10 + $0x458] ss:$24 sps:$4 sm:$0xff]  }
 0x22a   : > { %2651 = vmatpush1.bf16.msra.mxu1 %v16517_v57  ;;  %v16606_v57 = vld [vmem:[#allocation10 + $0x48c] ss:$24 sps:$4 sm:$0xff]  }
 0x22b   : > { %2608 = vmatpush1.bf16.msra.mxu0 %v16514_v56  ;;  %2652 = vmatprep.subr.bf16.mxu1 %v16525_v59  ;;  %v16601_v56 = vld [vmem:[#allocation10 + $0x160] ss:$24 sps:$4 sm:$0xff]  }
 0x22c   : > { %2609 = vmatprep.subr.bf16.mxu0 %v16522_v58  ;;  %v16609_v58 = vld [vmem:[#allocation10 + $0x194] ss:$24 sps:$4 sm:$0xff]   ;;  %v16604_v59 = vld [vmem:[#allocation10 + $0x488] ss:$24 sps:$4 sm:$0xff]  }
 0x22e   : > { %2653 = vmatpush1.bf16.msra.mxu1 %v16523_v61  ;;  %v16612_v61 = vld [vmem:[#allocation10 + $0x4bc] ss:$24 sps:$4 sm:$0xff]  }
 0x22f   : > { %2610 = vmatpush1.bf16.msra.mxu0 %v16520_v60  ;;  %2654 = vmatprep.subr.bf16.mxu1 %v16531_v63  ;;  %v16607_v60 = vld [vmem:[#allocation10 + $0x190] ss:$24 sps:$4 sm:$0xff]  }
 0x230   : > { %2611 = vmatprep.subr.bf16.mxu0 %v16528_v62  ;;  %v16615_v62 = vld [vmem:[#allocation10 + $0x1c4] ss:$24 sps:$4 sm:$0xff]   ;;  %v16610_v63 = vld [vmem:[#allocation10 + $0x4b8] ss:$24 sps:$4 sm:$0xff]  }
 0x232   : > { %2655 = vmatpush1.bf16.msra.mxu1 %v16529_v1  ;;  %v16618_v1 = vld [vmem:[#allocation10 + $0x4ec] ss:$24 sps:$4 sm:$0xff]  }
 0x233   : > { %2612 = vmatpush1.bf16.msra.mxu0 %v16526_v0  ;;  %2656 = vmatprep.subr.bf16.mxu1 %v16537_v3  ;;  %v16613_v0 = vld [vmem:[#allocation10 + $0x1c0] ss:$24 sps:$4 sm:$0xff]  }
 0x234   : > { %2613 = vmatprep.subr.bf16.mxu0 %v16534_v2  ;;  %v16621_v2 = vld [vmem:[#allocation10 + $0x1f4] ss:$24 sps:$4 sm:$0xff]   ;;  %v16616_v3 = vld [vmem:[#allocation10 + $0x4e8] ss:$24 sps:$4 sm:$0xff]  }
 0x236   : > { %2657 = vmatpush1.bf16.msra.mxu1 %v16535_v5  ;;  %v16624_v5 = vld [vmem:[#allocation10 + $0x51c] ss:$24 sps:$4 sm:$0xff]  }
 0x237   : > { %2614 = vmatpush1.bf16.msra.mxu0 %v16532_v4  ;;  %2658 = vmatprep.subr.bf16.mxu1 %v16543_v7  ;;  %v16619_v4 = vld [vmem:[#allocation10 + $0x1f0] ss:$24 sps:$4 sm:$0xff]  }
 0x238   : > { %2615 = vmatprep.subr.bf16.mxu0 %v16540_v6  ;;  %v16627_v6 = vld [vmem:[#allocation10 + $0x224] ss:$24 sps:$4 sm:$0xff]   ;;  %v16622_v7 = vld [vmem:[#allocation10 + $0x518] ss:$24 sps:$4 sm:$0xff]  }
 0x23a   : > { %2659 = vmatpush1.bf16.msra.mxu1 %v16541_v9  ;;  %v16630_v9 = vld [vmem:[#allocation10 + $0x54c] ss:$24 sps:$4 sm:$0xff]  }
 0x23b   : > { %2616 = vmatpush1.bf16.msra.mxu0 %v16538_v8  ;;  %2660 = vmatprep.subr.bf16.mxu1 %v16549_v11  ;;  %v16625_v8 = vld [vmem:[#allocation10 + $0x220] ss:$24 sps:$4 sm:$0xff]  }
 0x23c   : > { %2617 = vmatprep.subr.bf16.mxu0 %v16546_v10  ;;  %v16633_v10 = vld [vmem:[#allocation10 + $0x254] ss:$24 sps:$4 sm:$0xff]   ;;  %v16628_v11 = vld [vmem:[#allocation10 + $0x548] ss:$24 sps:$4 sm:$0xff]  }
 0x23e   : > { %2661 = vmatpush1.bf16.msra.mxu1 %v16547_v13  ;;  %v16636_v13 = vld [vmem:[#allocation10 + $0x57c] ss:$24 sps:$4 sm:$0xff]  }
 0x23f   : > { %2618 = vmatpush1.bf16.msra.mxu0 %v16544_v12  ;;  %2662 = vmatprep.subr.bf16.mxu1 %v16555_v17  ;;  %v16631_v12 = vld [vmem:[#allocation10 + $0x250] ss:$24 sps:$4 sm:$0xff]  }
 0x240   : > { %2619 = vmatprep.subr.bf16.mxu0 %v16552_v14  ;;  %v16639_v14 = vld [vmem:[#allocation10 + $0x284] ss:$24 sps:$4 sm:$0xff]   ;;  %v16634_v17 = vld [vmem:[#allocation10 + $0x578] ss:$24 sps:$4 sm:$0xff]  }
 0x242   : > { %2663 = vmatpush1.bf16.msra.mxu1 %v16553_v19  ;;  %v16642_v19 = vld [vmem:[#allocation10 + $0x5ac] ss:$24 sps:$4 sm:$0xff]  }
 0x243   : > { %2620 = vmatpush1.bf16.msra.mxu0 %v16550_v18  ;;  %2675 = vmatprep.subr.bf16.mxu1 %v16558_v22  ;;  %v16637_v18 = vld [vmem:[#allocation10 + $0x280] ss:$24 sps:$4 sm:$0xff]   ;;  %v16643_v22 = vld [vmem:[#allocation10 + $0x2b0] ss:$24 sps:$4 sm:$0xff]  }
 0x244   : > { %2761 = vmatprep.subr.bf16.mxu0 %v16561_v23  ;;  %v16648_v23 = vld [vmem:[#allocation10 + $0x5dc] ss:$24 sps:$4 sm:$0xff]  }
 0x245   : > { %2665 = vmatmul.mubr.bf16.vlgmr.msra.gmra.mrb[4].mxu1 %v19878_v15 }
 0x246   : > { %2622 = vmatmul.mubr.bf16.vlgmr.msra.gmra.mrb[0].mxu0 %v19888_v24  ;;  %2676 = vmatpush1.bf16.msra.mxu1 %v16556_v25  ;;  %v16651_v25 = vld [vmem:[#allocation10 + $0x2e4] ss:$24 sps:$4 sm:$0xff]  }
 0x247   : > { %2762 = vmatpush1.bf16.msra.mxu0 %v16559_v26  ;;  %2677 = vmatprep.subr.bf16.mxu1 %v16564_v27  ;;  %v16646_v26 = vld [vmem:[#allocation10 + $0x5d8] ss:$24 sps:$4 sm:$0xff]  }
 0x248   : > { %2763 = vmatprep.subr.bf16.mxu0 %v16567_v28  ;;  %2707 = vmatprep.mubr.bf16.mxu1 %v19874_v55  ;;  %v16649_v27 = vld [vmem:[#allocation10 + $0x2e0] ss:$24 sps:$4 sm:$0xff]   ;;  %v16654_v28 = vld [vmem:[#allocation10 + $0x60c] ss:$24 sps:$4 sm:$0xff]  }
 0x249   : > { %2793 = vmatprep.mubr.bf16.mxu0 %v19872_v54  ;;  %v16588_v54 = vld [vmem:[#allocation10 + $0x3fc] ss:$24 sps:$4 sm:$0xff]  }
 0x24a   : > { %2678 = vmatpush1.bf16.msra.mxu1 %v16562_v29  ;;  %v16657_v29 = vld [vmem:[#allocation10 + $0x314] ss:$24 sps:$4 sm:$0xff]  }
 0x24b   : > { %2764 = vmatpush1.bf16.msra.mxu0 %v16565_v30  ;;  %2679 = vmatprep.subr.bf16.mxu1 %v16570_v31  ;;  %v16652_v30 = vld [vmem:[#allocation10 + $0x608] ss:$24 sps:$4 sm:$0xff]  }
 0x24c   : > { %2765 = vmatprep.subr.bf16.mxu0 %v16573_v32  ;;  %v16655_v31 = vld [vmem:[#allocation10 + $0x310] ss:$24 sps:$4 sm:$0xff]   ;;  %v16660_v32 = vld [vmem:[#allocation10 + $0x63c] ss:$24 sps:$4 sm:$0xff]  }
 0x24e   : > { %2680 = vmatpush1.bf16.msra.mxu1 %v16568_v33  ;;  %v16663_v33 = vld [vmem:[#allocation10 + $0x344] ss:$24 sps:$4 sm:$0xff]  }
 0x24f   : > { %2766 = vmatpush1.bf16.msra.mxu0 %v16571_v34  ;;  %2681 = vmatprep.subr.bf16.mxu1 %v16576_v35  ;;  %v16658_v34 = vld [vmem:[#allocation10 + $0x638] ss:$24 sps:$4 sm:$0xff]  }
 0x250   : > { %2767 = vmatprep.subr.bf16.mxu0 %v16579_v36  ;;  %v16661_v35 = vld [vmem:[#allocation10 + $0x340] ss:$24 sps:$4 sm:$0xff]   ;;  %v16666_v36 = vld [vmem:[#allocation10 + $0x66c] ss:$24 sps:$4 sm:$0xff]  }
 0x252   : > { %2682 = vmatpush1.bf16.msra.mxu1 %v16574_v37  ;;  %v16669_v37 = vld [vmem:[#allocation10 + $0x374] ss:$24 sps:$4 sm:$0xff]  }
 0x253   : > { %2768 = vmatpush1.bf16.msra.mxu0 %v16577_v38  ;;  %2683 = vmatprep.subr.bf16.mxu1 %v16582_v39  ;;  %v16664_v38 = vld [vmem:[#allocation10 + $0x668] ss:$24 sps:$4 sm:$0xff]  }
 0x254   : > { %2769 = vmatprep.subr.bf16.mxu0 %v16585_v40  ;;  %v16667_v39 = vld [vmem:[#allocation10 + $0x370] ss:$24 sps:$4 sm:$0xff]   ;;  %v16672_v40 = vld [vmem:[#allocation10 + $0x69c] ss:$24 sps:$4 sm:$0xff]  }
 0x256   : > { %2684 = vmatpush1.bf16.msra.mxu1 %v16580_v41  ;;  %v16670_v41 = vld [vmem:[#allocation10 + $0x698] ss:$24 sps:$4 sm:$0xff]  }
 0x257   : > { %2770 = vmatpush1.bf16.msra.mxu0 %v16583_v42  ;;  %2685 = vmatprep.subr.bf16.mxu1 %v16588_v54  ;;  %v16673_v42 = vld [vmem:[#allocation10 + $0x3a0] ss:$24 sps:$4 sm:$0xff]   ;;  %v16678_v54 = vld [vmem:[#allocation10 + $0x6cc] ss:$24 sps:$4 sm:$0xff]  }
 0x258   : > { %2771 = vmatprep.subr.bf16.mxu0 %v16591_v43  ;;  %v16681_v43 = vld [vmem:[#allocation10 + $0x3d4] ss:$24 sps:$4 sm:$0xff]  }
 0x25a   : > { %2686 = vmatpush1.bf16.msra.mxu1 %v16586_v44  ;;  %v16676_v44 = vld [vmem:[#allocation10 + $0x6c8] ss:$24 sps:$4 sm:$0xff]  }
 0x25b   : > { %2772 = vmatpush1.bf16.msra.mxu0 %v16589_v46  ;;  %2687 = vmatprep.subr.bf16.mxu1 %v16594_v47  ;;  %v16684_v46 = vld [vmem:[#allocation10 + $0x6fc] ss:$24 sps:$4 sm:$0xff]  }
 0x25c   : > { %2773 = vmatprep.subr.bf16.mxu0 %v16597_v48  ;;  %v16687_v47 = vld [vmem:[#allocation10 + $0x404] ss:$24 sps:$4 sm:$0xff]   ;;  %v16682_v48 = vld [vmem:[#allocation10 + $0x6f8] ss:$24 sps:$4 sm:$0xff]  }
 0x25e   : > { %2688 = vmatpush1.bf16.msra.mxu1 %v16592_v49  ;;  %v16685_v49 = vld [vmem:[#allocation10 + $0x400] ss:$24 sps:$4 sm:$0xff]  }
 0x25f   : > { %2774 = vmatpush1.bf16.msra.mxu0 %v16595_v50  ;;  %2689 = vmatprep.subr.bf16.mxu1 %v16600_v51  ;;  %v16690_v50 = vld [vmem:[#allocation10 + $0x72c] ss:$24 sps:$4 sm:$0xff]  }
 0x260   : > { %2775 = vmatprep.subr.bf16.mxu0 %v16603_v52  ;;  %v16693_v51 = vld [vmem:[#allocation10 + $0x434] ss:$24 sps:$4 sm:$0xff]   ;;  %v16688_v52 = vld [vmem:[#allocation10 + $0x728] ss:$24 sps:$4 sm:$0xff]  }
 0x262   : > { %2690 = vmatpush1.bf16.msra.mxu1 %v16598_v53  ;;  %v16691_v53 = vld [vmem:[#allocation10 + $0x430] ss:$24 sps:$4 sm:$0xff]  }
 0x263   : > { %2776 = vmatpush1.bf16.msra.mxu0 %v16601_v56  ;;  %2691 = vmatprep.subr.bf16.mxu1 %v16606_v57  ;;  %v16696_v56 = vld [vmem:[#allocation10 + $0x75c] ss:$24 sps:$4 sm:$0xff]  }
 0x264   : > { %2777 = vmatprep.subr.bf16.mxu0 %v16609_v58  ;;  %v16699_v57 = vld [vmem:[#allocation10 + $0x464] ss:$24 sps:$4 sm:$0xff]   ;;  %v16694_v58 = vld [vmem:[#allocation10 + $0x758] ss:$24 sps:$4 sm:$0xff]  }
 0x266   : > { %2692 = vmatpush1.bf16.msra.mxu1 %v16604_v59  ;;  %v16697_v59 = vld [vmem:[#allocation10 + $0x460] ss:$24 sps:$4 sm:$0xff]  }
 0x267   : > { %2778 = vmatpush1.bf16.msra.mxu0 %v16607_v60  ;;  %2693 = vmatprep.subr.bf16.mxu1 %v16612_v61  ;;  %v16702_v60 = vld [vmem:[#allocation10 + $0x78c] ss:$24 sps:$4 sm:$0xff]  }
 0x268   : > { %2779 = vmatprep.subr.bf16.mxu0 %v16615_v62  ;;  %v16705_v61 = vld [vmem:[#allocation10 + $0x494] ss:$24 sps:$4 sm:$0xff]   ;;  %v16700_v62 = vld [vmem:[#allocation10 + $0x788] ss:$24 sps:$4 sm:$0xff]  }
 0x26a   : > { %2694 = vmatpush1.bf16.msra.mxu1 %v16610_v63  ;;  %v16703_v63 = vld [vmem:[#allocation10 + $0x490] ss:$24 sps:$4 sm:$0xff]  }
 0x26b   : > { %2780 = vmatpush1.bf16.msra.mxu0 %v16613_v0  ;;  %2695 = vmatprep.subr.bf16.mxu1 %v16618_v1  ;;  %v16708_v0 = vld [vmem:[#allocation10 + $0x7bc] ss:$24 sps:$4 sm:$0xff]  }
 0x26c   : > { %2781 = vmatprep.subr.bf16.mxu0 %v16621_v2  ;;  %v16711_v1 = vld [vmem:[#allocation10 + $0x4c4] ss:$24 sps:$4 sm:$0xff]   ;;  %v16706_v2 = vld [vmem:[#allocation10 + $0x7b8] ss:$24 sps:$4 sm:$0xff]  }
 0x26e   : > { %2696 = vmatpush1.bf16.msra.mxu1 %v16616_v3  ;;  %v16709_v3 = vld [vmem:[#allocation10 + $0x4c0] ss:$24 sps:$4 sm:$0xff]  }
 0x26f   : > { %2782 = vmatpush1.bf16.msra.mxu0 %v16619_v4  ;;  %2697 = vmatprep.subr.bf16.mxu1 %v16624_v5  ;;  %v16714_v4 = vld [vmem:[#allocation10 + $0x7ec] ss:$24 sps:$4 sm:$0xff]  }
 0x270   : > { %2783 = vmatprep.subr.bf16.mxu0 %v16627_v6  ;;  %v16717_v5 = vld [vmem:[#allocation10 + $0x4f4] ss:$24 sps:$4 sm:$0xff]   ;;  %v16712_v6 = vld [vmem:[#allocation10 + $0x7e8] ss:$24 sps:$4 sm:$0xff]  }
 0x272   : > { %2698 = vmatpush1.bf16.msra.mxu1 %v16622_v7  ;;  %v16715_v7 = vld [vmem:[#allocation10 + $0x4f0] ss:$24 sps:$4 sm:$0xff]  }
 0x273   : > { %2784 = vmatpush1.bf16.msra.mxu0 %v16625_v8  ;;  %2699 = vmatprep.subr.bf16.mxu1 %v16630_v9  ;;  %v16720_v8 = vld [vmem:[#allocation10 + $0x81c] ss:$24 sps:$4 sm:$0xff]  }
 0x274   : > { %2785 = vmatprep.subr.bf16.mxu0 %v16633_v10  ;;  %v16723_v9 = vld [vmem:[#allocation10 + $0x524] ss:$24 sps:$4 sm:$0xff]   ;;  %v16718_v10 = vld [vmem:[#allocation10 + $0x818] ss:$24 sps:$4 sm:$0xff]  }
 0x276   : > { %2700 = vmatpush1.bf16.msra.mxu1 %v16628_v11  ;;  %v16721_v11 = vld [vmem:[#allocation10 + $0x520] ss:$24 sps:$4 sm:$0xff]  }
 0x277   : > { %2786 = vmatpush1.bf16.msra.mxu0 %v16631_v12  ;;  %2701 = vmatprep.subr.bf16.mxu1 %v16636_v13  ;;  %v16726_v12 = vld [vmem:[#allocation10 + $0x84c] ss:$24 sps:$4 sm:$0xff]  }
 0x278   : > { %2787 = vmatprep.subr.bf16.mxu0 %v16639_v14  ;;  %v16729_v13 = vld [vmem:[#allocation10 + $0x554] ss:$24 sps:$4 sm:$0xff]   ;;  %v16724_v14 = vld [vmem:[#allocation10 + $0x848] ss:$24 sps:$4 sm:$0xff]  }
 0x27a   : > { %2702 = vmatpush1.bf16.msra.mxu1 %v16634_v17  ;;  %v16727_v17 = vld [vmem:[#allocation10 + $0x550] ss:$24 sps:$4 sm:$0xff]  }
 0x27b   : > { %2788 = vmatpush1.bf16.msra.mxu0 %v16637_v18  ;;  %2703 = vmatprep.subr.bf16.mxu1 %v16642_v19  ;;  %v16732_v18 = vld [vmem:[#allocation10 + $0x87c] ss:$24 sps:$4 sm:$0xff]  }
 0x27c   : > { %2789 = vmatprep.subr.bf16.mxu0 %v16645_v20  ;;  %v16735_v19 = vld [vmem:[#allocation10 + $0x584] ss:$24 sps:$4 sm:$0xff]   ;;  %v16730_v20 = vld [vmem:[#allocation10 + $0x878] ss:$24 sps:$4 sm:$0xff]  }
 0x27e   : > { %2704 = vmatpush1.bf16.msra.mxu1 %v16640_v21  ;;  %v16733_v21 = vld [vmem:[#allocation10 + $0x580] ss:$24 sps:$4 sm:$0xff]  }
 0x27f   : > { %2790 = vmatpush1.bf16.msra.mxu0 %v16643_v22  ;;  %2705 = vmatprep.subr.bf16.mxu1 %v16648_v23  ;;  %v16738_v22 = vld [vmem:[#allocation10 + $0x8ac] ss:$24 sps:$4 sm:$0xff]  }
 0x280   : > { %2791 = vmatprep.subr.bf16.mxu0 %v16651_v25  ;;  %v16741_v23 = vld [vmem:[#allocation10 + $0x5b4] ss:$24 sps:$4 sm:$0xff]   ;;  %v16736_v25 = vld [vmem:[#allocation10 + $0x8a8] ss:$24 sps:$4 sm:$0xff]  }
 0x282   : > { %2706 = vmatpush1.bf16.msra.mxu1 %v16646_v26  ;;  %v16739_v26 = vld [vmem:[#allocation10 + $0x5b0] ss:$24 sps:$4 sm:$0xff]  }
 0x283   : > { %2792 = vmatpush1.bf16.msra.mxu0 %v16649_v27  ;;  %2718 = vmatprep.subr.bf16.mxu1 %v16654_v28  ;;  %v16744_v27 = vld [vmem:[#allocation10 + $0x8dc] ss:$24 sps:$4 sm:$0xff]  }
 0x284   : > { %2804 = vmatprep.subr.bf16.mxu0 %v16657_v29  ;;  %v16747_v28 = vld [vmem:[#allocation10 + $0x5e4] ss:$24 sps:$4 sm:$0xff]   ;;  %v16742_v29 = vld [vmem:[#allocation10 + $0x8d8] ss:$24 sps:$4 sm:$0xff]  }
 0x285   : > { %2708 = vmatmul.mubr.bf16.vlgmr.msra.gmra.mrb[4].mxu1 %v19880_v16 }
 0x286   : > { %2794 = vmatmul.mubr.bf16.vlgmr.msra.gmra.mrb[4].mxu0 %v19878_v15  ;;  %2719 = vmatpush1.bf16.msra.mxu1 %v16652_v30  ;;  %v16675_v15 = vld [vmem:[#allocation10 + $0x3a4] ss:$24 sps:$4 sm:$0xff]   ;;  %v16745_v30 = vld [vmem:[#allocation10 + $0x5e0] ss:$24 sps:$4 sm:$0xff]  }
 0x287   : > { %2805 = vmatpush1.bf16.msra.mxu0 %v16655_v31  ;;  %2720 = vmatprep.subr.bf16.mxu1 %v16660_v32  ;;  %v16750_v31 = vld [vmem:[#allocation10 + $0x614] ss:$24 sps:$4 sm:$0xff]   ;;  %v16748_v32 = vld [vmem:[#allocation10 + $0x610] ss:$24 sps:$4 sm:$0xff]  }
 0x288   : > { %2806 = vmatprep.subr.bf16.mxu0 %v16663_v33  ;;  %2750 = vmatprep.mubr.bf16.mxu1 %v19885_v45  ;;  %v16753_v33 = vld [vmem:[#allocation10 + $0x644] ss:$24 sps:$4 sm:$0xff]  }
 0x289   : > { %2836 = vmatprep.mubr.bf16.mxu0 %v19874_v55  ;;  %v16679_v55 = vld [vmem:[#allocation10 + $0x3d0] ss:$24 sps:$4 sm:$0xff]  }
 0x28a   : > { %2721 = vmatpush1.bf16.msra.mxu1 %v16658_v34  ;;  %v16751_v34 = vld [vmem:[#allocation10 + $0x640] ss:$24 sps:$4 sm:$0xff]  }
 0x28b   : > { %2807 = vmatpush1.bf16.msra.mxu0 %v16661_v35  ;;  %2722 = vmatprep.subr.bf16.mxu1 %v16666_v36  ;;  %v16756_v35 = vld [vmem:[#allocation10 + $0x674] ss:$24 sps:$4 sm:$0xff]   ;;  %v16754_v36 = vld [vmem:[#allocation10 + $0x670] ss:$24 sps:$4 sm:$0xff]  }
 0x28c   : > { %2808 = vmatprep.subr.bf16.mxu0 %v16669_v37  ;;  %v16759_v37 = vld [vmem:[#allocation10 + $0x6a4] ss:$24 sps:$4 sm:$0xff]  }
 0x28e   : > { %2723 = vmatpush1.bf16.msra.mxu1 %v16664_v38  ;;  %v16757_v38 = vld [vmem:[#allocation10 + $0x6a0] ss:$24 sps:$4 sm:$0xff]  }
 0x28f   : > { %2809 = vmatpush1.bf16.msra.mxu0 %v16667_v39  ;;  %2724 = vmatprep.subr.bf16.mxu1 %v16672_v40  ;;  %v16762_v39 = vld [vmem:[#allocation10 + $0x6d4] ss:$24 sps:$4 sm:$0xff]   ;;  %v16760_v40 = vld [vmem:[#allocation10 + $0x6d0] ss:$24 sps:$4 sm:$0xff]  }
 0x290   : > { %2810 = vmatprep.subr.bf16.mxu0 %v16675_v15  ;;  %v16765_v15 = vld [vmem:[#allocation10 + $0x704] ss:$24 sps:$4 sm:$0xff]  }
 0x292   : > { %2725 = vmatpush1.bf16.msra.mxu1 %v16670_v41  ;;  %v16768_v41 = vld [vmem:[#allocation10 + $0x734] ss:$24 sps:$4 sm:$0xff]  }
 0x293   : > { %2811 = vmatpush1.bf16.msra.mxu0 %v16673_v42  ;;  %2726 = vmatprep.subr.bf16.mxu1 %v16678_v54  ;;  %v16766_v54 = vld [vmem:[#allocation10 + $0x730] ss:$24 sps:$4 sm:$0xff]  }
 0x294   : > { %2812 = vmatprep.subr.bf16.mxu0 %v16681_v43 }
 0x296   : > { %2727 = vmatpush1.bf16.msra.mxu1 %v16676_v44  ;;  %v16771_v44 = vld [vmem:[#allocation10 + $0x764] ss:$24 sps:$4 sm:$0xff]  }
 0x297   : > { %2813 = vmatpush1.bf16.msra.mxu0 %v16679_v55  ;;  %2728 = vmatprep.subr.bf16.mxu1 %v16684_v46  ;;  %v16769_v46 = vld [vmem:[#allocation10 + $0x760] ss:$24 sps:$4 sm:$0xff]  }
 0x298   : > { %2814 = vmatprep.subr.bf16.mxu0 %v16687_v47  ;;  %v16774_v47 = vld [vmem:[#allocation10 + $0x794] ss:$24 sps:$4 sm:$0xff]  }
 0x29a   : > { %2729 = vmatpush1.bf16.msra.mxu1 %v16682_v48  ;;  %v16772_v48 = vld [vmem:[#allocation10 + $0x790] ss:$24 sps:$4 sm:$0xff]  }
 0x29b   : > { %2815 = vmatpush1.bf16.msra.mxu0 %v16685_v49  ;;  %2730 = vmatprep.subr.bf16.mxu1 %v16690_v50  ;;  %v16777_v49 = vld [vmem:[#allocation10 + $0x7c4] ss:$24 sps:$4 sm:$0xff]   ;;  %v16775_v50 = vld [vmem:[#allocation10 + $0x7c0] ss:$24 sps:$4 sm:$0xff]  }
 0x29c   : > { %2816 = vmatprep.subr.bf16.mxu0 %v16693_v51  ;;  %v16780_v51 = vld [vmem:[#allocation10 + $0x7f4] ss:$24 sps:$4 sm:$0xff]  }
 0x29e   : > { %2731 = vmatpush1.bf16.msra.mxu1 %v16688_v52  ;;  %v16778_v52 = vld [vmem:[#allocation10 + $0x7f0] ss:$24 sps:$4 sm:$0xff]  }
 0x29f   : > { %2817 = vmatpush1.bf16.msra.mxu0 %v16691_v53  ;;  %2732 = vmatprep.subr.bf16.mxu1 %v16696_v56  ;;  %v16783_v53 = vld [vmem:[#allocation10 + $0x824] ss:$24 sps:$4 sm:$0xff]   ;;  %v16781_v56 = vld [vmem:[#allocation10 + $0x820] ss:$24 sps:$4 sm:$0xff]  }
 0x2a0   : > { %2818 = vmatprep.subr.bf16.mxu0 %v16699_v57  ;;  %v16786_v57 = vld [vmem:[#allocation10 + $0x854] ss:$24 sps:$4 sm:$0xff]  }
 0x2a2   : > { %2733 = vmatpush1.bf16.msra.mxu1 %v16694_v58  ;;  %v16784_v58 = vld [vmem:[#allocation10 + $0x850] ss:$24 sps:$4 sm:$0xff]  }
 0x2a3   : > { %2819 = vmatpush1.bf16.msra.mxu0 %v16697_v59  ;;  %2734 = vmatprep.subr.bf16.mxu1 %v16702_v60  ;;  %v16789_v59 = vld [vmem:[#allocation10 + $0x884] ss:$24 sps:$4 sm:$0xff]   ;;  %v16787_v60 = vld [vmem:[#allocation10 + $0x880] ss:$24 sps:$4 sm:$0xff]  }
 0x2a4   : > { %2820 = vmatprep.subr.bf16.mxu0 %v16705_v61  ;;  %v16792_v61 = vld [vmem:[#allocation10 + $0x8b4] ss:$24 sps:$4 sm:$0xff]  }
 0x2a6   : > { %2735 = vmatpush1.bf16.msra.mxu1 %v16700_v62  ;;  %v16790_v62 = vld [vmem:[#allocation10 + $0x8b0] ss:$24 sps:$4 sm:$0xff]  }
 0x2a7   : > { %2821 = vmatpush1.bf16.msra.mxu0 %v16703_v63  ;;  %2736 = vmatprep.subr.bf16.mxu1 %v16708_v0  ;;  %v16795_v63 = vld [vmem:[#allocation10 + $0x8e4] ss:$24 sps:$4 sm:$0xff]   ;;  %v16793_v0 = vld [vmem:[#allocation10 + $0x8e0] ss:$24 sps:$4 sm:$0xff]  }
 0x2a8   : > { %2822 = vmatprep.subr.bf16.mxu0 %v16711_v1  ;;  %v1033_v1 = vlaneseq }
 0x2aa   : > { %2737 = vmatpush1.bf16.msra.mxu1 %v16706_v2  ;;  %v19902_v2 = vshrl.u32 %v1033_v1, 7 }
 0x2ab   : > { %2823 = vmatpush1.bf16.msra.mxu0 %v16709_v3  ;;  %2738 = vmatprep.subr.bf16.mxu1 %v16714_v4  ;;  %v19905_v4 = vld [vmem:[#allocation11] sm:$0x3f] }
 0x2ac   : > { %2824 = vmatprep.subr.bf16.mxu0 %v16717_v5  ;;  %v1035_v3 = vsub.s32 0, %v19902_v2  ;;  %v1039_v5 = vsub.s32 1, %v19902_v2 }
 0x2ae   : > { %2739 = vmatpush1.bf16.msra.mxu1 %v16712_v6  ;;  %v1036_v6 = vrot.slane %v19905_v4, %v1035_v3 }
 0x2af   : > { %2825 = vmatpush1.bf16.msra.mxu0 %v16715_v7  ;;  %2740 = vmatprep.subr.bf16.mxu1 %v16720_v8  ;;  %v1040_v7 = vrot.slane %v19905_v4, %v1039_v5 }
 0x2b0   : > { %2826 = vmatprep.subr.bf16.mxu0 %v16723_v9 }
 0x2b2   : > { %2741 = vmatpush1.bf16.msra.mxu1 %v16718_v10 }
 0x2b3   : > { %2827 = vmatpush1.bf16.msra.mxu0 %v16721_v11  ;;  %2742 = vmatprep.subr.bf16.mxu1 %v16726_v12 }
 0x2b4   : > { %2828 = vmatprep.subr.bf16.mxu0 %v16729_v13 }
 0x2b6   : > { %2743 = vmatpush1.bf16.msra.mxu1 %v16724_v14 }
 0x2b7   : > { %2829 = vmatpush1.bf16.msra.mxu0 %v16727_v17  ;;  %2744 = vmatprep.subr.bf16.mxu1 %v16732_v18 }
 0x2b8   : > { %2830 = vmatprep.subr.bf16.mxu0 %v16735_v19 }
 0x2ba   : > { %2745 = vmatpush1.bf16.msra.mxu1 %v16730_v20 }
 0x2bb   : > { %2831 = vmatpush1.bf16.msra.mxu0 %v16733_v21  ;;  %2746 = vmatprep.subr.bf16.mxu1 %v16738_v22  ;;  %v1025_v21 = vld [vmem:[#allocation13] sm:$0x3f] }
 0x2bc   : > { %2832 = vmatprep.subr.bf16.mxu0 %v16741_v23  ;;  %v2906_v22 = vrot.slane %v1025_v21, %v1035_v3  ;;  %v2910_v23 = vrot.slane %v1025_v21, %v1039_v5 }
 0x2be   : > { %2747 = vmatpush1.bf16.msra.mxu1 %v16736_v25 }
 0x2bf   : > { %2833 = vmatpush1.bf16.msra.mxu0 %v16739_v26  ;;  %2748 = vmatprep.subr.bf16.mxu1 %v16744_v27 }
 0x2c0   : > { %2834 = vmatprep.subr.bf16.mxu0 %v16747_v28 }
 0x2c2   : > { %2749 = vmatpush1.bf16.msra.mxu1 %v16742_v29 }
 0x2c3   : > { %2835 = vmatpush1.bf16.msra.mxu0 %v16745_v30 }
 0x2c4   : > { %2847 = vmatprep.subr.bf16.mxu0 %v16750_v31 }
 0x2c5   : > { %2751 = vmatmul.mubr.bf16.vlgmr.msra.gmra.mrb[4].mxu1 %v19888_v24 }
 0x2c6   : > { %2837 = vmatmul.mubr.bf16.vlgmr.msra.gmra.mrb[4].mxu0 %v19880_v16  ;;  %v16763_v16 = vld [vmem:[#allocation10 + $0x700] ss:$24 sps:$4 sm:$0xff]  }
 0x2c7   : > { %2848 = vmatpush1.bf16.msra.mxu0 %v16748_v32  ;;  %2879 = vmatprep.mubr.bf16.mxu0 %v19885_v45 }
 0x2c8   : > { %2849 = vmatprep.subr.bf16.mxu0 %v16753_v33 }
 0x2cb   : > { %2850 = vmatpush1.bf16.msra.mxu0 %v16751_v34 }
 0x2cc   : > { %2851 = vmatprep.subr.bf16.mxu0 %v16756_v35  ;;  %v1043_v35 = vsub.s32 2, %v19902_v2 }
 0x2cf   : > { %2852 = vmatpush1.bf16.msra.mxu0 %v16754_v36  ;;  %v1047_v36 = vsub.s32 3, %v19902_v2 }
 0x2d0   : > { %2853 = vmatprep.subr.bf16.mxu0 %v16759_v37  ;;  %v1044_v37 = vrot.slane %v19905_v4, %v1043_v35 }
 0x2d3   : > { %2854 = vmatpush1.bf16.msra.mxu0 %v16757_v38  ;;  %v1048_v38 = vrot.slane %v19905_v4, %v1047_v36 }
 0x2d4   : > { %2855 = vmatprep.subr.bf16.mxu0 %v16762_v39 }
 0x2d7   : > { %2856 = vmatpush1.bf16.msra.mxu0 %v16760_v40 }
 0x2d8   : > { %2857 = vmatprep.subr.bf16.mxu0 %v16765_v15  ;;  %v2537_v42 = vpop.f32.mrb[0].mxu1 }
 0x2d9   : > { %v2539_v45 = vpop.f32.mrb[1].mxu1  ;;  %v2538_v8 = vadd.f32 %v2537_v42, %v1036_v6 }
 0x2da   : > { %v2541_v43 = vpop.f32.mrb[2].mxu1  ;;  %v2540_v9 = vadd.f32 %v2539_v45, %v1040_v7 }
 0x2db   : > { %2858 = vmatpush1.bf16.msra.mxu0 %v16763_v16  ;;  %v2543_v55 = vpop.f32.mrb[3].mxu1  ;;  %v2542_v11 = vadd.f32 %v2541_v43, %v1036_v6  ;;  %v2914_v43 = vrot.slane %v1025_v21, %v1043_v35 }
 0x2dc   : > { %2859 = vmatprep.subr.bf16.mxu0 %v16768_v41 }
 0x2df   : > { %2860 = vmatpush1.bf16.msra.mxu0 %v16766_v54 }
 0x2e0   : > { %2861 = vmatprep.subr.bf16.mxu0 %v16771_v44  ;;  %v2918_v44 = vrot.slane %v1025_v21, %v1047_v36 }
 0x2e3   : > { %2862 = vmatpush1.bf16.msra.mxu0 %v16769_v46 }
 0x2e4   : > { %2863 = vmatprep.subr.bf16.mxu0 %v16774_v47 }
 0x2e7   : > { %2864 = vmatpush1.bf16.msra.mxu0 %v16772_v48 }
 0x2e8   : > { %2865 = vmatprep.subr.bf16.mxu0 %v16777_v49 }
 0x2eb   : > { %2866 = vmatpush1.bf16.msra.mxu0 %v16775_v50 }
 0x2ec   : > { %2867 = vmatprep.subr.bf16.mxu0 %v16780_v51 }
 0x2ef   : > { %2868 = vmatpush1.bf16.msra.mxu0 %v16778_v52 }
 0x2f0   : > { %2869 = vmatprep.subr.bf16.mxu0 %v16783_v53 }
 0x2f3   : > { %2870 = vmatpush1.bf16.msra.mxu0 %v16781_v56 }
 0x2f4   : > { %2871 = vmatprep.subr.bf16.mxu0 %v16786_v57 }
 0x2f7   : > { %2872 = vmatpush1.bf16.msra.mxu0 %v16784_v58 }
 0x2f8   : > { %2873 = vmatprep.subr.bf16.mxu0 %v16789_v59  ;;  %v1051_v59 = vsub.s32 4, %v19902_v2 }
 0x2fb   : > { %2874 = vmatpush1.bf16.msra.mxu0 %v16787_v60  ;;  %v1055_v60 = vsub.s32 5, %v19902_v2 }
 0x2fc   : > { %2875 = vmatprep.subr.bf16.mxu0 %v16792_v61  ;;  %v1052_v61 = vrot.slane %v19905_v4, %v1051_v59 }
 0x2ff   : > { %2876 = vmatpush1.bf16.msra.mxu0 %v16790_v62  ;;  %v1056_v62 = vrot.slane %v19905_v4, %v1055_v60 }
 0x300   : > { %2877 = vmatprep.subr.bf16.mxu0 %v16795_v63 }
 0x303   : > { %2878 = vmatpush1.bf16.msra.mxu0 %v16793_v0 }
 0x306   : > { %2880 = vmatmul.mubr.bf16.vlgmr.msra.gmra.mrb[4].mxu0 %v19888_v24  ;;  %v2544_v24 = vadd.f32 %v2543_v55, %v1040_v7 }
 0x319   : > { %v2623_v10 = vpop.f32.mrb[0].mxu0 }
 0x31a   : > { %v15995_v12 = vadd.f32 %v2623_v10, %v2538_v8  ;;  %v2625_v13 = vpop.f32.mrb[1].mxu0  ;;  %v2926_v10 = vrot.slane %v1025_v21, %v1055_v60  ;;  %v16830_v60 = vld [vmem:[#allocation5 + $0x40] sm:$0xff] }
 0x31b   : > { %v15997_v14 = vadd.f32 %v2625_v13, %v2540_v9  ;;  %v2627_v17 = vpop.f32.mrb[2].mxu0  ;;  %v2922_v9 = vrot.slane %v1025_v21, %v1051_v59 }
 0x31c   : > { %16796 = vtanh.f32 %v15995_v12  ;;  %v15999_v18 = vadd.f32 %v2627_v17, %v2542_v11  ;;  %v2629_v19 = vpop.f32.mrb[3].mxu0 }
 0x31d   : > { %16798 = vtanh.f32 %v15997_v14  ;;  %v16001_v20 = vadd.f32 %v2629_v19, %v2544_v24 }
 0x31e   : > { %16800 = vtanh.f32 %v15999_v18 }
 0x31f   : > { %16802 = vtanh.f32 %v16001_v20 }
 0x326   : > { %v16797_v25 = vpop.eup %16796 }
 0x327   : > { %v16799_v26 = vpop.eup %16798  ;;  %v2933_v27 = vmul.f32 %v16797_v25, %v2906_v22 }
 0x328   : > { %v16801_v28 = vpop.eup %16800  ;;  %v2934_v29 = vmul.f32 %v16799_v26, %v2910_v23 }
 0x329   : > { %v16803_v30 = vpop.eup %16802  ;;  %v2939_v31 = vmul.f32 %v16801_v28, %v2906_v22 }
 0x32a   : > { %v2940_v32 = vmul.f32 %v16803_v30, %v2910_v23  ;;  %v2945_v33 = vadd.f32 %v2934_v29, %v2933_v27 }
 0x32c   : > { %v2952_v34 = vadd.f32 %v2940_v32, %v2939_v31 }
 0x398   : > { %v2752_v39 = vpop.f32.mrb[4].mxu1 }
 0x399   : > { %v16002_v40 = vadd.f32 %v2752_v39, %v1044_v37  ;;  %v2754_v15 = vpop.f32.mrb[5].mxu1 }
 0x39a   : > { %v16003_v16 = vadd.f32 %v2754_v15, %v1048_v38  ;;  %v2756_v41 = vpop.f32.mrb[6].mxu1 }
 0x39b   : > { %16804 = vtanh.f32 %v16002_v40  ;;  %v16004_v42 = vadd.f32 %v2756_v41, %v1044_v37  ;;  %v2758_v45 = vpop.f32.mrb[7].mxu1 }
 0x39c   : > { %16806 = vtanh.f32 %v16003_v16  ;;  %v16005_v54 = vadd.f32 %v2758_v45, %v1048_v38 }
 0x39d   : > { %16808 = vtanh.f32 %v16004_v42 }
 0x39e   : > { %16810 = vtanh.f32 %v16005_v54 }
 0x3a5   : > { %v16805_v55 = vpop.eup %16804 }
 0x3a6   : > { %v16807_v46 = vpop.eup %16806  ;;  %v2935_v47 = vmul.f32 %v16805_v55, %v2914_v43 }
 0x3a7   : > { %v16809_v48 = vpop.eup %16808  ;;  %v2936_v49 = vmul.f32 %v16807_v46, %v2918_v44 }
 0x3a8   : > { %v16811_v50 = vpop.eup %16810  ;;  %v2941_v51 = vmul.f32 %v16809_v48, %v2914_v43  ;;  %v2946_v52 = vadd.f32 %v2945_v33, %v2935_v47 }
 0x3a9   : > { %v2942_v53 = vmul.f32 %v16811_v50, %v2918_v44 }
 0x3aa   : > { %v2953_v56 = vadd.f32 %v2952_v34, %v2941_v51  ;;  %v2947_v57 = vadd.f32 %v2946_v52, %v2936_v49 }
 0x3ac   : > { %v2954_v58 = vadd.f32 %v2953_v56, %v2942_v53  ;;  %v16828_v56 = vld [vmem:[#allocation5 + $0x30] sm:$0xff] }
 0x3d9   : > { %v2881_v63 = vpop.f32.mrb[4].mxu0 }
 0x3da   : > { %v16006_v0 = vadd.f32 %v2881_v63, %v1052_v61  ;;  %v2883_v1 = vpop.f32.mrb[5].mxu0 }
 0x3db   : > { %v16007_v3 = vadd.f32 %v2883_v1, %v1056_v62  ;;  %v2885_v5 = vpop.f32.mrb[6].mxu0  ;;  %v16832_v1 = vld [vmem:[#allocation5 + $0x50] sm:$0xff] }
 0x3dc   : > { %16812 = vtanh.f32 %v16006_v0  ;;  %v16008_v6 = vadd.f32 %v2885_v5, %v1052_v61  ;;  %v2887_v7 = vpop.f32.mrb[7].mxu0  ;;  %v16833_v5 = vld [vmem:[#allocation5 + $0x58] sm:$0xff] }
 0x3dd   : > { %16814 = vtanh.f32 %v16007_v3  ;;  %v16009_v8 = vadd.f32 %v2887_v7, %v1056_v62  ;;  %v16831_v62 = vld [vmem:[#allocation5 + $0x48] sm:$0xff] }
 0x3de   : > { %16816 = vtanh.f32 %v16008_v6 }
 0x3df   : > { %16818 = vtanh.f32 %v16009_v8 }
 0x3e6   : > { %v16813_v11 = vpop.eup %16812 }
 0x3e7   : > { %v16815_v12 = vpop.eup %16814  ;;  %v2937_v13 = vmul.f32 %v16813_v11, %v2922_v9 }
 0x3e8   : > { %v16817_v24 = vpop.eup %16816  ;;  %v2938_v14 = vmul.f32 %v16815_v12, %v2926_v10 }
 0x3e9   : > { %v16819_v4 = vpop.eup %16818  ;;  %v2943_v17 = vmul.f32 %v16817_v24, %v2922_v9  ;;  %v2948_v18 = vadd.f32 %v2947_v57, %v2937_v13 }
 0x3ea   : > { %v2944_v19 = vmul.f32 %v16819_v4, %v2926_v10 }
 0x3eb   : > { %v2955_v20 = vadd.f32 %v2954_v58, %v2943_v17  ;;  %v2949_v22 = vadd.f32 %v2948_v18, %v2938_v14  ;;  %v16829_v58 = vld [vmem:[#allocation5 + $0x38] sm:$0xff]  ;;  %v19263_v18 = vmov 1983009808  }
 0x3ed   : > { %v2956_v23 = vadd.f32 %v2955_v20, %v2944_v19  ;;  %v3092_v19 = vunpack.c.l.s4 %v19263_v18 }
 0x3ef   : > { %2957 = vadd.xlane.f32.xlu0 %v2956_v23 }
 0x3f3   : > { %2950 = vadd.xlane.f32.xlu0 %v2949_v22 }
 0x47c   : > { %v2958_v25 = vpop.xlane.xlu0 %2957 }
 0x47d   : > { %v2965_v26 = vrot.slane %v2958_v25, 4 }
 0x47f   : > { %v2966_v27 = vmax.f32 %v2958_v25, %v2965_v26 }
 0x480   : > { %v2951_v28 = vpop.xlane.xlu0 %2950 }
 0x481   : > { %v2967_v29 = vrot.slane %v2966_v27, 2  ;;  %v2959_v21 = vrot.slane %v2951_v28, 4 }
 0x483   : > { %v2968_v30 = vmax.f32 %v2966_v27, %v2967_v29  ;;  %v2960_v31 = vmax.f32 %v2951_v28, %v2959_v21  ;;  %v16834_v21 = vld [vmem:[#allocation5] sm:$0xff] }
 0x485   : > { %v2969_v32 = vrot.slane %v2968_v30, 1  ;;  %v2961_v33 = vrot.slane %v2960_v31, 2 }
 0x487   : > { %v2970_v34 = vmax.f32 %v2968_v30, %v2969_v32  ;;  %v2962_v35 = vmax.f32 %v2960_v31, %v2961_v33  ;;  %v16835_v31 = vld [vmem:[#allocation5 + $0x8] sm:$0xff] }
 0x489   : > { %v2972_v36 = vsub.f32 %v2958_v25, %v2970_v34  ;;  %v2963_v37 = vrot.slane %v2962_v35, 1 }
 0x48b   : > { %v2975_v38 = vmul.f32 1.442695, %v2972_v36  ;;  %v2964_v39 = vmax.f32 %v2962_v35, %v2963_v37 }
 0x48d   : > { %16820 = vpow2.f32 %v2975_v38  ;;  %v2971_v40 = vsub.f32 %v2951_v28, %v2964_v39  ;;  %v16836_v38 = vld [vmem:[#allocation5 + $0x10] sm:$0xff] }
 0x48f   : > { %v2973_v15 = vmul.f32 1.442695, %v2971_v40  ;;  %v16837_v40 = vld [vmem:[#allocation5 + $0x18] sm:$0xff] }
 0x491   : > { %16822 = vpow2.f32 %v2973_v15 }
 0x497   : > { %v16821_v16 = vpop.eup %16820 }
 0x498   : > { %v2983_v41 = vrot.slane %v16821_v16, 4 }
 0x49a   : > { %v2984_v42 = vadd.f32 %v16821_v16, %v2983_v41 }
 0x49b   : > { %v16823_v45 = vpop.eup %16822 }
 0x49c   : > { %v2985_v54 = vrot.slane %v2984_v42, 2  ;;  %v2977_v43 = vrot.slane %v16823_v45, 4 }
 0x49e   : > { %v2986_v44 = vadd.f32 %v2985_v54, %v2984_v42  ;;  %v2978_v55 = vadd.f32 %v16823_v45, %v2977_v43  ;;  %v16838_v43 = vld [vmem:[#allocation5 + $0x20] sm:$0xff] }
 0x4a0   : > { %v2987_v46 = vrot.slane %v2986_v44, 1  ;;  %v2979_v47 = vrot.slane %v2978_v55, 2 }
 0x4a2   : > { %v2988_v48 = vadd.f32 %v2987_v46, %v2986_v44  ;;  %v2980_v49 = vadd.f32 %v2979_v47, %v2978_v55  ;;  %v3093_v47 = vunpack.c.0.s8 %v3092_v19 }
 0x4a4   : > { %16824 = vrcp.f32 %v2988_v48  ;;  %v2981_v50 = vrot.slane %v2980_v49, 1 }
 0x4a6   : > { %v2982_v51 = vadd.f32 %v2981_v50, %v2980_v49 }
 0x4a8   : > { %16826 = vrcp.f32 %v2982_v51 }
 0x4ae   : > { %v16825_v52 = vpop.eup %16824 }
 0x4af   : > { %v2992_v53 = vmul.f32 %v16825_v52, %v16821_v16 }
 0x4b1   : > { %v2999_v57 = vmul.f32 %v16828_v56, %v2992_v53  ;;  %v3000_v59 = vmul.f32 %v16829_v58, %v2992_v53  ;;  %v3001_v61 = vmul.f32 %v16830_v60, %v2992_v53  ;;  %v3002_v63 = vmul.f32 %v16831_v62, %v2992_v53 }
 0x4b2   : > { %v16827_v0 = vpop.eup %16826  ;;  %v3003_v3 = vmul.f32 %v16832_v1, %v2992_v53  ;;  %v3004_v6 = vmul.f32 %v16833_v5, %v2992_v53  ;;  %v3096_v1 = vsub.s32 %v3093_v47, %v19902_v2 }
 0x4b3   : > { %v3041_v7 = vrot.slane %v2999_v57, 4  ;;  %v3047_v8 = vrot.slane %v3000_v59, 4  ;;  %v3053_v9 = vrot.slane %v3001_v61, 4  ;;  %v3059_v10 = vrot.slane %v3002_v63, 4 }
 0x4b4   : > { %v3065_v11 = vrot.slane %v3003_v3, 4  ;;  %v3071_v12 = vrot.slane %v3004_v6, 4  ;;  %v2990_v13 = vmul.f32 %v16827_v0, %v16823_v45 }
 0x4b5   : > { %v3042_v24 = vadd.f32 %v3041_v7, %v2999_v57  ;;  %v3048_v14 = vadd.f32 %v3047_v8, %v3000_v59  ;;  %v3054_v4 = vadd.f32 %v3053_v9, %v3001_v61  ;;  %v3060_v17 = vadd.f32 %v3059_v10, %v3002_v63  ;;  %v16839_v57 = vld [vmem:[#allocation5 + $0x28] sm:$0xff] }
 0x4b6   : > { %v3066_v20 = vadd.f32 %v3065_v11, %v3003_v3  ;;  %v3072_v22 = vadd.f32 %v3071_v12, %v3004_v6  ;;  %v2993_v30 = vmul.f32 %v16834_v21, %v2990_v13  ;;  %v2994_v32 = vmul.f32 %v16835_v31, %v2990_v13 }
 0x4b7   : > { %v3043_v23 = vrot.slane %v3042_v24, 2  ;;  %v3049_v25 = vrot.slane %v3048_v14, 2  ;;  %v3055_v26 = vrot.slane %v3054_v4, 2  ;;  %v3061_v27 = vrot.slane %v3060_v17, 2 }
 0x4b8   : > { %v3067_v28 = vrot.slane %v3066_v20, 2  ;;  %v3073_v29 = vrot.slane %v3072_v22, 2  ;;  %v2995_v39 = vmul.f32 %v16836_v38, %v2990_v13  ;;  %v2996_v15 = vmul.f32 %v16837_v40, %v2990_v13 }
 0x4b9   : > { %v3044_v33 = vadd.f32 %v3043_v23, %v3042_v24  ;;  %v3050_v34 = vadd.f32 %v3049_v25, %v3048_v14  ;;  %v3056_v35 = vadd.f32 %v3055_v26, %v3054_v4  ;;  %v3062_v36 = vadd.f32 %v3061_v27, %v3060_v17 }
 0x4ba   : > { %v3068_v37 = vadd.f32 %v3067_v28, %v3066_v20  ;;  %v3074_v54 = vadd.f32 %v3073_v29, %v3072_v22  ;;  %v2997_v44 = vmul.f32 %v16838_v43, %v2990_v13  ;;  %v3005_v55 = vrot.slane %v2993_v30, 4 }
 0x4bb   : > { %v3045_v16 = vrot.slane %v3044_v33, 1  ;;  %v3051_v41 = vrot.slane %v3050_v34, 1  ;;  %v3057_v42 = vrot.slane %v3056_v35, 1  ;;  %v3063_v45 = vrot.slane %v3062_v36, 1 }
 0x4bc   : > { %v3011_v46 = vrot.slane %v2994_v32, 4  ;;  %v3006_v52 = vadd.f32 %v3005_v55, %v2993_v30  ;;  %v3069_v56 = vrot.slane %v3068_v37, 1  ;;  %v2998_v58 = vmul.f32 %v16839_v57, %v2990_v13 }
 0x4bd   : > { %v3046_v48 = vadd.f32 %v3045_v16, %v3044_v33  ;;  %v3052_v49 = vadd.f32 %v3051_v41, %v3050_v34  ;;  %v3058_v50 = vadd.f32 %v3057_v42, %v3056_v35  ;;  %v3064_v51 = vadd.f32 %v3063_v45, %v3062_v36 }
 0x4be   : > { %v3012_v53 = vadd.f32 %v3011_v46, %v2994_v32  ;;  %v3017_v59 = vrot.slane %v2995_v39, 4  ;;  %v3023_v60 = vrot.slane %v2996_v15, 4  ;;  %v3075_v61 = vrot.slane %v3074_v54, 1 }
 0x4bf   : > { %v3007_v62 = vrot.slane %v3006_v52, 2  ;;  %v3029_v0 = vrot.slane %v2997_v44, 4  ;;  %v3114_v3 = vcombine.low %v3046_v48, %v3052_v49  ;;  %v3115_v7 = vcombine.low %v3058_v50, %v3064_v51 }
 0x4c0   : > { %v3013_v63 = vrot.slane %v3012_v53, 2  ;;  %v3018_v5 = vadd.f32 %v3017_v59, %v2995_v39  ;;  %v3024_v6 = vadd.f32 %v3023_v60, %v2996_v15  ;;  %v3070_v11 = vadd.f32 %v3069_v56, %v3068_v37 }
 0x4c1   : > { %v3008_v8 = vadd.f32 %v3007_v62, %v3006_v52  ;;  %v3030_v10 = vadd.f32 %v3029_v0, %v2997_v44  ;;  %v3035_v14 = vrot.slane %v2998_v58, 4  ;;  %v3076_v13 = vadd.f32 %v3075_v61, %v3074_v54 }
 0x4c2   : > { %v3014_v9 = vadd.f32 %v3013_v63, %v3012_v53  ;;  %v3019_v12 = vrot.slane %v3018_v5, 2  ;;  %v3025_v24 = vrot.slane %v3024_v6, 2  ;;  %v3122_v19 = vrot.slane %v3114_v3, %v3096_v1 }
 0x4c3   : > { %v3009_v4 = vrot.slane %v3008_v8, 1  ;;  %v3031_v18 = vrot.slane %v3030_v10, 2  ;;  %v3036_v23 = vadd.f32 %v3035_v14, %v2998_v58  ;;  %v3129_v2 = vrot.slane %v3115_v7, %v3096_v1 }
 0x4c4   : > { %v3015_v17 = vrot.slane %v3014_v9, 1  ;;  %v3020_v20 = vadd.f32 %v3019_v12, %v3018_v5  ;;  %v3026_v22 = vadd.f32 %v3025_v24, %v3024_v6  ;;  %v3131_v32 = vcombine.low %v3070_v11, %v3076_v13 }
 0x4c5   : > { %v3010_v25 = vadd.f32 %v3009_v4, %v3008_v8  ;;  %v3032_v27 = vadd.f32 %v3031_v18, %v3030_v10  ;;  %v3037_v21 = vrot.slane %v3036_v23, 2  ;;  %v3130_v36 = vcombine.low %v3122_v19, %v3129_v2 }
 0x4c6   : > { %v3016_v26 = vadd.f32 %v3015_v17, %v3014_v9  ;;  %v3021_v28 = vrot.slane %v3020_v20, 1  ;;  %v3027_v29 = vrot.slane %v3026_v22, 1  ;;  %v3138_v15 = vrot.slane %v3131_v32, %v3096_v1 }
 0x4c7   : > { %v3033_v30 = vrot.slane %v3032_v27, 1  ;;  %v3038_v35 = vadd.f32 %v3037_v21, %v3036_v23  ;;  %v3143_v42 = vrot.slane %v3130_v36, 7 }
 0x4c8   : > { %v3089_v31 = vcombine.low %v3010_v25, %v3016_v26  ;;  %v3022_v33 = vadd.f32 %v3021_v28, %v3020_v20  ;;  %v3028_v34 = vadd.f32 %v3027_v29, %v3026_v22  ;;  %v3154_v43 = vrot.slane %v3138_v15, 7 }
 0x4c9   : > { %v3034_v37 = vadd.f32 %v3033_v30, %v3032_v27  ;;  %v3039_v38 = vrot.slane %v3038_v35, 1 }
 0x4ca   : > { %v3090_v39 = vcombine.low %v3022_v33, %v3028_v34  ;;  %v3097_v40 = vrot.slane %v3089_v31, %v3096_v1 }
 0x4cb   : > { %v3040_v16 = vadd.f32 %v3039_v38, %v3038_v35 }
 0x4cc   : > { %v3104_v41 = vrot.slane %v3090_v39, %v3096_v1 }
 0x4cd   : > { %v3106_v54 = vcombine.low %v3034_v37, %v3040_v16 }
 0x4ce   : > { %v3105_v45 = vcombine.low %v3097_v40, %v3104_v41 }
 0x4cf   : > { %v3113_v44 = vrot.slane %v3106_v54, %v3096_v1 }
 0x4d0   : > { %v3145_v55 = vsel %vm3144_vm0, %v3143_v42, %v3105_v45 }
 0x4d1   : > { %v3147_v46 = vsel %vm3146_vm1, %v3143_v42, %v3145_v55  ;;  %v3155_v48 = vsel %vm3144_vm0, %v3154_v43, %v3113_v44 }
 0x4d2   : > { %v3149_v47 = vsel %vm3148_vm2, %v3143_v42, %v3147_v46  ;;  %v3156_v50 = vsel %vm3146_vm1, %v3154_v43, %v3155_v48 }
 0x4d3   : > { %v3151_v49 = vsel %vm3150_vm3, %v3143_v42, %v3149_v47  ;;  %v3157_v51 = vsel %vm3148_vm2, %v3154_v43, %v3156_v50 }
 0x4d4   : > { %3161 = vst [vmem:[#allocation2] sm:$0xff] %v3151_v49  ;;  %v3158_v52 = vsel %vm3150_vm3, %v3154_v43, %v3157_v51 }
 0x4d5   : > { %3162 = vst [vmem:[#allocation2 + $0x8] sm:$0xf] %v3158_v52 }
 0x4d6 PF: > { %v16840_v53 = vld [vmem:[%s19844_s13 + $0x4] ss:$24 sps:$4 sm:$0xff]   ;;  %v16844_v57 = vld [vmem:[%s19844_s13] ss:$24 sps:$4 sm:$0xff]   ;;  %v16846_v59 = vld [vmem:[%s19844_s13 + $0x34] ss:$24 sps:$4 sm:$0xff]  }
 0x4d7   : > { %v16842_v56 = vld [vmem:[%s19844_s13 + $0x304] ss:$24 sps:$4 sm:$0xff]   ;;  %4942 = vmatprep.subr.bf16.mxu1 %v16840_v53  ;;  %v16845_v58 = vld [vmem:[%s19844_s13 + $0x300] ss:$24 sps:$4 sm:$0xff]   ;;  %v16848_v60 = vld [vmem:[%s19844_s13 + $0x334] ss:$24 sps:$4 sm:$0xff]  }
 0x4d8   : > { %4985 = vmatprep.subr.bf16.mxu0 %v16842_v56  ;;  %4943 = vmatpush1.bf16.msra.mxu1 %v16844_v57  ;;  %v16850_v61 = vld [vmem:[%s19844_s13 + $0x30] ss:$24 sps:$4 sm:$0xff]   ;;  %v16852_v63 = vld [vmem:[%s19844_s13 + $0x64] ss:$24 sps:$4 sm:$0xff]   ;;  %v16856_v1 = vld [vmem:[%s19844_s13 + $0x60] ss:$24 sps:$4 sm:$0xff]  }
 0x4d9   : > { %4986 = vmatpush1.bf16.msra.mxu0 %v16845_v58  ;;  %4944 = vmatprep.subr.bf16.mxu1 %v16846_v59  ;;  %v16851_v62 = vld [vmem:[%s19844_s13 + $0x330] ss:$24 sps:$4 sm:$0xff]   ;;  %v16854_v0 = vld [vmem:[%s19844_s13 + $0x364] ss:$24 sps:$4 sm:$0xff]   ;;  %v16857_v3 = vld [vmem:[%s19844_s13 + $0x360] ss:$24 sps:$4 sm:$0xff]  }
 0x4da   : > { %4987 = vmatprep.subr.bf16.mxu0 %v16848_v60  ;;  %v16858_v5 = vld [vmem:[%s19844_s13 + $0x94] ss:$24 sps:$4 sm:$0xff]   ;;  %v16862_v7 = vld [vmem:[%s19844_s13 + $0x90] ss:$24 sps:$4 sm:$0xff]   ;;  %v16864_v9 = vld [vmem:[%s19844_s13 + $0xc4] ss:$24 sps:$4 sm:$0xff]  }
 0x4db   : > { %v16860_v6 = vld [vmem:[%s19844_s13 + $0x394] ss:$24 sps:$4 sm:$0xff]   ;;  %v16863_v8 = vld [vmem:[%s19844_s13 + $0x390] ss:$24 sps:$4 sm:$0xff]   ;;  %v16866_v10 = vld [vmem:[%s19844_s13 + $0x3c4] ss:$24 sps:$4 sm:$0xff]  }
 0x4dc   : > { %4945 = vmatpush1.bf16.msra.mxu1 %v16850_v61  ;;  %v16868_v11 = vld [vmem:[%s19844_s13 + $0xc0] ss:$24 sps:$4 sm:$0xff]   ;;  %v16870_v24 = vld [vmem:[%s19844_s13 + $0xf4] ss:$24 sps:$4 sm:$0xff]   ;;  %v16874_v13 = vld [vmem:[%s19844_s13 + $0xf0] ss:$24 sps:$4 sm:$0xff]  }
 0x4dd   : > { %4988 = vmatpush1.bf16.msra.mxu0 %v16851_v62  ;;  %4946 = vmatprep.subr.bf16.mxu1 %v16852_v63  ;;  %v16869_v12 = vld [vmem:[%s19844_s13 + $0x3c0] ss:$24 sps:$4 sm:$0xff]   ;;  %v16872_v14 = vld [vmem:[%s19844_s13 + $0x3f4] ss:$24 sps:$4 sm:$0xff]   ;;  %v16875_v4 = vld [vmem:[%s19844_s13 + $0x3f0] ss:$24 sps:$4 sm:$0xff]  }
 0x4de   : > { %4989 = vmatprep.subr.bf16.mxu0 %v16854_v0  ;;  %v16876_v17 = vld [vmem:[%s19844_s13 + $0x124] ss:$24 sps:$4 sm:$0xff]   ;;  %v16880_v19 = vld [vmem:[%s19844_s13 + $0x120] ss:$24 sps:$4 sm:$0xff]   ;;  %v16882_v22 = vld [vmem:[%s19844_s13 + $0x154] ss:$24 sps:$4 sm:$0xff]  }
 0x4df   : > { %v16878_v18 = vld [vmem:[%s19844_s13 + $0x424] ss:$24 sps:$4 sm:$0xff]   ;;  %v16881_v20 = vld [vmem:[%s19844_s13 + $0x420] ss:$24 sps:$4 sm:$0xff]   ;;  %v16884_v23 = vld [vmem:[%s19844_s13 + $0x454] ss:$24 sps:$4 sm:$0xff]  }
 0x4e0   : > { %4947 = vmatpush1.bf16.msra.mxu1 %v16856_v1  ;;  %v16886_v2 = vld [vmem:[%s19844_s13 + $0x150] ss:$24 sps:$4 sm:$0xff]   ;;  %v16888_v26 = vld [vmem:[%s19844_s13 + $0x184] ss:$24 sps:$4 sm:$0xff]   ;;  %v16892_v28 = vld [vmem:[%s19844_s13 + $0x180] ss:$24 sps:$4 sm:$0xff]  }
 0x4e1   : > { %4990 = vmatpush1.bf16.msra.mxu0 %v16857_v3  ;;  %4948 = vmatprep.subr.bf16.mxu1 %v16858_v5  ;;  %v16887_v25 = vld [vmem:[%s19844_s13 + $0x450] ss:$24 sps:$4 sm:$0xff]   ;;  %v16890_v27 = vld [vmem:[%s19844_s13 + $0x484] ss:$24 sps:$4 sm:$0xff]   ;;  %v16893_v29 = vld [vmem:[%s19844_s13 + $0x480] ss:$24 sps:$4 sm:$0xff]  }
 0x4e2   : > { %4991 = vmatprep.subr.bf16.mxu0 %v16860_v6  ;;  %v16894_v21 = vld [vmem:[%s19844_s13 + $0x1b4] ss:$24 sps:$4 sm:$0xff]   ;;  %v16898_v31 = vld [vmem:[%s19844_s13 + $0x1b0] ss:$24 sps:$4 sm:$0xff]   ;;  %v16900_v33 = vld [vmem:[%s19844_s13 + $0x1e4] ss:$24 sps:$4 sm:$0xff]  }
 0x4e3   : > { %v16896_v30 = vld [vmem:[%s19844_s13 + $0x4b4] ss:$24 sps:$4 sm:$0xff]   ;;  %v16899_v32 = vld [vmem:[%s19844_s13 + $0x4b0] ss:$24 sps:$4 sm:$0xff]   ;;  %v16902_v34 = vld [vmem:[%s19844_s13 + $0x4e4] ss:$24 sps:$4 sm:$0xff]  }
 0x4e4   : > { %4949 = vmatpush1.bf16.msra.mxu1 %v16862_v7  ;;  %v16904_v35 = vld [vmem:[%s19844_s13 + $0x1e0] ss:$24 sps:$4 sm:$0xff]   ;;  %v16906_v37 = vld [vmem:[%s19844_s13 + $0x214] ss:$24 sps:$4 sm:$0xff]   ;;  %v16910_v39 = vld [vmem:[%s19844_s13 + $0x210] ss:$24 sps:$4 sm:$0xff]  }
 0x4e5   : > { %4992 = vmatpush1.bf16.msra.mxu0 %v16863_v8  ;;  %4950 = vmatprep.subr.bf16.mxu1 %v16864_v9  ;;  %v16905_v36 = vld [vmem:[%s19844_s13 + $0x4e0] ss:$24 sps:$4 sm:$0xff]   ;;  %v16908_v38 = vld [vmem:[%s19844_s13 + $0x514] ss:$24 sps:$4 sm:$0xff]   ;;  %v16911_v40 = vld [vmem:[%s19844_s13 + $0x510] ss:$24 sps:$4 sm:$0xff]  }
 0x4e6   : > { %4993 = vmatprep.subr.bf16.mxu0 %v16866_v10  ;;  %v3164_v15 = vld [vmem:[%s19829_s6 + $0x8] sm:$0xff]  ;;  %v3170_v16 = vld [vmem:[%s19829_s6 + $0x38] sm:$0xff]  ;;  %v3163_v61 = vld [vmem:[%s19829_s6] sm:$0xff]  ;;  %vm5584_vm4 = vcmask 1041409   ;;  %s15993_s30 = smul.u32 36, %s19379_s23  ;;  %vm5586_vm5 = vcmask 1043459  }
 0x4e7   : > { %v3166_v41 = vld [vmem:[%s19829_s6 + $0x18] sm:$0xff]  ;;  %v3172_v42 = vld [vmem:[%s19829_s6 + $0x48] sm:$0xff]  ;;  %v19972_v54 = vpack.c.bf16 %v3170_v16, %v3164_v15  ;;  %v3169_v63 = vld [vmem:[%s19829_s6 + $0x30] sm:$0xff]  ;;  %vm5588_vm6 = vcmask 1045509   ;;  %vm5590_vm7 = vcmask 1047559   ;;  %p15701_p11 = scmp.ne.s32.totalorder %s19379_s23, 1 }
 0x4e8   : > { %4951 = vmatpush1.bf16.msra.mxu1 %v16868_v11  ;;  %v16912_v45 = vld [vmem:[%s19844_s13 + $0x244] ss:$24 sps:$4 sm:$0xff]   ;;  %v19974_v43 = vpack.c.bf16 %v3172_v42, %v3166_v41  ;;  %v16916_v55 = vld [vmem:[%s19844_s13 + $0x240] ss:$24 sps:$4 sm:$0xff]   ;;  %v16918_v47 = vld [vmem:[%s19844_s13 + $0x274] ss:$24 sps:$4 sm:$0xff]   ;;  %v20001_v7 = vpack.c.bf16 %v3169_v63, %v3163_v61 }
 0x4e9   : > { %4994 = vmatpush1.bf16.msra.mxu0 %v16869_v12  ;;  %4952 = vmatprep.subr.bf16.mxu1 %v16870_v24  ;;  %v16914_v44 = vld [vmem:[%s19844_s13 + $0x544] ss:$24 sps:$4 sm:$0xff]   ;;  %v16917_v46 = vld [vmem:[%s19844_s13 + $0x540] ss:$24 sps:$4 sm:$0xff]   ;;  %v16920_v48 = vld [vmem:[%s19844_s13 + $0x574] ss:$24 sps:$4 sm:$0xff]  }
 0x4ea   : > { %4995 = vmatprep.subr.bf16.mxu0 %v16872_v14  ;;  %4974 = vmatprep.mubr.bf16.mxu1 %v19972_v54  ;;  %v16922_v49 = vld [vmem:[%s19844_s13 + $0x270] ss:$24 sps:$4 sm:$0xff]   ;;  %v16924_v51 = vld [vmem:[%s19844_s13 + $0x2a4] ss:$24 sps:$4 sm:$0xff]   ;;  %v16928_v53 = vld [vmem:[%s19844_s13 + $0x2a0] ss:$24 sps:$4 sm:$0xff]  }
 0x4eb   : > { %5017 = vmatprep.mubr.bf16.mxu0 %v19974_v43  ;;  %v16923_v50 = vld [vmem:[%s19844_s13 + $0x570] ss:$24 sps:$4 sm:$0xff]   ;;  %v16926_v52 = vld [vmem:[%s19844_s13 + $0x5a4] ss:$24 sps:$4 sm:$0xff]   ;;  %v16929_v56 = vld [vmem:[%s19844_s13 + $0x5a0] ss:$24 sps:$4 sm:$0xff]  }
 0x4ec   : > { %4953 = vmatpush1.bf16.msra.mxu1 %v16874_v13  ;;  %v16930_v57 = vld [vmem:[%s19844_s13 + $0x2d4] ss:$24 sps:$4 sm:$0xff]   ;;  %v16934_v59 = vld [vmem:[%s19844_s13 + $0x2d0] ss:$24 sps:$4 sm:$0xff]   ;;  %v16938_v62 = vld [vmem:[%s19844_s13 + $0x604] ss:$24 sps:$4 sm:$0xff]  }
 0x4ed   : > { %4996 = vmatpush1.bf16.msra.mxu0 %v16875_v4  ;;  %4954 = vmatprep.subr.bf16.mxu1 %v16876_v17  ;;  %v16932_v58 = vld [vmem:[%s19844_s13 + $0x5d4] ss:$24 sps:$4 sm:$0xff]   ;;  %v16935_v60 = vld [vmem:[%s19844_s13 + $0x5d0] ss:$24 sps:$4 sm:$0xff]   ;;  %v16936_v5 = vld [vmem:[%s19844_s13 + $0x600] ss:$24 sps:$4 sm:$0xff]  }
 0x4ee   : > { %4997 = vmatprep.subr.bf16.mxu0 %v16878_v18  ;;  %v3165_v0 = vld [vmem:[%s19829_s6 + $0x10] sm:$0xff]  ;;  %v3171_v1 = vld [vmem:[%s19829_s6 + $0x40] sm:$0xff]  ;;  %s20989_s18 = scalar_lea.vmem [#allocation3], %s15993_s30  ;;  %vm13142_vm8 = vcmask (!%p15701_p11), 1041408   ;;  %vm13708_vm9 = vcmask (!%p15701_p11), 1024   ;;  %s21647_s0 = sld [smem:[#allocation52_spill]] (!%p15701_p11) }
 0x4ef   : > { %v16941_v3 = vld [vmem:[%s19844_s13 + $0xc] ss:$24 sps:$4 sm:$0xff]   ;;  %v16939_v6 = vld [vmem:[%s19844_s13 + $0x8] ss:$24 sps:$4 sm:$0xff]   ;;  %v20003_v8 = vpack.c.bf16 %v3171_v1, %v3165_v0  ;;  %v16947_v10 = vld [vmem:[%s19844_s13 + $0x3c] ss:$24 sps:$4 sm:$0xff]  }
 0x4f0   : > { %4955 = vmatpush1.bf16.msra.mxu1 %v16880_v19  ;;  %v16944_v9 = vld [vmem:[%s19844_s13 + $0x634] ss:$24 sps:$4 sm:$0xff]   ;;  %v16942_v11 = vld [vmem:[%s19844_s13 + $0x630] ss:$24 sps:$4 sm:$0xff]   ;;  %v16950_v24 = vld [vmem:[%s19844_s13 + $0x664] ss:$24 sps:$4 sm:$0xff]  }
 0x4f1   : > { %4998 = vmatpush1.bf16.msra.mxu0 %v16881_v20  ;;  %4956 = vmatprep.subr.bf16.mxu1 %v16882_v22  ;;  %v16945_v12 = vld [vmem:[%s19844_s13 + $0x38] ss:$24 sps:$4 sm:$0xff]   ;;  %v16953_v14 = vld [vmem:[%s19844_s13 + $0x6c] ss:$24 sps:$4 sm:$0xff]   ;;  %v16951_v4 = vld [vmem:[%s19844_s13 + $0x68] ss:$24 sps:$4 sm:$0xff]  }
 0x4f2   : > { %4999 = vmatprep.subr.bf16.mxu0 %v16884_v23  ;;  %v16948_v13 = vld [vmem:[%s19844_s13 + $0x660] ss:$24 sps:$4 sm:$0xff]   ;;  %v16956_v17 = vld [vmem:[%s19844_s13 + $0x694] ss:$24 sps:$4 sm:$0xff]   ;;  %v16954_v19 = vld [vmem:[%s19844_s13 + $0x690] ss:$24 sps:$4 sm:$0xff]  }
 0x4f3   : > { %v16959_v18 = vld [vmem:[%s19844_s13 + $0x9c] ss:$24 sps:$4 sm:$0xff]   ;;  %v16957_v20 = vld [vmem:[%s19844_s13 + $0x98] ss:$24 sps:$4 sm:$0xff]   ;;  %v16965_v23 = vld [vmem:[%s19844_s13 + $0xcc] ss:$24 sps:$4 sm:$0xff]  }
 0x4f4   : > { %4957 = vmatpush1.bf16.msra.mxu1 %v16886_v2  ;;  %v16962_v22 = vld [vmem:[%s19844_s13 + $0x6c4] ss:$24 sps:$4 sm:$0xff]   ;;  %v16960_v2 = vld [vmem:[%s19844_s13 + $0x6c0] ss:$24 sps:$4 sm:$0xff]   ;;  %v16992_v42 = vld [vmem:[%s19844_s13 + $0x7b4] ss:$24 sps:$4 sm:$0xff]  }
 0x4f5   : > { %5000 = vmatpush1.bf16.msra.mxu0 %v16887_v25  ;;  %4958 = vmatprep.subr.bf16.mxu1 %v16888_v26  ;;  %v16963_v25 = vld [vmem:[%s19844_s13 + $0xc8] ss:$24 sps:$4 sm:$0xff]   ;;  %v16968_v26 = vld [vmem:[%s19844_s13 + $0x6f4] ss:$24 sps:$4 sm:$0xff]   ;;  %v17017_v63 = vld [vmem:[%s19844_s13 + $0x278] ss:$24 sps:$4 sm:$0xff]  }
 0x4f6   : > { %5001 = vmatprep.subr.bf16.mxu0 %v16890_v27  ;;  %v16971_v27 = vld [vmem:[%s19844_s13 + $0xfc] ss:$24 sps:$4 sm:$0xff]   ;;  %v16989_v15 = vld [vmem:[%s19844_s13 + $0x18c] ss:$24 sps:$4 sm:$0xff]   ;;  %v16984_v16 = vld [vmem:[%s19844_s13 + $0x780] ss:$24 sps:$4 sm:$0xff]  }
 0x4f7   : > { %v16987_v41 = vld [vmem:[%s19844_s13 + $0x188] ss:$24 sps:$4 sm:$0xff]   ;;  %v17019_v61 = vld [vmem:[%s19844_s13 + $0x27c] ss:$24 sps:$4 sm:$0xff]   ;;  %v17025_v1 = vld [vmem:[%s19844_s13 + $0x2ac] ss:$24 sps:$4 sm:$0xff]  }
 0x4f8   : > { %4959 = vmatpush1.bf16.msra.mxu1 %v16892_v28  ;;  %v16966_v28 = vld [vmem:[%s19844_s13 + $0x6f0] ss:$24 sps:$4 sm:$0xff]   ;;  %v17022_v0 = vld [vmem:[%s19844_s13 + $0x8a4] ss:$24 sps:$4 sm:$0xff]  }
 0x4f9   : > { %5002 = vmatpush1.bf16.msra.mxu0 %v16893_v29  ;;  %4960 = vmatprep.subr.bf16.mxu1 %v16894_v21  ;;  %v16969_v29 = vld [vmem:[%s19844_s13 + $0xf8] ss:$24 sps:$4 sm:$0xff]   ;;  %v16974_v21 = vld [vmem:[%s19844_s13 + $0x724] ss:$24 sps:$4 sm:$0xff]  }
 0x4fa   : > { %5003 = vmatprep.subr.bf16.mxu0 %v16896_v30  ;;  %v16977_v30 = vld [vmem:[%s19844_s13 + $0x12c] ss:$24 sps:$4 sm:$0xff]  }
 0x4fc   : > { %4961 = vmatpush1.bf16.msra.mxu1 %v16898_v31  ;;  %v16972_v31 = vld [vmem:[%s19844_s13 + $0x720] ss:$24 sps:$4 sm:$0xff]  }
 0x4fd   : > { %5004 = vmatpush1.bf16.msra.mxu0 %v16899_v32  ;;  %4962 = vmatprep.subr.bf16.mxu1 %v16900_v33  ;;  %v16975_v32 = vld [vmem:[%s19844_s13 + $0x128] ss:$24 sps:$4 sm:$0xff]   ;;  %v16980_v33 = vld [vmem:[%s19844_s13 + $0x754] ss:$24 sps:$4 sm:$0xff]  }
 0x4fe   : > { %5005 = vmatprep.subr.bf16.mxu0 %v16902_v34  ;;  %v3168_v34 = vld [vmem:[%s19829_s6 + $0x28] sm:$0xff] }
 0x500   : > { %4963 = vmatpush1.bf16.msra.mxu1 %v16904_v35  ;;  %v3174_v35 = vld [vmem:[%s19829_s6 + $0x58] sm:$0xff] }
 0x501   : > { %5006 = vmatpush1.bf16.msra.mxu0 %v16905_v36  ;;  %4964 = vmatprep.subr.bf16.mxu1 %v16906_v37  ;;  %v16983_v36 = vld [vmem:[%s19844_s13 + $0x15c] ss:$24 sps:$4 sm:$0xff]   ;;  %v20036_v37 = vpack.c.bf16 %v3174_v35, %v3168_v34 }
 0x502   : > { %5007 = vmatprep.subr.bf16.mxu0 %v16908_v38  ;;  %v16978_v38 = vld [vmem:[%s19844_s13 + $0x750] ss:$24 sps:$4 sm:$0xff]   ;;  %v17064_v34 = vld [vmem:[%s19844_s13 + $0x3fc] ss:$24 sps:$4 sm:$0xff]  }
 0x503   : > { %v17067_v35 = vld [vmem:[%s19844_s13 + $0x104] ss:$24 sps:$4 sm:$0xff]  }
 0x504   : > { %4965 = vmatpush1.bf16.msra.mxu1 %v16910_v39  ;;  %v16981_v39 = vld [vmem:[%s19844_s13 + $0x158] ss:$24 sps:$4 sm:$0xff]  }
 0x505   : > { %5008 = vmatpush1.bf16.msra.mxu0 %v16911_v40  ;;  %4966 = vmatprep.subr.bf16.mxu1 %v16912_v45  ;;  %v16986_v40 = vld [vmem:[%s19844_s13 + $0x784] ss:$24 sps:$4 sm:$0xff]  }
 0x506   : > { %5009 = vmatprep.subr.bf16.mxu0 %v16914_v44  ;;  %v16995_v45 = vld [vmem:[%s19844_s13 + $0x1bc] ss:$24 sps:$4 sm:$0xff]   ;;  %v16990_v44 = vld [vmem:[%s19844_s13 + $0x7b0] ss:$24 sps:$4 sm:$0xff]  }
 0x508   : > { %4967 = vmatpush1.bf16.msra.mxu1 %v16916_v55  ;;  %v16993_v55 = vld [vmem:[%s19844_s13 + $0x1b8] ss:$24 sps:$4 sm:$0xff]  }
 0x509   : > { %5010 = vmatpush1.bf16.msra.mxu0 %v16917_v46  ;;  %4968 = vmatprep.subr.bf16.mxu1 %v16918_v47  ;;  %v16998_v46 = vld [vmem:[%s19844_s13 + $0x7e4] ss:$24 sps:$4 sm:$0xff]  }
 0x50a   : > { %5011 = vmatprep.subr.bf16.mxu0 %v16920_v48  ;;  %v17001_v47 = vld [vmem:[%s19844_s13 + $0x1ec] ss:$24 sps:$4 sm:$0xff]   ;;  %v16996_v48 = vld [vmem:[%s19844_s13 + $0x7e0] ss:$24 sps:$4 sm:$0xff]  }
 0x50c   : > { %4969 = vmatpush1.bf16.msra.mxu1 %v16922_v49  ;;  %v16999_v49 = vld [vmem:[%s19844_s13 + $0x1e8] ss:$24 sps:$4 sm:$0xff]  }
 0x50d   : > { %5012 = vmatpush1.bf16.msra.mxu0 %v16923_v50  ;;  %4970 = vmatprep.subr.bf16.mxu1 %v16924_v51  ;;  %v17004_v50 = vld [vmem:[%s19844_s13 + $0x814] ss:$24 sps:$4 sm:$0xff]  }
 0x50e   : > { %5013 = vmatprep.subr.bf16.mxu0 %v16926_v52  ;;  %v17007_v51 = vld [vmem:[%s19844_s13 + $0x21c] ss:$24 sps:$4 sm:$0xff]   ;;  %v17002_v52 = vld [vmem:[%s19844_s13 + $0x810] ss:$24 sps:$4 sm:$0xff]  }
 0x510   : > { %4971 = vmatpush1.bf16.msra.mxu1 %v16928_v53  ;;  %v17005_v53 = vld [vmem:[%s19844_s13 + $0x218] ss:$24 sps:$4 sm:$0xff]  }
 0x511   : > { %5014 = vmatpush1.bf16.msra.mxu0 %v16929_v56  ;;  %4972 = vmatprep.subr.bf16.mxu1 %v16930_v57  ;;  %v17010_v56 = vld [vmem:[%s19844_s13 + $0x844] ss:$24 sps:$4 sm:$0xff]  }
 0x512   : > { %5015 = vmatprep.subr.bf16.mxu0 %v16932_v58  ;;  %v17013_v57 = vld [vmem:[%s19844_s13 + $0x24c] ss:$24 sps:$4 sm:$0xff]   ;;  %v17008_v58 = vld [vmem:[%s19844_s13 + $0x840] ss:$24 sps:$4 sm:$0xff]  }
 0x514   : > { %4973 = vmatpush1.bf16.msra.mxu1 %v16934_v59  ;;  %v17011_v59 = vld [vmem:[%s19844_s13 + $0x248] ss:$24 sps:$4 sm:$0xff]  }
 0x515   : > { %5016 = vmatpush1.bf16.msra.mxu0 %v16935_v60  ;;  %5071 = vmatprep.subr.bf16.mxu1 %v16941_v3  ;;  %v17016_v60 = vld [vmem:[%s19844_s13 + $0x874] ss:$24 sps:$4 sm:$0xff]   ;;  %v17020_v3 = vld [vmem:[%s19844_s13 + $0x8a0] ss:$24 sps:$4 sm:$0xff]  }
 0x516   : > { %5028 = vmatprep.subr.bf16.mxu0 %v16938_v62  ;;  %v17014_v62 = vld [vmem:[%s19844_s13 + $0x870] ss:$24 sps:$4 sm:$0xff]  }
 0x517   : > { %4975 = vmatmul.mubr.bf16.vlgmr.msra.gmra.mrb[0].mxu1 %v20001_v7 }
 0x518   : > { %5018 = vmatmul.mubr.bf16.vlgmr.msra.gmra.mrb[0].mxu0 %v20003_v8  ;;  %5072 = vmatpush1.bf16.msra.mxu1 %v16939_v6  ;;  %v17028_v6 = vld [vmem:[%s19844_s13 + $0x8d4] ss:$24 sps:$4 sm:$0xff]  }
 0x519   : > { %5029 = vmatpush1.bf16.msra.mxu0 %v16936_v5  ;;  %5073 = vmatprep.subr.bf16.mxu1 %v16947_v10  ;;  %v17023_v5 = vld [vmem:[%s19844_s13 + $0x2a8] ss:$24 sps:$4 sm:$0xff]  }
 0x51a   : > { %5030 = vmatprep.subr.bf16.mxu0 %v16944_v9  ;;  %5103 = vmatprep.mubr.bf16.mxu1 %v19972_v54  ;;  %v17031_v9 = vld [vmem:[%s19844_s13 + $0x2dc] ss:$24 sps:$4 sm:$0xff]   ;;  %v17026_v10 = vld [vmem:[%s19844_s13 + $0x8d0] ss:$24 sps:$4 sm:$0xff]  }
 0x51b   : > { %5060 = vmatprep.mubr.bf16.mxu0 %v20036_v37 }
 0x51c   : > { %5074 = vmatpush1.bf16.msra.mxu1 %v16945_v12  ;;  %v3167_v12 = vld [vmem:[%s19829_s6 + $0x20] sm:$0xff] }
 0x51d   : > { %5031 = vmatpush1.bf16.msra.mxu0 %v16942_v11  ;;  %5075 = vmatprep.subr.bf16.mxu1 %v16953_v14  ;;  %v17029_v11 = vld [vmem:[%s19844_s13 + $0x2d8] ss:$24 sps:$4 sm:$0xff]   ;;  %v17034_v14 = vld [vmem:[%s19844_s13 + $0x30c] ss:$24 sps:$4 sm:$0xff]  }
 0x51e   : > { %5032 = vmatprep.subr.bf16.mxu0 %v16950_v24  ;;  %v3173_v24 = vld [vmem:[%s19829_s6 + $0x50] sm:$0xff] }
 0x520   : > { %5076 = vmatpush1.bf16.msra.mxu1 %v16951_v4  ;;  %v20077_v4 = vpack.c.bf16 %v3173_v24, %v3167_v12  ;;  %v17121_v12 = vld [vmem:[%s19844_s13 + $0x2b4] ss:$24 sps:$4 sm:$0xff]   ;;  %v17116_v24 = vld [vmem:[%s19844_s13 + $0x5a8] ss:$24 sps:$4 sm:$0xff]  }
 0x521   : > { %5033 = vmatpush1.bf16.msra.mxu0 %v16948_v13  ;;  %5077 = vmatprep.subr.bf16.mxu1 %v16959_v18  ;;  %v17037_v13 = vld [vmem:[%s19844_s13 + $0x14] ss:$24 sps:$4 sm:$0xff]   ;;  %v17035_v18 = vld [vmem:[%s19844_s13 + $0x10] ss:$24 sps:$4 sm:$0xff]  }
 0x522   : > { %5034 = vmatprep.subr.bf16.mxu0 %v16956_v17  ;;  %v17032_v17 = vld [vmem:[%s19844_s13 + $0x308] ss:$24 sps:$4 sm:$0xff]  }
 0x524   : > { %5078 = vmatpush1.bf16.msra.mxu1 %v16957_v20  ;;  %v17043_v20 = vld [vmem:[%s19844_s13 + $0x44] ss:$24 sps:$4 sm:$0xff]  }
 0x525   : > { %5035 = vmatpush1.bf16.msra.mxu0 %v16954_v19  ;;  %5079 = vmatprep.subr.bf16.mxu1 %v16965_v23  ;;  %v17040_v19 = vld [vmem:[%s19844_s13 + $0x33c] ss:$24 sps:$4 sm:$0xff]   ;;  %v17041_v23 = vld [vmem:[%s19844_s13 + $0x40] ss:$24 sps:$4 sm:$0xff]  }
 0x526   : > { %5036 = vmatprep.subr.bf16.mxu0 %v16962_v22  ;;  %v17038_v22 = vld [vmem:[%s19844_s13 + $0x338] ss:$24 sps:$4 sm:$0xff]  }
 0x528   : > { %5080 = vmatpush1.bf16.msra.mxu1 %v16963_v25  ;;  %v17049_v25 = vld [vmem:[%s19844_s13 + $0x74] ss:$24 sps:$4 sm:$0xff]  }
 0x529   : > { %5037 = vmatpush1.bf16.msra.mxu0 %v16960_v2  ;;  %5081 = vmatprep.subr.bf16.mxu1 %v16971_v27  ;;  %v17046_v2 = vld [vmem:[%s19844_s13 + $0x36c] ss:$24 sps:$4 sm:$0xff]   ;;  %v17047_v27 = vld [vmem:[%s19844_s13 + $0x70] ss:$24 sps:$4 sm:$0xff]  }
 0x52a   : > { %5038 = vmatprep.subr.bf16.mxu0 %v16968_v26  ;;  %v17044_v26 = vld [vmem:[%s19844_s13 + $0x368] ss:$24 sps:$4 sm:$0xff]  }
 0x52c   : > { %5082 = vmatpush1.bf16.msra.mxu1 %v16969_v29  ;;  %v17055_v29 = vld [vmem:[%s19844_s13 + $0xa4] ss:$24 sps:$4 sm:$0xff]  }
 0x52d   : > { %5039 = vmatpush1.bf16.msra.mxu0 %v16966_v28  ;;  %5083 = vmatprep.subr.bf16.mxu1 %v16977_v30  ;;  %v17052_v28 = vld [vmem:[%s19844_s13 + $0x39c] ss:$24 sps:$4 sm:$0xff]   ;;  %v17053_v30 = vld [vmem:[%s19844_s13 + $0xa0] ss:$24 sps:$4 sm:$0xff]  }
 0x52e   : > { %5040 = vmatprep.subr.bf16.mxu0 %v16974_v21  ;;  %v17050_v21 = vld [vmem:[%s19844_s13 + $0x398] ss:$24 sps:$4 sm:$0xff]  }
 0x530   : > { %5084 = vmatpush1.bf16.msra.mxu1 %v16975_v32  ;;  %v17056_v32 = vld [vmem:[%s19844_s13 + $0x3c8] ss:$24 sps:$4 sm:$0xff]  }
 0x531   : > { %5041 = vmatpush1.bf16.msra.mxu0 %v16972_v31  ;;  %5085 = vmatprep.subr.bf16.mxu1 %v16983_v36  ;;  %v17061_v31 = vld [vmem:[%s19844_s13 + $0xd4] ss:$24 sps:$4 sm:$0xff]   ;;  %v17062_v36 = vld [vmem:[%s19844_s13 + $0x3f8] ss:$24 sps:$4 sm:$0xff]  }
 0x532   : > { %5042 = vmatprep.subr.bf16.mxu0 %v16980_v33  ;;  %v17059_v33 = vld [vmem:[%s19844_s13 + $0xd0] ss:$24 sps:$4 sm:$0xff]  }
 0x534   : > { %5086 = vmatpush1.bf16.msra.mxu1 %v16981_v39  ;;  %v17070_v39 = vld [vmem:[%s19844_s13 + $0x42c] ss:$24 sps:$4 sm:$0xff]  }
 0x535   : > { %5043 = vmatpush1.bf16.msra.mxu0 %v16978_v38  ;;  %5087 = vmatprep.subr.bf16.mxu1 %v16989_v15  ;;  %v17065_v38 = vld [vmem:[%s19844_s13 + $0x100] ss:$24 sps:$4 sm:$0xff]  }
 0x536   : > { %5044 = vmatprep.subr.bf16.mxu0 %v16986_v40  ;;  %v17073_v40 = vld [vmem:[%s19844_s13 + $0x134] ss:$24 sps:$4 sm:$0xff]   ;;  %v17068_v15 = vld [vmem:[%s19844_s13 + $0x428] ss:$24 sps:$4 sm:$0xff]  }
 0x538   : > { %5088 = vmatpush1.bf16.msra.mxu1 %v16987_v41  ;;  %v17076_v41 = vld [vmem:[%s19844_s13 + $0x45c] ss:$24 sps:$4 sm:$0xff]  }
 0x539   : > { %5045 = vmatpush1.bf16.msra.mxu0 %v16984_v16  ;;  %5089 = vmatprep.subr.bf16.mxu1 %v16995_v45  ;;  %v17071_v16 = vld [vmem:[%s19844_s13 + $0x130] ss:$24 sps:$4 sm:$0xff]  }
 0x53a   : > { %5046 = vmatprep.subr.bf16.mxu0 %v16992_v42  ;;  %v17079_v42 = vld [vmem:[%s19844_s13 + $0x164] ss:$24 sps:$4 sm:$0xff]   ;;  %v17074_v45 = vld [vmem:[%s19844_s13 + $0x458] ss:$24 sps:$4 sm:$0xff]  }
 0x53c   : > { %5090 = vmatpush1.bf16.msra.mxu1 %v16993_v55  ;;  %v17082_v55 = vld [vmem:[%s19844_s13 + $0x48c] ss:$24 sps:$4 sm:$0xff]  }
 0x53d   : > { %5047 = vmatpush1.bf16.msra.mxu0 %v16990_v44  ;;  %5091 = vmatprep.subr.bf16.mxu1 %v17001_v47  ;;  %v17077_v44 = vld [vmem:[%s19844_s13 + $0x160] ss:$24 sps:$4 sm:$0xff]  }
 0x53e   : > { %5048 = vmatprep.subr.bf16.mxu0 %v16998_v46  ;;  %v17085_v46 = vld [vmem:[%s19844_s13 + $0x194] ss:$24 sps:$4 sm:$0xff]   ;;  %v17080_v47 = vld [vmem:[%s19844_s13 + $0x488] ss:$24 sps:$4 sm:$0xff]  }
 0x540   : > { %5092 = vmatpush1.bf16.msra.mxu1 %v16999_v49  ;;  %v17088_v49 = vld [vmem:[%s19844_s13 + $0x4bc] ss:$24 sps:$4 sm:$0xff]  }
 0x541   : > { %5049 = vmatpush1.bf16.msra.mxu0 %v16996_v48  ;;  %5093 = vmatprep.subr.bf16.mxu1 %v17007_v51  ;;  %v17083_v48 = vld [vmem:[%s19844_s13 + $0x190] ss:$24 sps:$4 sm:$0xff]  }
 0x542   : > { %5050 = vmatprep.subr.bf16.mxu0 %v17004_v50  ;;  %v17091_v50 = vld [vmem:[%s19844_s13 + $0x1c4] ss:$24 sps:$4 sm:$0xff]   ;;  %v17086_v51 = vld [vmem:[%s19844_s13 + $0x4b8] ss:$24 sps:$4 sm:$0xff]  }
 0x544   : > { %5094 = vmatpush1.bf16.msra.mxu1 %v17005_v53  ;;  %v17094_v53 = vld [vmem:[%s19844_s13 + $0x4ec] ss:$24 sps:$4 sm:$0xff]  }
 0x545   : > { %5051 = vmatpush1.bf16.msra.mxu0 %v17002_v52  ;;  %5095 = vmatprep.subr.bf16.mxu1 %v17013_v57  ;;  %v17089_v52 = vld [vmem:[%s19844_s13 + $0x1c0] ss:$24 sps:$4 sm:$0xff]  }
 0x546   : > { %5052 = vmatprep.subr.bf16.mxu0 %v17010_v56  ;;  %v17097_v56 = vld [vmem:[%s19844_s13 + $0x1f4] ss:$24 sps:$4 sm:$0xff]   ;;  %v17092_v57 = vld [vmem:[%s19844_s13 + $0x4e8] ss:$24 sps:$4 sm:$0xff]  }
 0x548   : > { %5096 = vmatpush1.bf16.msra.mxu1 %v17011_v59  ;;  %v17100_v59 = vld [vmem:[%s19844_s13 + $0x51c] ss:$24 sps:$4 sm:$0xff]  }
 0x549   : > { %5053 = vmatpush1.bf16.msra.mxu0 %v17008_v58  ;;  %5097 = vmatprep.subr.bf16.mxu1 %v17019_v61  ;;  %v17095_v58 = vld [vmem:[%s19844_s13 + $0x1f0] ss:$24 sps:$4 sm:$0xff]  }
 0x54a   : > { %5054 = vmatprep.subr.bf16.mxu0 %v17016_v60  ;;  %v17103_v60 = vld [vmem:[%s19844_s13 + $0x224] ss:$24 sps:$4 sm:$0xff]   ;;  %v17098_v61 = vld [vmem:[%s19844_s13 + $0x518] ss:$24 sps:$4 sm:$0xff]  }
 0x54c   : > { %5098 = vmatpush1.bf16.msra.mxu1 %v17017_v63  ;;  %v17106_v63 = vld [vmem:[%s19844_s13 + $0x54c] ss:$24 sps:$4 sm:$0xff]  }
 0x54d   : > { %5055 = vmatpush1.bf16.msra.mxu0 %v17014_v62  ;;  %5099 = vmatprep.subr.bf16.mxu1 %v17025_v1  ;;  %v17101_v62 = vld [vmem:[%s19844_s13 + $0x220] ss:$24 sps:$4 sm:$0xff]  }
 0x54e   : > { %5056 = vmatprep.subr.bf16.mxu0 %v17022_v0  ;;  %v17109_v0 = vld [vmem:[%s19844_s13 + $0x254] ss:$24 sps:$4 sm:$0xff]   ;;  %v17104_v1 = vld [vmem:[%s19844_s13 + $0x548] ss:$24 sps:$4 sm:$0xff]  }
 0x550   : > { %5100 = vmatpush1.bf16.msra.mxu1 %v17023_v5  ;;  %v17112_v5 = vld [vmem:[%s19844_s13 + $0x57c] ss:$24 sps:$4 sm:$0xff]  }
 0x551   : > { %5057 = vmatpush1.bf16.msra.mxu0 %v17020_v3  ;;  %5101 = vmatprep.subr.bf16.mxu1 %v17031_v9  ;;  %v17107_v3 = vld [vmem:[%s19844_s13 + $0x250] ss:$24 sps:$4 sm:$0xff]  }
 0x552   : > { %5058 = vmatprep.subr.bf16.mxu0 %v17028_v6  ;;  %v17115_v6 = vld [vmem:[%s19844_s13 + $0x284] ss:$24 sps:$4 sm:$0xff]   ;;  %v17110_v9 = vld [vmem:[%s19844_s13 + $0x578] ss:$24 sps:$4 sm:$0xff]  }
 0x554   : > { %5102 = vmatpush1.bf16.msra.mxu1 %v17029_v11  ;;  %v17118_v11 = vld [vmem:[%s19844_s13 + $0x5ac] ss:$24 sps:$4 sm:$0xff]  }
 0x555   : > { %5059 = vmatpush1.bf16.msra.mxu0 %v17026_v10  ;;  %5114 = vmatprep.subr.bf16.mxu1 %v17034_v14  ;;  %v17113_v10 = vld [vmem:[%s19844_s13 + $0x280] ss:$24 sps:$4 sm:$0xff]   ;;  %v17119_v14 = vld [vmem:[%s19844_s13 + $0x2b0] ss:$24 sps:$4 sm:$0xff]  }
 0x556   : > { %5200 = vmatprep.subr.bf16.mxu0 %v17037_v13  ;;  %v17124_v13 = vld [vmem:[%s19844_s13 + $0x5dc] ss:$24 sps:$4 sm:$0xff]  }
 0x557   : > { %5104 = vmatmul.mubr.bf16.vlgmr.msra.gmra.mrb[4].mxu1 %v20001_v7 }
 0x558   : > { %5061 = vmatmul.mubr.bf16.vlgmr.msra.gmra.mrb[0].mxu0 %v20077_v4  ;;  %5115 = vmatpush1.bf16.msra.mxu1 %v17032_v17  ;;  %v17127_v17 = vld [vmem:[%s19844_s13 + $0x2e4] ss:$24 sps:$4 sm:$0xff]  }
 0x559   : > { %5201 = vmatpush1.bf16.msra.mxu0 %v17035_v18  ;;  %5116 = vmatprep.subr.bf16.mxu1 %v17040_v19  ;;  %v17122_v18 = vld [vmem:[%s19844_s13 + $0x5d8] ss:$24 sps:$4 sm:$0xff]  }
 0x55a   : > { %5202 = vmatprep.subr.bf16.mxu0 %v17043_v20  ;;  %5146 = vmatprep.mubr.bf16.mxu1 %v19974_v43  ;;  %v17125_v19 = vld [vmem:[%s19844_s13 + $0x2e0] ss:$24 sps:$4 sm:$0xff]   ;;  %v17130_v20 = vld [vmem:[%s19844_s13 + $0x60c] ss:$24 sps:$4 sm:$0xff]  }
 0x55b   : > { %5232 = vmatprep.mubr.bf16.mxu0 %v19972_v54  ;;  %v17058_v54 = vld [vmem:[%s19844_s13 + $0x3cc] ss:$24 sps:$4 sm:$0xff]  }
 0x55c   : > { %5117 = vmatpush1.bf16.msra.mxu1 %v17038_v22  ;;  %v17133_v22 = vld [vmem:[%s19844_s13 + $0x314] ss:$24 sps:$4 sm:$0xff]  }
 0x55d   : > { %5203 = vmatpush1.bf16.msra.mxu0 %v17041_v23  ;;  %5118 = vmatprep.subr.bf16.mxu1 %v17046_v2  ;;  %v17128_v23 = vld [vmem:[%s19844_s13 + $0x608] ss:$24 sps:$4 sm:$0xff]  }
 0x55e   : > { %5204 = vmatprep.subr.bf16.mxu0 %v17049_v25  ;;  %v17131_v2 = vld [vmem:[%s19844_s13 + $0x310] ss:$24 sps:$4 sm:$0xff]   ;;  %v17136_v25 = vld [vmem:[%s19844_s13 + $0x63c] ss:$24 sps:$4 sm:$0xff]  }
 0x560   : > { %5119 = vmatpush1.bf16.msra.mxu1 %v17044_v26  ;;  %v17139_v26 = vld [vmem:[%s19844_s13 + $0x344] ss:$24 sps:$4 sm:$0xff]  }
 0x561   : > { %5205 = vmatpush1.bf16.msra.mxu0 %v17047_v27  ;;  %5120 = vmatprep.subr.bf16.mxu1 %v17052_v28  ;;  %v17134_v27 = vld [vmem:[%s19844_s13 + $0x638] ss:$24 sps:$4 sm:$0xff]  }
 0x562   : > { %5206 = vmatprep.subr.bf16.mxu0 %v17055_v29  ;;  %v17137_v28 = vld [vmem:[%s19844_s13 + $0x340] ss:$24 sps:$4 sm:$0xff]   ;;  %v17142_v29 = vld [vmem:[%s19844_s13 + $0x66c] ss:$24 sps:$4 sm:$0xff]  }
 0x564   : > { %5121 = vmatpush1.bf16.msra.mxu1 %v17050_v21  ;;  %v17145_v21 = vld [vmem:[%s19844_s13 + $0x374] ss:$24 sps:$4 sm:$0xff]  }
 0x565   : > { %5207 = vmatpush1.bf16.msra.mxu0 %v17053_v30  ;;  %5122 = vmatprep.subr.bf16.mxu1 %v17058_v54  ;;  %v17140_v30 = vld [vmem:[%s19844_s13 + $0x668] ss:$24 sps:$4 sm:$0xff]   ;;  %v17148_v54 = vld [vmem:[%s19844_s13 + $0x69c] ss:$24 sps:$4 sm:$0xff]  }
 0x566   : > { %5208 = vmatprep.subr.bf16.mxu0 %v17061_v31  ;;  %v17151_v31 = vld [vmem:[%s19844_s13 + $0x3a4] ss:$24 sps:$4 sm:$0xff]  }
 0x568   : > { %5123 = vmatpush1.bf16.msra.mxu1 %v17056_v32  ;;  %v17146_v32 = vld [vmem:[%s19844_s13 + $0x698] ss:$24 sps:$4 sm:$0xff]  }
 0x569   : > { %5209 = vmatpush1.bf16.msra.mxu0 %v17059_v33  ;;  %5124 = vmatprep.subr.bf16.mxu1 %v17064_v34  ;;  %v17149_v33 = vld [vmem:[%s19844_s13 + $0x3a0] ss:$24 sps:$4 sm:$0xff]   ;;  %v17157_v34 = vld [vmem:[%s19844_s13 + $0x3d4] ss:$24 sps:$4 sm:$0xff]  }
 0x56a   : > { %5210 = vmatprep.subr.bf16.mxu0 %v17067_v35  ;;  %v17152_v35 = vld [vmem:[%s19844_s13 + $0x6c8] ss:$24 sps:$4 sm:$0xff]  }
 0x56c   : > { %5125 = vmatpush1.bf16.msra.mxu1 %v17062_v36  ;;  %v17155_v36 = vld [vmem:[%s19844_s13 + $0x3d0] ss:$24 sps:$4 sm:$0xff]  }
 0x56d   : > { %5211 = vmatpush1.bf16.msra.mxu0 %v17065_v38  ;;  %5126 = vmatprep.subr.bf16.mxu1 %v17070_v39  ;;  %v17160_v38 = vld [vmem:[%s19844_s13 + $0x6fc] ss:$24 sps:$4 sm:$0xff]  }
 0x56e   : > { %5212 = vmatprep.subr.bf16.mxu0 %v17073_v40  ;;  %v17163_v39 = vld [vmem:[%s19844_s13 + $0x404] ss:$24 sps:$4 sm:$0xff]   ;;  %v17158_v40 = vld [vmem:[%s19844_s13 + $0x6f8] ss:$24 sps:$4 sm:$0xff]  }
 0x570   : > { %5127 = vmatpush1.bf16.msra.mxu1 %v17068_v15  ;;  %v17161_v15 = vld [vmem:[%s19844_s13 + $0x400] ss:$24 sps:$4 sm:$0xff]  }
 0x571   : > { %5213 = vmatpush1.bf16.msra.mxu0 %v17071_v16  ;;  %5128 = vmatprep.subr.bf16.mxu1 %v17076_v41  ;;  %v17166_v16 = vld [vmem:[%s19844_s13 + $0x72c] ss:$24 sps:$4 sm:$0xff]  }
 0x572   : > { %5214 = vmatprep.subr.bf16.mxu0 %v17079_v42  ;;  %v17169_v41 = vld [vmem:[%s19844_s13 + $0x434] ss:$24 sps:$4 sm:$0xff]   ;;  %v17164_v42 = vld [vmem:[%s19844_s13 + $0x728] ss:$24 sps:$4 sm:$0xff]  }
 0x574   : > { %5129 = vmatpush1.bf16.msra.mxu1 %v17074_v45  ;;  %v17167_v45 = vld [vmem:[%s19844_s13 + $0x430] ss:$24 sps:$4 sm:$0xff]  }
 0x575   : > { %5215 = vmatpush1.bf16.msra.mxu0 %v17077_v44  ;;  %5130 = vmatprep.subr.bf16.mxu1 %v17082_v55  ;;  %v17172_v44 = vld [vmem:[%s19844_s13 + $0x75c] ss:$24 sps:$4 sm:$0xff]  }
 0x576   : > { %5216 = vmatprep.subr.bf16.mxu0 %v17085_v46  ;;  %v17175_v55 = vld [vmem:[%s19844_s13 + $0x464] ss:$24 sps:$4 sm:$0xff]   ;;  %v17170_v46 = vld [vmem:[%s19844_s13 + $0x758] ss:$24 sps:$4 sm:$0xff]  }
 0x578   : > { %5131 = vmatpush1.bf16.msra.mxu1 %v17080_v47  ;;  %v17173_v47 = vld [vmem:[%s19844_s13 + $0x460] ss:$24 sps:$4 sm:$0xff]  }
 0x579   : > { %5217 = vmatpush1.bf16.msra.mxu0 %v17083_v48  ;;  %5132 = vmatprep.subr.bf16.mxu1 %v17088_v49  ;;  %v17178_v48 = vld [vmem:[%s19844_s13 + $0x78c] ss:$24 sps:$4 sm:$0xff]  }
 0x57a   : > { %5218 = vmatprep.subr.bf16.mxu0 %v17091_v50  ;;  %v17181_v49 = vld [vmem:[%s19844_s13 + $0x494] ss:$24 sps:$4 sm:$0xff]   ;;  %v17176_v50 = vld [vmem:[%s19844_s13 + $0x788] ss:$24 sps:$4 sm:$0xff]  }
 0x57c   : > { %5133 = vmatpush1.bf16.msra.mxu1 %v17086_v51  ;;  %v17179_v51 = vld [vmem:[%s19844_s13 + $0x490] ss:$24 sps:$4 sm:$0xff]  }
 0x57d   : > { %5219 = vmatpush1.bf16.msra.mxu0 %v17089_v52  ;;  %5134 = vmatprep.subr.bf16.mxu1 %v17094_v53  ;;  %v17184_v52 = vld [vmem:[%s19844_s13 + $0x7bc] ss:$24 sps:$4 sm:$0xff]  }
 0x57e   : > { %5220 = vmatprep.subr.bf16.mxu0 %v17097_v56  ;;  %v17187_v53 = vld [vmem:[%s19844_s13 + $0x4c4] ss:$24 sps:$4 sm:$0xff]   ;;  %v17182_v56 = vld [vmem:[%s19844_s13 + $0x7b8] ss:$24 sps:$4 sm:$0xff]  }
 0x580   : > { %5135 = vmatpush1.bf16.msra.mxu1 %v17092_v57  ;;  %v17185_v57 = vld [vmem:[%s19844_s13 + $0x4c0] ss:$24 sps:$4 sm:$0xff]  }
 0x581   : > { %5221 = vmatpush1.bf16.msra.mxu0 %v17095_v58  ;;  %5136 = vmatprep.subr.bf16.mxu1 %v17100_v59  ;;  %v17190_v58 = vld [vmem:[%s19844_s13 + $0x7ec] ss:$24 sps:$4 sm:$0xff]  }
 0x582   : > { %5222 = vmatprep.subr.bf16.mxu0 %v17103_v60  ;;  %v17193_v59 = vld [vmem:[%s19844_s13 + $0x4f4] ss:$24 sps:$4 sm:$0xff]   ;;  %v17188_v60 = vld [vmem:[%s19844_s13 + $0x7e8] ss:$24 sps:$4 sm:$0xff]  }
 0x584   : > { %5137 = vmatpush1.bf16.msra.mxu1 %v17098_v61  ;;  %v17191_v61 = vld [vmem:[%s19844_s13 + $0x4f0] ss:$24 sps:$4 sm:$0xff]  }
 0x585   : > { %5223 = vmatpush1.bf16.msra.mxu0 %v17101_v62  ;;  %5138 = vmatprep.subr.bf16.mxu1 %v17106_v63  ;;  %v17196_v62 = vld [vmem:[%s19844_s13 + $0x81c] ss:$24 sps:$4 sm:$0xff]  }
 0x586   : > { %5224 = vmatprep.subr.bf16.mxu0 %v17109_v0  ;;  %v17199_v63 = vld [vmem:[%s19844_s13 + $0x524] ss:$24 sps:$4 sm:$0xff]   ;;  %v17194_v0 = vld [vmem:[%s19844_s13 + $0x818] ss:$24 sps:$4 sm:$0xff]  }
 0x588   : > { %5139 = vmatpush1.bf16.msra.mxu1 %v17104_v1  ;;  %v17197_v1 = vld [vmem:[%s19844_s13 + $0x520] ss:$24 sps:$4 sm:$0xff]  }
 0x589   : > { %5225 = vmatpush1.bf16.msra.mxu0 %v17107_v3  ;;  %5140 = vmatprep.subr.bf16.mxu1 %v17112_v5  ;;  %v17202_v3 = vld [vmem:[%s19844_s13 + $0x84c] ss:$24 sps:$4 sm:$0xff]  }
 0x58a   : > { %5226 = vmatprep.subr.bf16.mxu0 %v17115_v6  ;;  %v17205_v5 = vld [vmem:[%s19844_s13 + $0x554] ss:$24 sps:$4 sm:$0xff]   ;;  %v17200_v6 = vld [vmem:[%s19844_s13 + $0x848] ss:$24 sps:$4 sm:$0xff]  }
 0x58c   : > { %5141 = vmatpush1.bf16.msra.mxu1 %v17110_v9  ;;  %v17203_v9 = vld [vmem:[%s19844_s13 + $0x550] ss:$24 sps:$4 sm:$0xff]  }
 0x58d   : > { %5227 = vmatpush1.bf16.msra.mxu0 %v17113_v10  ;;  %5142 = vmatprep.subr.bf16.mxu1 %v17118_v11  ;;  %v17208_v10 = vld [vmem:[%s19844_s13 + $0x87c] ss:$24 sps:$4 sm:$0xff]  }
 0x58e   : > { %5228 = vmatprep.subr.bf16.mxu0 %v17121_v12  ;;  %v17211_v11 = vld [vmem:[%s19844_s13 + $0x584] ss:$24 sps:$4 sm:$0xff]   ;;  %v17206_v12 = vld [vmem:[%s19844_s13 + $0x878] ss:$24 sps:$4 sm:$0xff]  }
 0x590   : > { %5143 = vmatpush1.bf16.msra.mxu1 %v17116_v24  ;;  %v17209_v24 = vld [vmem:[%s19844_s13 + $0x580] ss:$24 sps:$4 sm:$0xff]  }
 0x591   : > { %5229 = vmatpush1.bf16.msra.mxu0 %v17119_v14  ;;  %5144 = vmatprep.subr.bf16.mxu1 %v17124_v13  ;;  %v17214_v14 = vld [vmem:[%s19844_s13 + $0x8ac] ss:$24 sps:$4 sm:$0xff]  }
 0x592   : > { %5230 = vmatprep.subr.bf16.mxu0 %v17127_v17  ;;  %v17217_v13 = vld [vmem:[%s19844_s13 + $0x5b4] ss:$24 sps:$4 sm:$0xff]   ;;  %v17212_v17 = vld [vmem:[%s19844_s13 + $0x8a8] ss:$24 sps:$4 sm:$0xff]  }
 0x594   : > { %5145 = vmatpush1.bf16.msra.mxu1 %v17122_v18  ;;  %v17215_v18 = vld [vmem:[%s19844_s13 + $0x5b0] ss:$24 sps:$4 sm:$0xff]  }
 0x595   : > { %5231 = vmatpush1.bf16.msra.mxu0 %v17125_v19  ;;  %5157 = vmatprep.subr.bf16.mxu1 %v17130_v20  ;;  %v17220_v19 = vld [vmem:[%s19844_s13 + $0x8dc] ss:$24 sps:$4 sm:$0xff]  }
 0x596   : > { %5243 = vmatprep.subr.bf16.mxu0 %v17133_v22  ;;  %v17223_v20 = vld [vmem:[%s19844_s13 + $0x5e4] ss:$24 sps:$4 sm:$0xff]   ;;  %v17218_v22 = vld [vmem:[%s19844_s13 + $0x8d8] ss:$24 sps:$4 sm:$0xff]  }
 0x597   : > { %5147 = vmatmul.mubr.bf16.vlgmr.msra.gmra.mrb[4].mxu1 %v20003_v8 }
 0x598   : > { %5233 = vmatmul.mubr.bf16.vlgmr.msra.gmra.mrb[4].mxu0 %v20001_v7  ;;  %5158 = vmatpush1.bf16.msra.mxu1 %v17128_v23  ;;  %v17143_v7 = vld [vmem:[%s19844_s13 + $0x370] ss:$24 sps:$4 sm:$0xff]   ;;  %v17221_v23 = vld [vmem:[%s19844_s13 + $0x5e0] ss:$24 sps:$4 sm:$0xff]  }
 0x599   : > { %5244 = vmatpush1.bf16.msra.mxu0 %v17131_v2  ;;  %5159 = vmatprep.subr.bf16.mxu1 %v17136_v25  ;;  %v17226_v2 = vld [vmem:[%s19844_s13 + $0x614] ss:$24 sps:$4 sm:$0xff]   ;;  %v17229_v25 = vld [vmem:[%s19844_s13 + $0x904] ss:$24 sps:$4 sm:$0xff]  }
 0x59a   : > { %5245 = vmatprep.subr.bf16.mxu0 %v17139_v26  ;;  %5189 = vmatprep.mubr.bf16.mxu1 %v20036_v37  ;;  %v17224_v26 = vld [vmem:[%s19844_s13 + $0x610] ss:$24 sps:$4 sm:$0xff]  }
 0x59b   : > { %5275 = vmatprep.mubr.bf16.mxu0 %v19974_v43  ;;  %v17154_v43 = vld [vmem:[%s19844_s13 + $0x6cc] ss:$24 sps:$4 sm:$0xff]  }
 0x59c   : > { %5160 = vmatpush1.bf16.msra.mxu1 %v17134_v27  ;;  %v14516_v27 = vld [vmem:[%s19829_s6 + $0x68] sm:$0xff] }
 0x59d   : > { %5246 = vmatpush1.bf16.msra.mxu0 %v17137_v28  ;;  %5161 = vmatprep.subr.bf16.mxu1 %v17142_v29  ;;  %v14522_v28 = vld [vmem:[%s19829_s6 + $0x98] sm:$0xff]  ;;  %v17227_v29 = vld [vmem:[%s19844_s13 + $0x900] ss:$24 sps:$4 sm:$0xff]  }
 0x59e   : > { %5247 = vmatprep.subr.bf16.mxu0 %v17145_v21  ;;  %v17232_v21 = vld [vmem:[%s19844_s13 + $0x644] ss:$24 sps:$4 sm:$0xff]  }
 0x5a0   : > { %5162 = vmatpush1.bf16.msra.mxu1 %v17140_v30  ;;  %v17235_v30 = vld [vmem:[%s19844_s13 + $0x934] ss:$24 sps:$4 sm:$0xff]  }
 0x5a1   : > { %5248 = vmatpush1.bf16.msra.mxu0 %v17143_v7  ;;  %5163 = vmatprep.subr.bf16.mxu1 %v17148_v54  ;;  %v20221_v7 = vpack.c.bf16 %v14522_v28, %v14516_v27  ;;  %v17230_v54 = vld [vmem:[%s19844_s13 + $0x640] ss:$24 sps:$4 sm:$0xff]   ;;  %v17316_v28 = vld [vmem:[%s19844_s13 + $0x8e4] ss:$24 sps:$4 sm:$0xff]  }
 0x5a2   : > { %5249 = vmatprep.subr.bf16.mxu0 %v17151_v31  ;;  %v17233_v31 = vld [vmem:[%s19844_s13 + $0x930] ss:$24 sps:$4 sm:$0xff]   ;;  %v17311_v27 = vld [vmem:[%s19844_s13 + $0xba0] ss:$24 sps:$4 sm:$0xff]  }
 0x5a4   : > { %5164 = vmatpush1.bf16.msra.mxu1 %v17146_v32  ;;  %v17238_v32 = vld [vmem:[%s19844_s13 + $0x674] ss:$24 sps:$4 sm:$0xff]  }
 0x5a5   : > { %5250 = vmatpush1.bf16.msra.mxu0 %v17149_v33  ;;  %5165 = vmatprep.subr.bf16.mxu1 %v17154_v43  ;;  %v17241_v33 = vld [vmem:[%s19844_s13 + $0x964] ss:$24 sps:$4 sm:$0xff]   ;;  %v17239_v43 = vld [vmem:[%s19844_s13 + $0x960] ss:$24 sps:$4 sm:$0xff]  }
 0x5a6   : > { %5251 = vmatprep.subr.bf16.mxu0 %v17157_v34  ;;  %v17244_v34 = vld [vmem:[%s19844_s13 + $0x6a4] ss:$24 sps:$4 sm:$0xff]  }
 0x5a8   : > { %5166 = vmatpush1.bf16.msra.mxu1 %v17152_v35  ;;  %v17247_v35 = vld [vmem:[%s19844_s13 + $0x994] ss:$24 sps:$4 sm:$0xff]  }
 0x5a9   : > { %5252 = vmatpush1.bf16.msra.mxu0 %v17155_v36  ;;  %5167 = vmatprep.subr.bf16.mxu1 %v17160_v38  ;;  %v17242_v36 = vld [vmem:[%s19844_s13 + $0x6a0] ss:$24 sps:$4 sm:$0xff]   ;;  %v17250_v38 = vld [vmem:[%s19844_s13 + $0x6d4] ss:$24 sps:$4 sm:$0xff]  }
 0x5aa   : > { %5253 = vmatprep.subr.bf16.mxu0 %v17163_v39  ;;  %v17253_v39 = vld [vmem:[%s19844_s13 + $0x9c4] ss:$24 sps:$4 sm:$0xff]  }
 0x5ac   : > { %5168 = vmatpush1.bf16.msra.mxu1 %v17158_v40  ;;  %v17248_v40 = vld [vmem:[%s19844_s13 + $0x6d0] ss:$24 sps:$4 sm:$0xff]  }
 0x5ad   : > { %5254 = vmatpush1.bf16.msra.mxu0 %v17161_v15  ;;  %5169 = vmatprep.subr.bf16.mxu1 %v17166_v16  ;;  %v17251_v15 = vld [vmem:[%s19844_s13 + $0x9c0] ss:$24 sps:$4 sm:$0xff]   ;;  %v17256_v16 = vld [vmem:[%s19844_s13 + $0x704] ss:$24 sps:$4 sm:$0xff]  }
 0x5ae   : > { %5255 = vmatprep.subr.bf16.mxu0 %v17169_v41  ;;  %v17259_v41 = vld [vmem:[%s19844_s13 + $0x9f4] ss:$24 sps:$4 sm:$0xff]  }
 0x5b0   : > { %5170 = vmatpush1.bf16.msra.mxu1 %v17164_v42  ;;  %v17254_v42 = vld [vmem:[%s19844_s13 + $0x700] ss:$24 sps:$4 sm:$0xff]  }
 0x5b1   : > { %5256 = vmatpush1.bf16.msra.mxu0 %v17167_v45  ;;  %5171 = vmatprep.subr.bf16.mxu1 %v17172_v44  ;;  %v17257_v45 = vld [vmem:[%s19844_s13 + $0x9f0] ss:$24 sps:$4 sm:$0xff]   ;;  %v17262_v44 = vld [vmem:[%s19844_s13 + $0x734] ss:$24 sps:$4 sm:$0xff]  }
 0x5b2   : > { %5257 = vmatprep.subr.bf16.mxu0 %v17175_v55  ;;  %v17265_v55 = vld [vmem:[%s19844_s13 + $0xa24] ss:$24 sps:$4 sm:$0xff]  }
 0x5b4   : > { %5172 = vmatpush1.bf16.msra.mxu1 %v17170_v46 }
 0x5b5   : > { %5258 = vmatpush1.bf16.msra.mxu0 %v17173_v47  ;;  %5173 = vmatprep.subr.bf16.mxu1 %v17178_v48  ;;  %v17260_v48 = vld [vmem:[%s19844_s13 + $0x730] ss:$24 sps:$4 sm:$0xff]  }
 0x5b6   : > { %5259 = vmatprep.subr.bf16.mxu0 %v17181_v49  ;;  %v17263_v49 = vld [vmem:[%s19844_s13 + $0xa20] ss:$24 sps:$4 sm:$0xff]  }
 0x5b8   : > { %5174 = vmatpush1.bf16.msra.mxu1 %v17176_v50 }
 0x5b9   : > { %5260 = vmatpush1.bf16.msra.mxu0 %v17179_v51  ;;  %5175 = vmatprep.subr.bf16.mxu1 %v17184_v52  ;;  %v17268_v51 = vld [vmem:[%s19844_s13 + $0x764] ss:$24 sps:$4 sm:$0xff]   ;;  %v17271_v52 = vld [vmem:[%s19844_s13 + $0xa54] ss:$24 sps:$4 sm:$0xff]  }
 0x5ba   : > { %5261 = vmatprep.subr.bf16.mxu0 %v17187_v53 }
 0x5bc   : > { %5176 = vmatpush1.bf16.msra.mxu1 %v17182_v56  ;;  %v17266_v56 = vld [vmem:[%s19844_s13 + $0x760] ss:$24 sps:$4 sm:$0xff]  }
 0x5bd   : > { %5262 = vmatpush1.bf16.msra.mxu0 %v17185_v57  ;;  %5177 = vmatprep.subr.bf16.mxu1 %v17190_v58  ;;  %v17269_v57 = vld [vmem:[%s19844_s13 + $0xa50] ss:$24 sps:$4 sm:$0xff]   ;;  %v17274_v58 = vld [vmem:[%s19844_s13 + $0x794] ss:$24 sps:$4 sm:$0xff]  }
 0x5be   : > { %5263 = vmatprep.subr.bf16.mxu0 %v17193_v59  ;;  %v17277_v59 = vld [vmem:[%s19844_s13 + $0xa84] ss:$24 sps:$4 sm:$0xff]  }
 0x5c0   : > { %5178 = vmatpush1.bf16.msra.mxu1 %v17188_v60  ;;  %v17272_v60 = vld [vmem:[%s19844_s13 + $0x790] ss:$24 sps:$4 sm:$0xff]  }
 0x5c1   : > { %5264 = vmatpush1.bf16.msra.mxu0 %v17191_v61  ;;  %5179 = vmatprep.subr.bf16.mxu1 %v17196_v62  ;;  %v17275_v61 = vld [vmem:[%s19844_s13 + $0xa80] ss:$24 sps:$4 sm:$0xff]   ;;  %v17280_v62 = vld [vmem:[%s19844_s13 + $0x7c4] ss:$24 sps:$4 sm:$0xff]  }
 0x5c2   : > { %5265 = vmatprep.subr.bf16.mxu0 %v17199_v63  ;;  %v17283_v63 = vld [vmem:[%s19844_s13 + $0xab4] ss:$24 sps:$4 sm:$0xff]  }
 0x5c4   : > { %5180 = vmatpush1.bf16.msra.mxu1 %v17194_v0  ;;  %v17278_v0 = vld [vmem:[%s19844_s13 + $0x7c0] ss:$24 sps:$4 sm:$0xff]  }
 0x5c5   : > { %5266 = vmatpush1.bf16.msra.mxu0 %v17197_v1  ;;  %5181 = vmatprep.subr.bf16.mxu1 %v17202_v3  ;;  %v17281_v1 = vld [vmem:[%s19844_s13 + $0xab0] ss:$24 sps:$4 sm:$0xff]   ;;  %v17286_v3 = vld [vmem:[%s19844_s13 + $0x7f4] ss:$24 sps:$4 sm:$0xff]  }
 0x5c6   : > { %5267 = vmatprep.subr.bf16.mxu0 %v17205_v5  ;;  %v17289_v5 = vld [vmem:[%s19844_s13 + $0xae4] ss:$24 sps:$4 sm:$0xff]  }
 0x5c8   : > { %5182 = vmatpush1.bf16.msra.mxu1 %v17200_v6  ;;  %v17284_v6 = vld [vmem:[%s19844_s13 + $0x7f0] ss:$24 sps:$4 sm:$0xff]  }
 0x5c9   : > { %5268 = vmatpush1.bf16.msra.mxu0 %v17203_v9  ;;  %5183 = vmatprep.subr.bf16.mxu1 %v17208_v10  ;;  %v17287_v9 = vld [vmem:[%s19844_s13 + $0xae0] ss:$24 sps:$4 sm:$0xff]   ;;  %v17292_v10 = vld [vmem:[%s19844_s13 + $0x824] ss:$24 sps:$4 sm:$0xff]  }
 0x5ca   : > { %5269 = vmatprep.subr.bf16.mxu0 %v17211_v11  ;;  %v17295_v11 = vld [vmem:[%s19844_s13 + $0xb14] ss:$24 sps:$4 sm:$0xff]  }
 0x5cc   : > { %5184 = vmatpush1.bf16.msra.mxu1 %v17206_v12  ;;  %v17290_v12 = vld [vmem:[%s19844_s13 + $0x820] ss:$24 sps:$4 sm:$0xff]  }
 0x5cd   : > { %5270 = vmatpush1.bf16.msra.mxu0 %v17209_v24  ;;  %5185 = vmatprep.subr.bf16.mxu1 %v17214_v14  ;;  %v17293_v24 = vld [vmem:[%s19844_s13 + $0xb10] ss:$24 sps:$4 sm:$0xff]   ;;  %v17298_v14 = vld [vmem:[%s19844_s13 + $0x854] ss:$24 sps:$4 sm:$0xff]  }
 0x5ce   : > { %5271 = vmatprep.subr.bf16.mxu0 %v17217_v13  ;;  %v17301_v13 = vld [vmem:[%s19844_s13 + $0xb44] ss:$24 sps:$4 sm:$0xff]  }
 0x5d0   : > { %5186 = vmatpush1.bf16.msra.mxu1 %v17212_v17  ;;  %v17296_v17 = vld [vmem:[%s19844_s13 + $0x850] ss:$24 sps:$4 sm:$0xff]  }
 0x5d1   : > { %5272 = vmatpush1.bf16.msra.mxu0 %v17215_v18  ;;  %5187 = vmatprep.subr.bf16.mxu1 %v17220_v19  ;;  %v17299_v18 = vld [vmem:[%s19844_s13 + $0xb40] ss:$24 sps:$4 sm:$0xff]   ;;  %v17304_v19 = vld [vmem:[%s19844_s13 + $0x884] ss:$24 sps:$4 sm:$0xff]  }
 0x5d2   : > { %5273 = vmatprep.subr.bf16.mxu0 %v17223_v20  ;;  %v17307_v20 = vld [vmem:[%s19844_s13 + $0xb74] ss:$24 sps:$4 sm:$0xff]  }
 0x5d4   : > { %5188 = vmatpush1.bf16.msra.mxu1 %v17218_v22  ;;  %v17302_v22 = vld [vmem:[%s19844_s13 + $0x880] ss:$24 sps:$4 sm:$0xff]  }
 0x5d5   : > { %5274 = vmatpush1.bf16.msra.mxu0 %v17221_v23  ;;  %7389 = vmatprep.subr.bf16.mxu1 %v17229_v25  ;;  %v17305_v23 = vld [vmem:[%s19844_s13 + $0xb70] ss:$24 sps:$4 sm:$0xff]   ;;  %v17313_v25 = vld [vmem:[%s19844_s13 + $0xba4] ss:$24 sps:$4 sm:$0xff]  }
 0x5d6   : > { %5286 = vmatprep.subr.bf16.mxu0 %v17226_v2  ;;  %v17310_v2 = vld [vmem:[%s19844_s13 + $0x8b4] ss:$24 sps:$4 sm:$0xff]  }
 0x5d7   : > { %5190 = vmatmul.mubr.bf16.vlgmr.msra.gmra.mrb[4].mxu1 %v20077_v4 }
 0x5d8   : > { %5276 = vmatmul.mubr.bf16.vlgmr.msra.gmra.mrb[4].mxu0 %v20003_v8  ;;  %7390 = vmatpush1.bf16.msra.mxu1 %v17227_v29  ;;  %v17236_v8 = vld [vmem:[%s19844_s13 + $0x670] ss:$24 sps:$4 sm:$0xff]   ;;  %v17319_v29 = vld [vmem:[%s19844_s13 + $0xbd4] ss:$24 sps:$4 sm:$0xff]  }
 0x5d9   : > { %5287 = vmatpush1.bf16.msra.mxu0 %v17224_v26  ;;  %7391 = vmatprep.subr.bf16.mxu1 %v17235_v30  ;;  %v17308_v26 = vld [vmem:[%s19844_s13 + $0x8b0] ss:$24 sps:$4 sm:$0xff]  }
 0x5da   : > { %5288 = vmatprep.subr.bf16.mxu0 %v17232_v21  ;;  %5318 = vmatprep.mubr.bf16.mxu0 %v20036_v37  ;;  %v17245_v37 = vld [vmem:[%s19844_s13 + $0x990] ss:$24 sps:$4 sm:$0xff]   ;;  %v17314_v21 = vld [vmem:[%s19844_s13 + $0x8e0] ss:$24 sps:$4 sm:$0xff]  }
 0x5db   : > { %7421 = vmatprep.mubr.bf16.mxu1 %v20221_v7  ;;  %v17317_v30 = vld [vmem:[%s19844_s13 + $0xbd0] ss:$24 sps:$4 sm:$0xff]  }
 0x5dc   : > { %7392 = vmatpush1.bf16.msra.mxu1 %v17233_v31  ;;  %v14521_v31 = vld [vmem:[%s19829_s6 + $0x90] sm:$0xff] }
 0x5dd   : > { %5289 = vmatpush1.bf16.msra.mxu0 %v17230_v54  ;;  %7393 = vmatprep.subr.bf16.mxu1 %v17241_v33  ;;  %v14515_v54 = vld [vmem:[%s19829_s6 + $0x60] sm:$0xff]  ;;  %v17325_v33 = vld [vmem:[%s19844_s13 + $0x90c] ss:$24 sps:$4 sm:$0xff]  }
 0x5de   : > { %5290 = vmatprep.subr.bf16.mxu0 %v17238_v32  ;;  %v17322_v32 = vld [vmem:[%s19844_s13 + $0xc04] ss:$24 sps:$4 sm:$0xff]  }
 0x5e0   : > { %7394 = vmatpush1.bf16.msra.mxu1 %v17239_v43  ;;  %v14518_v43 = vld [vmem:[%s19829_s6 + $0x78] sm:$0xff] }
 0x5e1   : > { %5291 = vmatpush1.bf16.msra.mxu0 %v17236_v8  ;;  %7395 = vmatprep.subr.bf16.mxu1 %v17247_v35  ;;  %v20297_v8 = vpack.c.bf16 %v14521_v31, %v14515_v54  ;;  %v17320_v35 = vld [vmem:[%s19844_s13 + $0xc00] ss:$24 sps:$4 sm:$0xff]  }
 0x5e2   : > { %5292 = vmatprep.subr.bf16.mxu0 %v17244_v34  ;;  %v14524_v34 = vld [vmem:[%s19829_s6 + $0xa8] sm:$0xff]  ;;  %v3464_v54 = vld [vmem:[%s19852_s8] sm:$0x3f] }
 0x5e4   : > { %7396 = vmatpush1.bf16.msra.mxu1 %v17245_v37  ;;  %v17328_v37 = vld [vmem:[%s19844_s13 + $0xc34] ss:$24 sps:$4 sm:$0xff]  }
 0x5e5   : > { %5293 = vmatpush1.bf16.msra.mxu0 %v17242_v36  ;;  %7397 = vmatprep.subr.bf16.mxu1 %v17253_v39  ;;  %v17323_v36 = vld [vmem:[%s19844_s13 + $0x908] ss:$24 sps:$4 sm:$0xff]   ;;  %v20305_v39 = vpack.c.bf16 %v14524_v34, %v14518_v43 }
 0x5e6   : > { %5294 = vmatprep.subr.bf16.mxu0 %v17250_v38  ;;  %v17331_v38 = vld [vmem:[%s19844_s13 + $0x93c] ss:$24 sps:$4 sm:$0xff]   ;;  %v17374_v34 = vld [vmem:[%s19844_s13 + $0xdb0] ss:$24 sps:$4 sm:$0xff]  }
 0x5e8   : > { %7398 = vmatpush1.bf16.msra.mxu1 %v17251_v15  ;;  %v17326_v15 = vld [vmem:[%s19844_s13 + $0xc30] ss:$24 sps:$4 sm:$0xff]  }
 0x5e9   : > { %5295 = vmatpush1.bf16.msra.mxu0 %v17248_v40  ;;  %7399 = vmatprep.subr.bf16.mxu1 %v17259_v41  ;;  %v3472_v40 = vlaneseq  ;;  %v17334_v41 = vld [vmem:[%s19844_s13 + $0xc64] ss:$24 sps:$4 sm:$0xff]  }
 0x5ea   : > { %5296 = vmatprep.subr.bf16.mxu0 %v17256_v16  ;;  %v20247_v46 = vpop.f32.mrb[0].mxu1  ;;  %v17329_v16 = vld [vmem:[%s19844_s13 + $0x938] ss:$24 sps:$4 sm:$0xff]  }
 0x5eb   : > { %v20249_v47 = vpop.f32.mrb[1].mxu1 }
 0x5ec   : > { %7400 = vmatpush1.bf16.msra.mxu1 %v17257_v45  ;;  %v20253_v50 = vpop.f32.mrb[2].mxu1  ;;  %v17332_v45 = vld [vmem:[%s19844_s13 + $0xc60] ss:$24 sps:$4 sm:$0xff]  }
 0x5ed   : > { %5297 = vmatpush1.bf16.msra.mxu0 %v17254_v42  ;;  %7401 = vmatprep.subr.bf16.mxu1 %v17265_v55  ;;  %v20257_v53 = vpop.f32.mrb[3].mxu1  ;;  %v17337_v42 = vld [vmem:[%s19844_s13 + $0x96c] ss:$24 sps:$4 sm:$0xff]  }
 0x5ee   : > { %5298 = vmatprep.subr.bf16.mxu0 %v17262_v44  ;;  %v17335_v44 = vld [vmem:[%s19844_s13 + $0x968] ss:$24 sps:$4 sm:$0xff]   ;;  %v17340_v55 = vld [vmem:[%s19844_s13 + $0xc94] ss:$24 sps:$4 sm:$0xff]  }
 0x5f0   : > { %7402 = vmatpush1.bf16.msra.mxu1 %v17263_v49  ;;  %v17338_v49 = vld [vmem:[%s19844_s13 + $0xc90] ss:$24 sps:$4 sm:$0xff]  }
 0x5f1   : > { %5299 = vmatpush1.bf16.msra.mxu0 %v17260_v48  ;;  %7403 = vmatprep.subr.bf16.mxu1 %v17271_v52  ;;  %v17343_v48 = vld [vmem:[%s19844_s13 + $0x99c] ss:$24 sps:$4 sm:$0xff]   ;;  %v17341_v52 = vld [vmem:[%s19844_s13 + $0x998] ss:$24 sps:$4 sm:$0xff]  }
 0x5f2   : > { %5300 = vmatprep.subr.bf16.mxu0 %v17268_v51 }
 0x5f4   : > { %7404 = vmatpush1.bf16.msra.mxu1 %v17269_v57  ;;  %v17346_v57 = vld [vmem:[%s19844_s13 + $0xcc4] ss:$24 sps:$4 sm:$0xff]  }
 0x5f5   : > { %5301 = vmatpush1.bf16.msra.mxu0 %v17266_v56  ;;  %7405 = vmatprep.subr.bf16.mxu1 %v17277_v59  ;;  %v3463_v56 = vld [vmem:[%s19850_s10] sm:$0x3f] }
 0x5f6   : > { %5302 = vmatprep.subr.bf16.mxu0 %v17274_v58  ;;  %v17349_v58 = vld [vmem:[%s19844_s13 + $0x9cc] ss:$24 sps:$4 sm:$0xff]  }
 0x5f8   : > { %7406 = vmatpush1.bf16.msra.mxu1 %v17275_v61  ;;  %v17344_v61 = vld [vmem:[%s19844_s13 + $0xcc0] ss:$24 sps:$4 sm:$0xff]  }
 0x5f9   : > { %5303 = vmatpush1.bf16.msra.mxu0 %v17272_v60  ;;  %7407 = vmatprep.subr.bf16.mxu1 %v17283_v63  ;;  %v17352_v63 = vld [vmem:[%s19844_s13 + $0xcf4] ss:$24 sps:$4 sm:$0xff]  }
 0x5fa   : > { %5304 = vmatprep.subr.bf16.mxu0 %v17280_v62  ;;  %v17347_v62 = vld [vmem:[%s19844_s13 + $0x9c8] ss:$24 sps:$4 sm:$0xff]  }
 0x5fc   : > { %7408 = vmatpush1.bf16.msra.mxu1 %v17281_v1 }
 0x5fd   : > { %5305 = vmatpush1.bf16.msra.mxu0 %v17278_v0  ;;  %7409 = vmatprep.subr.bf16.mxu1 %v17289_v5  ;;  %v17355_v0 = vld [vmem:[%s19844_s13 + $0x9fc] ss:$24 sps:$4 sm:$0xff]   ;;  %v17353_v5 = vld [vmem:[%s19844_s13 + $0x9f8] ss:$24 sps:$4 sm:$0xff]  }
 0x5fe   : > { %5306 = vmatprep.subr.bf16.mxu0 %v17286_v3  ;;  %v17350_v3 = vld [vmem:[%s19844_s13 + $0xcf0] ss:$24 sps:$4 sm:$0xff]  }
 0x600   : > { %7410 = vmatpush1.bf16.msra.mxu1 %v17287_v9  ;;  %v17358_v9 = vld [vmem:[%s19844_s13 + $0xd24] ss:$24 sps:$4 sm:$0xff]  }
 0x601   : > { %5307 = vmatpush1.bf16.msra.mxu0 %v17284_v6  ;;  %7411 = vmatprep.subr.bf16.mxu1 %v17295_v11 }
 0x602   : > { %5308 = vmatprep.subr.bf16.mxu0 %v17292_v10  ;;  %v17361_v10 = vld [vmem:[%s19844_s13 + $0xa2c] ss:$24 sps:$4 sm:$0xff]  }
 0x604   : > { %7412 = vmatpush1.bf16.msra.mxu1 %v17293_v24  ;;  %v17356_v24 = vld [vmem:[%s19844_s13 + $0xd20] ss:$24 sps:$4 sm:$0xff]  }
 0x605   : > { %5309 = vmatpush1.bf16.msra.mxu0 %v17290_v12  ;;  %7413 = vmatprep.subr.bf16.mxu1 %v17301_v13 }
 0x606   : > { %5310 = vmatprep.subr.bf16.mxu0 %v17298_v14  ;;  %v17359_v14 = vld [vmem:[%s19844_s13 + $0xa28] ss:$24 sps:$4 sm:$0xff]  }
 0x608   : > { %7414 = vmatpush1.bf16.msra.mxu1 %v17299_v18 }
 0x609   : > { %5311 = vmatpush1.bf16.msra.mxu0 %v17296_v17  ;;  %7415 = vmatprep.subr.bf16.mxu1 %v17307_v20 }
 0x60a   : > { %5312 = vmatprep.subr.bf16.mxu0 %v17304_v19 }
 0x60c   : > { %7416 = vmatpush1.bf16.msra.mxu1 %v17305_v23  ;;  %v17364_v23 = vld [vmem:[%s19844_s13 + $0xd54] ss:$24 sps:$4 sm:$0xff]  }
 0x60d   : > { %5313 = vmatpush1.bf16.msra.mxu0 %v17302_v22  ;;  %7417 = vmatprep.subr.bf16.mxu1 %v17313_v25  ;;  %v17365_v25 = vld [vmem:[%s19844_s13 + $0xa58] ss:$24 sps:$4 sm:$0xff]  }
 0x60e   : > { %5314 = vmatprep.subr.bf16.mxu0 %v17310_v2 }
 0x610   : > { %7418 = vmatpush1.bf16.msra.mxu1 %v17311_v27  ;;  %v17373_v27 = vld [vmem:[%s19844_s13 + $0xa8c] ss:$24 sps:$4 sm:$0xff]  }
 0x611   : > { %5315 = vmatpush1.bf16.msra.mxu0 %v17308_v26  ;;  %7419 = vmatprep.subr.bf16.mxu1 %v17319_v29  ;;  %v17370_v26 = vld [vmem:[%s19844_s13 + $0xd84] ss:$24 sps:$4 sm:$0xff]   ;;  %v17371_v29 = vld [vmem:[%s19844_s13 + $0xa88] ss:$24 sps:$4 sm:$0xff]  }
 0x612   : > { %5316 = vmatprep.subr.bf16.mxu0 %v17316_v28  ;;  %v17368_v28 = vld [vmem:[%s19844_s13 + $0xd80] ss:$24 sps:$4 sm:$0xff]  }
 0x614   : > { %7420 = vmatpush1.bf16.msra.mxu1 %v17317_v30  ;;  %v17379_v30 = vld [vmem:[%s19844_s13 + $0xabc] ss:$24 sps:$4 sm:$0xff]  }
 0x615   : > { %5317 = vmatpush1.bf16.msra.mxu0 %v17314_v21  ;;  %7432 = vmatprep.subr.bf16.mxu1 %v17322_v32  ;;  %v17376_v21 = vld [vmem:[%s19844_s13 + $0xdb4] ss:$24 sps:$4 sm:$0xff]  }
 0x616   : > { %7518 = vmatprep.subr.bf16.mxu0 %v17325_v33 }
 0x617   : > { %7422 = vmatmul.mubr.bf16.vlgmr.msra.gmra.mrb[8].mxu1 %v20297_v8 }
 0x618   : > { %5319 = vmatmul.mubr.bf16.vlgmr.msra.gmra.mrb[4].mxu0 %v20077_v4  ;;  %7433 = vmatpush1.bf16.msra.mxu1 %v17320_v35  ;;  %v20315_v4 = vshrl.u32 %v3472_v40, 7  ;;  %v17377_v35 = vld [vmem:[%s19844_s13 + $0xab8] ss:$24 sps:$4 sm:$0xff]   ;;  %v17385_v40 = vld [vmem:[%s19844_s13 + $0xaec] ss:$24 sps:$4 sm:$0xff]  }
 0x619   : > { %7519 = vmatpush1.bf16.msra.mxu0 %v17323_v36  ;;  %7434 = vmatprep.subr.bf16.mxu1 %v17328_v37 }
 0x61a   : > { %7520 = vmatprep.subr.bf16.mxu0 %v17331_v38  ;;  %7464 = vmatprep.mubr.bf16.mxu1 %v20305_v39  ;;  %v20323_v51 = vsub.s32 0, %v20315_v4  ;;  %v20330_v59 = vsub.s32 1, %v20315_v4  ;;  %v17382_v38 = vld [vmem:[%s19844_s13 + $0xde4] ss:$24 sps:$4 sm:$0xff]  }
 0x61b   : > { %7550 = vmatprep.mubr.bf16.mxu0 %v20221_v7 }
 0x61c   : > { %7435 = vmatpush1.bf16.msra.mxu1 %v17326_v15  ;;  %v3475_v60 = vrot.slane %v3463_v56, %v20323_v51  ;;  %v3479_v1 = vrot.slane %v3463_v56, %v20330_v59  ;;  %v5345_v31 = vrot.slane %v3464_v54, %v20323_v51  ;;  %v5349_v32 = vrot.slane %v3464_v54, %v20330_v59  ;;  %v17386_v56 = vld [vmem:[%s19844_s13 + $0xe10] ss:$24 sps:$4 sm:$0xff]   ;;  %v17439_v54 = vld [vmem:[%s19844_s13 + $0xc9c] ss:$24 sps:$4 sm:$0xff]  }
 0x61d   : > { %7521 = vmatpush1.bf16.msra.mxu0 %v17329_v16  ;;  %7436 = vmatprep.subr.bf16.mxu1 %v17334_v41 }
 0x61e   : > { %7522 = vmatprep.subr.bf16.mxu0 %v17337_v42  ;;  %v4977_v6 = vadd.f32 %v20247_v46, %v3475_v60  ;;  %v4979_v11 = vadd.f32 %v20249_v47, %v3479_v1  ;;  %v4981_v13 = vadd.f32 %v20253_v50, %v3475_v60  ;;  %v4983_v19 = vadd.f32 %v20257_v53, %v3479_v1  ;;  %v17367_v50 = vld [vmem:[%s19844_s13 + $0xa5c] ss:$24 sps:$4 sm:$0xff]   ;;  %v17362_v53 = vld [vmem:[%s19844_s13 + $0xd50] ss:$24 sps:$4 sm:$0xff]   ;;  %v17397_v60 = vld [vmem:[%s19844_s13 + $0xb4c] ss:$24 sps:$4 sm:$0xff]  }
 0x61f   : > { %v17398_v1 = vld [vmem:[%s19844_s13 + $0xe70] ss:$24 sps:$4 sm:$0xff]  }
 0x620   : > { %7437 = vmatpush1.bf16.msra.mxu1 %v17332_v45 }
 0x621   : > { %7523 = vmatpush1.bf16.msra.mxu0 %v17335_v44  ;;  %7438 = vmatprep.subr.bf16.mxu1 %v17340_v55  ;;  %v17380_v44 = vld [vmem:[%s19844_s13 + $0xde0] ss:$24 sps:$4 sm:$0xff]  }
 0x622   : > { %7524 = vmatprep.subr.bf16.mxu0 %v17343_v48  ;;  %v17383_v55 = vld [vmem:[%s19844_s13 + $0xae8] ss:$24 sps:$4 sm:$0xff]   ;;  %v17388_v48 = vld [vmem:[%s19844_s13 + $0xe14] ss:$24 sps:$4 sm:$0xff]  }
 0x624   : > { %7439 = vmatpush1.bf16.msra.mxu1 %v17338_v49  ;;  %v17391_v49 = vld [vmem:[%s19844_s13 + $0xb1c] ss:$24 sps:$4 sm:$0xff]  }
 0x625   : > { %7525 = vmatpush1.bf16.msra.mxu0 %v17341_v52  ;;  %7440 = vmatprep.subr.bf16.mxu1 %v17346_v57  ;;  %v17389_v57 = vld [vmem:[%s19844_s13 + $0xb18] ss:$24 sps:$4 sm:$0xff]  }
 0x626   : > { %7526 = vmatprep.subr.bf16.mxu0 %v17349_v58  ;;  %v17394_v58 = vld [vmem:[%s19844_s13 + $0xe44] ss:$24 sps:$4 sm:$0xff]  }
 0x628   : > { %7441 = vmatpush1.bf16.msra.mxu1 %v17344_v61  ;;  %v17392_v61 = vld [vmem:[%s19844_s13 + $0xe40] ss:$24 sps:$4 sm:$0xff]  }
 0x629   : > { %7527 = vmatpush1.bf16.msra.mxu0 %v17347_v62  ;;  %7442 = vmatprep.subr.bf16.mxu1 %v17352_v63  ;;  %v17395_v62 = vld [vmem:[%s19844_s13 + $0xb48] ss:$24 sps:$4 sm:$0xff]   ;;  %v17400_v63 = vld [vmem:[%s19844_s13 + $0xe74] ss:$24 sps:$4 sm:$0xff]  }
 0x62a   : > { %7528 = vmatprep.subr.bf16.mxu0 %v17355_v0  ;;  %v17403_v0 = vld [vmem:[%s19844_s13 + $0xb7c] ss:$24 sps:$4 sm:$0xff]  }
 0x62b   : > { %v5062_v12 = vpop.f32.mrb[0].mxu0 }
 0x62c   : > { %v16031_v17 = vadd.f32 %v5062_v12, %v4977_v6  ;;  %v5064_v18 = vpop.f32.mrb[1].mxu0  ;;  %7443 = vmatpush1.bf16.msra.mxu1 %v17350_v3  ;;  %v17401_v3 = vld [vmem:[%s19844_s13 + $0xb78] ss:$24 sps:$4 sm:$0xff]   ;;  %v17409_v6 = vld [vmem:[%s19844_s13 + $0xbac] ss:$24 sps:$4 sm:$0xff]  }
 0x62d   : > { %v16033_v46 = vadd.f32 %v5064_v18, %v4979_v11  ;;  %v5066_v20 = vpop.f32.mrb[2].mxu0  ;;  %7529 = vmatpush1.bf16.msra.mxu0 %v17353_v5  ;;  %7444 = vmatprep.subr.bf16.mxu1 %v17358_v9  ;;  %v17406_v5 = vld [vmem:[%s19844_s13 + $0xea4] ss:$24 sps:$4 sm:$0xff]   ;;  %v17404_v9 = vld [vmem:[%s19844_s13 + $0xea0] ss:$24 sps:$4 sm:$0xff]  }
 0x62e   : > { %18136 = vtanh.f32 %v16031_v17  ;;  %v16035_v22 = vadd.f32 %v5066_v20, %v4981_v13  ;;  %v5068_v47 = vpop.f32.mrb[3].mxu0  ;;  %7530 = vmatprep.subr.bf16.mxu0 %v17361_v10  ;;  %v17407_v10 = vld [vmem:[%s19844_s13 + $0xba8] ss:$24 sps:$4 sm:$0xff]   ;;  %v17412_v11 = vld [vmem:[%s19844_s13 + $0xed4] ss:$24 sps:$4 sm:$0xff]  }
 0x62f   : > { %18138 = vtanh.f32 %v16033_v46  ;;  %v16037_v2 = vadd.f32 %v5068_v47, %v4983_v19  ;;  %v17415_v12 = vld [vmem:[%s19844_s13 + $0xbdc] ss:$24 sps:$4 sm:$0xff]   ;;  %v17421_v17 = vld [vmem:[%s19844_s13 + $0xc0c] ss:$24 sps:$4 sm:$0xff]   ;;  %v17419_v47 = vld [vmem:[%s19844_s13 + $0xc08] ss:$24 sps:$4 sm:$0xff]  }
 0x630   : > { %18140 = vtanh.f32 %v16035_v22  ;;  %7445 = vmatpush1.bf16.msra.mxu1 %v17356_v24  ;;  %v17410_v24 = vld [vmem:[%s19844_s13 + $0xed0] ss:$24 sps:$4 sm:$0xff]   ;;  %v17418_v13 = vld [vmem:[%s19844_s13 + $0xf04] ss:$24 sps:$4 sm:$0xff]   ;;  %v14523_v19 = vld [vmem:[%s19829_s6 + $0xa0] sm:$0xff] }
 0x631   : > { %18142 = vtanh.f32 %v16037_v2  ;;  %7531 = vmatpush1.bf16.msra.mxu0 %v17359_v14  ;;  %7446 = vmatprep.subr.bf16.mxu1 %v17364_v23  ;;  %v17413_v14 = vld [vmem:[%s19844_s13 + $0xbd8] ss:$24 sps:$4 sm:$0xff]   ;;  %v14517_v18 = vld [vmem:[%s19829_s6 + $0x70] sm:$0xff]  ;;  %v14520_v46 = vld [vmem:[%s19829_s6 + $0x88] sm:$0xff] }
 0x632   : > { %7532 = vmatprep.subr.bf16.mxu0 %v17367_v50  ;;  %v14526_v20 = vld [vmem:[%s19829_s6 + $0xb8] sm:$0xff]  ;;  %v17416_v22 = vld [vmem:[%s19844_s13 + $0xf00] ss:$24 sps:$4 sm:$0xff]   ;;  %v20399_v23 = vpack.c.bf16 %v14523_v19, %v14517_v18  ;;  %v17427_v2 = vld [vmem:[%s19844_s13 + $0xc3c] ss:$24 sps:$4 sm:$0xff]  }
 0x633   : > { %v17424_v50 = vld [vmem:[%s19844_s13 + $0xf34] ss:$24 sps:$4 sm:$0xff]  }
 0x634   : > { %7447 = vmatpush1.bf16.msra.mxu1 %v17362_v53  ;;  %v20403_v53 = vpack.c.bf16 %v14526_v20, %v14520_v46  ;;  %v17496_v18 = vld [vmem:[%s19844_s13 + $0x1174] ss:$24 sps:$4 sm:$0xff]   ;;  %v17494_v46 = vld [vmem:[%s19844_s13 + $0x1170] ss:$24 sps:$4 sm:$0xff]  }
 0x635   : > { %7533 = vmatpush1.bf16.msra.mxu0 %v17365_v25  ;;  %7448 = vmatprep.subr.bf16.mxu1 %v17370_v26  ;;  %v17422_v25 = vld [vmem:[%s19844_s13 + $0xf30] ss:$24 sps:$4 sm:$0xff]   ;;  %v17499_v19 = vld [vmem:[%s19844_s13 + $0xe7c] ss:$24 sps:$4 sm:$0xff]  }
 0x636   : > { %7534 = vmatprep.subr.bf16.mxu0 %v17373_v27  ;;  %v17425_v26 = vld [vmem:[%s19844_s13 + $0xc38] ss:$24 sps:$4 sm:$0xff]   ;;  %v17430_v27 = vld [vmem:[%s19844_s13 + $0xf64] ss:$24 sps:$4 sm:$0xff]  }
 0x637   : > { %v17497_v20 = vld [vmem:[%s19844_s13 + $0xe78] ss:$24 sps:$4 sm:$0xff]  }
 0x638   : > { %v18137_v33 = vpop.eup %18136  ;;  %7449 = vmatpush1.bf16.msra.mxu1 %v17368_v28  ;;  %v17433_v28 = vld [vmem:[%s19844_s13 + $0xc6c] ss:$24 sps:$4 sm:$0xff]  }
 0x639   : > { %v18139_v43 = vpop.eup %18138  ;;  %7535 = vmatpush1.bf16.msra.mxu0 %v17371_v29  ;;  %v5372_v36 = vmul.f32 %v18137_v33, %v5345_v31  ;;  %7450 = vmatprep.subr.bf16.mxu1 %v17376_v21  ;;  %v17428_v29 = vld [vmem:[%s19844_s13 + $0xf60] ss:$24 sps:$4 sm:$0xff]   ;;  %v17442_v33 = vld [vmem:[%s19844_s13 + $0xfc4] ss:$24 sps:$4 sm:$0xff]  }
 0x63a   : > { %v18141_v37 = vpop.eup %18140  ;;  %7536 = vmatprep.subr.bf16.mxu0 %v17379_v30  ;;  %v5373_v15 = vmul.f32 %v18139_v43, %v5349_v32  ;;  %v17431_v21 = vld [vmem:[%s19844_s13 + $0xc68] ss:$24 sps:$4 sm:$0xff]   ;;  %v17436_v30 = vld [vmem:[%s19844_s13 + $0xf94] ss:$24 sps:$4 sm:$0xff]  }
 0x63b   : > { %v18143_v16 = vpop.eup %18142  ;;  %v5378_v41 = vmul.f32 %v18141_v37, %v5345_v31  ;;  %v17434_v31 = vld [vmem:[%s19844_s13 + $0xf90] ss:$24 sps:$4 sm:$0xff]   ;;  %v17445_v43 = vld [vmem:[%s19844_s13 + $0xccc] ss:$24 sps:$4 sm:$0xff]   ;;  %v17451_v37 = vld [vmem:[%s19844_s13 + $0xcfc] ss:$24 sps:$4 sm:$0xff]  }
 0x63c   : > { %v20365_v42 = vadd.f32 %v5373_v15, %v5372_v36  ;;  %v5379_v45 = vmul.f32 %v18143_v16, %v5349_v32  ;;  %7451 = vmatpush1.bf16.msra.mxu1 %v17374_v34  ;;  %v17437_v32 = vld [vmem:[%s19844_s13 + $0xc98] ss:$24 sps:$4 sm:$0xff]   ;;  %v17448_v36 = vld [vmem:[%s19844_s13 + $0xff4] ss:$24 sps:$4 sm:$0xff]   ;;  %v17454_v15 = vld [vmem:[%s19844_s13 + $0x1024] ss:$24 sps:$4 sm:$0xff]  }
 0x63d   : > { %7537 = vmatpush1.bf16.msra.mxu0 %v17377_v35  ;;  %7452 = vmatprep.subr.bf16.mxu1 %v17382_v38  ;;  %v17440_v34 = vld [vmem:[%s19844_s13 + $0xfc0] ss:$24 sps:$4 sm:$0xff]   ;;  %v17446_v38 = vld [vmem:[%s19844_s13 + $0xff0] ss:$24 sps:$4 sm:$0xff]   ;;  %v17457_v16 = vld [vmem:[%s19844_s13 + $0xd2c] ss:$24 sps:$4 sm:$0xff]  }
 0x63e   : > { %7538 = vmatprep.subr.bf16.mxu0 %v17385_v40  ;;  %v20371_v52 = vadd.f32 %v5379_v45, %v5378_v41  ;;  %v17443_v35 = vld [vmem:[%s19844_s13 + $0xcc8] ss:$24 sps:$4 sm:$0xff]   ;;  %v17449_v40 = vld [vmem:[%s19844_s13 + $0xcf8] ss:$24 sps:$4 sm:$0xff]  }
 0x63f   : > { %v17452_v41 = vld [vmem:[%s19844_s13 + $0x1020] ss:$24 sps:$4 sm:$0xff]  }
 0x640   : > { %7453 = vmatpush1.bf16.msra.mxu1 %v17380_v44  ;;  %v17455_v45 = vld [vmem:[%s19844_s13 + $0xd28] ss:$24 sps:$4 sm:$0xff]   ;;  %v17460_v44 = vld [vmem:[%s19844_s13 + $0x1054] ss:$24 sps:$4 sm:$0xff]  }
 0x641   : > { %7539 = vmatpush1.bf16.msra.mxu0 %v17383_v55  ;;  %7454 = vmatprep.subr.bf16.mxu1 %v17388_v48  ;;  %v17463_v55 = vld [vmem:[%s19844_s13 + $0xd5c] ss:$24 sps:$4 sm:$0xff]   ;;  %v17458_v48 = vld [vmem:[%s19844_s13 + $0x1050] ss:$24 sps:$4 sm:$0xff]  }
 0x642   : > { %7540 = vmatprep.subr.bf16.mxu0 %v17391_v49  ;;  %v17461_v49 = vld [vmem:[%s19844_s13 + $0xd58] ss:$24 sps:$4 sm:$0xff]  }
 0x644   : > { %7455 = vmatpush1.bf16.msra.mxu1 %v17386_v56  ;;  %v17466_v56 = vld [vmem:[%s19844_s13 + $0x1084] ss:$24 sps:$4 sm:$0xff]  }
 0x645   : > { %7541 = vmatpush1.bf16.msra.mxu0 %v17389_v57  ;;  %7456 = vmatprep.subr.bf16.mxu1 %v17394_v58  ;;  %v17469_v57 = vld [vmem:[%s19844_s13 + $0xd8c] ss:$24 sps:$4 sm:$0xff]   ;;  %v17464_v58 = vld [vmem:[%s19844_s13 + $0x1080] ss:$24 sps:$4 sm:$0xff]  }
 0x646   : > { %7542 = vmatprep.subr.bf16.mxu0 %v17397_v60  ;;  %v17467_v60 = vld [vmem:[%s19844_s13 + $0xd88] ss:$24 sps:$4 sm:$0xff]  }
 0x648   : > { %7457 = vmatpush1.bf16.msra.mxu1 %v17392_v61  ;;  %v17472_v61 = vld [vmem:[%s19844_s13 + $0x10b4] ss:$24 sps:$4 sm:$0xff]  }
 0x649   : > { %7543 = vmatpush1.bf16.msra.mxu0 %v17395_v62  ;;  %7458 = vmatprep.subr.bf16.mxu1 %v17400_v63  ;;  %v17475_v62 = vld [vmem:[%s19844_s13 + $0xdbc] ss:$24 sps:$4 sm:$0xff]   ;;  %v17470_v63 = vld [vmem:[%s19844_s13 + $0x10b0] ss:$24 sps:$4 sm:$0xff]  }
 0x64a   : > { %7544 = vmatprep.subr.bf16.mxu0 %v17403_v0  ;;  %v17473_v0 = vld [vmem:[%s19844_s13 + $0xdb8] ss:$24 sps:$4 sm:$0xff]  }
 0x64c   : > { %7459 = vmatpush1.bf16.msra.mxu1 %v17398_v1  ;;  %v17478_v1 = vld [vmem:[%s19844_s13 + $0x10e4] ss:$24 sps:$4 sm:$0xff]  }
 0x64d   : > { %7545 = vmatpush1.bf16.msra.mxu0 %v17401_v3  ;;  %7460 = vmatprep.subr.bf16.mxu1 %v17406_v5  ;;  %v17481_v3 = vld [vmem:[%s19844_s13 + $0xdec] ss:$24 sps:$4 sm:$0xff]   ;;  %v17476_v5 = vld [vmem:[%s19844_s13 + $0x10e0] ss:$24 sps:$4 sm:$0xff]  }
 0x64e   : > { %7546 = vmatprep.subr.bf16.mxu0 %v17409_v6  ;;  %v17479_v6 = vld [vmem:[%s19844_s13 + $0xde8] ss:$24 sps:$4 sm:$0xff]  }
 0x650   : > { %7461 = vmatpush1.bf16.msra.mxu1 %v17404_v9  ;;  %v17484_v9 = vld [vmem:[%s19844_s13 + $0x1114] ss:$24 sps:$4 sm:$0xff]  }
 0x651   : > { %7547 = vmatpush1.bf16.msra.mxu0 %v17407_v10  ;;  %7462 = vmatprep.subr.bf16.mxu1 %v17412_v11  ;;  %v17487_v10 = vld [vmem:[%s19844_s13 + $0xe1c] ss:$24 sps:$4 sm:$0xff]   ;;  %v17482_v11 = vld [vmem:[%s19844_s13 + $0x1110] ss:$24 sps:$4 sm:$0xff]  }
 0x652   : > { %7548 = vmatprep.subr.bf16.mxu0 %v17415_v12  ;;  %v17485_v12 = vld [vmem:[%s19844_s13 + $0xe18] ss:$24 sps:$4 sm:$0xff]  }
 0x654   : > { %7463 = vmatpush1.bf16.msra.mxu1 %v17410_v24  ;;  %v17490_v24 = vld [vmem:[%s19844_s13 + $0x1144] ss:$24 sps:$4 sm:$0xff]  }
 0x655   : > { %7549 = vmatpush1.bf16.msra.mxu0 %v17413_v14  ;;  %7475 = vmatprep.subr.bf16.mxu1 %v17418_v13  ;;  %v17493_v14 = vld [vmem:[%s19844_s13 + $0xe4c] ss:$24 sps:$4 sm:$0xff]   ;;  %v17488_v13 = vld [vmem:[%s19844_s13 + $0x1140] ss:$24 sps:$4 sm:$0xff]  }
 0x656   : > { %7561 = vmatprep.subr.bf16.mxu0 %v17421_v17  ;;  %v17491_v17 = vld [vmem:[%s19844_s13 + $0xe48] ss:$24 sps:$4 sm:$0xff]  }
 0x657   : > { %7465 = vmatmul.mubr.bf16.vlgmr.msra.gmra.mrb[8].mxu1 %v20399_v23 }
 0x658   : > { %7551 = vmatmul.mubr.bf16.vlgmr.msra.gmra.mrb[8].mxu0 %v20297_v8  ;;  %7476 = vmatpush1.bf16.msra.mxu1 %v17416_v22  ;;  %v17502_v22 = vld [vmem:[%s19844_s13 + $0x11a4] ss:$24 sps:$4 sm:$0xff]  }
 0x659   : > { %7562 = vmatpush1.bf16.msra.mxu0 %v17419_v47  ;;  %7477 = vmatprep.subr.bf16.mxu1 %v17424_v50  ;;  %v17505_v47 = vld [vmem:[%s19844_s13 + $0xeac] ss:$24 sps:$4 sm:$0xff]   ;;  %v17500_v50 = vld [vmem:[%s19844_s13 + $0x11a0] ss:$24 sps:$4 sm:$0xff]  }
 0x65a   : > { %7563 = vmatprep.subr.bf16.mxu0 %v17427_v2  ;;  %7507 = vmatprep.mubr.bf16.mxu1 %v20403_v53  ;;  %v17503_v2 = vld [vmem:[%s19844_s13 + $0xea8] ss:$24 sps:$4 sm:$0xff]  }
 0x65b   : > { %7593 = vmatprep.mubr.bf16.mxu0 %v20305_v39 }
 0x65c   : > { %7478 = vmatpush1.bf16.msra.mxu1 %v17422_v25  ;;  %v17508_v25 = vld [vmem:[%s19844_s13 + $0x11d4] ss:$24 sps:$4 sm:$0xff]  }
 0x65d   : > { %7564 = vmatpush1.bf16.msra.mxu0 %v17425_v26  ;;  %7479 = vmatprep.subr.bf16.mxu1 %v17430_v27  ;;  %v17511_v26 = vld [vmem:[%s19844_s13 + $0xedc] ss:$24 sps:$4 sm:$0xff]   ;;  %v17506_v27 = vld [vmem:[%s19844_s13 + $0x11d0] ss:$24 sps:$4 sm:$0xff]  }
 0x65e   : > { %7565 = vmatprep.subr.bf16.mxu0 %v17433_v28  ;;  %v17509_v28 = vld [vmem:[%s19844_s13 + $0xed8] ss:$24 sps:$4 sm:$0xff]  }
 0x660   : > { %7480 = vmatpush1.bf16.msra.mxu1 %v17428_v29  ;;  %v14519_v29 = vld [vmem:[%s19829_s6 + $0x80] sm:$0xff] }
 0x661   : > { %7566 = vmatpush1.bf16.msra.mxu0 %v17431_v21  ;;  %7481 = vmatprep.subr.bf16.mxu1 %v17436_v30  ;;  %v14525_v21 = vld [vmem:[%s19829_s6 + $0xb0] sm:$0xff] }
 0x662   : > { %7567 = vmatprep.subr.bf16.mxu0 %v17439_v54  ;;  %v17514_v30 = vld [vmem:[%s19844_s13 + $0xf0c] ss:$24 sps:$4 sm:$0xff]  }
 0x663   : > { %v17517_v54 = vld [vmem:[%s19844_s13 + $0x914] ss:$24 sps:$4 sm:$0xff]  }
 0x664   : > { %7482 = vmatpush1.bf16.msra.mxu1 %v17434_v31  ;;  %v20471_v31 = vpack.c.bf16 %v14525_v21, %v14519_v29  ;;  %v17571_v29 = vld [vmem:[%s19844_s13 + $0xac4] ss:$24 sps:$4 sm:$0xff]  }
 0x665   : > { %7568 = vmatpush1.bf16.msra.mxu0 %v17437_v32  ;;  %7483 = vmatprep.subr.bf16.mxu1 %v17442_v33  ;;  %v17512_v32 = vld [vmem:[%s19844_s13 + $0xf08] ss:$24 sps:$4 sm:$0xff]  }
 0x666   : > { %7569 = vmatprep.subr.bf16.mxu0 %v17445_v43  ;;  %v17515_v33 = vld [vmem:[%s19844_s13 + $0x910] ss:$24 sps:$4 sm:$0xff]   ;;  %v17520_v43 = vld [vmem:[%s19844_s13 + $0xf3c] ss:$24 sps:$4 sm:$0xff]  }
 0x668   : > { %7484 = vmatpush1.bf16.msra.mxu1 %v17440_v34  ;;  %v17523_v34 = vld [vmem:[%s19844_s13 + $0x944] ss:$24 sps:$4 sm:$0xff]  }
 0x669   : > { %7570 = vmatpush1.bf16.msra.mxu0 %v17443_v35  ;;  %7485 = vmatprep.subr.bf16.mxu1 %v17448_v36  ;;  %v17518_v35 = vld [vmem:[%s19844_s13 + $0xf38] ss:$24 sps:$4 sm:$0xff]  }
 0x66a   : > { %7571 = vmatprep.subr.bf16.mxu0 %v17451_v37  ;;  %v17521_v36 = vld [vmem:[%s19844_s13 + $0x940] ss:$24 sps:$4 sm:$0xff]   ;;  %v17526_v37 = vld [vmem:[%s19844_s13 + $0xf6c] ss:$24 sps:$4 sm:$0xff]  }
 0x66c   : > { %7486 = vmatpush1.bf16.msra.mxu1 %v17446_v38  ;;  %v17529_v38 = vld [vmem:[%s19844_s13 + $0x974] ss:$24 sps:$4 sm:$0xff]  }
 0x66d   : > { %7572 = vmatpush1.bf16.msra.mxu0 %v17449_v40  ;;  %7487 = vmatprep.subr.bf16.mxu1 %v17454_v15  ;;  %v17524_v40 = vld [vmem:[%s19844_s13 + $0xf68] ss:$24 sps:$4 sm:$0xff]  }
 0x66e   : > { %7573 = vmatprep.subr.bf16.mxu0 %v17457_v16  ;;  %v17527_v15 = vld [vmem:[%s19844_s13 + $0x970] ss:$24 sps:$4 sm:$0xff]   ;;  %v17532_v16 = vld [vmem:[%s19844_s13 + $0xf9c] ss:$24 sps:$4 sm:$0xff]  }
 0x670   : > { %7488 = vmatpush1.bf16.msra.mxu1 %v17452_v41  ;;  %v17535_v41 = vld [vmem:[%s19844_s13 + $0x9a4] ss:$24 sps:$4 sm:$0xff]  }
 0x671   : > { %7574 = vmatpush1.bf16.msra.mxu0 %v17455_v45  ;;  %7489 = vmatprep.subr.bf16.mxu1 %v17460_v44  ;;  %v17530_v45 = vld [vmem:[%s19844_s13 + $0xf98] ss:$24 sps:$4 sm:$0xff]  }
 0x672   : > { %7575 = vmatprep.subr.bf16.mxu0 %v17463_v55  ;;  %v17533_v44 = vld [vmem:[%s19844_s13 + $0x9a0] ss:$24 sps:$4 sm:$0xff]   ;;  %v17541_v55 = vld [vmem:[%s19844_s13 + $0x9d4] ss:$24 sps:$4 sm:$0xff]  }
 0x674   : > { %7490 = vmatpush1.bf16.msra.mxu1 %v17458_v48  ;;  %v20494_v48 = vsub.s32 2, %v20315_v4 }
 0x675   : > { %7576 = vmatpush1.bf16.msra.mxu0 %v17461_v49  ;;  %7491 = vmatprep.subr.bf16.mxu1 %v17466_v56  ;;  %v17536_v49 = vld [vmem:[%s19844_s13 + $0xfc8] ss:$24 sps:$4 sm:$0xff]  }
 0x676   : > { %7577 = vmatprep.subr.bf16.mxu0 %v17469_v57  ;;  %v17539_v56 = vld [vmem:[%s19844_s13 + $0x9d0] ss:$24 sps:$4 sm:$0xff]   ;;  %v20499_v57 = vsub.s32 3, %v20315_v4 }
 0x678   : > { %7492 = vmatpush1.bf16.msra.mxu1 %v17464_v58  ;;  %v17544_v58 = vld [vmem:[%s19844_s13 + $0xffc] ss:$24 sps:$4 sm:$0xff]  }
 0x679   : > { %7578 = vmatpush1.bf16.msra.mxu0 %v17467_v60  ;;  %7493 = vmatprep.subr.bf16.mxu1 %v17472_v61  ;;  %v17547_v60 = vld [vmem:[%s19844_s13 + $0xa04] ss:$24 sps:$4 sm:$0xff]  }
 0x67a   : > { %7579 = vmatprep.subr.bf16.mxu0 %v17475_v62  ;;  %v20504_v61 = vld [vmem:[%s19850_s10] sm:$0x3f] }
 0x67b   : > { %v3483_v62 = vrot.slane %v20504_v61, %v20494_v48 }
 0x67c   : > { %7494 = vmatpush1.bf16.msra.mxu1 %v17470_v63  ;;  %v3487_v63 = vrot.slane %v20504_v61, %v20499_v57 }
 0x67d   : > { %7580 = vmatpush1.bf16.msra.mxu0 %v17473_v0  ;;  %7495 = vmatprep.subr.bf16.mxu1 %v17478_v1  ;;  %v17542_v0 = vld [vmem:[%s19844_s13 + $0xff8] ss:$24 sps:$4 sm:$0xff]  }
 0x67e   : > { %7581 = vmatprep.subr.bf16.mxu0 %v17481_v3  ;;  %v17545_v1 = vld [vmem:[%s19844_s13 + $0xa00] ss:$24 sps:$4 sm:$0xff]   ;;  %v17550_v3 = vld [vmem:[%s19844_s13 + $0x102c] ss:$24 sps:$4 sm:$0xff]  }
 0x680   : > { %7496 = vmatpush1.bf16.msra.mxu1 %v17476_v5  ;;  %v17553_v5 = vld [vmem:[%s19844_s13 + $0xa34] ss:$24 sps:$4 sm:$0xff]  }
 0x681   : > { %7582 = vmatpush1.bf16.msra.mxu0 %v17479_v6  ;;  %7497 = vmatprep.subr.bf16.mxu1 %v17484_v9 }
 0x682   : > { %7583 = vmatprep.subr.bf16.mxu0 %v17487_v10 }
 0x684   : > { %7498 = vmatpush1.bf16.msra.mxu1 %v17482_v11 }
 0x685   : > { %7584 = vmatpush1.bf16.msra.mxu0 %v17485_v12  ;;  %7499 = vmatprep.subr.bf16.mxu1 %v17490_v24  ;;  %v17548_v24 = vld [vmem:[%s19844_s13 + $0x1028] ss:$24 sps:$4 sm:$0xff]  }
 0x686   : > { %7585 = vmatprep.subr.bf16.mxu0 %v17493_v14  ;;  %v17551_v14 = vld [vmem:[%s19844_s13 + $0xa30] ss:$24 sps:$4 sm:$0xff]  }
 0x688   : > { %7500 = vmatpush1.bf16.msra.mxu1 %v17488_v13 }
 0x689   : > { %7586 = vmatpush1.bf16.msra.mxu0 %v17491_v17  ;;  %7501 = vmatprep.subr.bf16.mxu1 %v17496_v18  ;;  %v17556_v18 = vld [vmem:[%s19844_s13 + $0x105c] ss:$24 sps:$4 sm:$0xff]  }
 0x68a   : > { %7587 = vmatprep.subr.bf16.mxu0 %v17499_v19  ;;  %v17559_v19 = vld [vmem:[%s19844_s13 + $0xa64] ss:$24 sps:$4 sm:$0xff]  }
 0x68c   : > { %7502 = vmatpush1.bf16.msra.mxu1 %v17494_v46 }
 0x68d   : > { %7588 = vmatpush1.bf16.msra.mxu0 %v17497_v20  ;;  %7503 = vmatprep.subr.bf16.mxu1 %v17502_v22  ;;  %v17554_v20 = vld [vmem:[%s19844_s13 + $0x1058] ss:$24 sps:$4 sm:$0xff]  }
 0x68e   : > { %7589 = vmatprep.subr.bf16.mxu0 %v17505_v47  ;;  %v17557_v22 = vld [vmem:[%s19844_s13 + $0xa60] ss:$24 sps:$4 sm:$0xff]   ;;  %v17562_v47 = vld [vmem:[%s19844_s13 + $0x108c] ss:$24 sps:$4 sm:$0xff]  }
 0x690   : > { %7504 = vmatpush1.bf16.msra.mxu1 %v17500_v50  ;;  %v17565_v50 = vld [vmem:[%s19844_s13 + $0xa94] ss:$24 sps:$4 sm:$0xff]  }
 0x691   : > { %7590 = vmatpush1.bf16.msra.mxu0 %v17503_v2  ;;  %7505 = vmatprep.subr.bf16.mxu1 %v17508_v25  ;;  %v17560_v2 = vld [vmem:[%s19844_s13 + $0x1088] ss:$24 sps:$4 sm:$0xff]  }
 0x692   : > { %7591 = vmatprep.subr.bf16.mxu0 %v17511_v26  ;;  %v17563_v25 = vld [vmem:[%s19844_s13 + $0xa90] ss:$24 sps:$4 sm:$0xff]  }
 0x693   : > { %v20525_v26 = vld [vmem:[%s19852_s8] sm:$0x3f] }
 0x694   : > { %7506 = vmatpush1.bf16.msra.mxu1 %v17506_v27  ;;  %v5353_v27 = vrot.slane %v20525_v26, %v20494_v48  ;;  %v5357_v21 = vrot.slane %v20525_v26, %v20499_v57 }
 0x695   : > { %7592 = vmatpush1.bf16.msra.mxu0 %v17509_v28  ;;  %7647 = vmatprep.subr.bf16.mxu1 %v17517_v54  ;;  %v17568_v28 = vld [vmem:[%s19844_s13 + $0x10bc] ss:$24 sps:$4 sm:$0xff]  }
 0x696   : > { %7604 = vmatprep.subr.bf16.mxu0 %v17514_v30 }
 0x697   : > { %7508 = vmatmul.mubr.bf16.vlgmr.msra.gmra.mrb[8].mxu1 %v20471_v31 }
 0x698   : > { %7594 = vmatmul.mubr.bf16.vlgmr.msra.gmra.mrb[8].mxu0 %v20399_v23  ;;  %7648 = vmatpush1.bf16.msra.mxu1 %v17515_v33  ;;  %v17569_v33 = vld [vmem:[%s19844_s13 + $0xac0] ss:$24 sps:$4 sm:$0xff]  }
 0x699   : > { %7605 = vmatpush1.bf16.msra.mxu0 %v17512_v32  ;;  %7649 = vmatprep.subr.bf16.mxu1 %v17523_v34  ;;  %v17566_v32 = vld [vmem:[%s19844_s13 + $0x10b8] ss:$24 sps:$4 sm:$0xff]  }
 0x69a   : > { %7606 = vmatprep.subr.bf16.mxu0 %v17520_v43  ;;  %7636 = vmatprep.mubr.bf16.mxu0 %v20403_v53 }
 0x69b   : > { %7679 = vmatprep.mubr.bf16.mxu1 %v20221_v7  ;;  %v17538_v7 = vld [vmem:[%s19844_s13 + $0xfcc] ss:$24 sps:$4 sm:$0xff]  }
 0x69c   : > { %7650 = vmatpush1.bf16.msra.mxu1 %v17521_v36  ;;  %v17577_v36 = vld [vmem:[%s19844_s13 + $0xaf4] ss:$24 sps:$4 sm:$0xff]  }
 0x69d   : > { %7607 = vmatpush1.bf16.msra.mxu0 %v17518_v35  ;;  %7651 = vmatprep.subr.bf16.mxu1 %v17529_v38  ;;  %v17574_v35 = vld [vmem:[%s19844_s13 + $0x10ec] ss:$24 sps:$4 sm:$0xff]  }
 0x69e   : > { %7608 = vmatprep.subr.bf16.mxu0 %v17526_v37 }
 0x6a0   : > { %7652 = vmatpush1.bf16.msra.mxu1 %v17527_v15 }
 0x6a1   : > { %7609 = vmatpush1.bf16.msra.mxu0 %v17524_v40  ;;  %7653 = vmatprep.subr.bf16.mxu1 %v17535_v41  ;;  %v17572_v41 = vld [vmem:[%s19844_s13 + $0x10e8] ss:$24 sps:$4 sm:$0xff]  }
 0x6a2   : > { %7610 = vmatprep.subr.bf16.mxu0 %v17532_v16 }
 0x6a4   : > { %7654 = vmatpush1.bf16.msra.mxu1 %v17533_v44 }
 0x6a5   : > { %7611 = vmatpush1.bf16.msra.mxu0 %v17530_v45  ;;  %7655 = vmatprep.subr.bf16.mxu1 %v17541_v55  ;;  %v17575_v45 = vld [vmem:[%s19844_s13 + $0xaf0] ss:$24 sps:$4 sm:$0xff]   ;;  %v17580_v55 = vld [vmem:[%s19844_s13 + $0x111c] ss:$24 sps:$4 sm:$0xff]  }
 0x6a6   : > { %7612 = vmatprep.subr.bf16.mxu0 %v17538_v7 }
 0x6a8   : > { %7656 = vmatpush1.bf16.msra.mxu1 %v17539_v56  ;;  %v17578_v56 = vld [vmem:[%s19844_s13 + $0x1118] ss:$24 sps:$4 sm:$0xff]  }
 0x6a9   : > { %7613 = vmatpush1.bf16.msra.mxu0 %v17536_v49  ;;  %7657 = vmatprep.subr.bf16.mxu1 %v17547_v60  ;;  %v17586_v60 = vld [vmem:[%s19844_s13 + $0x114c] ss:$24 sps:$4 sm:$0xff]  }
 0x6aa   : > { %7614 = vmatprep.subr.bf16.mxu0 %v17544_v58  ;;  %v5191_v6 = vpop.f32.mrb[4].mxu1  ;;  %v17581_v58 = vld [vmem:[%s19844_s13 + $0xb20] ss:$24 sps:$4 sm:$0xff]  }
 0x6ab   : > { %v16038_v9 = vadd.f32 %v5191_v6, %v3483_v62  ;;  %v5193_v10 = vpop.f32.mrb[5].mxu1  ;;  %v17598_v6 = vld [vmem:[%s19844_s13 + $0x11ac] ss:$24 sps:$4 sm:$0xff]  }
 0x6ac   : > { %v16039_v11 = vadd.f32 %v5193_v10, %v3487_v63  ;;  %v5195_v12 = vpop.f32.mrb[6].mxu1  ;;  %7658 = vmatpush1.bf16.msra.mxu1 %v17545_v1  ;;  %v17595_v1 = vld [vmem:[%s19844_s13 + $0xb84] ss:$24 sps:$4 sm:$0xff]   ;;  %v17596_v10 = vld [vmem:[%s19844_s13 + $0x11a8] ss:$24 sps:$4 sm:$0xff]  }
 0x6ad   : > { %7615 = vmatpush1.bf16.msra.mxu0 %v17542_v0  ;;  %18144 = vtanh.f32 %v16038_v9  ;;  %v16040_v13 = vadd.f32 %v5195_v12, %v3483_v62  ;;  %v5197_v17 = vpop.f32.mrb[7].mxu1  ;;  %7659 = vmatprep.subr.bf16.mxu1 %v17553_v5  ;;  %v17584_v62 = vld [vmem:[%s19844_s13 + $0x1148] ss:$24 sps:$4 sm:$0xff]   ;;  %v17592_v0 = vld [vmem:[%s19844_s13 + $0x117c] ss:$24 sps:$4 sm:$0xff]  }
 0x6ae   : > { %7616 = vmatprep.subr.bf16.mxu0 %v17550_v3  ;;  %18146 = vtanh.f32 %v16039_v11  ;;  %v16041_v46 = vadd.f32 %v5197_v17, %v3487_v63  ;;  %v17587_v63 = vld [vmem:[%s19844_s13 + $0xb50] ss:$24 sps:$4 sm:$0xff]   ;;  %v17593_v5 = vld [vmem:[%s19844_s13 + $0xb80] ss:$24 sps:$4 sm:$0xff]   ;;  %v17601_v9 = vld [vmem:[%s19844_s13 + $0xbb4] ss:$24 sps:$4 sm:$0xff]  }
 0x6af   : > { %18148 = vtanh.f32 %v16040_v13  ;;  %v17590_v3 = vld [vmem:[%s19844_s13 + $0x1178] ss:$24 sps:$4 sm:$0xff]   ;;  %v17604_v12 = vld [vmem:[%s19844_s13 + $0x11dc] ss:$24 sps:$4 sm:$0xff]  }
 0x6b0   : > { %18150 = vtanh.f32 %v16041_v46  ;;  %7660 = vmatpush1.bf16.msra.mxu1 %v17551_v14  ;;  %v17599_v11 = vld [vmem:[%s19844_s13 + $0xbb0] ss:$24 sps:$4 sm:$0xff]   ;;  %v17605_v13 = vld [vmem:[%s19844_s13 + $0xbe0] ss:$24 sps:$4 sm:$0xff]   ;;  %v17610_v17 = vld [vmem:[%s19844_s13 + $0xc14] ss:$24 sps:$4 sm:$0xff]  }
 0x6b1   : > { %7617 = vmatpush1.bf16.msra.mxu0 %v17548_v24  ;;  %7661 = vmatprep.subr.bf16.mxu1 %v17559_v19  ;;  %v17607_v24 = vld [vmem:[%s19844_s13 + $0xbe4] ss:$24 sps:$4 sm:$0xff]   ;;  %v17602_v14 = vld [vmem:[%s19844_s13 + $0x11d8] ss:$24 sps:$4 sm:$0xff]  }
 0x6b2   : > { %7618 = vmatprep.subr.bf16.mxu0 %v17556_v18  ;;  %v17613_v18 = vld [vmem:[%s19844_s13 + $0x1204] ss:$24 sps:$4 sm:$0xff]   ;;  %v15115_v46 = vld [vmem:[%s19829_s6 + $0xf8] sm:$0xff] }
 0x6b3   : > { %v15109_v19 = vld [vmem:[%s19829_s6 + $0xc8] sm:$0xff] }
 0x6b4   : > { %7662 = vmatpush1.bf16.msra.mxu1 %v17557_v22  ;;  %v17611_v22 = vld [vmem:[%s19844_s13 + $0x1200] ss:$24 sps:$4 sm:$0xff]  }
 0x6b5   : > { %7619 = vmatpush1.bf16.msra.mxu0 %v17554_v20  ;;  %7663 = vmatprep.subr.bf16.mxu1 %v17565_v50  ;;  %v17608_v20 = vld [vmem:[%s19844_s13 + $0xc10] ss:$24 sps:$4 sm:$0xff]   ;;  %v17619_v50 = vld [vmem:[%s19844_s13 + $0x1234] ss:$24 sps:$4 sm:$0xff]  }
 0x6b6   : > { %7620 = vmatprep.subr.bf16.mxu0 %v17562_v47  ;;  %v17616_v47 = vld [vmem:[%s19844_s13 + $0xc44] ss:$24 sps:$4 sm:$0xff]  }
 0x6b7   : > { %v18145_v30 = vpop.eup %18144 }
 0x6b8   : > { %v18147_v54 = vpop.eup %18146  ;;  %7664 = vmatpush1.bf16.msra.mxu1 %v17563_v25  ;;  %v5374_v43 = vmul.f32 %v18145_v30, %v5353_v27  ;;  %v17614_v25 = vld [vmem:[%s19844_s13 + $0xc40] ss:$24 sps:$4 sm:$0xff]   ;;  %v17628_v30 = vld [vmem:[%s19844_s13 + $0xca4] ss:$24 sps:$4 sm:$0xff]  }
 0x6b9   : > { %7621 = vmatpush1.bf16.msra.mxu0 %v17560_v2  ;;  %v18149_v34 = vpop.eup %18148  ;;  %7665 = vmatprep.subr.bf16.mxu1 %v17571_v29  ;;  %v5375_v37 = vmul.f32 %v18147_v54, %v5357_v21  ;;  %v20573_v2 = vpack.c.bf16 %v15115_v46, %v15109_v19  ;;  %v17625_v29 = vld [vmem:[%s19844_s13 + $0x1264] ss:$24 sps:$4 sm:$0xff]   ;;  %v17631_v54 = vld [vmem:[%s19844_s13 + $0x1294] ss:$24 sps:$4 sm:$0xff]  }
 0x6ba   : > { %7622 = vmatprep.subr.bf16.mxu0 %v17568_v28  ;;  %v18151_v38 = vpop.eup %18150  ;;  %v5385_v40 = vadd.f32 %v20365_v42, %v5374_v43  ;;  %v5380_v15 = vmul.f32 %v18149_v34, %v5353_v27  ;;  %v17583_v42 = vld [vmem:[%s19844_s13 + $0xb24] ss:$24 sps:$4 sm:$0xff]   ;;  %v17617_v27 = vld [vmem:[%s19844_s13 + $0x1230] ss:$24 sps:$4 sm:$0xff]   ;;  %v17622_v28 = vld [vmem:[%s19844_s13 + $0xc74] ss:$24 sps:$4 sm:$0xff]  }
 0x6bb   : > { %v5381_v16 = vmul.f32 %v18151_v38, %v5357_v21  ;;  %v17623_v21 = vld [vmem:[%s19844_s13 + $0x1260] ss:$24 sps:$4 sm:$0xff]   ;;  %v17637_v43 = vld [vmem:[%s19844_s13 + $0x12c4] ss:$24 sps:$4 sm:$0xff]   ;;  %v20592_v34 = vsub.s32 4, %v20315_v4 }
 0x6bc   : > { %7666 = vmatpush1.bf16.msra.mxu1 %v17569_v33  ;;  %v20540_v44 = vadd.f32 %v5385_v40, %v5375_v37  ;;  %v5392_v7 = vadd.f32 %v20371_v52, %v5380_v15  ;;  %v17589_v52 = vld [vmem:[%s19844_s13 + $0xb54] ss:$24 sps:$4 sm:$0xff]   ;;  %v20597_v37 = vsub.s32 5, %v20315_v4  ;;  %v17640_v38 = vld [vmem:[%s19844_s13 + $0xd04] ss:$24 sps:$4 sm:$0xff]  }
 0x6bd   : > { %7623 = vmatpush1.bf16.msra.mxu0 %v17566_v32  ;;  %7667 = vmatprep.subr.bf16.mxu1 %v17577_v36  ;;  %v17626_v32 = vld [vmem:[%s19844_s13 + $0xca0] ss:$24 sps:$4 sm:$0xff]   ;;  %v17634_v33 = vld [vmem:[%s19844_s13 + $0xcd4] ss:$24 sps:$4 sm:$0xff]   ;;  %21638 = vst [vmem:[#allocation41_spill] sm:$0xff] %v20592_v34  ;;  %v3491_v15 = vrot.slane %v20504_v61, %v20592_v34 }
 0x6be   : > { %7624 = vmatprep.subr.bf16.mxu0 %v17574_v35  ;;  %v20545_v49 = vadd.f32 %v5392_v7, %v5381_v16  ;;  %v17632_v35 = vld [vmem:[%s19844_s13 + $0xcd0] ss:$24 sps:$4 sm:$0xff]   ;;  %v17635_v36 = vld [vmem:[%s19844_s13 + $0x12c0] ss:$24 sps:$4 sm:$0xff]   ;;  %21639 = vst [vmem:[#allocation42_spill] sm:$0xff] %v20597_v37  ;;  %v3495_v16 = vrot.slane %v20504_v61, %v20597_v37 }
 0x6bf   : > { %v17643_v40 = vld [vmem:[%s19844_s13 + $0x12f4] ss:$24 sps:$4 sm:$0xff]  }
 0x6c0   : > { %7668 = vmatpush1.bf16.msra.mxu1 %v17575_v45  ;;  %v17641_v45 = vld [vmem:[%s19844_s13 + $0x12f0] ss:$24 sps:$4 sm:$0xff]   ;;  %v17646_v7 = vld [vmem:[%s19844_s13 + $0xd34] ss:$24 sps:$4 sm:$0xff]  }
 0x6c1   : > { %7625 = vmatpush1.bf16.msra.mxu0 %v17572_v41  ;;  %7669 = vmatprep.subr.bf16.mxu1 %v17583_v42  ;;  %v17638_v41 = vld [vmem:[%s19844_s13 + $0xd00] ss:$24 sps:$4 sm:$0xff]  }
 0x6c2   : > { %7626 = vmatprep.subr.bf16.mxu0 %v17580_v55  ;;  %v17649_v55 = vld [vmem:[%s19844_s13 + $0x1324] ss:$24 sps:$4 sm:$0xff]  }
 0x6c4   : > { %7670 = vmatpush1.bf16.msra.mxu1 %v17581_v58 }
 0x6c5   : > { %7627 = vmatpush1.bf16.msra.mxu0 %v17578_v56  ;;  %7671 = vmatprep.subr.bf16.mxu1 %v17589_v52 }
 0x6c6   : > { %7628 = vmatprep.subr.bf16.mxu0 %v17586_v60 }
 0x6c8   : > { %7672 = vmatpush1.bf16.msra.mxu1 %v17587_v63  ;;  %v17647_v63 = vld [vmem:[%s19844_s13 + $0x1320] ss:$24 sps:$4 sm:$0xff]  }
 0x6c9   : > { %7629 = vmatpush1.bf16.msra.mxu0 %v17584_v62  ;;  %7673 = vmatprep.subr.bf16.mxu1 %v17595_v1  ;;  %v17644_v62 = vld [vmem:[%s19844_s13 + $0xd30] ss:$24 sps:$4 sm:$0xff]   ;;  %v17652_v1 = vld [vmem:[%s19844_s13 + $0xd64] ss:$24 sps:$4 sm:$0xff]  }
 0x6ca   : > { %7630 = vmatprep.subr.bf16.mxu0 %v17592_v0 }
 0x6cc   : > { %7674 = vmatpush1.bf16.msra.mxu1 %v17593_v5 }
 0x6cd   : > { %7631 = vmatpush1.bf16.msra.mxu0 %v17590_v3  ;;  %7675 = vmatprep.subr.bf16.mxu1 %v17601_v9  ;;  %v17655_v3 = vld [vmem:[%s19844_s13 + $0x1354] ss:$24 sps:$4 sm:$0xff]   ;;  %v17653_v9 = vld [vmem:[%s19844_s13 + $0x1350] ss:$24 sps:$4 sm:$0xff]  }
 0x6ce   : > { %7632 = vmatprep.subr.bf16.mxu0 %v17598_v6  ;;  %v17650_v6 = vld [vmem:[%s19844_s13 + $0xd60] ss:$24 sps:$4 sm:$0xff]  }
 0x6d0   : > { %7676 = vmatpush1.bf16.msra.mxu1 %v17599_v11  ;;  %v17661_v11 = vld [vmem:[%s19844_s13 + $0x1384] ss:$24 sps:$4 sm:$0xff]  }
 0x6d1   : > { %7633 = vmatpush1.bf16.msra.mxu0 %v17596_v10  ;;  %7677 = vmatprep.subr.bf16.mxu1 %v17607_v24  ;;  %v17658_v10 = vld [vmem:[%s19844_s13 + $0xd94] ss:$24 sps:$4 sm:$0xff]   ;;  %v17659_v24 = vld [vmem:[%s19844_s13 + $0x1380] ss:$24 sps:$4 sm:$0xff]  }
 0x6d2   : > { %7634 = vmatprep.subr.bf16.mxu0 %v17604_v12  ;;  %v17656_v12 = vld [vmem:[%s19844_s13 + $0xd90] ss:$24 sps:$4 sm:$0xff]  }
 0x6d4   : > { %7678 = vmatpush1.bf16.msra.mxu1 %v17605_v13  ;;  %v17664_v13 = vld [vmem:[%s19844_s13 + $0xdc4] ss:$24 sps:$4 sm:$0xff]  }
 0x6d5   : > { %7635 = vmatpush1.bf16.msra.mxu0 %v17602_v14  ;;  %7690 = vmatprep.subr.bf16.mxu1 %v17610_v17  ;;  %v5361_v14 = vrot.slane %v20525_v26, %v20592_v34  ;;  %v17667_v17 = vld [vmem:[%s19844_s13 + $0x13b4] ss:$24 sps:$4 sm:$0xff]  }
 0x6d6   : > { %9830 = vmatprep.subr.bf16.mxu0 %v17613_v18  ;;  %v5365_v18 = vrot.slane %v20525_v26, %v20597_v37 }
 0x6d7   : > { %7680 = vmatmul.mubr.bf16.vlgmr.msra.gmra.mrb[12].mxu1 %v20297_v8  ;;  %v17620_v8 = vld [vmem:[%s19844_s13 + $0xc70] ss:$24 sps:$4 sm:$0xff]  }
 0x6d8   : > { %7637 = vmatmul.mubr.bf16.vlgmr.msra.gmra.mrb[8].mxu0 %v20471_v31  ;;  %7691 = vmatpush1.bf16.msra.mxu1 %v17608_v20  ;;  %v17662_v20 = vld [vmem:[%s19844_s13 + $0xdc0] ss:$24 sps:$4 sm:$0xff]  }
 0x6d9   : > { %9831 = vmatpush1.bf16.msra.mxu0 %v17611_v22  ;;  %7692 = vmatprep.subr.bf16.mxu1 %v17616_v47  ;;  %v17665_v22 = vld [vmem:[%s19844_s13 + $0x13b0] ss:$24 sps:$4 sm:$0xff]  }
 0x6da   : > { %9832 = vmatprep.subr.bf16.mxu0 %v17619_v50  ;;  %7722 = vmatprep.mubr.bf16.mxu1 %v20305_v39  ;;  %v17629_v39 = vld [vmem:[%s19844_s13 + $0x1290] ss:$24 sps:$4 sm:$0xff]  }
 0x6db   : > { %9862 = vmatprep.mubr.bf16.mxu0 %v20573_v2 }
 0x6dc   : > { %7693 = vmatpush1.bf16.msra.mxu1 %v17614_v25 }
 0x6dd   : > { %9833 = vmatpush1.bf16.msra.mxu0 %v17617_v27  ;;  %7694 = vmatprep.subr.bf16.mxu1 %v17622_v28  ;;  %v17670_v27 = vld [vmem:[%s19844_s13 + $0xdf4] ss:$24 sps:$4 sm:$0xff]   ;;  %v17673_v28 = vld [vmem:[%s19844_s13 + $0x13e4] ss:$24 sps:$4 sm:$0xff]  }
 0x6de   : > { %9834 = vmatprep.subr.bf16.mxu0 %v17625_v29 }
 0x6e0   : > { %7695 = vmatpush1.bf16.msra.mxu1 %v17620_v8 }
 0x6e1   : > { %9835 = vmatpush1.bf16.msra.mxu0 %v17623_v21  ;;  %7696 = vmatprep.subr.bf16.mxu1 %v17628_v30 }
 0x6e2   : > { %9836 = vmatprep.subr.bf16.mxu0 %v17631_v54  ;;  %v17668_v54 = vld [vmem:[%s19844_s13 + $0xdf0] ss:$24 sps:$4 sm:$0xff]  }
 0x6e4   : > { %7697 = vmatpush1.bf16.msra.mxu1 %v17626_v32  ;;  %v17671_v32 = vld [vmem:[%s19844_s13 + $0x13e0] ss:$24 sps:$4 sm:$0xff]  }
 0x6e5   : > { %9837 = vmatpush1.bf16.msra.mxu0 %v17629_v39  ;;  %7698 = vmatprep.subr.bf16.mxu1 %v17634_v33  ;;  %v17676_v33 = vld [vmem:[%s19844_s13 + $0xe24] ss:$24 sps:$4 sm:$0xff]  }
 0x6e6   : > { %9838 = vmatprep.subr.bf16.mxu0 %v17637_v43  ;;  %v17679_v43 = vld [vmem:[%s19844_s13 + $0x1414] ss:$24 sps:$4 sm:$0xff]  }
 0x6e8   : > { %7699 = vmatpush1.bf16.msra.mxu1 %v17632_v35  ;;  %v17674_v35 = vld [vmem:[%s19844_s13 + $0xe20] ss:$24 sps:$4 sm:$0xff]  }
 0x6e9   : > { %9839 = vmatpush1.bf16.msra.mxu0 %v17635_v36  ;;  %7700 = vmatprep.subr.bf16.mxu1 %v17640_v38  ;;  %v17677_v36 = vld [vmem:[%s19844_s13 + $0x1410] ss:$24 sps:$4 sm:$0xff]   ;;  %v17682_v38 = vld [vmem:[%s19844_s13 + $0xe54] ss:$24 sps:$4 sm:$0xff]  }
 0x6ea   : > { %9840 = vmatprep.subr.bf16.mxu0 %v17643_v40  ;;  %v17680_v40 = vld [vmem:[%s19844_s13 + $0xe50] ss:$24 sps:$4 sm:$0xff]  }
 0x6eb   : > { %v5320_v42 = vpop.f32.mrb[4].mxu0 }
 0x6ec   : > { %v16042_v56 = vadd.f32 %v5320_v42, %v3491_v15  ;;  %v5322_v58 = vpop.f32.mrb[5].mxu0  ;;  %7701 = vmatpush1.bf16.msra.mxu1 %v17638_v41  ;;  %v17691_v41 = vld [vmem:[%s19844_s13 + $0x1474] ss:$24 sps:$4 sm:$0xff]   ;;  %v17697_v42 = vld [vmem:[%s19844_s13 + $0x14a4] ss:$24 sps:$4 sm:$0xff]  }
 0x6ed   : > { %v16043_v60 = vadd.f32 %v5322_v58, %v3495_v16  ;;  %v5324_v52 = vpop.f32.mrb[6].mxu0  ;;  %9841 = vmatpush1.bf16.msra.mxu0 %v17641_v45  ;;  %7702 = vmatprep.subr.bf16.mxu1 %v17646_v7  ;;  %v17686_v45 = vld [vmem:[%s19844_s13 + $0xe80] ss:$24 sps:$4 sm:$0xff]   ;;  %v17689_v7 = vld [vmem:[%s19844_s13 + $0x1470] ss:$24 sps:$4 sm:$0xff]  }
 0x6ee   : > { %18152 = vtanh.f32 %v16042_v56  ;;  %v16044_v61 = vadd.f32 %v5324_v52, %v3491_v15  ;;  %v5326_v0 = vpop.f32.mrb[7].mxu0  ;;  %9842 = vmatprep.subr.bf16.mxu0 %v17649_v55  ;;  %v17683_v15 = vld [vmem:[%s19844_s13 + $0x1440] ss:$24 sps:$4 sm:$0xff]   ;;  %v17694_v55 = vld [vmem:[%s19844_s13 + $0xeb4] ss:$24 sps:$4 sm:$0xff]  }
 0x6ef   : > { %18154 = vtanh.f32 %v16043_v60  ;;  %v16045_v5 = vadd.f32 %v5326_v0, %v3495_v16  ;;  %v17688_v16 = vld [vmem:[%s19844_s13 + $0xe84] ss:$24 sps:$4 sm:$0xff]   ;;  %v17692_v56 = vld [vmem:[%s19844_s13 + $0xeb0] ss:$24 sps:$4 sm:$0xff]   ;;  %v17695_v58 = vld [vmem:[%s19844_s13 + $0x14a0] ss:$24 sps:$4 sm:$0xff]  }
 0x6f0   : > { %18156 = vtanh.f32 %v16044_v61  ;;  %7703 = vmatpush1.bf16.msra.mxu1 %v17644_v62  ;;  %v17700_v60 = vld [vmem:[%s19844_s13 + $0xee4] ss:$24 sps:$4 sm:$0xff]   ;;  %v17703_v52 = vld [vmem:[%s19844_s13 + $0x14d4] ss:$24 sps:$4 sm:$0xff]   ;;  %v17698_v62 = vld [vmem:[%s19844_s13 + $0xee0] ss:$24 sps:$4 sm:$0xff]  }
 0x6f1   : > { %18158 = vtanh.f32 %v16045_v5  ;;  %9843 = vmatpush1.bf16.msra.mxu0 %v17647_v63  ;;  %7704 = vmatprep.subr.bf16.mxu1 %v17652_v1  ;;  %v17701_v63 = vld [vmem:[%s19844_s13 + $0x14d0] ss:$24 sps:$4 sm:$0xff]   ;;  %v15108_v61 = vld [vmem:[%s19829_s6 + $0xc0] sm:$0xff] }
 0x6f2   : > { %9844 = vmatprep.subr.bf16.mxu0 %v17655_v3  ;;  %v15114_v0 = vld [vmem:[%s19829_s6 + $0xf0] sm:$0xff]  ;;  %v17706_v1 = vld [vmem:[%s19844_s13 + $0xf14] ss:$24 sps:$4 sm:$0xff]  }
 0x6f3   : > { %v17709_v3 = vld [vmem:[%s19844_s13 + $0x1504] ss:$24 sps:$4 sm:$0xff]   ;;  %v20657_v5 = vpack.c.bf16 %v15114_v0, %v15108_v61  ;;  %v17776_v0 = vld [vmem:[%s19844_s13 + $0x1150] ss:$24 sps:$4 sm:$0xff]  }
 0x6f4   : > { %7705 = vmatpush1.bf16.msra.mxu1 %v17650_v6  ;;  %v15111_v6 = vld [vmem:[%s19829_s6 + $0xd8] sm:$0xff]  ;;  %v17781_v61 = vld [vmem:[%s19844_s13 + $0x1744] ss:$24 sps:$4 sm:$0xff]  }
 0x6f5   : > { %9845 = vmatpush1.bf16.msra.mxu0 %v17653_v9  ;;  %7706 = vmatprep.subr.bf16.mxu1 %v17658_v10  ;;  %v15117_v9 = vld [vmem:[%s19829_s6 + $0x108] sm:$0xff]  ;;  %v17704_v10 = vld [vmem:[%s19844_s13 + $0xf10] ss:$24 sps:$4 sm:$0xff]  }
 0x6f6   : > { %9846 = vmatprep.subr.bf16.mxu0 %v17661_v11  ;;  %v17707_v11 = vld [vmem:[%s19844_s13 + $0x1500] ss:$24 sps:$4 sm:$0xff]  }
 0x6f8   : > { %v18153_v19 = vpop.eup %18152  ;;  %7707 = vmatpush1.bf16.msra.mxu1 %v17656_v12  ;;  %v17712_v12 = vld [vmem:[%s19844_s13 + $0xf44] ss:$24 sps:$4 sm:$0xff]  }
 0x6f9   : > { %v18155_v46 = vpop.eup %18154  ;;  %9847 = vmatpush1.bf16.msra.mxu0 %v17659_v24  ;;  %v5376_v47 = vmul.f32 %v18153_v19, %v5361_v14  ;;  %7708 = vmatprep.subr.bf16.mxu1 %v17664_v13  ;;  %v17715_v24 = vld [vmem:[%s19844_s13 + $0x1534] ss:$24 sps:$4 sm:$0xff]   ;;  %v17710_v13 = vld [vmem:[%s19844_s13 + $0xf40] ss:$24 sps:$4 sm:$0xff]   ;;  %v17721_v19 = vld [vmem:[%s19844_s13 + $0x1564] ss:$24 sps:$4 sm:$0xff]  }
 0x6fa   : > { %v18157_v50 = vpop.eup %18156  ;;  %9848 = vmatprep.subr.bf16.mxu0 %v17667_v17  ;;  %v5377_v25 = vmul.f32 %v18155_v46, %v5365_v18  ;;  %v17713_v17 = vld [vmem:[%s19844_s13 + $0x1530] ss:$24 sps:$4 sm:$0xff]   ;;  %v17719_v46 = vld [vmem:[%s19844_s13 + $0x1560] ss:$24 sps:$4 sm:$0xff]  }
 0x6fb   : > { %v18159_v29 = vpop.eup %18158  ;;  %v5387_v26 = vadd.f32 %v20540_v44, %v5376_v47  ;;  %v5382_v8 = vmul.f32 %v18157_v50, %v5361_v14  ;;  %v20665_v14 = vpack.c.bf16 %v15117_v9, %v15111_v6  ;;  %v17722_v47 = vld [vmem:[%s19844_s13 + $0xfa0] ss:$24 sps:$4 sm:$0xff]   ;;  %v17730_v50 = vld [vmem:[%s19844_s13 + $0xfd4] ss:$24 sps:$4 sm:$0xff]  }
 0x6fc   : > { %v5383_v21 = vmul.f32 %v18159_v29, %v5365_v18  ;;  %7709 = vmatpush1.bf16.msra.mxu1 %v17662_v20  ;;  %v17718_v18 = vld [vmem:[%s19844_s13 + $0xf74] ss:$24 sps:$4 sm:$0xff]   ;;  %v17724_v20 = vld [vmem:[%s19844_s13 + $0xfa4] ss:$24 sps:$4 sm:$0xff]   ;;  %v17782_v9 = vld [vmem:[%s19844_s13 + $0x1180] ss:$24 sps:$4 sm:$0xff]  }
 0x6fd   : > { %9849 = vmatpush1.bf16.msra.mxu0 %v17665_v22  ;;  %v5388_v30 = vadd.f32 %v5387_v26, %v5377_v25  ;;  %v5394_v39 = vadd.f32 %v20545_v49, %v5382_v8  ;;  %7710 = vmatprep.subr.bf16.mxu1 %v17670_v27  ;;  %v17685_v49 = vld [vmem:[%s19844_s13 + $0x1444] ss:$24 sps:$4 sm:$0xff]   ;;  %v17727_v22 = vld [vmem:[%s19844_s13 + $0x1594] ss:$24 sps:$4 sm:$0xff]   ;;  %v17728_v27 = vld [vmem:[%s19844_s13 + $0xfd0] ss:$24 sps:$4 sm:$0xff]  }
 0x6fe   : > { %9850 = vmatprep.subr.bf16.mxu0 %v17673_v28  ;;  %v17733_v25 = vld [vmem:[%s19844_s13 + $0x15c4] ss:$24 sps:$4 sm:$0xff]   ;;  %v17731_v28 = vld [vmem:[%s19844_s13 + $0x15c0] ss:$24 sps:$4 sm:$0xff]   ;;  %v17739_v26 = vld [vmem:[%s19844_s13 + $0x15f4] ss:$24 sps:$4 sm:$0xff]  }
 0x6ff   : > { %5389 = vadd.xlane.f32.xlu1 %v5388_v30  ;;  %v5395_v44 = vadd.f32 %v5394_v39, %v5383_v21  ;;  %v17736_v29 = vld [vmem:[%s19844_s13 + $0x1004] ss:$24 sps:$4 sm:$0xff]   ;;  %v17734_v8 = vld [vmem:[%s19844_s13 + $0x1000] ss:$24 sps:$4 sm:$0xff]   ;;  %v17737_v21 = vld [vmem:[%s19844_s13 + $0x15f0] ss:$24 sps:$4 sm:$0xff]  }
 0x700   : > { %7711 = vmatpush1.bf16.msra.mxu1 %v17668_v54  ;;  %v17742_v30 = vld [vmem:[%s19844_s13 + $0x1034] ss:$24 sps:$4 sm:$0xff]   ;;  %v17745_v54 = vld [vmem:[%s19844_s13 + $0x1624] ss:$24 sps:$4 sm:$0xff]   ;;  %v17743_v39 = vld [vmem:[%s19844_s13 + $0x1620] ss:$24 sps:$4 sm:$0xff]  }
 0x701   : > { %9851 = vmatpush1.bf16.msra.mxu0 %v17671_v32  ;;  %5396 = vadd.xlane.f32.xlu0 %v5395_v44  ;;  %v17740_v32 = vld [vmem:[%s19844_s13 + $0x1030] ss:$24 sps:$4 sm:$0xff]   ;;  %v17751_v44 = vld [vmem:[%s19844_s13 + $0x1654] ss:$24 sps:$4 sm:$0xff]  }
 0x702   : > { %7712 = vmatprep.subr.bf16.mxu1 %v17676_v33  ;;  %9852 = vmatprep.subr.bf16.mxu0 %v17679_v43  ;;  %v17748_v33 = vld [vmem:[%s19844_s13 + $0x1064] ss:$24 sps:$4 sm:$0xff]   ;;  %v17746_v43 = vld [vmem:[%s19844_s13 + $0x1060] ss:$24 sps:$4 sm:$0xff]   ;;  %v17787_v6 = vld [vmem:[%s19844_s13 + $0x1774] ss:$24 sps:$4 sm:$0xff]  }
 0x704   : > { %7713 = vmatpush1.bf16.msra.mxu1 %v17674_v35  ;;  %v17749_v35 = vld [vmem:[%s19844_s13 + $0x1650] ss:$24 sps:$4 sm:$0xff]  }
 0x705   : > { %9853 = vmatpush1.bf16.msra.mxu0 %v17677_v36  ;;  %7714 = vmatprep.subr.bf16.mxu1 %v17682_v38  ;;  %v17754_v36 = vld [vmem:[%s19844_s13 + $0x1094] ss:$24 sps:$4 sm:$0xff]   ;;  %v17757_v38 = vld [vmem:[%s19844_s13 + $0x1684] ss:$24 sps:$4 sm:$0xff]  }
 0x706   : > { %9854 = vmatprep.subr.bf16.mxu0 %v17685_v49  ;;  %v17752_v49 = vld [vmem:[%s19844_s13 + $0x1090] ss:$24 sps:$4 sm:$0xff]  }
 0x708   : > { %7715 = vmatpush1.bf16.msra.mxu1 %v17680_v40  ;;  %v17755_v40 = vld [vmem:[%s19844_s13 + $0x1680] ss:$24 sps:$4 sm:$0xff]  }
 0x709   : > { %9855 = vmatpush1.bf16.msra.mxu0 %v17683_v15  ;;  %7716 = vmatprep.subr.bf16.mxu1 %v17688_v16  ;;  %v17760_v15 = vld [vmem:[%s19844_s13 + $0x10c4] ss:$24 sps:$4 sm:$0xff]   ;;  %v17763_v16 = vld [vmem:[%s19844_s13 + $0x16b4] ss:$24 sps:$4 sm:$0xff]  }
 0x70a   : > { %9856 = vmatprep.subr.bf16.mxu0 %v17691_v41  ;;  %v17758_v41 = vld [vmem:[%s19844_s13 + $0x10c0] ss:$24 sps:$4 sm:$0xff]  }
 0x70c   : > { %7717 = vmatpush1.bf16.msra.mxu1 %v17686_v45  ;;  %v17761_v45 = vld [vmem:[%s19844_s13 + $0x16b0] ss:$24 sps:$4 sm:$0xff]  }
 0x70d   : > { %9857 = vmatpush1.bf16.msra.mxu0 %v17689_v7  ;;  %7718 = vmatprep.subr.bf16.mxu1 %v17694_v55  ;;  %v17766_v7 = vld [vmem:[%s19844_s13 + $0x10f4] ss:$24 sps:$4 sm:$0xff]   ;;  %v17769_v55 = vld [vmem:[%s19844_s13 + $0x16e4] ss:$24 sps:$4 sm:$0xff]  }
 0x70e   : > { %9858 = vmatprep.subr.bf16.mxu0 %v17697_v42  ;;  %v17764_v42 = vld [vmem:[%s19844_s13 + $0x10f0] ss:$24 sps:$4 sm:$0xff]  }
 0x710   : > { %7719 = vmatpush1.bf16.msra.mxu1 %v17692_v56  ;;  %v17767_v56 = vld [vmem:[%s19844_s13 + $0x16e0] ss:$24 sps:$4 sm:$0xff]  }
 0x711   : > { %9859 = vmatpush1.bf16.msra.mxu0 %v17695_v58  ;;  %7720 = vmatprep.subr.bf16.mxu1 %v17700_v60  ;;  %v17772_v58 = vld [vmem:[%s19844_s13 + $0x1124] ss:$24 sps:$4 sm:$0xff]   ;;  %v17775_v60 = vld [vmem:[%s19844_s13 + $0x1714] ss:$24 sps:$4 sm:$0xff]  }
 0x712   : > { %9860 = vmatprep.subr.bf16.mxu0 %v17703_v52  ;;  %v17770_v52 = vld [vmem:[%s19844_s13 + $0x1120] ss:$24 sps:$4 sm:$0xff]  }
 0x714   : > { %7721 = vmatpush1.bf16.msra.mxu1 %v17698_v62  ;;  %v17773_v62 = vld [vmem:[%s19844_s13 + $0x1710] ss:$24 sps:$4 sm:$0xff]  }
 0x715   : > { %9861 = vmatpush1.bf16.msra.mxu0 %v17701_v63  ;;  %7733 = vmatprep.subr.bf16.mxu1 %v17706_v1  ;;  %v17778_v63 = vld [vmem:[%s19844_s13 + $0x1154] ss:$24 sps:$4 sm:$0xff]   ;;  %v17779_v1 = vld [vmem:[%s19844_s13 + $0x1740] ss:$24 sps:$4 sm:$0xff]  }
 0x716   : > { %9873 = vmatprep.subr.bf16.mxu0 %v17709_v3  ;;  %v17784_v3 = vld [vmem:[%s19844_s13 + $0x1184] ss:$24 sps:$4 sm:$0xff]  }
 0x717   : > { %7723 = vmatmul.mubr.bf16.vlgmr.msra.gmra.mrb[12].mxu1 %v20399_v23  ;;  %v17716_v23 = vld [vmem:[%s19844_s13 + $0xf70] ss:$24 sps:$4 sm:$0xff]  }
 0x718   : > { %9863 = vmatmul.mubr.bf16.vlgmr.msra.gmra.mrb[12].mxu0 %v20657_v5  ;;  %7734 = vmatpush1.bf16.msra.mxu1 %v17704_v10  ;;  %v17785_v10 = vld [vmem:[%s19844_s13 + $0x1770] ss:$24 sps:$4 sm:$0xff]  }
 0x719   : > { %9874 = vmatpush1.bf16.msra.mxu0 %v17707_v11  ;;  %7735 = vmatprep.subr.bf16.mxu1 %v17712_v12  ;;  %v17790_v11 = vld [vmem:[%s19844_s13 + $0x11b4] ss:$24 sps:$4 sm:$0xff]   ;;  %v17793_v12 = vld [vmem:[%s19844_s13 + $0x17a4] ss:$24 sps:$4 sm:$0xff]  }
 0x71a   : > { %9875 = vmatprep.subr.bf16.mxu0 %v17715_v24  ;;  %7765 = vmatprep.mubr.bf16.mxu1 %v20403_v53  ;;  %v17725_v53 = vld [vmem:[%s19844_s13 + $0x1590] ss:$24 sps:$4 sm:$0xff]  }
 0x71b   : > { %9905 = vmatprep.mubr.bf16.mxu0 %v20665_v14  ;;  %v17788_v24 = vld [vmem:[%s19844_s13 + $0x11b0] ss:$24 sps:$4 sm:$0xff]  }
 0x71c   : > { %7736 = vmatpush1.bf16.msra.mxu1 %v17710_v13  ;;  %v17791_v13 = vld [vmem:[%s19844_s13 + $0x17a0] ss:$24 sps:$4 sm:$0xff]  }
 0x71d   : > { %9876 = vmatpush1.bf16.msra.mxu0 %v17713_v17  ;;  %7737 = vmatprep.subr.bf16.mxu1 %v17718_v18  ;;  %v17796_v17 = vld [vmem:[%s19844_s13 + $0x11e4] ss:$24 sps:$4 sm:$0xff]   ;;  %v17799_v18 = vld [vmem:[%s19844_s13 + $0x17d4] ss:$24 sps:$4 sm:$0xff]  }
 0x71e   : > { %9877 = vmatprep.subr.bf16.mxu0 %v17721_v19  ;;  %v17794_v19 = vld [vmem:[%s19844_s13 + $0x11e0] ss:$24 sps:$4 sm:$0xff]  }
 0x720   : > { %7738 = vmatpush1.bf16.msra.mxu1 %v17716_v23  ;;  %v17797_v23 = vld [vmem:[%s19844_s13 + $0x17d0] ss:$24 sps:$4 sm:$0xff]  }
 0x721   : > { %9878 = vmatpush1.bf16.msra.mxu0 %v17719_v46  ;;  %7739 = vmatprep.subr.bf16.mxu1 %v17724_v20  ;;  %v15110_v46 = vld [vmem:[%s19829_s6 + $0xd0] sm:$0xff]  ;;  %v15116_v20 = vld [vmem:[%s19829_s6 + $0x100] sm:$0xff] }
 0x722   : > { %9879 = vmatprep.subr.bf16.mxu0 %v17727_v22  ;;  %v17802_v22 = vld [vmem:[%s19844_s13 + $0x1804] ss:$24 sps:$4 sm:$0xff]  }
 0x724   : > { %7740 = vmatpush1.bf16.msra.mxu1 %v17722_v47  ;;  %v17805_v47 = vld [vmem:[%s19844_s13 + $0x120c] ss:$24 sps:$4 sm:$0xff]  }
 0x725   : > { %9880 = vmatpush1.bf16.msra.mxu0 %v17725_v53  ;;  %7741 = vmatprep.subr.bf16.mxu1 %v17730_v50  ;;  %v20733_v53 = vpack.c.bf16 %v15116_v20, %v15110_v46  ;;  %v15113_v50 = vld [vmem:[%s19829_s6 + $0xe8] sm:$0xff]  ;;  %v17856_v20 = vld [vmem:[%s19844_s13 + $0x19b4] ss:$24 sps:$4 sm:$0xff]  }
 0x726   : > { %9881 = vmatprep.subr.bf16.mxu0 %v17733_v25  ;;  %v15119_v25 = vld [vmem:[%s19829_s6 + $0x118] sm:$0xff] }
 0x728   : > { %7742 = vmatpush1.bf16.msra.mxu1 %v17728_v27  ;;  %v17800_v27 = vld [vmem:[%s19844_s13 + $0x1800] ss:$24 sps:$4 sm:$0xff]  }
 0x729   : > { %9882 = vmatpush1.bf16.msra.mxu0 %v17731_v28  ;;  %7743 = vmatprep.subr.bf16.mxu1 %v17736_v29  ;;  %v17803_v28 = vld [vmem:[%s19844_s13 + $0x1208] ss:$24 sps:$4 sm:$0xff]   ;;  %v17808_v29 = vld [vmem:[%s19844_s13 + $0x1834] ss:$24 sps:$4 sm:$0xff]  }
 0x72a   : > { %9883 = vmatprep.subr.bf16.mxu0 %v17739_v26  ;;  %v17811_v26 = vld [vmem:[%s19844_s13 + $0x123c] ss:$24 sps:$4 sm:$0xff]  }
 0x72c   : > { %7744 = vmatpush1.bf16.msra.mxu1 %v17734_v8  ;;  %v20741_v8 = vpack.c.bf16 %v15119_v25, %v15113_v50 }
 0x72d   : > { %9884 = vmatpush1.bf16.msra.mxu0 %v17737_v21  ;;  %7745 = vmatprep.subr.bf16.mxu1 %v17742_v30  ;;  %v17806_v21 = vld [vmem:[%s19844_s13 + $0x1830] ss:$24 sps:$4 sm:$0xff]  }
 0x72e   : > { %9885 = vmatprep.subr.bf16.mxu0 %v17745_v54  ;;  %v17809_v30 = vld [vmem:[%s19844_s13 + $0x1238] ss:$24 sps:$4 sm:$0xff]   ;;  %v17814_v54 = vld [vmem:[%s19844_s13 + $0x1864] ss:$24 sps:$4 sm:$0xff]  }
 0x730   : > { %7746 = vmatpush1.bf16.msra.mxu1 %v17740_v32  ;;  %v17817_v32 = vld [vmem:[%s19844_s13 + $0x126c] ss:$24 sps:$4 sm:$0xff]  }
 0x731   : > { %9886 = vmatpush1.bf16.msra.mxu0 %v17743_v39  ;;  %7747 = vmatprep.subr.bf16.mxu1 %v17748_v33  ;;  %v17815_v39 = vld [vmem:[%s19844_s13 + $0x1268] ss:$24 sps:$4 sm:$0xff]   ;;  %v17820_v33 = vld [vmem:[%s19844_s13 + $0x1894] ss:$24 sps:$4 sm:$0xff]  }
 0x732   : > { %9887 = vmatprep.subr.bf16.mxu0 %v17751_v44  ;;  %v17823_v44 = vld [vmem:[%s19844_s13 + $0x129c] ss:$24 sps:$4 sm:$0xff]  }
 0x734   : > { %7748 = vmatpush1.bf16.msra.mxu1 %v17746_v43  ;;  %v17818_v43 = vld [vmem:[%s19844_s13 + $0x1890] ss:$24 sps:$4 sm:$0xff]  }
 0x735   : > { %9888 = vmatpush1.bf16.msra.mxu0 %v17749_v35  ;;  %7749 = vmatprep.subr.bf16.mxu1 %v17754_v36  ;;  %v17821_v35 = vld [vmem:[%s19844_s13 + $0x1298] ss:$24 sps:$4 sm:$0xff]   ;;  %v17826_v36 = vld [vmem:[%s19844_s13 + $0x18c4] ss:$24 sps:$4 sm:$0xff]  }
 0x736   : > { %9889 = vmatprep.subr.bf16.mxu0 %v17757_v38  ;;  %v17829_v38 = vld [vmem:[%s19844_s13 + $0x12cc] ss:$24 sps:$4 sm:$0xff]  }
 0x738   : > { %7750 = vmatpush1.bf16.msra.mxu1 %v17752_v49  ;;  %v17824_v49 = vld [vmem:[%s19844_s13 + $0x18c0] ss:$24 sps:$4 sm:$0xff]  }
 0x739   : > { %9890 = vmatpush1.bf16.msra.mxu0 %v17755_v40  ;;  %7751 = vmatprep.subr.bf16.mxu1 %v17760_v15  ;;  %v17827_v40 = vld [vmem:[%s19844_s13 + $0x12c8] ss:$24 sps:$4 sm:$0xff]  }
 0x73a   : > { %9891 = vmatprep.subr.bf16.mxu0 %v17763_v16  ;;  %v20762_v15 = vld [vmem:[%s19850_s10 + $0x6] sm:$0x3f]  ;;  %v17832_v16 = vld [vmem:[%s19844_s13 + $0x18f4] ss:$24 sps:$4 sm:$0xff]  }
 0x73c   : > { %7752 = vmatpush1.bf16.msra.mxu1 %v17758_v41  ;;  %v17835_v41 = vld [vmem:[%s19844_s13 + $0x12fc] ss:$24 sps:$4 sm:$0xff]  }
 0x73d   : > { %9892 = vmatpush1.bf16.msra.mxu0 %v17761_v45  ;;  %7753 = vmatprep.subr.bf16.mxu1 %v17766_v7  ;;  %v5922_v45 = vrot.slane %v20762_v15, %v20323_v51  ;;  %v5926_v7 = vrot.slane %v20762_v15, %v20330_v59 }
 0x73e   : > { %9893 = vmatprep.subr.bf16.mxu0 %v17769_v55  ;;  %v17830_v55 = vld [vmem:[%s19844_s13 + $0x18f0] ss:$24 sps:$4 sm:$0xff]  }
 0x740   : > { %7754 = vmatpush1.bf16.msra.mxu1 %v17764_v42  ;;  %v17833_v42 = vld [vmem:[%s19844_s13 + $0x12f8] ss:$24 sps:$4 sm:$0xff]  }
 0x741   : > { %9894 = vmatpush1.bf16.msra.mxu0 %v17767_v56  ;;  %7755 = vmatprep.subr.bf16.mxu1 %v17772_v58  ;;  %v17838_v56 = vld [vmem:[%s19844_s13 + $0x1924] ss:$24 sps:$4 sm:$0xff]  }
 0x742   : > { %9895 = vmatprep.subr.bf16.mxu0 %v17775_v60  ;;  %v17841_v58 = vld [vmem:[%s19844_s13 + $0x132c] ss:$24 sps:$4 sm:$0xff]  }
 0x744   : > { %7756 = vmatpush1.bf16.msra.mxu1 %v17770_v52 }
 0x745   : > { %9896 = vmatpush1.bf16.msra.mxu0 %v17773_v62  ;;  %7757 = vmatprep.subr.bf16.mxu1 %v17778_v63 }
 0x746   : > { %9897 = vmatprep.subr.bf16.mxu0 %v17781_v61 }
 0x748   : > { %7758 = vmatpush1.bf16.msra.mxu1 %v17776_v0  ;;  %v17836_v0 = vld [vmem:[%s19844_s13 + $0x1920] ss:$24 sps:$4 sm:$0xff]  }
 0x749   : > { %9898 = vmatpush1.bf16.msra.mxu0 %v17779_v1  ;;  %7759 = vmatprep.subr.bf16.mxu1 %v17784_v3  ;;  %v17839_v1 = vld [vmem:[%s19844_s13 + $0x1328] ss:$24 sps:$4 sm:$0xff]  }
 0x74a   : > { %9899 = vmatprep.subr.bf16.mxu0 %v17787_v6 }
 0x74c   : > { %7760 = vmatpush1.bf16.msra.mxu1 %v17782_v9  ;;  %v17844_v9 = vld [vmem:[%s19844_s13 + $0x1954] ss:$24 sps:$4 sm:$0xff]  }
 0x74d   : > { %9900 = vmatpush1.bf16.msra.mxu0 %v17785_v10  ;;  %7761 = vmatprep.subr.bf16.mxu1 %v17790_v11  ;;  %v17847_v10 = vld [vmem:[%s19844_s13 + $0x135c] ss:$24 sps:$4 sm:$0xff]  }
 0x74e   : > { %9901 = vmatprep.subr.bf16.mxu0 %v17793_v12  ;;  %v17842_v12 = vld [vmem:[%s19844_s13 + $0x1950] ss:$24 sps:$4 sm:$0xff]  }
 0x750   : > { %7762 = vmatpush1.bf16.msra.mxu1 %v17788_v24  ;;  %v17845_v24 = vld [vmem:[%s19844_s13 + $0x1358] ss:$24 sps:$4 sm:$0xff]  }
 0x751   : > { %9902 = vmatpush1.bf16.msra.mxu0 %v17791_v13  ;;  %7763 = vmatprep.subr.bf16.mxu1 %v17796_v17  ;;  %v17850_v13 = vld [vmem:[%s19844_s13 + $0x1984] ss:$24 sps:$4 sm:$0xff]  }
 0x752   : > { %9903 = vmatprep.subr.bf16.mxu0 %v17799_v18  ;;  %v17853_v17 = vld [vmem:[%s19844_s13 + $0x138c] ss:$24 sps:$4 sm:$0xff]  }
 0x753   : > { %v20783_v18 = vld [vmem:[%s19852_s8 + $0x6] sm:$0x3f] }
 0x754   : > { %7764 = vmatpush1.bf16.msra.mxu1 %v17794_v19  ;;  %v17848_v19 = vld [vmem:[%s19844_s13 + $0x1980] ss:$24 sps:$4 sm:$0xff]   ;;  %v7792_v46 = vrot.slane %v20783_v18, %v20323_v51 }
 0x755   : > { %9904 = vmatpush1.bf16.msra.mxu0 %v17797_v23  ;;  %9959 = vmatprep.subr.bf16.mxu1 %v17805_v47  ;;  %v17851_v23 = vld [vmem:[%s19844_s13 + $0x1388] ss:$24 sps:$4 sm:$0xff]   ;;  %v7796_v47 = vrot.slane %v20783_v18, %v20330_v59 }
 0x756   : > { %9916 = vmatprep.subr.bf16.mxu0 %v17802_v22  ;;  %v17859_v22 = vld [vmem:[%s19844_s13 + $0x13bc] ss:$24 sps:$4 sm:$0xff]  }
 0x757   : > { %7766 = vmatmul.mubr.bf16.vlgmr.msra.gmra.mrb[12].mxu1 %v20471_v31  ;;  %v17812_v31 = vld [vmem:[%s19844_s13 + $0x1860] ss:$24 sps:$4 sm:$0xff]  }
 0x758   : > { %9906 = vmatmul.mubr.bf16.vlgmr.msra.gmra.mrb[12].mxu0 %v20733_v53  ;;  %9960 = vmatpush1.bf16.msra.mxu1 %v17803_v28  ;;  %v17857_v28 = vld [vmem:[%s19844_s13 + $0x13b8] ss:$24 sps:$4 sm:$0xff]  }
 0x759   : > { %9917 = vmatpush1.bf16.msra.mxu0 %v17800_v27  ;;  %9961 = vmatprep.subr.bf16.mxu1 %v17811_v26  ;;  %v17854_v27 = vld [vmem:[%s19844_s13 + $0x19b0] ss:$24 sps:$4 sm:$0xff]  }
 0x75a   : > { %9918 = vmatprep.subr.bf16.mxu0 %v17808_v29  ;;  %9948 = vmatprep.mubr.bf16.mxu0 %v20741_v8 }
 0x75b   : > { %9991 = vmatprep.mubr.bf16.mxu1 %v20573_v2 }
 0x75c   : > { %9962 = vmatpush1.bf16.msra.mxu1 %v17809_v30  ;;  %v17865_v30 = vld [vmem:[%s19844_s13 + $0x13ec] ss:$24 sps:$4 sm:$0xff]  }
 0x75d   : > { %9919 = vmatpush1.bf16.msra.mxu0 %v17806_v21  ;;  %9963 = vmatprep.subr.bf16.mxu1 %v17817_v32  ;;  %v17862_v21 = vld [vmem:[%s19844_s13 + $0x19e4] ss:$24 sps:$4 sm:$0xff]  }
 0x75e   : > { %9920 = vmatprep.subr.bf16.mxu0 %v17814_v54 }
 0x760   : > { %9964 = vmatpush1.bf16.msra.mxu1 %v17815_v39 }
 0x761   : > { %9921 = vmatpush1.bf16.msra.mxu0 %v17812_v31  ;;  %9965 = vmatprep.subr.bf16.mxu1 %v17823_v44  ;;  %v17860_v44 = vld [vmem:[%s19844_s13 + $0x19e0] ss:$24 sps:$4 sm:$0xff]  }
 0x762   : > { %9922 = vmatprep.subr.bf16.mxu0 %v17820_v33 }
 0x764   : > { %9966 = vmatpush1.bf16.msra.mxu1 %v17821_v35  ;;  %v17868_v35 = vld [vmem:[%s19844_s13 + $0x1a14] ss:$24 sps:$4 sm:$0xff]  }
 0x765   : > { %9923 = vmatpush1.bf16.msra.mxu0 %v17818_v43  ;;  %9967 = vmatprep.subr.bf16.mxu1 %v17829_v38  ;;  %v17863_v43 = vld [vmem:[%s19844_s13 + $0x13e8] ss:$24 sps:$4 sm:$0xff]  }
 0x766   : > { %9924 = vmatprep.subr.bf16.mxu0 %v17826_v36  ;;  %v17871_v36 = vld [vmem:[%s19844_s13 + $0x141c] ss:$24 sps:$4 sm:$0xff]  }
 0x768   : > { %9968 = vmatpush1.bf16.msra.mxu1 %v17827_v40  ;;  %v17869_v40 = vld [vmem:[%s19844_s13 + $0x1418] ss:$24 sps:$4 sm:$0xff]  }
 0x769   : > { %9925 = vmatpush1.bf16.msra.mxu0 %v17824_v49  ;;  %9969 = vmatprep.subr.bf16.mxu1 %v17835_v41  ;;  %v17866_v49 = vld [vmem:[%s19844_s13 + $0x1a10] ss:$24 sps:$4 sm:$0xff]   ;;  %v17877_v41 = vld [vmem:[%s19844_s13 + $0x144c] ss:$24 sps:$4 sm:$0xff]  }
 0x76a   : > { %9926 = vmatprep.subr.bf16.mxu0 %v17832_v16  ;;  %v7509_v60 = vpop.f32.mrb[8].mxu1  ;;  %v17874_v16 = vld [vmem:[%s19844_s13 + $0x1a44] ss:$24 sps:$4 sm:$0xff]  }
 0x76b   : > { %v16046_v52 = vadd.f32 %v7509_v60, %v5922_v45  ;;  %v7511_v62 = vpop.f32.mrb[9].mxu1  ;;  %v17886_v60 = vld [vmem:[%s19844_s13 + $0x1aa4] ss:$24 sps:$4 sm:$0xff]  }
 0x76c   : > { %v16047_v63 = vadd.f32 %v7511_v62, %v5926_v7  ;;  %v7513_v61 = vpop.f32.mrb[10].mxu1  ;;  %9970 = vmatpush1.bf16.msra.mxu1 %v17833_v42  ;;  %v17883_v42 = vld [vmem:[%s19844_s13 + $0x147c] ss:$24 sps:$4 sm:$0xff]  }
 0x76d   : > { %9927 = vmatpush1.bf16.msra.mxu0 %v17830_v55  ;;  %18160 = vtanh.f32 %v16046_v52  ;;  %v16048_v3 = vadd.f32 %v7513_v61, %v5922_v45  ;;  %v7515_v6 = vpop.f32.mrb[11].mxu1  ;;  %9971 = vmatprep.subr.bf16.mxu1 %v17841_v58  ;;  %v17872_v45 = vld [vmem:[%s19844_s13 + $0x1a40] ss:$24 sps:$4 sm:$0xff]   ;;  %v17880_v55 = vld [vmem:[%s19844_s13 + $0x1a74] ss:$24 sps:$4 sm:$0xff]  }
 0x76e   : > { %9928 = vmatprep.subr.bf16.mxu0 %v17838_v56  ;;  %18162 = vtanh.f32 %v16047_v63  ;;  %v16049_v11 = vadd.f32 %v7515_v6, %v5926_v7  ;;  %v17875_v7 = vld [vmem:[%s19844_s13 + $0x1448] ss:$24 sps:$4 sm:$0xff]   ;;  %v17881_v58 = vld [vmem:[%s19844_s13 + $0x1478] ss:$24 sps:$4 sm:$0xff]   ;;  %v17889_v52 = vld [vmem:[%s19844_s13 + $0x14ac] ss:$24 sps:$4 sm:$0xff]  }
 0x76f   : > { %18164 = vtanh.f32 %v16048_v3  ;;  %v17878_v56 = vld [vmem:[%s19844_s13 + $0x1a70] ss:$24 sps:$4 sm:$0xff]   ;;  %v17884_v61 = vld [vmem:[%s19844_s13 + $0x1aa0] ss:$24 sps:$4 sm:$0xff]   ;;  %v17895_v3 = vld [vmem:[%s19844_s13 + $0x14dc] ss:$24 sps:$4 sm:$0xff]  }
 0x770   : > { %18166 = vtanh.f32 %v16049_v11  ;;  %9972 = vmatpush1.bf16.msra.mxu1 %v17839_v1  ;;  %v17892_v1 = vld [vmem:[%s19844_s13 + $0x1ad4] ss:$24 sps:$4 sm:$0xff]   ;;  %v17890_v11 = vld [vmem:[%s19844_s13 + $0x1ad0] ss:$24 sps:$4 sm:$0xff]  }
 0x771   : > { %9929 = vmatpush1.bf16.msra.mxu0 %v17836_v0  ;;  %9973 = vmatprep.subr.bf16.mxu1 %v17847_v10  ;;  %v17887_v0 = vld [vmem:[%s19844_s13 + $0x14a8] ss:$24 sps:$4 sm:$0xff]  }
 0x772   : > { %9930 = vmatprep.subr.bf16.mxu0 %v17844_v9 }
 0x774   : > { %9974 = vmatpush1.bf16.msra.mxu1 %v17845_v24  ;;  %v17893_v24 = vld [vmem:[%s19844_s13 + $0x14d8] ss:$24 sps:$4 sm:$0xff]  }
 0x775   : > { %9931 = vmatpush1.bf16.msra.mxu0 %v17842_v12  ;;  %9975 = vmatprep.subr.bf16.mxu1 %v17853_v17  ;;  %v15118_v17 = vld [vmem:[%s19829_s6 + $0x110] sm:$0xff] }
 0x776   : > { %9932 = vmatprep.subr.bf16.mxu0 %v17850_v13  ;;  %v15112_v13 = vld [vmem:[%s19829_s6 + $0xe0] sm:$0xff] }
 0x777   : > { %v18161_v50 = vpop.eup %18160 }
 0x778   : > { %v18163_v25 = vpop.eup %18162  ;;  %9976 = vmatpush1.bf16.msra.mxu1 %v17851_v23  ;;  %v7819_v29 = vmul.f32 %v18161_v50, %v7792_v46  ;;  %v17898_v23 = vld [vmem:[%s19844_s13 + $0x150c] ss:$24 sps:$4 sm:$0xff]  }
 0x779   : > { %9933 = vmatpush1.bf16.msra.mxu0 %v17848_v19  ;;  %v18165_v26 = vpop.eup %18164  ;;  %9977 = vmatprep.subr.bf16.mxu1 %v17859_v22  ;;  %v7820_v54 = vmul.f32 %v18163_v25, %v7796_v47  ;;  %v17896_v25 = vld [vmem:[%s19844_s13 + $0x1508] ss:$24 sps:$4 sm:$0xff]  }
 0x77a   : > { %9934 = vmatprep.subr.bf16.mxu0 %v17856_v20  ;;  %v18167_v32 = vpop.eup %18166  ;;  %v7825_v31 = vmul.f32 %v18165_v26, %v7792_v46  ;;  %v17901_v46 = vld [vmem:[%s19844_s13 + $0x1214] ss:$24 sps:$4 sm:$0xff]   ;;  %v17907_v26 = vld [vmem:[%s19844_s13 + $0x1244] ss:$24 sps:$4 sm:$0xff]  }
 0x77b   : > { %v7826_v39 = vmul.f32 %v18167_v32, %v7796_v47  ;;  %v20797_v33 = vadd.f32 %v7820_v54, %v7819_v29  ;;  %v20827_v47 = vpack.c.bf16 %v15118_v17, %v15112_v13  ;;  %v17904_v29 = vld [vmem:[%s19844_s13 + $0x153c] ss:$24 sps:$4 sm:$0xff]   ;;  %v17902_v32 = vld [vmem:[%s19844_s13 + $0x1538] ss:$24 sps:$4 sm:$0xff]  }
 0x77c   : > { %9978 = vmatpush1.bf16.msra.mxu1 %v17857_v28 }
 0x77d   : > { %9935 = vmatpush1.bf16.msra.mxu0 %v17854_v27  ;;  %9979 = vmatprep.subr.bf16.mxu1 %v17865_v30  ;;  %v20803_v38 = vadd.f32 %v7826_v39, %v7825_v31  ;;  %v17899_v27 = vld [vmem:[%s19844_s13 + $0x1210] ss:$24 sps:$4 sm:$0xff]   ;;  %v17905_v31 = vld [vmem:[%s19844_s13 + $0x1240] ss:$24 sps:$4 sm:$0xff]  }
 0x77e   : > { %9936 = vmatprep.subr.bf16.mxu0 %v17862_v21 }
 0x780   : > { %9980 = vmatpush1.bf16.msra.mxu1 %v17863_v43  ;;  %v17913_v43 = vld [vmem:[%s19844_s13 + $0x1274] ss:$24 sps:$4 sm:$0xff]  }
 0x781   : > { %9937 = vmatpush1.bf16.msra.mxu0 %v17860_v44  ;;  %9981 = vmatprep.subr.bf16.mxu1 %v17871_v36  ;;  %v17910_v44 = vld [vmem:[%s19844_s13 + $0x156c] ss:$24 sps:$4 sm:$0xff]  }
 0x782   : > { %9938 = vmatprep.subr.bf16.mxu0 %v17868_v35 }
 0x784   : > { %9982 = vmatpush1.bf16.msra.mxu1 %v17869_v40  ;;  %v17911_v40 = vld [vmem:[%s19844_s13 + $0x1270] ss:$24 sps:$4 sm:$0xff]  }
 0x785   : > { %9939 = vmatpush1.bf16.msra.mxu0 %v17866_v49  ;;  %9983 = vmatprep.subr.bf16.mxu1 %v17877_v41  ;;  %v17908_v49 = vld [vmem:[%s19844_s13 + $0x1568] ss:$24 sps:$4 sm:$0xff]   ;;  %v17916_v41 = vld [vmem:[%s19844_s13 + $0x159c] ss:$24 sps:$4 sm:$0xff]  }
 0x786   : > { %9940 = vmatprep.subr.bf16.mxu0 %v17874_v16 }
 0x788   : > { %9984 = vmatpush1.bf16.msra.mxu1 %v17875_v7  ;;  %v17917_v7 = vld [vmem:[%s19844_s13 + $0x12a0] ss:$24 sps:$4 sm:$0xff]  }
 0x789   : > { %9941 = vmatpush1.bf16.msra.mxu0 %v17872_v45  ;;  %9985 = vmatprep.subr.bf16.mxu1 %v17883_v42  ;;  %v17919_v45 = vld [vmem:[%s19844_s13 + $0x12a4] ss:$24 sps:$4 sm:$0xff]   ;;  %v17925_v42 = vld [vmem:[%s19844_s13 + $0x12d4] ss:$24 sps:$4 sm:$0xff]  }
 0x78a   : > { %9942 = vmatprep.subr.bf16.mxu0 %v17880_v55  ;;  %v17922_v55 = vld [vmem:[%s19844_s13 + $0x15cc] ss:$24 sps:$4 sm:$0xff]  }
 0x78c   : > { %v5390_v62 = vpop.xlane.xlu1 %5389  ;;  %9986 = vmatpush1.bf16.msra.mxu1 %v17881_v58  ;;  %v17923_v58 = vld [vmem:[%s19844_s13 + $0x12d0] ss:$24 sps:$4 sm:$0xff]  }
 0x78d   : > { %v5398_v63 = vrot.slane %v5390_v62, 4  ;;  %9943 = vmatpush1.bf16.msra.mxu0 %v17878_v56  ;;  %9987 = vmatprep.subr.bf16.mxu1 %v17889_v52  ;;  %v17920_v56 = vld [vmem:[%s19844_s13 + $0x15c8] ss:$24 sps:$4 sm:$0xff]   ;;  %v17931_v52 = vld [vmem:[%s19844_s13 + $0x1304] ss:$24 sps:$4 sm:$0xff]  }
 0x78e   : > { %9944 = vmatprep.subr.bf16.mxu0 %v17886_v60  ;;  %v5397_v9 = vpop.xlane.xlu0 %5396  ;;  %v17928_v60 = vld [vmem:[%s19844_s13 + $0x15fc] ss:$24 sps:$4 sm:$0xff]  }
 0x78f   : > { %v5399_v6 = vmax.f32 %v5390_v62, %v5398_v63  ;;  %v5404_v10 = vrot.slane %v5397_v9, 4 }
 0x790   : > { %9988 = vmatpush1.bf16.msra.mxu1 %v17887_v0  ;;  %v5934_v0 = vrot.slane %v20762_v15, %v20499_v57 }
 0x791   : > { %v5400_v12 = vrot.slane %v5399_v6, 2  ;;  %9945 = vmatpush1.bf16.msra.mxu0 %v17884_v61  ;;  %v5405_v19 = vmax.f32 %v5397_v9, %v5404_v10  ;;  %9989 = vmatprep.subr.bf16.mxu1 %v17895_v3  ;;  %v5930_v61 = vrot.slane %v20762_v15, %v20494_v48  ;;  %v17929_v3 = vld [vmem:[%s19844_s13 + $0x1300] ss:$24 sps:$4 sm:$0xff]   ;;  %v17934_v10 = vld [vmem:[%s19844_s13 + $0x162c] ss:$24 sps:$4 sm:$0xff]  }
 0x792   : > { %9946 = vmatprep.subr.bf16.mxu0 %v17892_v1  ;;  %v17926_v1 = vld [vmem:[%s19844_s13 + $0x15f8] ss:$24 sps:$4 sm:$0xff]  }
 0x793   : > { %v5401_v20 = vmax.f32 %v5399_v6, %v5400_v12  ;;  %v5406_v22 = vrot.slane %v5405_v19, 2 }
 0x794   : > { %9990 = vmatpush1.bf16.msra.mxu1 %v17893_v24 }
 0x795   : > { %v5402_v50 = vrot.slane %v5401_v20, 1  ;;  %9947 = vmatpush1.bf16.msra.mxu0 %v17890_v11  ;;  %v5407_v28 = vmax.f32 %v5405_v19, %v5406_v22  ;;  %10002 = vmatprep.subr.bf16.mxu1 %v17898_v23  ;;  %v17937_v11 = vld [vmem:[%s19844_s13 + $0x1334] ss:$24 sps:$4 sm:$0xff]   ;;  %v17935_v22 = vld [vmem:[%s19844_s13 + $0x1330] ss:$24 sps:$4 sm:$0xff]  }
 0x796   : > { %10088 = vmatprep.subr.bf16.mxu0 %v17901_v46 }
 0x797   : > { %v5403_v21 = vmax.f32 %v5401_v20, %v5402_v50  ;;  %v5408_v30 = vrot.slane %v5407_v28, 1  ;;  %9992 = vmatmul.mubr.bf16.vlgmr.msra.gmra.mrb[16].mxu1 %v20657_v5  ;;  %v17932_v20 = vld [vmem:[%s19844_s13 + $0x1628] ss:$24 sps:$4 sm:$0xff]  }
 0x798   : > { %9949 = vmatmul.mubr.bf16.vlgmr.msra.gmra.mrb[12].mxu0 %v20827_v47  ;;  %10003 = vmatpush1.bf16.msra.mxu1 %v17896_v25 }
 0x799   : > { %v5410_v54 = vsub.f32 %v5390_v62, %v5403_v21  ;;  %10089 = vmatpush1.bf16.msra.mxu0 %v17899_v27  ;;  %v5409_v39 = vmax.f32 %v5407_v28, %v5408_v30  ;;  %10004 = vmatprep.subr.bf16.mxu1 %v17904_v29  ;;  %v17940_v28 = vld [vmem:[%s19844_s13 + $0x165c] ss:$24 sps:$4 sm:$0xff]  }
 0x79a   : > { %10090 = vmatprep.subr.bf16.mxu0 %v17907_v26  ;;  %10034 = vmatprep.mubr.bf16.mxu1 %v20665_v14  ;;  %v17943_v29 = vld [vmem:[%s19844_s13 + $0x1364] ss:$24 sps:$4 sm:$0xff]  }
 0x79b   : > { %v5412_v35 = vmul.f32 1.442695, %v5410_v54  ;;  %10120 = vmatprep.mubr.bf16.mxu0 %v20573_v2  ;;  %v5411_v36 = vsub.f32 %v5397_v9, %v5409_v39  ;;  %v17914_v2 = vld [vmem:[%s19844_s13 + $0x1598] ss:$24 sps:$4 sm:$0xff]  }
 0x79c   : > { %10005 = vmatpush1.bf16.msra.mxu1 %v17902_v32  ;;  %v17938_v32 = vld [vmem:[%s19844_s13 + $0x1658] ss:$24 sps:$4 sm:$0xff]  }
 0x79d   : > { %18168 = vpow2.f32 %v5412_v35  ;;  %10091 = vmatpush1.bf16.msra.mxu0 %v17905_v31  ;;  %v5414_v16 = vmul.f32 1.442695, %v5411_v36  ;;  %10006 = vmatprep.subr.bf16.mxu1 %v17910_v44  ;;  %v17941_v31 = vld [vmem:[%s19844_s13 + $0x1360] ss:$24 sps:$4 sm:$0xff]   ;;  %v17946_v44 = vld [vmem:[%s19844_s13 + $0x168c] ss:$24 sps:$4 sm:$0xff]  }
 0x79e   : > { %10092 = vmatprep.subr.bf16.mxu0 %v17913_v43  ;;  %v17949_v43 = vld [vmem:[%s19844_s13 + $0x1394] ss:$24 sps:$4 sm:$0xff]  }
 0x79f   : > { %18170 = vpow2.f32 %v5414_v16  ;;  %v7800_v16 = vrot.slane %v20783_v18, %v20494_v48 }
 0x7a0   : > { %10007 = vmatpush1.bf16.msra.mxu1 %v17908_v49  ;;  %v17944_v49 = vld [vmem:[%s19844_s13 + $0x1688] ss:$24 sps:$4 sm:$0xff]  }
 0x7a1   : > { %10093 = vmatpush1.bf16.msra.mxu0 %v17911_v40  ;;  %10008 = vmatprep.subr.bf16.mxu1 %v17916_v41  ;;  %v17947_v40 = vld [vmem:[%s19844_s13 + $0x1390] ss:$24 sps:$4 sm:$0xff]   ;;  %v17952_v41 = vld [vmem:[%s19844_s13 + $0x16bc] ss:$24 sps:$4 sm:$0xff]  }
 0x7a2   : > { %10094 = vmatprep.subr.bf16.mxu0 %v17919_v45  ;;  %v17955_v45 = vld [vmem:[%s19844_s13 + $0x13c4] ss:$24 sps:$4 sm:$0xff]  }
 0x7a4   : > { %10009 = vmatpush1.bf16.msra.mxu1 %v17914_v2  ;;  %v7804_v2 = vrot.slane %v20783_v18, %v20499_v57 }
 0x7a5   : > { %10095 = vmatpush1.bf16.msra.mxu0 %v17917_v7  ;;  %10010 = vmatprep.subr.bf16.mxu1 %v17922_v55 }
 0x7a6   : > { %10096 = vmatprep.subr.bf16.mxu0 %v17925_v42  ;;  %v17950_v42 = vld [vmem:[%s19844_s13 + $0x16b8] ss:$24 sps:$4 sm:$0xff]  }
 0x7a7   : > { %v20853_v62 = vpop.eup %18168 }
 0x7a8   : > { %v5416_v63 = vrot.slane %v20853_v62, 4  ;;  %10011 = vmatpush1.bf16.msra.mxu1 %v17920_v56  ;;  %v17953_v56 = vld [vmem:[%s19844_s13 + $0x13c0] ss:$24 sps:$4 sm:$0xff]  }
 0x7a9   : > { %10097 = vmatpush1.bf16.msra.mxu0 %v17923_v58  ;;  %v20862_v6 = vpop.eup %18170  ;;  %10012 = vmatprep.subr.bf16.mxu1 %v17928_v60 }
 0x7aa   : > { %v5417_v9 = vadd.f32 %v20853_v62, %v5416_v63  ;;  %10098 = vmatprep.subr.bf16.mxu0 %v17931_v52  ;;  %v5422_v12 = vrot.slane %v20862_v6, 4  ;;  %v17958_v52 = vld [vmem:[%s19844_s13 + $0x16ec] ss:$24 sps:$4 sm:$0xff]  }
 0x7ab   : > { %v7638_v24 = vpop.f32.mrb[8].mxu0  ;;  %v17961_v63 = vld [vmem:[%s19844_s13 + $0x13f4] ss:$24 sps:$4 sm:$0xff]  }
 0x7ac   : > { %v5418_v13 = vrot.slane %v5417_v9, 2  ;;  %v16050_v17 = vadd.f32 %v7638_v24, %v5930_v61  ;;  %v7640_v15 = vpop.f32.mrb[9].mxu0  ;;  %v5423_v19 = vadd.f32 %v20862_v6, %v5422_v12  ;;  %10013 = vmatpush1.bf16.msra.mxu1 %v17926_v1  ;;  %v17959_v24 = vld [vmem:[%s19844_s13 + $0x13f0] ss:$24 sps:$4 sm:$0xff]  }
 0x7ad   : > { %v16051_v23 = vadd.f32 %v7640_v15, %v5934_v0  ;;  %v7642_v46 = vpop.f32.mrb[10].mxu0  ;;  %10099 = vmatpush1.bf16.msra.mxu0 %v17929_v3  ;;  %10014 = vmatprep.subr.bf16.mxu1 %v17934_v10 }
 0x7ae   : > { %v5419_v50 = vadd.f32 %v5418_v13, %v5417_v9  ;;  %18172 = vtanh.f32 %v16050_v17  ;;  %v16052_v25 = vadd.f32 %v7642_v46, %v5930_v61  ;;  %v7644_v27 = vpop.f32.mrb[11].mxu0  ;;  %10100 = vmatprep.subr.bf16.mxu0 %v17937_v11  ;;  %v5424_v26 = vrot.slane %v5423_v19, 2  ;;  %v17956_v9 = vld [vmem:[%s19844_s13 + $0x16e8] ss:$24 sps:$4 sm:$0xff]   ;;  %v17964_v13 = vld [vmem:[%s19844_s13 + $0x171c] ss:$24 sps:$4 sm:$0xff]  }
 0x7af   : > { %18174 = vtanh.f32 %v16051_v23  ;;  %v16053_v21 = vadd.f32 %v7644_v27, %v5934_v0  ;;  %v17967_v17 = vld [vmem:[%s19844_s13 + $0x1424] ss:$24 sps:$4 sm:$0xff]   ;;  %v18234_v23 = vld [vmem:[%s19829_s6] sm:$0xff] }
 0x7b0   : > { %v5420_v30 = vrot.slane %v5419_v50, 1  ;;  %18176 = vtanh.f32 %v16052_v25  ;;  %v5425_v54 = vadd.f32 %v5424_v26, %v5423_v19  ;;  %10015 = vmatpush1.bf16.msra.mxu1 %v17932_v20  ;;  %v18237_v25 = vld [vmem:[%s19829_s6 + $0x18] sm:$0xff]  ;;  %v18239_v26 = vld [vmem:[%s19829_s6 + $0x28] sm:$0xff] }
 0x7b1   : > { %18178 = vtanh.f32 %v16053_v21  ;;  %10101 = vmatpush1.bf16.msra.mxu0 %v17935_v22  ;;  %10016 = vmatprep.subr.bf16.mxu1 %v17940_v28  ;;  %v18236_v22 = vld [vmem:[%s19829_s6 + $0x10] sm:$0xff]  ;;  %v17962_v28 = vld [vmem:[%s19844_s13 + $0x1718] ss:$24 sps:$4 sm:$0xff]  }
 0x7b2   : > { %v5421_v39 = vadd.f32 %v5420_v30, %v5419_v50  ;;  %10102 = vmatprep.subr.bf16.mxu0 %v17943_v29  ;;  %v5426_v35 = vrot.slane %v5425_v54, 1  ;;  %v18238_v29 = vld [vmem:[%s19829_s6 + $0x20] sm:$0xff] }
 0x7b4   : > { %18180 = vrcp.f32 %v5421_v39  ;;  %v5427_v36 = vadd.f32 %v5426_v35, %v5425_v54  ;;  %10017 = vmatpush1.bf16.msra.mxu1 %v17938_v32  ;;  %v17965_v54 = vld [vmem:[%s19844_s13 + $0x1420] ss:$24 sps:$4 sm:$0xff]   ;;  %v17970_v32 = vld [vmem:[%s19844_s13 + $0x174c] ss:$24 sps:$4 sm:$0xff]  }
 0x7b5   : > { %10103 = vmatpush1.bf16.msra.mxu0 %v17941_v31  ;;  %10018 = vmatprep.subr.bf16.mxu1 %v17946_v44  ;;  %v17973_v35 = vld [vmem:[%s19844_s13 + $0x1454] ss:$24 sps:$4 sm:$0xff]  }
 0x7b6   : > { %10104 = vmatprep.subr.bf16.mxu0 %v17949_v43  ;;  %18182 = vrcp.f32 %v5427_v36 }
 0x7b8   : > { %v18173_v7 = vpop.eup %18172  ;;  %10019 = vmatpush1.bf16.msra.mxu1 %v17944_v49 }
 0x7b9   : > { %v18175_v55 = vpop.eup %18174  ;;  %10105 = vmatpush1.bf16.msra.mxu0 %v17947_v40  ;;  %v7821_v58 = vmul.f32 %v18173_v7, %v7800_v16  ;;  %10020 = vmatprep.subr.bf16.mxu1 %v17952_v41 }
 0x7ba   : > { %v18177_v60 = vpop.eup %18176  ;;  %10106 = vmatprep.subr.bf16.mxu0 %v17955_v45  ;;  %v7822_v61 = vmul.f32 %v18175_v55, %v7804_v2  ;;  %v17968_v45 = vld [vmem:[%s19844_s13 + $0x1748] ss:$24 sps:$4 sm:$0xff]   ;;  %v18241_v55 = vld [vmem:[%s19829_s6 + $0x38] sm:$0xff] }
 0x7bb   : > { %v18179_v0 = vpop.eup %18178  ;;  %v7827_v18 = vmul.f32 %v18177_v60, %v7800_v16  ;;  %v7832_v1 = vadd.f32 %v20797_v33, %v7821_v58  ;;  %v17976_v58 = vld [vmem:[%s19844_s13 + $0x177c] ss:$24 sps:$4 sm:$0xff]  }
 0x7bc   : > { %v7828_v3 = vmul.f32 %v18179_v0, %v7804_v2  ;;  %10021 = vmatpush1.bf16.msra.mxu1 %v17950_v42  ;;  %v18240_v2 = vld [vmem:[%s19829_s6 + $0x30] sm:$0xff] }
 0x7bd   : > { %10107 = vmatpush1.bf16.msra.mxu0 %v17953_v56  ;;  %v7839_v10 = vadd.f32 %v20803_v38, %v7827_v18  ;;  %v20892_v11 = vadd.f32 %v7832_v1, %v7822_v61  ;;  %10022 = vmatprep.subr.bf16.mxu1 %v17958_v52  ;;  %v18235_v38 = vld [vmem:[%s19829_s6 + $0x8] sm:$0xff]  ;;  %v17971_v56 = vld [vmem:[%s19844_s13 + $0x1450] ss:$24 sps:$4 sm:$0xff]   ;;  %v19264_v1 = vmov 1983009808  }
 0x7be   : > { %v18181_v12 = vpop.eup %18180  ;;  %10108 = vmatprep.subr.bf16.mxu0 %v17961_v63  ;;  %v17979_v0 = vld [vmem:[%s19844_s13 + $0x1484] ss:$24 sps:$4 sm:$0xff]  }
 0x7bf   : > { %v5429_v33 = vmul.f32 %v18181_v12, %v20853_v62  ;;  %v20898_v15 = vadd.f32 %v7839_v10, %v7828_v3  ;;  %v20921_v3 = vunpack.c.l.s4 %v19264_v1  ;;  %v17974_v12 = vld [vmem:[%s19844_s13 + $0x1778] ss:$24 sps:$4 sm:$0xff]  }
 0x7c0   : > { %v18183_v19 = vpop.eup %18182  ;;  %10023 = vmatpush1.bf16.msra.mxu1 %v17956_v9 }
 0x7c1   : > { %v5432_v46 = vmul.f32 %v18234_v23, %v5429_v33  ;;  %v5433_v20 = vmul.f32 %v18235_v38, %v5429_v33  ;;  %v5434_v50 = vmul.f32 %v18236_v22, %v5429_v33  ;;  %v5435_v27 = vmul.f32 %v18237_v25, %v5429_v33  ;;  %10109 = vmatpush1.bf16.msra.mxu0 %v17959_v24  ;;  %v18242_v38 = vld [vmem:[%s19829_s6 + $0x40] sm:$0xff]  ;;  %v18243_v22 = vld [vmem:[%s19829_s6 + $0x48] sm:$0xff] }
 0x7c2   : > { %v5436_v62 = vmul.f32 %v18238_v29, %v5429_v33  ;;  %v5437_v21 = vmul.f32 %v18239_v26, %v5429_v33  ;;  %v20908_v30 = vmul.f32 %v18183_v19, %v20862_v6  ;;  %10024 = vmatprep.subr.bf16.mxu1 %v17964_v13  ;;  %10110 = vmatprep.subr.bf16.mxu0 %v17967_v17  ;;  %v17977_v17 = vld [vmem:[%s19844_s13 + $0x1480] ss:$24 sps:$4 sm:$0xff]   ;;  %v17982_v19 = vld [vmem:[%s19844_s13 + $0x17ac] ss:$24 sps:$4 sm:$0xff]  }
 0x7c3   : > { %v5444_v31 = vrot.slane %v5432_v46, 4  ;;  %v5450_v39 = vrot.slane %v5433_v20, 4  ;;  %v5456_v44 = vrot.slane %v5434_v50, 4  ;;  %v5462_v43 = vrot.slane %v5435_v27, 4  ;;  %v17985_v25 = vld [vmem:[%s19844_s13 + $0x14b4] ss:$24 sps:$4 sm:$0xff]  }
 0x7c4   : > { %v5468_v36 = vrot.slane %v5436_v62, 4  ;;  %v5474_v49 = vrot.slane %v5437_v21, 4  ;;  %10025 = vmatpush1.bf16.msra.mxu1 %v17962_v28  ;;  %v5438_v7 = vmul.f32 %v18240_v2, %v20908_v30  ;;  %v5439_v42 = vmul.f32 %v18241_v55, %v20908_v30  ;;  %v18244_v28 = vld [vmem:[%s19829_s6 + $0x50] sm:$0xff] }
 0x7c5   : > { %v5445_v40 = vadd.f32 %v5444_v31, %v5432_v46  ;;  %v5451_v6 = vadd.f32 %v5450_v39, %v5433_v20  ;;  %v5457_v16 = vadd.f32 %v5456_v44, %v5434_v50  ;;  %v5463_v41 = vadd.f32 %v5462_v43, %v5435_v27  ;;  %10111 = vmatpush1.bf16.msra.mxu0 %v17965_v54  ;;  %v17980_v31 = vld [vmem:[%s19844_s13 + $0x17a8] ss:$24 sps:$4 sm:$0xff]   ;;  %v18245_v43 = vld [vmem:[%s19829_s6 + $0x58] sm:$0xff]  ;;  %v17991_v2 = vld [vmem:[%s19844_s13 + $0x14e4] ss:$24 sps:$4 sm:$0xff]  }
 0x7c6   : > { %v5469_v61 = vadd.f32 %v5468_v36, %v5436_v62  ;;  %10026 = vmatprep.subr.bf16.mxu1 %v17970_v32  ;;  %10112 = vmatprep.subr.bf16.mxu0 %v17973_v35  ;;  %v5475_v10 = vadd.f32 %v5474_v49, %v5437_v21  ;;  %v5480_v13 = vrot.slane %v5438_v7, 4  ;;  %v5486_v33 = vrot.slane %v5439_v42, 4  ;;  %v17983_v39 = vld [vmem:[%s19844_s13 + $0x14b0] ss:$24 sps:$4 sm:$0xff]  }
 0x7c7   : > { %v5446_v60 = vrot.slane %v5445_v40, 2  ;;  %v5452_v52 = vrot.slane %v5451_v6, 2  ;;  %v5458_v63 = vrot.slane %v5457_v16, 2  ;;  %v5464_v18 = vrot.slane %v5463_v41, 2 }
 0x7c8   : > { %10027 = vmatpush1.bf16.msra.mxu1 %v17968_v45  ;;  %v5470_v46 = vrot.slane %v5469_v61, 2  ;;  %v5440_v20 = vmul.f32 %v18242_v38, %v20908_v30  ;;  %v5441_v50 = vmul.f32 %v18243_v22, %v20908_v30  ;;  %v5442_v29 = vmul.f32 %v18244_v28, %v20908_v30  ;;  %v17992_v28 = vld [vmem:[%s19844_s13 + $0x1808] ss:$24 sps:$4 sm:$0xff]  }
 0x7c9   : > { %v5447_v9 = vadd.f32 %v5446_v60, %v5445_v40  ;;  %v5453_v24 = vadd.f32 %v5452_v52, %v5451_v6  ;;  %10113 = vmatpush1.bf16.msra.mxu0 %v17971_v56  ;;  %10028 = vmatprep.subr.bf16.mxu1 %v17976_v58  ;;  %v5459_v23 = vadd.f32 %v5458_v63, %v5457_v16  ;;  %v5533_v21 = vunpack.c.0.s8 %v20921_v3  ;;  %v17988_v40 = vld [vmem:[%s19844_s13 + $0x17dc] ss:$24 sps:$4 sm:$0xff]   ;;  %v17986_v63 = vld [vmem:[%s19844_s13 + $0x17d8] ss:$24 sps:$4 sm:$0xff]  }
 0x7ca   : > { %10114 = vmatprep.subr.bf16.mxu0 %v17979_v0  ;;  %v5465_v27 = vadd.f32 %v5464_v18, %v5463_v41  ;;  %v5481_v62 = vadd.f32 %v5480_v13, %v5438_v7  ;;  %v5487_v26 = vadd.f32 %v5486_v33, %v5439_v42  ;;  %v5476_v32 = vrot.slane %v5475_v10, 2  ;;  %v17994_v13 = vld [vmem:[%s19844_s13 + $0x180c] ss:$24 sps:$4 sm:$0xff]  }
 0x7cb   : > { %v5448_v54 = vrot.slane %v5447_v9, 1  ;;  %v5454_v44 = vrot.slane %v5453_v24, 1  ;;  %v5443_v35 = vmul.f32 %v18245_v43, %v20908_v30  ;;  %v5460_v6 = vrot.slane %v5459_v23, 1 }
 0x7cc   : > { %10029 = vmatpush1.bf16.msra.mxu1 %v17974_v12  ;;  %v5482_v36 = vrot.slane %v5481_v62, 2  ;;  %v5488_v49 = vrot.slane %v5487_v26, 2  ;;  %v5471_v16 = vadd.f32 %v5470_v46, %v5469_v61  ;;  %v5492_v41 = vrot.slane %v5440_v20, 4  ;;  %v17989_v12 = vld [vmem:[%s19844_s13 + $0x14e0] ss:$24 sps:$4 sm:$0xff]  }
 0x7cd   : > { %10115 = vmatpush1.bf16.msra.mxu0 %v17977_v17  ;;  %10030 = vmatprep.subr.bf16.mxu1 %v17982_v19  ;;  %v5498_v45 = vrot.slane %v5441_v50, 4  ;;  %v5466_v7 = vrot.slane %v5465_v27, 1  ;;  %v5504_v56 = vrot.slane %v5442_v29, 4  ;;  %v20940_v58 = vadd.f32 %v5448_v54, %v5447_v9  ;;  %v18000_v54 = vld [vmem:[%s19844_s13 + $0x183c] ss:$24 sps:$4 sm:$0xff]  }
 0x7ce   : > { %10116 = vmatprep.subr.bf16.mxu0 %v17985_v25  ;;  %v5483_v55 = vadd.f32 %v5482_v36, %v5481_v62  ;;  %v5489_v42 = vadd.f32 %v5488_v49, %v5487_v26  ;;  %v5477_v30 = vadd.f32 %v5476_v32, %v5475_v10  ;;  %v5493_v60 = vadd.f32 %v5492_v41, %v5440_v20  ;;  %v17997_v10 = vld [vmem:[%s19844_s13 + $0x1514] ss:$24 sps:$4 sm:$0xff]   ;;  %v17995_v26 = vld [vmem:[%s19844_s13 + $0x1510] ss:$24 sps:$4 sm:$0xff]  }
 0x7cf   : > { %v5499_v52 = vadd.f32 %v5498_v45, %v5441_v50  ;;  %v5455_v0 = vadd.f32 %v5454_v44, %v5453_v24  ;;  %v5505_v1 = vadd.f32 %v5504_v56, %v5442_v29  ;;  %v5461_v33 = vadd.f32 %v5460_v6, %v5459_v23  ;;  %v18003_v44 = vld [vmem:[%s19844_s13 + $0x1544] ss:$24 sps:$4 sm:$0xff]   ;;  %v17998_v45 = vld [vmem:[%s19844_s13 + $0x1838] ss:$24 sps:$4 sm:$0xff]  }
 0x7d0   : > { %10031 = vmatpush1.bf16.msra.mxu1 %v17980_v31  ;;  %v5484_v61 = vrot.slane %v5483_v55, 1  ;;  %v5490_v18 = vrot.slane %v5489_v42, 1  ;;  %v5494_v17 = vrot.slane %v5493_v60, 2  ;;  %v5510_v9 = vrot.slane %v5443_v35, 4 }
 0x7d1   : > { %10117 = vmatpush1.bf16.msra.mxu0 %v17983_v39  ;;  %10032 = vmatprep.subr.bf16.mxu1 %v17988_v40  ;;  %v5500_v19 = vrot.slane %v5499_v52, 2  ;;  %v5467_v46 = vadd.f32 %v5466_v7, %v5465_v27  ;;  %v5506_v24 = vrot.slane %v5505_v1, 2  ;;  %v5472_v29 = vrot.slane %v5471_v16, 1 }
 0x7d2   : > { %10118 = vmatprep.subr.bf16.mxu0 %v17991_v2  ;;  %v5485_v38 = vadd.f32 %v5484_v61, %v5483_v55  ;;  %v5491_v20 = vadd.f32 %v5490_v18, %v5489_v42  ;;  %v5495_v22 = vadd.f32 %v5494_v17, %v5493_v60  ;;  %v5511_v25 = vadd.f32 %v5510_v9, %v5443_v35  ;;  %v18010_v17 = vld [vmem:[%s19844_s13 + $0x1898] ss:$24 sps:$4 sm:$0xff]   ;;  %v18018_v9 = vld [vmem:[%s19844_s13 + $0x18cc] ss:$24 sps:$4 sm:$0xff]  }
 0x7d3   : > { %v5501_v50 = vadd.f32 %v5500_v19, %v5499_v52  ;;  %v5478_v62 = vrot.slane %v5477_v30, 1  ;;  %v5507_v23 = vadd.f32 %v5506_v24, %v5505_v1  ;;  %v20953_v43 = vsub.s32 %v5533_v21, %v20315_v4  ;;  %v18001_v4 = vld [vmem:[%s19844_s13 + $0x1540] ss:$24 sps:$4 sm:$0xff]   ;;  %v18006_v21 = vld [vmem:[%s19844_s13 + $0x186c] ss:$24 sps:$4 sm:$0xff]  }
 0x7d4   : > { %10033 = vmatpush1.bf16.msra.mxu1 %v17986_v63  ;;  %v5496_v32 = vrot.slane %v5495_v22, 1  ;;  %v5512_v27 = vrot.slane %v5511_v25, 2  ;;  %v5554_v39 = vcombine.low %v5485_v38, %v5491_v20  ;;  %v5529_v35 = vcombine.low %v20940_v58, %v5455_v0  ;;  %v18009_v58 = vld [vmem:[%s19844_s13 + $0x1574] ss:$24 sps:$4 sm:$0xff]   ;;  %v18004_v52 = vld [vmem:[%s19844_s13 + $0x1868] ss:$24 sps:$4 sm:$0xff]  }
 0x7d5   : > { %10119 = vmatpush1.bf16.msra.mxu0 %v17989_v12  ;;  %10045 = vmatprep.subr.bf16.mxu1 %v17994_v13  ;;  %v5502_v31 = vrot.slane %v5501_v50, 1  ;;  %v5530_v36 = vcombine.low %v5461_v33, %v5467_v46  ;;  %v5508_v49 = vrot.slane %v5507_v23, 1  ;;  %v5473_v2 = vadd.f32 %v5472_v29, %v5471_v16  ;;  %v18007_v63 = vld [vmem:[%s19844_s13 + $0x1570] ss:$24 sps:$4 sm:$0xff]   ;;  %v18012_v0 = vld [vmem:[%s19844_s13 + $0x189c] ss:$24 sps:$4 sm:$0xff]  }
 0x7d6   : > { %10131 = vmatprep.subr.bf16.mxu0 %v17997_v10  ;;  %v5497_v40 = vadd.f32 %v5496_v32, %v5495_v22  ;;  %v5513_v41 = vadd.f32 %v5512_v27, %v5511_v25  ;;  %v5479_v3 = vadd.f32 %v5478_v62, %v5477_v30  ;;  %v5562_v56 = vrot.slane %v5554_v39, %v20953_v43  ;;  %v18015_v1 = vld [vmem:[%s19844_s13 + $0x15a4] ss:$24 sps:$4 sm:$0xff]   ;;  %v18013_v19 = vld [vmem:[%s19844_s13 + $0x15a0] ss:$24 sps:$4 sm:$0xff]   ;;  %v18021_v20 = vld [vmem:[%s19844_s13 + $0x15d4] ss:$24 sps:$4 sm:$0xff]  }
 0x7d7   : > { %10035 = vmatmul.mubr.bf16.vlgmr.msra.gmra.mrb[16].mxu1 %v20733_v53  ;;  %v5503_v6 = vadd.f32 %v5502_v31, %v5501_v50  ;;  %v5509_v7 = vadd.f32 %v5508_v49, %v5507_v23  ;;  %v5544_v16 = vrot.slane %v5530_v36, %v20953_v43  ;;  %v18016_v25 = vld [vmem:[%s19844_s13 + $0x18c8] ss:$24 sps:$4 sm:$0xff]   ;;  %v18024_v23 = vld [vmem:[%s19844_s13 + $0x18fc] ss:$24 sps:$4 sm:$0xff]   ;;  %v18022_v31 = vld [vmem:[%s19844_s13 + $0x18f8] ss:$24 sps:$4 sm:$0xff]  }
 0x7d8   : > { %10046 = vmatpush1.bf16.msra.mxu1 %v17992_v28  ;;  %10121 = vmatmul.mubr.bf16.vlgmr.msra.gmra.mrb[16].mxu0 %v20657_v5  ;;  %v5514_v55 = vrot.slane %v5513_v41, 1  ;;  %v5537_v5 = vrot.slane %v5529_v35, %v20953_v43  ;;  %v5546_v61 = vcombine.low %v5473_v2, %v5479_v3  ;;  %v18019_v62 = vld [vmem:[%s19844_s13 + $0x15d0] ss:$24 sps:$4 sm:$0xff]   ;;  %v18025_v27 = vld [vmem:[%s19844_s13 + $0x1600] ss:$24 sps:$4 sm:$0xff]  }
 0x7d9   : > { %10132 = vmatpush1.bf16.msra.mxu0 %v17995_v26  ;;  %10047 = vmatprep.subr.bf16.mxu1 %v18000_v54  ;;  %v5555_v42 = vcombine.low %v5497_v40, %v5503_v6  ;;  %v18027_v54 = vld [vmem:[%s19844_s13 + $0x1604] ss:$24 sps:$4 sm:$0xff]   ;;  %v18028_v35 = vld [vmem:[%s19844_s13 + $0x1928] ss:$24 sps:$4 sm:$0xff]   ;;  %v18034_v6 = vld [vmem:[%s19844_s13 + $0x1958] ss:$24 sps:$4 sm:$0xff]  }
 0x7da   : > { %10133 = vmatprep.subr.bf16.mxu0 %v18003_v44  ;;  %10077 = vmatprep.mubr.bf16.mxu1 %v20741_v8  ;;  %v5515_v30 = vadd.f32 %v5514_v55, %v5513_v41  ;;  %v5545_v12 = vcombine.low %v5537_v5, %v5544_v16  ;;  %v5553_v10 = vrot.slane %v5546_v61, %v20953_v43  ;;  %v18030_v39 = vld [vmem:[%s19844_s13 + $0x192c] ss:$24 sps:$4 sm:$0xff]   ;;  %v18031_v36 = vld [vmem:[%s19844_s13 + $0x1630] ss:$24 sps:$4 sm:$0xff]   ;;  %v18036_v49 = vld [vmem:[%s19844_s13 + $0x195c] ss:$24 sps:$4 sm:$0xff]  }
 0x7db   : > { %10163 = vmatprep.mubr.bf16.mxu0 %v20665_v14  ;;  %v5569_v60 = vrot.slane %v5555_v42, %v20953_v43  ;;  %v18033_v44 = vld [vmem:[%s19844_s13 + $0x1634] ss:$24 sps:$4 sm:$0xff]   ;;  %v18039_v40 = vld [vmem:[%s19844_s13 + $0x1664] ss:$24 sps:$4 sm:$0xff]   ;;  %v18037_v41 = vld [vmem:[%s19844_s13 + $0x1660] ss:$24 sps:$4 sm:$0xff]  }
 0x7dc   : > { %10048 = vmatpush1.bf16.msra.mxu1 %v17998_v45  ;;  %v5571_v14 = vcombine.low %v5509_v7, %v5515_v30  ;;  %v18042_v45 = vld [vmem:[%s19844_s13 + $0x198c] ss:$24 sps:$4 sm:$0xff]   ;;  %v18040_v3 = vld [vmem:[%s19844_s13 + $0x1988] ss:$24 sps:$4 sm:$0xff]   ;;  %v18046_v55 = vld [vmem:[%s19844_s13 + $0x19b8] ss:$24 sps:$4 sm:$0xff]  }
 0x7dd   : > { %10134 = vmatpush1.bf16.msra.mxu0 %v18001_v4  ;;  %10049 = vmatprep.subr.bf16.mxu1 %v18006_v21  ;;  %v5570_v18 = vcombine.low %v5562_v56, %v5569_v60  ;;  %v18045_v2 = vld [vmem:[%s19844_s13 + $0x1694] ss:$24 sps:$4 sm:$0xff]   ;;  %v18043_v4 = vld [vmem:[%s19844_s13 + $0x1690] ss:$24 sps:$4 sm:$0xff]   ;;  %v18051_v7 = vld [vmem:[%s19844_s13 + $0x16c4] ss:$24 sps:$4 sm:$0xff]  }
 0x7de   : > { %10135 = vmatprep.subr.bf16.mxu0 %v18009_v58  ;;  %v5578_v13 = vrot.slane %v5571_v14, %v20953_v43  ;;  %v18048_v21 = vld [vmem:[%s19844_s13 + $0x19bc] ss:$24 sps:$4 sm:$0xff]   ;;  %v18049_v42 = vld [vmem:[%s19844_s13 + $0x16c0] ss:$24 sps:$4 sm:$0xff]   ;;  %v18054_v56 = vld [vmem:[%s19844_s13 + $0x19ec] ss:$24 sps:$4 sm:$0xff]  }
 0x7df   : > { %v5583_v33 = vrot.slane %v5570_v18, 7  ;;  %v18057_v58 = vld [vmem:[%s19844_s13 + $0x16f4] ss:$24 sps:$4 sm:$0xff]   ;;  %v18052_v5 = vld [vmem:[%s19844_s13 + $0x19e8] ss:$24 sps:$4 sm:$0xff]  }
 0x7e0   : > { %10050 = vmatpush1.bf16.msra.mxu1 %v18004_v52  ;;  %v5594_v38 = vrot.slane %v5578_v13, 7  ;;  %v18055_v16 = vld [vmem:[%s19844_s13 + $0x16f0] ss:$24 sps:$4 sm:$0xff]   ;;  %v18060_v30 = vld [vmem:[%s19844_s13 + $0x1a1c] ss:$24 sps:$4 sm:$0xff]  }
 0x7e1   : > { %10136 = vmatpush1.bf16.msra.mxu0 %v18007_v63  ;;  %10051 = vmatprep.subr.bf16.mxu1 %v18012_v0  ;;  %v5585_v46 = vsel %vm5584_vm4, %v5583_v33, %v5545_v12  ;;  %v18063_v60 = vld [vmem:[%s19844_s13 + $0x1724] ss:$24 sps:$4 sm:$0xff]   ;;  %v18058_v52 = vld [vmem:[%s19844_s13 + $0x1a18] ss:$24 sps:$4 sm:$0xff]   ;;  %v18069_v61 = vld [vmem:[%s19844_s13 + $0x1754] ss:$24 sps:$4 sm:$0xff]  }
 0x7e2   : > { %10137 = vmatprep.subr.bf16.mxu0 %v18015_v1  ;;  %v5587_v24 = vsel %vm5586_vm5, %v5583_v33, %v5585_v46  ;;  %v5595_v50 = vsel %vm5584_vm4, %v5594_v38, %v5553_v10  ;;  %v18061_v63 = vld [vmem:[%s19844_s13 + $0x1720] ss:$24 sps:$4 sm:$0xff]   ;;  %v18066_v0 = vld [vmem:[%s19844_s13 + $0x1a4c] ss:$24 sps:$4 sm:$0xff]   ;;  %v18067_v14 = vld [vmem:[%s19844_s13 + $0x1750] ss:$24 sps:$4 sm:$0xff]  }
 0x7e3   : > { %v5589_v22 = vsel %vm5588_vm6, %v5583_v33, %v5587_v24  ;;  %v5596_v29 = vsel %vm5586_vm5, %v5594_v38, %v5595_v50  ;;  %v18064_v18 = vld [vmem:[%s19844_s13 + $0x1a48] ss:$24 sps:$4 sm:$0xff]   ;;  %v18072_v1 = vld [vmem:[%s19844_s13 + $0x1a7c] ss:$24 sps:$4 sm:$0xff]   ;;  %v18070_v13 = vld [vmem:[%s19844_s13 + $0x1a78] ss:$24 sps:$4 sm:$0xff]  }
 0x7e4   : > { %10052 = vmatpush1.bf16.msra.mxu1 %v18010_v17  ;;  %v5591_v28 = vsel %vm5590_vm7, %v5583_v33, %v5589_v22  ;;  %v5597_v26 = vsel %vm5588_vm6, %v5594_v38, %v5596_v29  ;;  %v18075_v12 = vld [vmem:[%s19844_s13 + $0x1784] ss:$24 sps:$4 sm:$0xff]   ;;  %v18073_v33 = vld [vmem:[%s19844_s13 + $0x1780] ss:$24 sps:$4 sm:$0xff]   ;;  %v18079_v10 = vld [vmem:[%s19844_s13 + $0x17b0] ss:$24 sps:$4 sm:$0xff]  }
 0x7e5   : > { %10138 = vmatpush1.bf16.msra.mxu0 %v18013_v19  ;;  %10053 = vmatprep.subr.bf16.mxu1 %v18018_v9  ;;  %5604 = vst [vmem:[%s20989_s18] sm:$0xff] %v5591_v28  ;;  %v5598_v32 = vsel %vm5590_vm7, %v5594_v38, %v5597_v26  ;;  %v18078_v17 = vld [vmem:[%s19844_s13 + $0x1aac] ss:$24 sps:$4 sm:$0xff]   ;;  %v18076_v9 = vld [vmem:[%s19844_s13 + $0x1aa8] ss:$24 sps:$4 sm:$0xff]   ;;  %v18084_v46 = vld [vmem:[%s19844_s13 + $0x1adc] ss:$24 sps:$4 sm:$0xff]  }
 0x7e6   : > { %10139 = vmatprep.subr.bf16.mxu0 %v18021_v20  ;;  %5605 = vst [vmem:[%s20989_s18 + $0x8] sm:$0xf] %v5598_v32  ;;  %v18081_v19 = vld [vmem:[%s19844_s13 + $0x17b4] ss:$24 sps:$4 sm:$0xff]   ;;  %v18087_v38 = vld [vmem:[%s19844_s13 + $0x17e4] ss:$24 sps:$4 sm:$0xff]  }
 0x7e7   : > { %v18082_v20 = vld [vmem:[%s19844_s13 + $0x1ad8] ss:$24 sps:$4 sm:$0xff]   ;;  %v18090_v22 = vld [vmem:[%s19844_s13 + $0x1814] ss:$24 sps:$4 sm:$0xff]   ;;  %v18105_v32 = vld [vmem:[%s19844_s13 + $0x1904] ss:$24 sps:$4 sm:$0xff]  }
 0x7e8   : > { %10054 = vmatpush1.bf16.msra.mxu1 %v18016_v25  ;;  %v18085_v24 = vld [vmem:[%s19844_s13 + $0x17e0] ss:$24 sps:$4 sm:$0xff]   ;;  %v18088_v50 = vld [vmem:[%s19844_s13 + $0x1810] ss:$24 sps:$4 sm:$0xff]   ;;  %v18093_v25 = vld [vmem:[%s19844_s13 + $0x1844] ss:$24 sps:$4 sm:$0xff]  }
 0x7e9   : > { %10140 = vmatpush1.bf16.msra.mxu0 %v18019_v62  ;;  %10055 = vmatprep.subr.bf16.mxu1 %v18024_v23  ;;  %v18091_v28 = vld [vmem:[%s19844_s13 + $0x1840] ss:$24 sps:$4 sm:$0xff]   ;;  %v18096_v29 = vld [vmem:[%s19844_s13 + $0x1874] ss:$24 sps:$4 sm:$0xff]   ;;  %v18094_v62 = vld [vmem:[%s19844_s13 + $0x1870] ss:$24 sps:$4 sm:$0xff]  }
 0x7ea   : > { %10141 = vmatprep.subr.bf16.mxu0 %v18027_v54  ;;  %v18099_v23 = vld [vmem:[%s19844_s13 + $0x18a4] ss:$24 sps:$4 sm:$0xff]   ;;  %v18097_v26 = vld [vmem:[%s19844_s13 + $0x18a0] ss:$24 sps:$4 sm:$0xff]   ;;  %v18102_v54 = vld [vmem:[%s19844_s13 + $0x18d4] ss:$24 sps:$4 sm:$0xff]  }
 0x7ec   : > { %10056 = vmatpush1.bf16.msra.mxu1 %v18022_v31  ;;  %v18246_v31 = vld [vmem:[%s19850_s10 + $0x6] sm:$0x3f] }
 0x7ed   : > { %10142 = vmatpush1.bf16.msra.mxu0 %v18025_v27  ;;  %10057 = vmatprep.subr.bf16.mxu1 %v18030_v39  ;;  %v5942_v27 = vrot.slane %v18246_v31, %v20597_v37  ;;  %v18103_v39 = vld [vmem:[%s19844_s13 + $0x1900] ss:$24 sps:$4 sm:$0xff]  }
 0x7ee   : > { %10143 = vmatprep.subr.bf16.mxu0 %v18033_v44 }
 0x7f0   : > { %10058 = vmatpush1.bf16.msra.mxu1 %v18028_v35  ;;  %v18108_v35 = vld [vmem:[%s19844_s13 + $0x1934] ss:$24 sps:$4 sm:$0xff]  }
 0x7f1   : > { %10144 = vmatpush1.bf16.msra.mxu0 %v18031_v36  ;;  %10059 = vmatprep.subr.bf16.mxu1 %v18036_v49 }
 0x7f2   : > { %10145 = vmatprep.subr.bf16.mxu0 %v18039_v40 }
 0x7f4   : > { %10060 = vmatpush1.bf16.msra.mxu1 %v18034_v6 }
 0x7f5   : > { %10146 = vmatpush1.bf16.msra.mxu0 %v18037_v41  ;;  %10061 = vmatprep.subr.bf16.mxu1 %v18042_v45 }
 0x7f6   : > { %10147 = vmatprep.subr.bf16.mxu0 %v18045_v2  ;;  %v18106_v2 = vld [vmem:[%s19844_s13 + $0x1930] ss:$24 sps:$4 sm:$0xff]  }
 0x7f8   : > { %10062 = vmatpush1.bf16.msra.mxu1 %v18040_v3 }
 0x7f9   : > { %10148 = vmatpush1.bf16.msra.mxu0 %v18043_v4  ;;  %10063 = vmatprep.subr.bf16.mxu1 %v18048_v21  ;;  %v18111_v4 = vld [vmem:[%s19844_s13 + $0x1964] ss:$24 sps:$4 sm:$0xff]   ;;  %v18109_v21 = vld [vmem:[%s19844_s13 + $0x1960] ss:$24 sps:$4 sm:$0xff]  }
 0x7fa   : > { %10149 = vmatprep.subr.bf16.mxu0 %v18051_v7  ;;  %v18114_v7 = vld [vmem:[%s19844_s13 + $0x1994] ss:$24 sps:$4 sm:$0xff]  }
 0x7fc   : > { %10064 = vmatpush1.bf16.msra.mxu1 %v18046_v55  ;;  %v18247_v55 = vld [vmem:[%s19852_s8 + $0x6] sm:$0x3f] }
 0x7fd   : > { %10150 = vmatpush1.bf16.msra.mxu0 %v18049_v42  ;;  %10065 = vmatprep.subr.bf16.mxu1 %v18054_v56  ;;  %v7808_v42 = vrot.slane %v18247_v55, %v20592_v34  ;;  %v18112_v56 = vld [vmem:[%s19844_s13 + $0x1990] ss:$24 sps:$4 sm:$0xff]  }
 0x7fe   : > { %10151 = vmatprep.subr.bf16.mxu0 %v18057_v58  ;;  %v7812_v58 = vrot.slane %v18247_v55, %v20597_v37 }
 0x800   : > { %10066 = vmatpush1.bf16.msra.mxu1 %v18052_v5  ;;  %v18117_v5 = vld [vmem:[%s19844_s13 + $0x19c4] ss:$24 sps:$4 sm:$0xff]  }
 0x801   : > { %10152 = vmatpush1.bf16.msra.mxu0 %v18055_v16  ;;  %10067 = vmatprep.subr.bf16.mxu1 %v18060_v30 }
 0x802   : > { %10153 = vmatprep.subr.bf16.mxu0 %v18063_v60 }
 0x804   : > { %10068 = vmatpush1.bf16.msra.mxu1 %v18058_v52 }
 0x805   : > { %10154 = vmatpush1.bf16.msra.mxu0 %v18061_v63  ;;  %10069 = vmatprep.subr.bf16.mxu1 %v18066_v0  ;;  %v18115_v63 = vld [vmem:[%s19844_s13 + $0x19c0] ss:$24 sps:$4 sm:$0xff]  }
 0x806   : > { %10155 = vmatprep.subr.bf16.mxu0 %v18069_v61 }
 0x808   : > { %10070 = vmatpush1.bf16.msra.mxu1 %v18064_v18  ;;  %v18120_v18 = vld [vmem:[%s19844_s13 + $0x19f4] ss:$24 sps:$4 sm:$0xff]  }
 0x809   : > { %10156 = vmatpush1.bf16.msra.mxu0 %v18067_v14  ;;  %10071 = vmatprep.subr.bf16.mxu1 %v18072_v1 }
 0x80a   : > { %10157 = vmatprep.subr.bf16.mxu0 %v18075_v12 }
 0x80c   : > { %10072 = vmatpush1.bf16.msra.mxu1 %v18070_v13 }
 0x80d   : > { %10158 = vmatpush1.bf16.msra.mxu0 %v18073_v33  ;;  %10073 = vmatprep.subr.bf16.mxu1 %v18078_v17  ;;  %v18118_v17 = vld [vmem:[%s19844_s13 + $0x19f0] ss:$24 sps:$4 sm:$0xff]  }
 0x80e   : > { %10159 = vmatprep.subr.bf16.mxu0 %v18081_v19 }
 0x810   : > { %10074 = vmatpush1.bf16.msra.mxu1 %v18076_v9  ;;  %v18123_v9 = vld [vmem:[%s19844_s13 + $0x1a24] ss:$24 sps:$4 sm:$0xff]  }
 0x811   : > { %10160 = vmatpush1.bf16.msra.mxu0 %v18079_v10  ;;  %10075 = vmatprep.subr.bf16.mxu1 %v18084_v46  ;;  %v18121_v10 = vld [vmem:[%s19844_s13 + $0x1a20] ss:$24 sps:$4 sm:$0xff]   ;;  %v18129_v46 = vld [vmem:[%s19844_s13 + $0x1a84] ss:$24 sps:$4 sm:$0xff]  }
 0x812   : > { %10161 = vmatprep.subr.bf16.mxu0 %v18087_v38  ;;  %v18127_v38 = vld [vmem:[%s19844_s13 + $0x1a80] ss:$24 sps:$4 sm:$0xff]  }
 0x814   : > { %10076 = vmatpush1.bf16.msra.mxu1 %v18082_v20  ;;  %v18132_v20 = vld [vmem:[%s19844_s13 + $0x1ab4] ss:$24 sps:$4 sm:$0xff]  }
 0x815   : > { %10162 = vmatpush1.bf16.msra.mxu0 %v18085_v24  ;;  %v18130_v24 = vld [vmem:[%s19844_s13 + $0x1ab0] ss:$24 sps:$4 sm:$0xff]  }
 0x816   : > { %10174 = vmatprep.subr.bf16.mxu0 %v18090_v22  ;;  %v18135_v22 = vld [vmem:[%s19844_s13 + $0x1ae4] ss:$24 sps:$4 sm:$0xff]  }
 0x817   : > { %10078 = vmatmul.mubr.bf16.vlgmr.msra.gmra.mrb[16].mxu1 %v20827_v47 }
 0x818   : > { %10164 = vmatmul.mubr.bf16.vlgmr.msra.gmra.mrb[16].mxu0 %v20733_v53  ;;  %v18100_v53 = vld [vmem:[%s19844_s13 + $0x18d0] ss:$24 sps:$4 sm:$0xff]  }
 0x819   : > { %10175 = vmatpush1.bf16.msra.mxu0 %v18088_v50  ;;  %10206 = vmatprep.mubr.bf16.mxu0 %v20741_v8  ;;  %v5938_v8 = vrot.slane %v18246_v31, %v20592_v34  ;;  %v18133_v50 = vld [vmem:[%s19844_s13 + $0x1ae0] ss:$24 sps:$4 sm:$0xff]  }
 0x81a   : > { %10176 = vmatprep.subr.bf16.mxu0 %v18093_v25  ;;  %v21082_v25 = vld [vmem:[%s19850_s10 + $0xc] sm:$0x3f] }
 0x81d   : > { %10177 = vmatpush1.bf16.msra.mxu0 %v18091_v28  ;;  %v8363_v28 = vrot.slane %v21082_v25, %v20323_v51 }
 0x81e   : > { %10178 = vmatprep.subr.bf16.mxu0 %v18096_v29  ;;  %v8367_v29 = vrot.slane %v21082_v25, %v20330_v59 }
 0x821   : > { %10179 = vmatpush1.bf16.msra.mxu0 %v18094_v62 }
 0x822   : > { %10180 = vmatprep.subr.bf16.mxu0 %v18099_v23 }
 0x825   : > { %10181 = vmatpush1.bf16.msra.mxu0 %v18097_v26 }
 0x826   : > { %10182 = vmatprep.subr.bf16.mxu0 %v18102_v54 }
 0x829   : > { %10183 = vmatpush1.bf16.msra.mxu0 %v18100_v53 }
 0x82a   : > { %v7767_v44 = vpop.f32.mrb[12].mxu1  ;;  %10184 = vmatprep.subr.bf16.mxu0 %v18105_v32 }
 0x82b   : > { %v16054_v36 = vadd.f32 %v7767_v44, %v5938_v8  ;;  %v7769_v49 = vpop.f32.mrb[13].mxu1 }
 0x82c   : > { %v16055_v40 = vadd.f32 %v7769_v49, %v5942_v27  ;;  %v7771_v6 = vpop.f32.mrb[14].mxu1 }
 0x82d   : > { %18184 = vtanh.f32 %v16054_v36  ;;  %v16056_v41 = vadd.f32 %v7771_v6, %v5938_v8  ;;  %10185 = vmatpush1.bf16.msra.mxu0 %v18103_v39  ;;  %v7773_v45 = vpop.f32.mrb[15].mxu1 }
 0x82e   : > { %18186 = vtanh.f32 %v16055_v40  ;;  %v16057_v3 = vadd.f32 %v7773_v45, %v5942_v27  ;;  %10186 = vmatprep.subr.bf16.mxu0 %v18108_v35 }
 0x82f   : > { %18188 = vtanh.f32 %v16056_v41 }
 0x830   : > { %18190 = vtanh.f32 %v16057_v3 }
 0x831   : > { %10187 = vmatpush1.bf16.msra.mxu0 %v18106_v2 }
 0x832   : > { %10188 = vmatprep.subr.bf16.mxu0 %v18111_v4 }
 0x835   : > { %10189 = vmatpush1.bf16.msra.mxu0 %v18109_v21 }
 0x836   : > { %10190 = vmatprep.subr.bf16.mxu0 %v18114_v7 }
 0x837   : > { %v18185_v16 = vpop.eup %18184 }
 0x838   : > { %v18187_v30 = vpop.eup %18186  ;;  %v7823_v60 = vmul.f32 %v18185_v16, %v7808_v42 }
 0x839   : > { %v18189_v52 = vpop.eup %18188  ;;  %10191 = vmatpush1.bf16.msra.mxu0 %v18112_v56  ;;  %v7824_v0 = vmul.f32 %v18187_v30, %v7812_v58 }
 0x83a   : > { %v18191_v61 = vpop.eup %18190  ;;  %10192 = vmatprep.subr.bf16.mxu0 %v18117_v5  ;;  %v7829_v14 = vmul.f32 %v18189_v52, %v7808_v42  ;;  %v7834_v1 = vadd.f32 %v20892_v11, %v7823_v60  ;;  %v18126_v11 = vld [vmem:[%s19844_s13 + $0x1a54] ss:$24 sps:$4 sm:$0xff]  }
 0x83b   : > { %v7830_v12 = vmul.f32 %v18191_v61, %v7812_v58 }
 0x83c   : > { %v7841_v13 = vadd.f32 %v20898_v15, %v7829_v14  ;;  %v7835_v33 = vadd.f32 %v7834_v1, %v7824_v0  ;;  %v18124_v15 = vld [vmem:[%s19844_s13 + $0x1a50] ss:$24 sps:$4 sm:$0xff]  }
 0x83d   : > { %10193 = vmatpush1.bf16.msra.mxu0 %v18115_v63 }
 0x83e   : > { %10194 = vmatprep.subr.bf16.mxu0 %v18120_v18  ;;  %v7842_v19 = vadd.f32 %v7841_v13, %v7830_v12  ;;  %v8371_v12 = vrot.slane %v21082_v25, %v20494_v48 }
 0x840   : > { %7843 = vadd.xlane.f32.xlu0 %v7842_v19 }
 0x841   : > { %10195 = vmatpush1.bf16.msra.mxu0 %v18118_v17 }
 0x842   : > { %10196 = vmatprep.subr.bf16.mxu0 %v18123_v9 }
 0x844   : > { %7836 = vadd.xlane.f32.xlu0 %v7835_v33  ;;  %v8375_v33 = vrot.slane %v21082_v25, %v20499_v57 }
 0x845   : > { %10197 = vmatpush1.bf16.msra.mxu0 %v18121_v10 }
 0x846   : > { %10198 = vmatprep.subr.bf16.mxu0 %v18126_v11 }
 0x849   : > { %10199 = vmatpush1.bf16.msra.mxu0 %v18124_v15 }
 0x84a   : > { %10200 = vmatprep.subr.bf16.mxu0 %v18129_v46 }
 0x84d   : > { %10201 = vmatpush1.bf16.msra.mxu0 %v18127_v38 }
 0x84e   : > { %10202 = vmatprep.subr.bf16.mxu0 %v18132_v20 }
 0x851   : > { %10203 = vmatpush1.bf16.msra.mxu0 %v18130_v24 }
 0x852   : > { %10204 = vmatprep.subr.bf16.mxu0 %v18135_v22 }
 0x855   : > { %10205 = vmatpush1.bf16.msra.mxu0 %v18133_v50 }
 0x858   : > { %10207 = vmatmul.mubr.bf16.vlgmr.msra.gmra.mrb[16].mxu0 %v20827_v47  ;;  %v21089_v47 = vld [vmem:[%s19852_s8 + $0xc] sm:$0x3f] }
 0x859   : > { %v10233_v27 = vrot.slane %v21089_v47, %v20323_v51  ;;  %v10237_v39 = vrot.slane %v21089_v47, %v20330_v59 }
 0x86b   : > { %v9950_v62 = vpop.f32.mrb[12].mxu0 }
 0x86c   : > { %v16058_v23 = vadd.f32 %v9950_v62, %v8363_v28  ;;  %v9952_v26 = vpop.f32.mrb[13].mxu0 }
 0x86d   : > { %v16059_v54 = vadd.f32 %v9952_v26, %v8367_v29  ;;  %v9954_v53 = vpop.f32.mrb[14].mxu0 }
 0x86e   : > { %18192 = vtanh.f32 %v16058_v23  ;;  %v16060_v32 = vadd.f32 %v9954_v53, %v8363_v28  ;;  %v9956_v31 = vpop.f32.mrb[15].mxu0 }
 0x86f   : > { %18194 = vtanh.f32 %v16059_v54  ;;  %v16061_v8 = vadd.f32 %v9956_v31, %v8367_v29 }
 0x870   : > { %18196 = vtanh.f32 %v16060_v32  ;;  %v10241_v32 = vrot.slane %v21089_v47, %v20494_v48 }
 0x871   : > { %18198 = vtanh.f32 %v16061_v8  ;;  %v10245_v8 = vrot.slane %v21089_v47, %v20499_v57 }
 0x878   : > { %v18193_v44 = vpop.eup %18192 }
 0x879   : > { %v18195_v35 = vpop.eup %18194  ;;  %v10260_v36 = vmul.f32 %v18193_v44, %v10233_v27 }
 0x87a   : > { %v18197_v49 = vpop.eup %18196  ;;  %v10261_v40 = vmul.f32 %v18195_v35, %v10237_v39 }
 0x87b   : > { %v18199_v6 = vpop.eup %18198  ;;  %v10266_v41 = vmul.f32 %v18197_v49, %v10233_v27 }
 0x87c   : > { %v10267_v45 = vmul.f32 %v18199_v6, %v10237_v39  ;;  %v10272_v2 = vadd.f32 %v10261_v40, %v10260_v36 }
 0x87e   : > { %v10279_v3 = vadd.f32 %v10267_v45, %v10266_v41 }
 0x8cd   : > { %v7844_v4 = vpop.xlane.xlu0 %7843 }
 0x8ce   : > { %v7851_v21 = vrot.slane %v7844_v4, 4 }
 0x8d0   : > { %v7852_v7 = vmax.f32 %v7844_v4, %v7851_v21 }
 0x8d1   : > { %v7837_v55 = vpop.xlane.xlu0 %7836 }
 0x8d2   : > { %v7853_v42 = vrot.slane %v7852_v7, 2  ;;  %v7845_v56 = vrot.slane %v7837_v55, 4 }
 0x8d4   : > { %v7854_v58 = vmax.f32 %v7852_v7, %v7853_v42  ;;  %v7846_v5 = vmax.f32 %v7837_v55, %v7845_v56  ;;  %v18248_v56 = vld [vmem:[%s19829_s6 + $0x90] sm:$0xff] }
 0x8d6   : > { %v7855_v16 = vrot.slane %v7854_v58, 1  ;;  %v7847_v30 = vrot.slane %v7846_v5, 2 }
 0x8d8   : > { %v7856_v60 = vmax.f32 %v7854_v58, %v7855_v16  ;;  %v7848_v52 = vmax.f32 %v7846_v5, %v7847_v30  ;;  %v18249_v5 = vld [vmem:[%s19829_s6 + $0x98] sm:$0xff]  ;;  %v18250_v30 = vld [vmem:[%s19829_s6 + $0xa0] sm:$0xff] }
 0x8da   : > { %v7858_v63 = vsub.f32 %v7844_v4, %v7856_v60  ;;  %v7849_v0 = vrot.slane %v7848_v52, 1 }
 0x8dc   : > { %v7861_v61 = vmul.f32 1.442695, %v7858_v63  ;;  %v7850_v18 = vmax.f32 %v7848_v52, %v7849_v0  ;;  %v18251_v52 = vld [vmem:[%s19829_s6 + $0xa8] sm:$0xff] }
 0x8de   : > { %18200 = vpow2.f32 %v7861_v61  ;;  %v7857_v14 = vsub.f32 %v7837_v55, %v7850_v18  ;;  %v18253_v18 = vld [vmem:[%s19829_s6 + $0xb8] sm:$0xff] }
 0x8e0   : > { %v7859_v1 = vmul.f32 1.442695, %v7857_v14 }
 0x8e2   : > { %18202 = vpow2.f32 %v7859_v1 }
 0x8e8   : > { %v18201_v13 = vpop.eup %18200 }
 0x8e9   : > { %v7869_v17 = vrot.slane %v18201_v13, 4 }
 0x8ea   : > { %v10079_v19 = vpop.f32.mrb[16].mxu1 }
 0x8eb   : > { %v7870_v9 = vadd.f32 %v18201_v13, %v7869_v17  ;;  %v16062_v10 = vadd.f32 %v10079_v19, %v8371_v12  ;;  %v10081_v11 = vpop.f32.mrb[17].mxu1 }
 0x8ec   : > { %v18203_v15 = vpop.eup %18202  ;;  %v16063_v46 = vadd.f32 %v10081_v11, %v8375_v33  ;;  %v10083_v38 = vpop.f32.mrb[18].mxu1 }
 0x8ed   : > { %v7871_v20 = vrot.slane %v7870_v9, 2  ;;  %v7863_v24 = vrot.slane %v18203_v15, 4  ;;  %18204 = vtanh.f32 %v16062_v10  ;;  %v16064_v22 = vadd.f32 %v10083_v38, %v8371_v12  ;;  %v10085_v50 = vpop.f32.mrb[19].mxu1 }
 0x8ee   : > { %18206 = vtanh.f32 %v16063_v46  ;;  %v16065_v28 = vadd.f32 %v10085_v50, %v8375_v33 }
 0x8ef   : > { %v7872_v29 = vadd.f32 %v7871_v20, %v7870_v9  ;;  %v7864_v62 = vadd.f32 %v18203_v15, %v7863_v24  ;;  %18208 = vtanh.f32 %v16064_v22 }
 0x8f0   : > { %18210 = vtanh.f32 %v16065_v28 }
 0x8f1   : > { %v7873_v23 = vrot.slane %v7872_v29, 1  ;;  %v7865_v26 = vrot.slane %v7864_v62, 2 }
 0x8f3   : > { %v7874_v54 = vadd.f32 %v7873_v23, %v7872_v29  ;;  %v7866_v53 = vadd.f32 %v7865_v26, %v7864_v62  ;;  %v18254_v23 = vld [vmem:[%s19829_s6 + $0x60] sm:$0xff] }
 0x8f5   : > { %18212 = vrcp.f32 %v7874_v54  ;;  %v7867_v31 = vrot.slane %v7866_v53, 1  ;;  %v18255_v54 = vld [vmem:[%s19829_s6 + $0x68] sm:$0xff] }
 0x8f7   : > { %v18205_v27 = vpop.eup %18204  ;;  %v7868_v39 = vadd.f32 %v7867_v31, %v7866_v53 }
 0x8f8   : > { %v18207_v44 = vpop.eup %18206  ;;  %v10262_v35 = vmul.f32 %v18205_v27, %v10241_v32 }
 0x8f9   : > { %v18209_v36 = vpop.eup %18208  ;;  %18214 = vrcp.f32 %v7868_v39  ;;  %v10263_v49 = vmul.f32 %v18207_v44, %v10245_v8  ;;  %v18256_v39 = vld [vmem:[%s19829_s6 + $0x70] sm:$0xff] }
 0x8fa   : > { %v18211_v40 = vpop.eup %18210  ;;  %v10268_v6 = vmul.f32 %v18209_v36, %v10241_v32  ;;  %v10273_v41 = vadd.f32 %v10272_v2, %v10262_v35  ;;  %v18252_v2 = vld [vmem:[%s19829_s6 + $0xb0] sm:$0xff]  ;;  %v18257_v35 = vld [vmem:[%s19829_s6 + $0x78] sm:$0xff] }
 0x8fb   : > { %v10269_v45 = vmul.f32 %v18211_v40, %v10245_v8 }
 0x8fc   : > { %v10280_v4 = vadd.f32 %v10279_v3, %v10268_v6  ;;  %v21103_v21 = vadd.f32 %v10273_v41, %v10263_v49 }
 0x8fe   : > { %v21105_v7 = vadd.f32 %v10280_v4, %v10269_v45  ;;  %v18258_v4 = vld [vmem:[%s19829_s6 + $0x80] sm:$0xff] }
 0x8ff   : > { %v18213_v55 = vpop.eup %18212 }
 0x900   : > { %v7878_v42 = vmul.f32 %v18213_v55, %v18201_v13 }
 0x902   : > { %v7885_v58 = vmul.f32 %v18248_v56, %v7878_v42  ;;  %v7886_v16 = vmul.f32 %v18249_v5, %v7878_v42  ;;  %v7887_v60 = vmul.f32 %v18250_v30, %v7878_v42  ;;  %v7888_v63 = vmul.f32 %v18251_v52, %v7878_v42 }
 0x903   : > { %v18215_v0 = vpop.eup %18214  ;;  %v7889_v61 = vmul.f32 %v18252_v2, %v7878_v42  ;;  %v7890_v3 = vmul.f32 %v18253_v18, %v7878_v42 }
 0x904   : > { %v7927_v14 = vrot.slane %v7885_v58, 4  ;;  %v7933_v1 = vrot.slane %v7886_v16, 4  ;;  %v7939_v12 = vrot.slane %v7887_v60, 4  ;;  %v7945_v33 = vrot.slane %v7888_v63, 4 }
 0x905   : > { %v7951_v17 = vrot.slane %v7889_v61, 4  ;;  %v7957_v13 = vrot.slane %v7890_v3, 4  ;;  %v7876_v19 = vmul.f32 %v18215_v0, %v18203_v15  ;;  %v18259_v0 = vld [vmem:[%s19829_s6 + $0x88] sm:$0xff] }
 0x906   : > { %v7928_v9 = vadd.f32 %v7927_v14, %v7885_v58  ;;  %v7934_v10 = vadd.f32 %v7933_v1, %v7886_v16  ;;  %v7940_v11 = vadd.f32 %v7939_v12, %v7887_v60  ;;  %v7946_v46 = vadd.f32 %v7945_v33, %v7888_v63 }
 0x907   : > { %v7952_v38 = vadd.f32 %v7951_v17, %v7889_v61  ;;  %v7958_v20 = vadd.f32 %v7957_v13, %v7890_v3  ;;  %v7879_v26 = vmul.f32 %v18254_v23, %v7876_v19  ;;  %v7880_v53 = vmul.f32 %v18255_v54, %v7876_v19 }
 0x908   : > { %v7929_v24 = vrot.slane %v7928_v9, 2  ;;  %v7935_v22 = vrot.slane %v7934_v10, 2  ;;  %v7941_v50 = vrot.slane %v7940_v11, 2  ;;  %v7947_v28 = vrot.slane %v7946_v46, 2 }
 0x909   : > { %v7953_v29 = vrot.slane %v7952_v38, 2  ;;  %v7959_v62 = vrot.slane %v7958_v20, 2  ;;  %v7881_v44 = vmul.f32 %v18256_v39, %v7876_v19  ;;  %v7882_v36 = vmul.f32 %v18257_v35, %v7876_v19 }
 0x90a   : > { %v7930_v15 = vadd.f32 %v7929_v24, %v7928_v9  ;;  %v7936_v32 = vadd.f32 %v7935_v22, %v7934_v10  ;;  %v7942_v31 = vadd.f32 %v7941_v50, %v7940_v11  ;;  %v7948_v8 = vadd.f32 %v7947_v28, %v7946_v46 }
 0x90b   : > { %v7954_v27 = vadd.f32 %v7953_v29, %v7952_v38  ;;  %v7960_v45 = vadd.f32 %v7959_v62, %v7958_v20  ;;  %v7883_v55 = vmul.f32 %v18258_v4, %v7876_v19  ;;  %v7891_v42 = vrot.slane %v7879_v26, 4 }
 0x90c   : > { %v7931_v49 = vrot.slane %v7930_v15, 1  ;;  %v7937_v40 = vrot.slane %v7936_v32, 1  ;;  %v7943_v6 = vrot.slane %v7942_v31, 1  ;;  %v7949_v41 = vrot.slane %v7948_v8, 1 }
 0x90d   : > { %v7897_v56 = vrot.slane %v7880_v53, 4  ;;  %v7892_v60 = vadd.f32 %v7891_v42, %v7879_v26  ;;  %v7955_v63 = vrot.slane %v7954_v27, 1  ;;  %v7884_v2 = vmul.f32 %v18259_v0, %v7876_v19 }
 0x90e   : > { %v7932_v58 = vadd.f32 %v7931_v49, %v7930_v15  ;;  %v7938_v5 = vadd.f32 %v7937_v40, %v7936_v32  ;;  %v7944_v16 = vadd.f32 %v7943_v6, %v7942_v31  ;;  %v7950_v30 = vadd.f32 %v7949_v41, %v7948_v8 }
 0x90f   : > { %v7898_v52 = vadd.f32 %v7897_v56, %v7880_v53  ;;  %v7903_v61 = vrot.slane %v7881_v44, 4  ;;  %v7909_v18 = vrot.slane %v7882_v36, 4  ;;  %v7961_v3 = vrot.slane %v7960_v45, 1 }
 0x910   : > { %v7893_v14 = vrot.slane %v7892_v60, 2  ;;  %v7915_v12 = vrot.slane %v7883_v55, 4  ;;  %v8001_v33 = vcombine.low %v7932_v58, %v7938_v5  ;;  %v8002_v9 = vcombine.low %v7944_v16, %v7950_v30 }
 0x911   : > { %v7899_v1 = vrot.slane %v7898_v52, 2  ;;  %v7904_v17 = vadd.f32 %v7903_v61, %v7881_v44  ;;  %v7910_v13 = vadd.f32 %v7909_v18, %v7882_v36  ;;  %v7956_v38 = vadd.f32 %v7955_v63, %v7954_v27 }
 0x912   : > { %v7894_v10 = vadd.f32 %v7893_v14, %v7892_v60  ;;  %v7916_v46 = vadd.f32 %v7915_v12, %v7883_v55  ;;  %v7921_v22 = vrot.slane %v7884_v2, 4  ;;  %v7962_v50 = vadd.f32 %v7961_v3, %v7960_v45 }
 0x913   : > { %v7900_v11 = vadd.f32 %v7899_v1, %v7898_v52  ;;  %v7905_v20 = vrot.slane %v7904_v17, 2  ;;  %v7911_v24 = vrot.slane %v7910_v13, 2  ;;  %v8009_v62 = vrot.slane %v8001_v33, %v20953_v43 }
 0x914   : > { %v7895_v28 = vrot.slane %v7894_v10, 1  ;;  %v7917_v29 = vrot.slane %v7916_v46, 2  ;;  %v7922_v54 = vadd.f32 %v7921_v22, %v7884_v2  ;;  %v8016_v53 = vrot.slane %v8002_v9, %v20953_v43 }
 0x915   : > { %v7901_v19 = vrot.slane %v7900_v11, 1  ;;  %v7906_v23 = vadd.f32 %v7905_v20, %v7904_v17  ;;  %v7912_v26 = vadd.f32 %v7911_v24, %v7910_v13  ;;  %v8018_v36 = vcombine.low %v7956_v38, %v7962_v50 }
 0x916   : > { %v7896_v15 = vadd.f32 %v7895_v28, %v7894_v10  ;;  %v7918_v31 = vadd.f32 %v7917_v29, %v7916_v46  ;;  %v7923_v27 = vrot.slane %v7922_v54, 2  ;;  %v8017_v41 = vcombine.low %v8009_v62, %v8016_v53 }
 0x917   : > { %v7902_v32 = vadd.f32 %v7901_v19, %v7900_v11  ;;  %v7907_v8 = vrot.slane %v7906_v23, 1  ;;  %v7913_v39 = vrot.slane %v7912_v26, 1  ;;  %v8025_v56 = vrot.slane %v8018_v36, %v20953_v43 }
 0x918   : > { %v7919_v44 = vrot.slane %v7918_v31, 1  ;;  %v7924_v6 = vadd.f32 %v7923_v27, %v7922_v54  ;;  %v8028_v16 = vrot.slane %v8017_v41, 7  ;;  %v8379_v33 = vrot.slane %v21082_v25, %v20592_v34 }
 0x919   : > { %v7976_v35 = vcombine.low %v7896_v15, %v7902_v32  ;;  %v7908_v49 = vadd.f32 %v7907_v8, %v7906_v23  ;;  %v7914_v40 = vadd.f32 %v7913_v39, %v7912_v26  ;;  %v8035_v52 = vrot.slane %v8025_v56, 7 }
 0x91a   : > { %v7920_v45 = vadd.f32 %v7919_v44, %v7918_v31  ;;  %v7925_v4 = vrot.slane %v7924_v6, 1  ;;  %v8383_v17 = vrot.slane %v21082_v25, %v20597_v37  ;;  %v10249_v22 = vrot.slane %v21089_v47, %v20592_v34 }
 0x91b   : > { %v7977_v55 = vcombine.low %v7908_v49, %v7914_v40  ;;  %v7984_v42 = vrot.slane %v7976_v35, %v20953_v43  ;;  %v10253_v50 = vrot.slane %v21089_v47, %v20597_v37 }
 0x91c   : > { %v7926_v58 = vadd.f32 %v7925_v4, %v7924_v6 }
 0x91d   : > { %v7991_v5 = vrot.slane %v7977_v55, %v20953_v43 }
 0x91e   : > { %v7993_v60 = vcombine.low %v7920_v45, %v7926_v58 }
 0x91f   : > { %v7992_v30 = vcombine.low %v7984_v42, %v7991_v5 }
 0x920   : > { %v8000_v63 = vrot.slane %v7993_v60, %v20953_v43 }
 0x921   : > { %v8029_v0 = vsel %vm5584_vm4, %v8028_v16, %v7992_v30 }
 0x922   : > { %v8030_v2 = vsel %vm5586_vm5, %v8028_v16, %v8029_v0  ;;  %v8036_v18 = vsel %vm5584_vm4, %v8035_v52, %v8000_v63 }
 0x923   : > { %v8031_v61 = vsel %vm5588_vm6, %v8028_v16, %v8030_v2  ;;  %v8037_v14 = vsel %vm5586_vm5, %v8035_v52, %v8036_v18 }
 0x924   : > { %v8032_v3 = vsel %vm5590_vm7, %v8028_v16, %v8031_v61  ;;  %v8038_v1 = vsel %vm5588_vm6, %v8035_v52, %v8037_v14 }
 0x925   : > { %15106 = vst [vmem:[%s20989_s18 + $0xc] sm:$0xff] %v8032_v3  ;;  %v8039_v12 = vsel %vm5590_vm7, %v8035_v52, %v8038_v1 }
 0x926   : > { %15107 = vst [vmem:[%s20989_s18 + $0x14] sm:$0xf] %v8039_v12 }
 0x92b   : > { %v10208_v13 = vpop.f32.mrb[16].mxu0 }
 0x92c   : > { %v16066_v9 = vadd.f32 %v10208_v13, %v8379_v33  ;;  %v10210_v10 = vpop.f32.mrb[17].mxu0 }
 0x92d   : > { %v16067_v11 = vadd.f32 %v10210_v10, %v8383_v17  ;;  %v10212_v46 = vpop.f32.mrb[18].mxu0 }
 0x92e   : > { %18216 = vtanh.f32 %v16066_v9  ;;  %v16068_v38 = vadd.f32 %v10212_v46, %v8379_v33  ;;  %v10214_v20 = vpop.f32.mrb[19].mxu0  ;;  %v18261_v9 = vld [vmem:[%s19829_s6 + $0xf8] sm:$0xff] }
 0x92f   : > { %18218 = vtanh.f32 %v16067_v11  ;;  %v16069_v24 = vadd.f32 %v10214_v20, %v8383_v17  ;;  %v18260_v17 = vld [vmem:[%s19829_s6 + $0xf0] sm:$0xff]  ;;  %v18262_v11 = vld [vmem:[%s19829_s6 + $0x100] sm:$0xff] }
 0x930   : > { %18220 = vtanh.f32 %v16068_v38  ;;  %v18263_v38 = vld [vmem:[%s19829_s6 + $0x108] sm:$0xff] }
 0x931   : > { %18222 = vtanh.f32 %v16069_v24 }
 0x938   : > { %v18217_v28 = vpop.eup %18216 }
 0x939   : > { %v18219_v25 = vpop.eup %18218  ;;  %v10264_v19 = vmul.f32 %v18217_v28, %v10249_v22  ;;  %v18265_v28 = vld [vmem:[%s19829_s6 + $0x118] sm:$0xff] }
 0x93a   : > { %v18221_v29 = vpop.eup %18220  ;;  %v10265_v62 = vmul.f32 %v18219_v25, %v10253_v50 }
 0x93b   : > { %v18223_v23 = vpop.eup %18222  ;;  %v10270_v26 = vmul.f32 %v18221_v29, %v10249_v22  ;;  %v10275_v54 = vadd.f32 %v21103_v21, %v10264_v19  ;;  %v18264_v22 = vld [vmem:[%s19829_s6 + $0x110] sm:$0xff] }
 0x93c   : > { %v10271_v53 = vmul.f32 %v18223_v23, %v10253_v50 }
 0x93d   : > { %v10282_v15 = vadd.f32 %v21105_v7, %v10270_v26  ;;  %v10276_v32 = vadd.f32 %v10275_v54, %v10265_v62 }
 0x93f   : > { %v10283_v31 = vadd.f32 %v10282_v15, %v10271_v53 }
 0x941   : > { %10284 = vadd.xlane.f32.xlu1 %v10283_v31 }
 0x945   : > { %10277 = vadd.xlane.f32.xlu1 %v10276_v32 }
 0x9ce   : > { %v10285_v8 = vpop.xlane.xlu1 %10284 }
 0x9cf   : > { %v10292_v39 = vrot.slane %v10285_v8, 4 }
 0x9d1   : > { %v10293_v27 = vmax.f32 %v10285_v8, %v10292_v39 }
 0x9d2   : > { %v10278_v47 = vpop.xlane.xlu1 %10277 }
 0x9d3   : > { %v10294_v44 = vrot.slane %v10293_v27, 2  ;;  %v10286_v35 = vrot.slane %v10278_v47, 4 }
 0x9d5   : > { %v10295_v36 = vmax.f32 %v10293_v27, %v10294_v44  ;;  %v10287_v49 = vmax.f32 %v10278_v47, %v10286_v35 }
 0x9d7   : > { %v10296_v40 = vrot.slane %v10295_v36, 1  ;;  %v10288_v6 = vrot.slane %v10287_v49, 2 }
 0x9d9   : > { %v10297_v41 = vmax.f32 %v10295_v36, %v10296_v40  ;;  %v10289_v45 = vmax.f32 %v10287_v49, %v10288_v6  ;;  %v18266_v6 = vld [vmem:[%s19829_s6 + $0xc0] sm:$0xff] }
 0x9db   : > { %v10299_v21 = vsub.f32 %v10285_v8, %v10297_v41  ;;  %v10290_v4 = vrot.slane %v10289_v45, 1 }
 0x9dd   : > { %v10302_v55 = vmul.f32 1.442695, %v10299_v21  ;;  %v10291_v7 = vmax.f32 %v10289_v45, %v10290_v4  ;;  %v18267_v45 = vld [vmem:[%s19829_s6 + $0xc8] sm:$0xff] }
 0x9df   : > { %18224 = vpow2.f32 %v10302_v55  ;;  %v10298_v42 = vsub.f32 %v10278_v47, %v10291_v7 }
 0x9e1   : > { %v10300_v56 = vmul.f32 1.442695, %v10298_v42 }
 0x9e3   : > { %18226 = vpow2.f32 %v10300_v56 }
 0x9e9   : > { %v18225_v58 = vpop.eup %18224 }
 0x9ea   : > { %v10310_v5 = vrot.slane %v18225_v58, 4 }
 0x9ec   : > { %v10311_v16 = vadd.f32 %v18225_v58, %v10310_v5 }
 0x9ed   : > { %v18227_v30 = vpop.eup %18226 }
 0x9ee   : > { %v10312_v60 = vrot.slane %v10311_v16, 2  ;;  %v10304_v52 = vrot.slane %v18227_v30, 4 }
 0x9f0   : > { %v10313_v63 = vadd.f32 %v10312_v60, %v10311_v16  ;;  %v10305_v0 = vadd.f32 %v18227_v30, %v10304_v52  ;;  %v18269_v16 = vld [vmem:[%s19829_s6 + $0xd8] sm:$0xff] }
 0x9f2   : > { %v10314_v2 = vrot.slane %v10313_v63, 1  ;;  %v10306_v61 = vrot.slane %v10305_v0, 2 }
 0x9f4   : > { %v10315_v18 = vadd.f32 %v10314_v2, %v10313_v63  ;;  %v10307_v3 = vadd.f32 %v10306_v61, %v10305_v0  ;;  %v18270_v61 = vld [vmem:[%s19829_s6 + $0xe0] sm:$0xff] }
 0x9f6   : > { %18228 = vrcp.f32 %v10315_v18  ;;  %v10308_v14 = vrot.slane %v10307_v3, 1 }
 0x9f8   : > { %v10309_v1 = vadd.f32 %v10308_v14, %v10307_v3 }
 0x9fa   : > { %18230 = vrcp.f32 %v10309_v1 }
 0xa00   : > { %v18229_v12 = vpop.eup %18228 }
 0xa01   : > { %v10319_v33 = vmul.f32 %v18229_v12, %v18225_v58  ;;  %v18268_v58 = vld [vmem:[%s19829_s6 + $0xd0] sm:$0xff] }
 0xa03   : > { %v10326_v13 = vmul.f32 %v18260_v17, %v10319_v33  ;;  %v10327_v10 = vmul.f32 %v18261_v9, %v10319_v33  ;;  %v10328_v46 = vmul.f32 %v18262_v11, %v10319_v33  ;;  %v10329_v20 = vmul.f32 %v18263_v38, %v10319_v33  ;;  %v18271_v11 = vld [vmem:[%s19829_s6 + $0xe8] sm:$0xff] }
 0xa04   : > { %v18231_v24 = vpop.eup %18230  ;;  %v10330_v50 = vmul.f32 %v18264_v22, %v10319_v33  ;;  %v10331_v25 = vmul.f32 %v18265_v28, %v10319_v33 }
 0xa05   : > { %v10368_v19 = vrot.slane %v10326_v13, 4  ;;  %v10374_v29 = vrot.slane %v10327_v10, 4  ;;  %v10380_v62 = vrot.slane %v10328_v46, 4  ;;  %v10386_v23 = vrot.slane %v10329_v20, 4 }
 0xa06   : > { %v10392_v26 = vrot.slane %v10330_v50, 4  ;;  %v10398_v54 = vrot.slane %v10331_v25, 4  ;;  %v10317_v53 = vmul.f32 %v18231_v24, %v18227_v30 }
 0xa07   : > { %v10369_v15 = vadd.f32 %v10368_v19, %v10326_v13  ;;  %v10375_v32 = vadd.f32 %v10374_v29, %v10327_v10  ;;  %v10381_v31 = vadd.f32 %v10380_v62, %v10328_v46  ;;  %v10387_v8 = vadd.f32 %v10386_v23, %v10329_v20 }
 0xa08   : > { %v10393_v39 = vadd.f32 %v10392_v26, %v10330_v50  ;;  %v10399_v27 = vadd.f32 %v10398_v54, %v10331_v25  ;;  %v10320_v41 = vmul.f32 %v18266_v6, %v10317_v53  ;;  %v10321_v21 = vmul.f32 %v18267_v45, %v10317_v53 }
 0xa09   : > { %v10370_v47 = vrot.slane %v10369_v15, 2  ;;  %v10376_v44 = vrot.slane %v10375_v32, 2  ;;  %v10382_v35 = vrot.slane %v10381_v31, 2  ;;  %v10388_v36 = vrot.slane %v10387_v8, 2 }
 0xa0a   : > { %v10394_v49 = vrot.slane %v10393_v39, 2  ;;  %v10400_v40 = vrot.slane %v10399_v27, 2  ;;  %v10322_v5 = vmul.f32 %v18268_v58, %v10317_v53  ;;  %v10323_v30 = vmul.f32 %v18269_v16, %v10317_v53 }
 0xa0b   : > { %v10371_v4 = vadd.f32 %v10370_v47, %v10369_v15  ;;  %v10377_v55 = vadd.f32 %v10376_v44, %v10375_v32  ;;  %v10383_v7 = vadd.f32 %v10382_v35, %v10381_v31  ;;  %v10389_v42 = vadd.f32 %v10388_v36, %v10387_v8 }
 0xa0c   : > { %v10395_v56 = vadd.f32 %v10394_v49, %v10393_v39  ;;  %v10401_v2 = vadd.f32 %v10400_v40, %v10399_v27  ;;  %v10324_v18 = vmul.f32 %v18270_v61, %v10317_v53  ;;  %v10332_v3 = vrot.slane %v10320_v41, 4 }
 0xa0d   : > { %v10372_v60 = vrot.slane %v10371_v4, 1  ;;  %v10378_v52 = vrot.slane %v10377_v55, 1  ;;  %v10384_v63 = vrot.slane %v10383_v7, 1  ;;  %v10390_v0 = vrot.slane %v10389_v42, 1 }
 0xa0e   : > { %v10338_v14 = vrot.slane %v10321_v21, 4  ;;  %v10333_v13 = vadd.f32 %v10332_v3, %v10320_v41  ;;  %v10396_v10 = vrot.slane %v10395_v56, 1  ;;  %v10325_v46 = vmul.f32 %v18271_v11, %v10317_v53 }
 0xa0f   : > { %v10373_v1 = vadd.f32 %v10372_v60, %v10371_v4  ;;  %v10379_v12 = vadd.f32 %v10378_v52, %v10377_v55  ;;  %v10385_v33 = vadd.f32 %v10384_v63, %v10383_v7  ;;  %v10391_v17 = vadd.f32 %v10390_v0, %v10389_v42 }
 0xa10   : > { %v10339_v9 = vadd.f32 %v10338_v14, %v10321_v21  ;;  %v10344_v38 = vrot.slane %v10322_v5, 4  ;;  %v10350_v20 = vrot.slane %v10323_v30, 4  ;;  %v10402_v24 = vrot.slane %v10401_v2, 1 }
 0xa11   : > { %v10334_v22 = vrot.slane %v10333_v13, 2  ;;  %v10356_v28 = vrot.slane %v10324_v18, 4  ;;  %v10442_v25 = vcombine.low %v10373_v1, %v10379_v12  ;;  %v10443_v62 = vcombine.low %v10385_v33, %v10391_v17 }
 0xa12   : > { %v10340_v50 = vrot.slane %v10339_v9, 2  ;;  %v10345_v19 = vadd.f32 %v10344_v38, %v10322_v5  ;;  %v10351_v29 = vadd.f32 %v10350_v20, %v10323_v30  ;;  %v10397_v15 = vadd.f32 %v10396_v10, %v10395_v56 }
 0xa13   : > { %v10335_v23 = vadd.f32 %v10334_v22, %v10333_v13  ;;  %v10357_v54 = vadd.f32 %v10356_v28, %v10324_v18  ;;  %v10362_v8 = vrot.slane %v10325_v46, 4  ;;  %v10403_v39 = vadd.f32 %v10402_v24, %v10401_v2  ;;  %v18272_v24 = vld [vmem:[#allocation19 + $0x4] ss:$24 sps:$4 sm:$0xff] (!%p15701_p11)   ;;  %v18277_v28 = vld [vmem:[#allocation19 + $0x300] ss:$24 sps:$4 sm:$0xff] (!%p15701_p11)  }
 0xa14   : > { %v10341_v26 = vadd.f32 %v10340_v50, %v10339_v9  ;;  %v10346_v32 = vrot.slane %v10345_v19, 2  ;;  %v10352_v31 = vrot.slane %v10351_v29, 2  ;;  %v10450_v44 = vrot.slane %v10442_v25, %v20953_v43  ;;  %v18274_v22 = vld [vmem:[#allocation19 + $0x304] ss:$24 sps:$4 sm:$0xff] (!%p15701_p11)   ;;  %12375 = vmatprep.subr.bf16.mxu1 (!%p15701_p11), %v18272_v24  ;;  %v18276_v50 = vld [vmem:[#allocation19] ss:$24 sps:$4 sm:$0xff] (!%p15701_p11)  }
 0xa15   : > { %v10336_v27 = vrot.slane %v10335_v23, 1  ;;  %v10358_v47 = vrot.slane %v10357_v54, 2  ;;  %v10363_v49 = vadd.f32 %v10362_v8, %v10325_v46  ;;  %v10457_v40 = vrot.slane %v10443_v62, %v20953_v43  ;;  %12418 = vmatprep.subr.bf16.mxu0 (!%p15701_p11), %v18274_v22  ;;  %v18278_v25 = vld [vmem:[#allocation19 + $0x34] ss:$24 sps:$4 sm:$0xff] (!%p15701_p11)   ;;  %12376 = vmatpush1.bf16.msra.mxu1 (!%p15701_p11), %v18276_v50  ;;  %v18283_v62 = vld [vmem:[#allocation19 + $0x330] ss:$24 sps:$4 sm:$0xff] (!%p15701_p11)  }
 0xa16   : > { %v10342_v53 = vrot.slane %v10341_v26, 1  ;;  %v10347_v35 = vadd.f32 %v10346_v32, %v10345_v19  ;;  %v10353_v36 = vadd.f32 %v10352_v31, %v10351_v29  ;;  %v10459_v56 = vcombine.low %v10397_v15, %v10403_v39  ;;  %12419 = vmatpush1.bf16.msra.mxu0 (!%p15701_p11), %v18277_v28  ;;  %v18280_v19 = vld [vmem:[#allocation19 + $0x334] ss:$24 sps:$4 sm:$0xff] (!%p15701_p11)   ;;  %v18282_v29 = vld [vmem:[#allocation19 + $0x30] ss:$24 sps:$4 sm:$0xff] (!%p15701_p11)   ;;  %12377 = vmatprep.subr.bf16.mxu1 (!%p15701_p11), %v18278_v25 }
 0xa17   : > { %v10337_v6 = vadd.f32 %v10336_v27, %v10335_v23  ;;  %v10359_v45 = vadd.f32 %v10358_v47, %v10357_v54  ;;  %v10364_v55 = vrot.slane %v10363_v49, 2  ;;  %v10458_v30 = vcombine.low %v10450_v44, %v10457_v40  ;;  %12420 = vmatprep.subr.bf16.mxu0 (!%p15701_p11), %v18280_v19  ;;  %v18284_v23 = vld [vmem:[#allocation19 + $0x64] ss:$24 sps:$4 sm:$0xff] (!%p15701_p11)   ;;  %v18288_v54 = vld [vmem:[#allocation19 + $0x60] ss:$24 sps:$4 sm:$0xff] (!%p15701_p11)  }
 0xa18   : > { %v10343_v41 = vadd.f32 %v10342_v53, %v10341_v26  ;;  %v10348_v21 = vrot.slane %v10347_v35, 1  ;;  %v10354_v4 = vrot.slane %v10353_v36, 1  ;;  %v10466_v2 = vrot.slane %v10459_v56, %v20953_v43  ;;  %v18286_v26 = vld [vmem:[#allocation19 + $0x364] ss:$24 sps:$4 sm:$0xff] (!%p15701_p11)   ;;  %v18289_v15 = vld [vmem:[#allocation19 + $0x360] ss:$24 sps:$4 sm:$0xff] (!%p15701_p11)  }
 0xa19   : > { %v10360_v7 = vrot.slane %v10359_v45, 1  ;;  %v10365_v16 = vadd.f32 %v10364_v55, %v10363_v49  ;;  %v10469_v3 = vrot.slane %v10458_v30, 7  ;;  %12378 = vmatpush1.bf16.msra.mxu1 (!%p15701_p11), %v18282_v29  ;;  %v18290_v32 = vld [vmem:[#allocation19 + $0x94] ss:$24 sps:$4 sm:$0xff] (!%p15701_p11)   ;;  %v18294_v8 = vld [vmem:[#allocation19 + $0x90] ss:$24 sps:$4 sm:$0xff] (!%p15701_p11)  }
 0xa1a   : > { %v10417_v42 = vcombine.low %v10337_v6, %v10343_v41  ;;  %v10349_v58 = vadd.f32 %v10348_v21, %v10347_v35  ;;  %v10355_v5 = vadd.f32 %v10354_v4, %v10353_v36  ;;  %v10476_v12 = vrot.slane %v10466_v2, 7  ;;  %12421 = vmatpush1.bf16.msra.mxu0 (!%p15701_p11), %v18283_v62  ;;  %12379 = vmatprep.subr.bf16.mxu1 (!%p15701_p11), %v18284_v23  ;;  %v18292_v31 = vld [vmem:[#allocation19 + $0x394] ss:$24 sps:$4 sm:$0xff] (!%p15701_p11)   ;;  %v18295_v39 = vld [vmem:[#allocation19 + $0x390] ss:$24 sps:$4 sm:$0xff] (!%p15701_p11)  }
 0xa1b   : > { %v10361_v60 = vadd.f32 %v10360_v7, %v10359_v45  ;;  %v10366_v52 = vrot.slane %v10365_v16, 1  ;;  %12422 = vmatprep.subr.bf16.mxu0 (!%p15701_p11), %v18286_v26  ;;  %v18296_v27 = vld [vmem:[#allocation19 + $0xc4] ss:$24 sps:$4 sm:$0xff] (!%p15701_p11)   ;;  %v18300_v47 = vld [vmem:[#allocation19 + $0xc0] ss:$24 sps:$4 sm:$0xff] (!%p15701_p11)  }
 0xa1c   : > { %v10418_v63 = vcombine.low %v10349_v58, %v10355_v5  ;;  %v10425_v0 = vrot.slane %v10417_v42, %v20953_v43  ;;  %v18298_v53 = vld [vmem:[#allocation19 + $0x3c4] ss:$24 sps:$4 sm:$0xff] (!%p15701_p11)   ;;  %v18301_v44 = vld [vmem:[#allocation19 + $0x3c0] ss:$24 sps:$4 sm:$0xff] (!%p15701_p11)   ;;  %v18302_v35 = vld [vmem:[#allocation19 + $0xf4] ss:$24 sps:$4 sm:$0xff] (!%p15701_p11)  }
 0xa1d   : > { %v10367_v61 = vadd.f32 %v10366_v52, %v10365_v16  ;;  %12380 = vmatpush1.bf16.msra.mxu1 (!%p15701_p11), %v18288_v54  ;;  %v18304_v36 = vld [vmem:[#allocation19 + $0x3f4] ss:$24 sps:$4 sm:$0xff] (!%p15701_p11)   ;;  %v18306_v49 = vld [vmem:[#allocation19 + $0xf0] ss:$24 sps:$4 sm:$0xff] (!%p15701_p11)   ;;  %v18308_v6 = vld [vmem:[#allocation19 + $0x124] ss:$24 sps:$4 sm:$0xff] (!%p15701_p11)  }
 0xa1e   : > { %v10432_v18 = vrot.slane %v10418_v63, %v20953_v43  ;;  %12423 = vmatpush1.bf16.msra.mxu0 (!%p15701_p11), %v18289_v15  ;;  %12381 = vmatprep.subr.bf16.mxu1 (!%p15701_p11), %v18290_v32  ;;  %v18307_v40 = vld [vmem:[#allocation19 + $0x3f0] ss:$24 sps:$4 sm:$0xff] (!%p15701_p11)   ;;  %v18310_v41 = vld [vmem:[#allocation19 + $0x424] ss:$24 sps:$4 sm:$0xff] (!%p15701_p11)   ;;  %v18312_v45 = vld [vmem:[#allocation19 + $0x120] ss:$24 sps:$4 sm:$0xff] (!%p15701_p11)  }
 0xa1f   : > { %v10434_v1 = vcombine.low %v10361_v60, %v10367_v61  ;;  %12424 = vmatprep.subr.bf16.mxu0 (!%p15701_p11), %v18292_v31  ;;  %v18313_v21 = vld [vmem:[#allocation19 + $0x420] ss:$24 sps:$4 sm:$0xff] (!%p15701_p11)   ;;  %v18314_v4 = vld [vmem:[#allocation19 + $0x154] ss:$24 sps:$4 sm:$0xff] (!%p15701_p11)   ;;  %v18318_v7 = vld [vmem:[#allocation19 + $0x150] ss:$24 sps:$4 sm:$0xff] (!%p15701_p11)  }
 0xa20   : > { %v10433_v14 = vcombine.low %v10425_v0, %v10432_v18  ;;  %v18316_v55 = vld [vmem:[#allocation19 + $0x454] ss:$24 sps:$4 sm:$0xff] (!%p15701_p11)   ;;  %v18319_v42 = vld [vmem:[#allocation19 + $0x450] ss:$24 sps:$4 sm:$0xff] (!%p15701_p11)   ;;  %v18320_v56 = vld [vmem:[#allocation19 + $0x184] ss:$24 sps:$4 sm:$0xff] (!%p15701_p11)  }
 0xa21   : > { %v10441_v33 = vrot.slane %v10434_v1, %v20953_v43  ;;  %10491 = sbr.rel (%p15701_p11) target bundleno = 3537 (0xdd1), region = 136  ;;  %12382 = vmatpush1.bf16.msra.mxu1 (!%p15701_p11), %v18294_v8  ;;  %v18322_v58 = vld [vmem:[#allocation19 + $0x484] ss:$24 sps:$4 sm:$0xff] (!%p15701_p11)   ;;  %v18324_v5 = vld [vmem:[#allocation19 + $0x180] ss:$24 sps:$4 sm:$0xff] (!%p15701_p11)  }
 0xa22   : > { %v10470_v17 = vsel %vm5584_vm4, %v10469_v3, %v10433_v14  ;;  %12425 = vmatpush1.bf16.msra.mxu0 (!%p15701_p11), %v18295_v39  ;;  %12383 = vmatprep.subr.bf16.mxu1 (!%p15701_p11), %v18296_v27  ;;  %v18325_v16 = vld [vmem:[#allocation19 + $0x480] ss:$24 sps:$4 sm:$0xff] (!%p15701_p11)   ;;  %v18326_v30 = vld [vmem:[#allocation19 + $0x1b4] ss:$24 sps:$4 sm:$0xff] (!%p15701_p11)   ;;  %v18330_v52 = vld [vmem:[#allocation19 + $0x1b0] ss:$24 sps:$4 sm:$0xff] (!%p15701_p11)  }
 0xa23   : > { %v10471_v13 = vsel %vm5586_vm5, %v10469_v3, %v10470_v17  ;;  %v10477_v10 = vsel %vm5584_vm4, %v10476_v12, %v10441_v33  ;;  %12426 = vmatprep.subr.bf16.mxu0 (!%p15701_p11), %v18298_v53  ;;  %v18328_v60 = vld [vmem:[#allocation19 + $0x4b4] ss:$24 sps:$4 sm:$0xff] (!%p15701_p11)   ;;  %v18331_v63 = vld [vmem:[#allocation19 + $0x4b0] ss:$24 sps:$4 sm:$0xff] (!%p15701_p11)   ;;  %v18332_v0 = vld [vmem:[#allocation19 + $0x1e4] ss:$24 sps:$4 sm:$0xff] (!%p15701_p11)  }
 0xa24   : > { %v10472_v9 = vsel %vm5588_vm6, %v10469_v3, %v10471_v13  ;;  %v10478_v46 = vsel %vm5586_vm5, %v10476_v12, %v10477_v10  ;;  %v18334_v2 = vld [vmem:[#allocation19 + $0x4e4] ss:$24 sps:$4 sm:$0xff] (!%p15701_p11)   ;;  %v18336_v61 = vld [vmem:[#allocation19 + $0x1e0] ss:$24 sps:$4 sm:$0xff] (!%p15701_p11)   ;;  %v18340_v14 = vld [vmem:[#allocation19 + $0x514] ss:$24 sps:$4 sm:$0xff] (!%p15701_p11)  }
 0xa25   : > { %v10473_v11 = vsel %vm5590_vm7, %v10469_v3, %v10472_v9  ;;  %v10479_v38 = vsel %vm5588_vm6, %v10476_v12, %v10478_v46  ;;  %12384 = vmatpush1.bf16.msra.mxu1 (!%p15701_p11), %v18300_v47  ;;  %v18337_v18 = vld [vmem:[#allocation19 + $0x4e0] ss:$24 sps:$4 sm:$0xff] (!%p15701_p11)   ;;  %v18338_v3 = vld [vmem:[#allocation19 + $0x214] ss:$24 sps:$4 sm:$0xff] (!%p15701_p11)   ;;  %v18342_v1 = vld [vmem:[#allocation19 + $0x210] ss:$24 sps:$4 sm:$0xff] (!%p15701_p11)  }
 0xa26   : > { %15699 = vst [vmem:[%s20989_s18 + $0x18] sm:$0xff] %v10473_v11  ;;  %v10480_v20 = vsel %vm5590_vm7, %v10476_v12, %v10479_v38  ;;  %12427 = vmatpush1.bf16.msra.mxu0 (!%p15701_p11), %v18301_v44  ;;  %12385 = vmatprep.subr.bf16.mxu1 (!%p15701_p11), %v18302_v35  ;;  %v18343_v12 = vld [vmem:[#allocation19 + $0x510] ss:$24 sps:$4 sm:$0xff] (!%p15701_p11)   ;;  %v18346_v24 = vld [vmem:[#allocation19 + $0x544] ss:$24 sps:$4 sm:$0xff] (!%p15701_p11)  }
 0xa27   : > { %15700 = vst [vmem:[%s20989_s18 + $0x20] sm:$0xf] %v10480_v20  ;;  %12428 = vmatprep.subr.bf16.mxu0 (!%p15701_p11), %v18304_v36  ;;  %v18344_v20 = vld [vmem:[#allocation19 + $0x244] ss:$24 sps:$4 sm:$0xff] (!%p15701_p11)   ;;  %v18348_v19 = vld [vmem:[#allocation19 + $0x240] ss:$24 sps:$4 sm:$0xff] (!%p15701_p11)  }
 0xa28   : > { %v18349_v29 = vld [vmem:[#allocation19 + $0x540] ss:$24 sps:$4 sm:$0xff]   ;;  %v18350_v23 = vld [vmem:[#allocation19 + $0x274] ss:$24 sps:$4 sm:$0xff]   ;;  %v18354_v32 = vld [vmem:[#allocation19 + $0x270] ss:$24 sps:$4 sm:$0xff]  }
 0xa29   : > { %12386 = vmatpush1.bf16.msra.mxu1 %v18306_v49  ;;  %v18352_v26 = vld [vmem:[#allocation19 + $0x574] ss:$24 sps:$4 sm:$0xff]   ;;  %v18355_v31 = vld [vmem:[#allocation19 + $0x570] ss:$24 sps:$4 sm:$0xff]   ;;  %v18356_v8 = vld [vmem:[#allocation19 + $0x2a4] ss:$24 sps:$4 sm:$0xff]  }
 0xa2a   : > { %12429 = vmatpush1.bf16.msra.mxu0 %v18307_v40  ;;  %12387 = vmatprep.subr.bf16.mxu1 %v18308_v6  ;;  %v18358_v39 = vld [vmem:[#allocation19 + $0x5a4] ss:$24 sps:$4 sm:$0xff]   ;;  %v18360_v44 = vld [vmem:[#allocation19 + $0x2a0] ss:$24 sps:$4 sm:$0xff]   ;;  %v18362_v40 = vld [vmem:[#allocation19 + $0x2d4] ss:$24 sps:$4 sm:$0xff]  }
 0xa2b   : > { %12430 = vmatprep.subr.bf16.mxu0 %v18310_v41  ;;  %v18361_v35 = vld [vmem:[#allocation19 + $0x5a0] ss:$24 sps:$4 sm:$0xff]   ;;  %v18364_v6 = vld [vmem:[#allocation19 + $0x5d4] ss:$24 sps:$4 sm:$0xff]  }
 0xa2d   : > { %12388 = vmatpush1.bf16.msra.mxu1 %v18312_v45 }
 0xa2e   : > { %12431 = vmatpush1.bf16.msra.mxu0 %v18313_v21  ;;  %12389 = vmatprep.subr.bf16.mxu1 %v18314_v4  ;;  %v10492_v33 = vld [vmem:[#allocation3] sm:$0xff]  ;;  %v10494_v17 = vld [vmem:[#allocation3 + $0xc] sm:$0xff]  ;;  %v10496_v13 = vld [vmem:[#allocation3 + $0x18] sm:$0xff] }
 0xa2f   : > { %12432 = vmatprep.subr.bf16.mxu0 %v18316_v55  ;;  %v10498_v9 = vld [vmem:[#allocation3 + $0x24] sm:$0xff]  ;;  %v10500_v10 = vld [vmem:[#allocation3 + $0x30] sm:$0xff]  ;;  %v10502_v11 = vld [vmem:[#allocation3 + $0x3c] sm:$0xff]  ;;  %v10516_v46 = vcombine.low %v10492_v33, %v10494_v17  ;;  %v10517_v27 = vcombine.high %v10492_v33, %v10494_v17 }
 0xa30   : > { %v10518_v38 = vcombine.low %v10496_v13, %v10498_v9  ;;  %v10570_v22 = vcombine.low %v10500_v10, %v10502_v11  ;;  %v10519_v53 = vcombine.high %v10496_v13, %v10498_v9  ;;  %v10571_v47 = vcombine.high %v10500_v10, %v10502_v11  ;;  %v18403_v33 = vld [vmem:[#allocation19 + $0x9c] ss:$24 sps:$4 sm:$0xff]   ;;  %v18398_v17 = vld [vmem:[#allocation19 + $0x690] ss:$24 sps:$4 sm:$0xff]   ;;  %v18409_v10 = vld [vmem:[#allocation19 + $0xcc] ss:$24 sps:$4 sm:$0xff]  }
 0xa31   : > { %12390 = vmatpush1.bf16.msra.mxu1 %v18318_v7  ;;  %v10526_v50 = vrot.slane %v10516_v46, %v20953_v43  ;;  %v10533_v36 = vrot.slane %v10517_v27, %v20953_v43  ;;  %v18366_v7 = vld [vmem:[#allocation19 + $0x2d0] ss:$24 sps:$4 sm:$0xff]   ;;  %v18406_v9 = vld [vmem:[#allocation19 + $0x6c4] ss:$24 sps:$4 sm:$0xff]   ;;  %v18404_v11 = vld [vmem:[#allocation19 + $0x6c0] ss:$24 sps:$4 sm:$0xff]  }
 0xa32   : > { %12433 = vmatpush1.bf16.msra.mxu0 %v18319_v42  ;;  %12391 = vmatprep.subr.bf16.mxu1 %v18320_v56  ;;  %v10540_v28 = vrot.slane %v10518_v38, %v20953_v43  ;;  %v10578_v25 = vrot.slane %v10570_v22, %v20953_v43  ;;  %v10547_v49 = vrot.slane %v10519_v53, %v20953_v43  ;;  %v18367_v42 = vld [vmem:[#allocation19 + $0x5d0] ss:$24 sps:$4 sm:$0xff]   ;;  %v18412_v38 = vld [vmem:[#allocation19 + $0x6f4] ss:$24 sps:$4 sm:$0xff]  }
 0xa33   : > { %12434 = vmatprep.subr.bf16.mxu0 %v18322_v58  ;;  %v10585_v41 = vrot.slane %v10571_v47, %v20953_v43  ;;  %v18382_v58 = vld [vmem:[#allocation19 + $0x604] ss:$24 sps:$4 sm:$0xff]   ;;  %v18401_v13 = vld [vmem:[#allocation19 + $0x98] ss:$24 sps:$4 sm:$0xff]   ;;  %v18407_v46 = vld [vmem:[#allocation19 + $0xc8] ss:$24 sps:$4 sm:$0xff]  }
 0xa34   : > { %v10549_v62 = vcombine.high %v10526_v50, %v10540_v28  ;;  %v10586_v54 = vcombine.high %v10578_v25, %v10578_v25  ;;  %v10551_v45 = vcombine.high %v10533_v36, %v10547_v49  ;;  %v10548_v4 = vcombine.low %v10526_v50, %v10540_v28  ;;  %v18413_v22 = vld [vmem:[#allocation19 + $0xf8] ss:$24 sps:$4 sm:$0xff]   ;;  %v18418_v50 = vld [vmem:[#allocation19 + $0x724] ss:$24 sps:$4 sm:$0xff]  }
 0xa35   : > { %12392 = vmatpush1.bf16.msra.mxu1 %v18324_v5  ;;  %v10587_v21 = vcombine.high %v10585_v41, %v10585_v41  ;;  %v10550_v55 = vcombine.low %v10533_v36, %v10547_v49  ;;  %v18385_v5 = vld [vmem:[#allocation19 + $0xc] ss:$24 sps:$4 sm:$0xff]  }
 0xa36   : > { %12435 = vmatpush1.bf16.msra.mxu0 %v18325_v16  ;;  %12393 = vmatprep.subr.bf16.mxu1 %v18326_v30  ;;  %v21177_v15 = vpack.c.bf16 %v10586_v54, %v10549_v62  ;;  %v21186_v16 = vpack.c.bf16 %v10578_v25, %v10548_v4  ;;  %v18421_v28 = vld [vmem:[#allocation19 + $0x12c] ss:$24 sps:$4 sm:$0xff]   ;;  %v18416_v25 = vld [vmem:[#allocation19 + $0x720] ss:$24 sps:$4 sm:$0xff]   ;;  %v18427_v62 = vld [vmem:[#allocation19 + $0x15c] ss:$24 sps:$4 sm:$0xff]  }
 0xa37   : > { %12436 = vmatprep.subr.bf16.mxu0 %v18328_v60  ;;  %v21183_v56 = vpack.c.bf16 %v10587_v21, %v10551_v45  ;;  %v21188_v30 = vpack.c.bf16 %v10585_v41, %v10550_v55  ;;  %v18380_v60 = vld [vmem:[#allocation19 + $0x600] ss:$24 sps:$4 sm:$0xff]   ;;  %v18430_v49 = vld [vmem:[#allocation19 + $0x784] ss:$24 sps:$4 sm:$0xff]   ;;  %v18436_v55 = vld [vmem:[#allocation19 + $0x7b4] ss:$24 sps:$4 sm:$0xff]  }
 0xa38   : > { %12407 = vmatprep.mubr.bf16.mxu1 %v21177_v15  ;;  %v10497_v54 = vld [vmem:[#allocation3 + $0x20] sm:$0xf]  ;;  %v18431_v4 = vld [vmem:[#allocation19 + $0x188] ss:$24 sps:$4 sm:$0xff]  }
 0xa39   : > { %12394 = vmatpush1.bf16.msra.mxu1 %v18330_v52  ;;  %12450 = vmatprep.mubr.bf16.mxu0 %v21183_v56  ;;  %v18383_v52 = vld [vmem:[#allocation19 + $0x8] ss:$24 sps:$4 sm:$0xff]  }
 0xa3a   : > { %12437 = vmatpush1.bf16.msra.mxu0 %v18331_v63  ;;  %12395 = vmatprep.subr.bf16.mxu1 %v18332_v0  ;;  %v18388_v63 = vld [vmem:[#allocation19 + $0x634] ss:$24 sps:$4 sm:$0xff]   ;;  %v18428_v21 = vld [vmem:[#allocation19 + $0x780] ss:$24 sps:$4 sm:$0xff]  }
 0xa3b   : > { %12438 = vmatprep.subr.bf16.mxu0 %v18334_v2  ;;  %v18391_v0 = vld [vmem:[#allocation19 + $0x3c] ss:$24 sps:$4 sm:$0xff]   ;;  %v18386_v2 = vld [vmem:[#allocation19 + $0x630] ss:$24 sps:$4 sm:$0xff]  }
 0xa3d   : > { %12396 = vmatpush1.bf16.msra.mxu1 %v18336_v61  ;;  %v18389_v61 = vld [vmem:[#allocation19 + $0x38] ss:$24 sps:$4 sm:$0xff]  }
 0xa3e   : > { %12439 = vmatpush1.bf16.msra.mxu0 %v18337_v18  ;;  %12397 = vmatprep.subr.bf16.mxu1 %v18338_v3  ;;  %v18394_v18 = vld [vmem:[#allocation19 + $0x664] ss:$24 sps:$4 sm:$0xff]  }
 0xa3f   : > { %12440 = vmatprep.subr.bf16.mxu0 %v18340_v14  ;;  %v18397_v3 = vld [vmem:[#allocation19 + $0x6c] ss:$24 sps:$4 sm:$0xff]   ;;  %v18392_v14 = vld [vmem:[#allocation19 + $0x660] ss:$24 sps:$4 sm:$0xff]  }
 0xa41   : > { %12398 = vmatpush1.bf16.msra.mxu1 %v18342_v1  ;;  %v18395_v1 = vld [vmem:[#allocation19 + $0x68] ss:$24 sps:$4 sm:$0xff]  }
 0xa42   : > { %12441 = vmatpush1.bf16.msra.mxu0 %v18343_v12  ;;  %12399 = vmatprep.subr.bf16.mxu1 %v18344_v20  ;;  %v18400_v12 = vld [vmem:[#allocation19 + $0x694] ss:$24 sps:$4 sm:$0xff]  }
 0xa43   : > { %12442 = vmatprep.subr.bf16.mxu0 %v18346_v24  ;;  %v18415_v20 = vld [vmem:[#allocation19 + $0xfc] ss:$24 sps:$4 sm:$0xff]   ;;  %v18410_v24 = vld [vmem:[#allocation19 + $0x6f0] ss:$24 sps:$4 sm:$0xff]  }
 0xa45   : > { %12400 = vmatpush1.bf16.msra.mxu1 %v18348_v19  ;;  %v18419_v19 = vld [vmem:[#allocation19 + $0x128] ss:$24 sps:$4 sm:$0xff]  }
 0xa46   : > { %12443 = vmatpush1.bf16.msra.mxu0 %v18349_v29  ;;  %12401 = vmatprep.subr.bf16.mxu1 %v18350_v23  ;;  %v18424_v29 = vld [vmem:[#allocation19 + $0x754] ss:$24 sps:$4 sm:$0xff]   ;;  %v10493_v23 = vld [vmem:[#allocation3 + $0x8] sm:$0xf] }
 0xa47   : > { %12444 = vmatprep.subr.bf16.mxu0 %v18352_v26  ;;  %v10495_v26 = vld [vmem:[#allocation3 + $0x14] sm:$0xf] }
 0xa49   : > { %12402 = vmatpush1.bf16.msra.mxu1 %v18354_v32  ;;  %v10499_v32 = vld [vmem:[#allocation3 + $0x2c] sm:$0xf] }
 0xa4a   : > { %12445 = vmatpush1.bf16.msra.mxu0 %v18355_v31  ;;  %12403 = vmatprep.subr.bf16.mxu1 %v18356_v8  ;;  %v10501_v31 = vld [vmem:[#allocation3 + $0x38] sm:$0xf]  ;;  %v10552_v8 = vcombine.low %v10493_v23, %v10495_v26  ;;  %v10553_v27 = vcombine.low %v10497_v54, %v10499_v32  ;;  %v18479_v23 = vld [vmem:[#allocation19 + $0x308] ss:$24 sps:$4 sm:$0xff]   ;;  %v18487_v54 = vld [vmem:[#allocation19 + $0x33c] ss:$24 sps:$4 sm:$0xff]  }
 0xa4b   : > { %12446 = vmatprep.subr.bf16.mxu0 %v18358_v39  ;;  %v10503_v39 = vld [vmem:[#allocation3 + $0x44] sm:$0xf]  ;;  %v18482_v26 = vld [vmem:[#allocation19 + $0x10] ss:$24 sps:$4 sm:$0xff]  }
 0xa4c   : > { %v21194_v53 = vrot.slane %v10552_v8, %v20953_v43  ;;  %v10588_v47 = vcombine.low %v10501_v31, %v10503_v39  ;;  %v21197_v36 = vrot.slane %v10553_v27, %v20953_v43  ;;  %v18490_v32 = vld [vmem:[#allocation19 + $0x44] ss:$24 sps:$4 sm:$0xff]   ;;  %v18485_v31 = vld [vmem:[#allocation19 + $0x338] ss:$24 sps:$4 sm:$0xff]   ;;  %v18496_v27 = vld [vmem:[#allocation19 + $0x74] ss:$24 sps:$4 sm:$0xff]  }
 0xa4d   : > { %12404 = vmatpush1.bf16.msra.mxu1 %v18360_v44  ;;  %v18422_v44 = vld [vmem:[#allocation19 + $0x750] ss:$24 sps:$4 sm:$0xff]   ;;  %v18488_v8 = vld [vmem:[#allocation19 + $0x40] ss:$24 sps:$4 sm:$0xff]   ;;  %v18493_v39 = vld [vmem:[#allocation19 + $0x36c] ss:$24 sps:$4 sm:$0xff]  }
 0xa4e   : > { %12447 = vmatpush1.bf16.msra.mxu0 %v18361_v35  ;;  %12405 = vmatprep.subr.bf16.mxu1 %v18362_v40  ;;  %v18425_v35 = vld [vmem:[#allocation19 + $0x158] ss:$24 sps:$4 sm:$0xff]   ;;  %v21200_v40 = vrot.slane %v10588_v47, %v20953_v43  ;;  %v10569_v41 = vcombine.high %v21194_v53, %v21197_v36 }
 0xa4f   : > { %12448 = vmatprep.subr.bf16.mxu0 %v18364_v6  ;;  %v18433_v6 = vld [vmem:[#allocation19 + $0x18c] ss:$24 sps:$4 sm:$0xff]   ;;  %v18494_v47 = vld [vmem:[#allocation19 + $0x70] ss:$24 sps:$4 sm:$0xff]  }
 0xa50   : > { %v10596_v45 = vcombine.high %v21200_v40, %v21200_v40 }
 0xa51   : > { %12406 = vmatpush1.bf16.msra.mxu1 %v18366_v7 }
 0xa52   : > { %12449 = vmatpush1.bf16.msra.mxu0 %v18367_v42  ;;  %12504 = vmatprep.subr.bf16.mxu1 %v18385_v5  ;;  %v21206_v7 = vpack.c.bf16 %v10596_v45, %v10569_v41  ;;  %v18439_v42 = vld [vmem:[#allocation19 + $0x1bc] ss:$24 sps:$4 sm:$0xff]   ;;  %v18437_v5 = vld [vmem:[#allocation19 + $0x1b8] ss:$24 sps:$4 sm:$0xff]   ;;  %v18503_v41 = vld [vmem:[#allocation19 + $0x3c8] ss:$24 sps:$4 sm:$0xff]  }
 0xa53   : > { %12461 = vmatprep.subr.bf16.mxu0 %v18382_v58  ;;  %v18434_v58 = vld [vmem:[#allocation19 + $0x7b0] ss:$24 sps:$4 sm:$0xff]  }
 0xa54   : > { %12408 = vmatmul.mubr.bf16.vlgmr.msra.gmra.mrb[0].mxu1 %v21186_v16  ;;  %v18506_v45 = vld [vmem:[#allocation19 + $0xd0] ss:$24 sps:$4 sm:$0xff]  }
 0xa55   : > { %12451 = vmatmul.mubr.bf16.vlgmr.msra.gmra.mrb[0].mxu0 %v21188_v30  ;;  %12505 = vmatpush1.bf16.msra.mxu1 %v18383_v52  ;;  %v18445_v52 = vld [vmem:[#allocation19 + $0x1ec] ss:$24 sps:$4 sm:$0xff]  }
 0xa56   : > { %12462 = vmatpush1.bf16.msra.mxu0 %v18380_v60  ;;  %12506 = vmatprep.subr.bf16.mxu1 %v18391_v0  ;;  %v18442_v60 = vld [vmem:[#allocation19 + $0x7e4] ss:$24 sps:$4 sm:$0xff]   ;;  %v18443_v0 = vld [vmem:[#allocation19 + $0x1e8] ss:$24 sps:$4 sm:$0xff]  }
 0xa57   : > { %12463 = vmatprep.subr.bf16.mxu0 %v18388_v63  ;;  %12536 = vmatprep.mubr.bf16.mxu1 %v21177_v15  ;;  %v18440_v63 = vld [vmem:[#allocation19 + $0x7e0] ss:$24 sps:$4 sm:$0xff]  }
 0xa58   : > { %12493 = vmatprep.mubr.bf16.mxu0 %v21206_v7 }
 0xa59   : > { %12507 = vmatpush1.bf16.msra.mxu1 %v18389_v61  ;;  %v18451_v61 = vld [vmem:[#allocation19 + $0x21c] ss:$24 sps:$4 sm:$0xff]  }
 0xa5a   : > { %12464 = vmatpush1.bf16.msra.mxu0 %v18386_v2  ;;  %12508 = vmatprep.subr.bf16.mxu1 %v18397_v3  ;;  %v18448_v2 = vld [vmem:[#allocation19 + $0x814] ss:$24 sps:$4 sm:$0xff]   ;;  %v18449_v3 = vld [vmem:[#allocation19 + $0x218] ss:$24 sps:$4 sm:$0xff]  }
 0xa5b   : > { %12465 = vmatprep.subr.bf16.mxu0 %v18394_v18  ;;  %v18446_v18 = vld [vmem:[#allocation19 + $0x810] ss:$24 sps:$4 sm:$0xff]  }
 0xa5d   : > { %12509 = vmatpush1.bf16.msra.mxu1 %v18395_v1  ;;  %v18457_v1 = vld [vmem:[#allocation19 + $0x24c] ss:$24 sps:$4 sm:$0xff]  }
 0xa5e   : > { %12466 = vmatpush1.bf16.msra.mxu0 %v18392_v14  ;;  %12510 = vmatprep.subr.bf16.mxu1 %v18403_v33  ;;  %v18454_v14 = vld [vmem:[#allocation19 + $0x844] ss:$24 sps:$4 sm:$0xff]   ;;  %v18455_v33 = vld [vmem:[#allocation19 + $0x248] ss:$24 sps:$4 sm:$0xff]  }
 0xa5f   : > { %12467 = vmatprep.subr.bf16.mxu0 %v18400_v12  ;;  %v18452_v12 = vld [vmem:[#allocation19 + $0x840] ss:$24 sps:$4 sm:$0xff]  }
 0xa61   : > { %12511 = vmatpush1.bf16.msra.mxu1 %v18401_v13  ;;  %v18463_v13 = vld [vmem:[#allocation19 + $0x27c] ss:$24 sps:$4 sm:$0xff]  }
 0xa62   : > { %12468 = vmatpush1.bf16.msra.mxu0 %v18398_v17  ;;  %12512 = vmatprep.subr.bf16.mxu1 %v18409_v10  ;;  %v18460_v17 = vld [vmem:[#allocation19 + $0x874] ss:$24 sps:$4 sm:$0xff]   ;;  %v18461_v10 = vld [vmem:[#allocation19 + $0x278] ss:$24 sps:$4 sm:$0xff]  }
 0xa63   : > { %12469 = vmatprep.subr.bf16.mxu0 %v18406_v9  ;;  %v18458_v9 = vld [vmem:[#allocation19 + $0x870] ss:$24 sps:$4 sm:$0xff]  }
 0xa65   : > { %12513 = vmatpush1.bf16.msra.mxu1 %v18407_v46  ;;  %v18469_v46 = vld [vmem:[#allocation19 + $0x2ac] ss:$24 sps:$4 sm:$0xff]  }
 0xa66   : > { %12470 = vmatpush1.bf16.msra.mxu0 %v18404_v11  ;;  %12514 = vmatprep.subr.bf16.mxu1 %v18415_v20  ;;  %v18466_v11 = vld [vmem:[#allocation19 + $0x8a4] ss:$24 sps:$4 sm:$0xff]   ;;  %v18467_v20 = vld [vmem:[#allocation19 + $0x2a8] ss:$24 sps:$4 sm:$0xff]  }
 0xa67   : > { %12471 = vmatprep.subr.bf16.mxu0 %v18412_v38  ;;  %v18464_v38 = vld [vmem:[#allocation19 + $0x8a0] ss:$24 sps:$4 sm:$0xff]  }
 0xa69   : > { %12515 = vmatpush1.bf16.msra.mxu1 %v18413_v22  ;;  %v18475_v22 = vld [vmem:[#allocation19 + $0x2dc] ss:$24 sps:$4 sm:$0xff]  }
 0xa6a   : > { %12472 = vmatpush1.bf16.msra.mxu0 %v18410_v24  ;;  %12516 = vmatprep.subr.bf16.mxu1 %v18421_v28  ;;  %v18472_v24 = vld [vmem:[#allocation19 + $0x8d4] ss:$24 sps:$4 sm:$0xff]   ;;  %v18473_v28 = vld [vmem:[#allocation19 + $0x2d8] ss:$24 sps:$4 sm:$0xff]  }
 0xa6b   : > { %12473 = vmatprep.subr.bf16.mxu0 %v18418_v50  ;;  %v18470_v50 = vld [vmem:[#allocation19 + $0x8d0] ss:$24 sps:$4 sm:$0xff]  }
 0xa6d   : > { %12517 = vmatpush1.bf16.msra.mxu1 %v18419_v19  ;;  %v18481_v19 = vld [vmem:[#allocation19 + $0x30c] ss:$24 sps:$4 sm:$0xff]  }
 0xa6e   : > { %12474 = vmatpush1.bf16.msra.mxu0 %v18416_v25  ;;  %12518 = vmatprep.subr.bf16.mxu1 %v18427_v62  ;;  %v10568_v25 = vcombine.low %v21194_v53, %v21197_v36  ;;  %v18491_v53 = vld [vmem:[#allocation19 + $0x368] ss:$24 sps:$4 sm:$0xff]   ;;  %v18497_v36 = vld [vmem:[#allocation19 + $0x398] ss:$24 sps:$4 sm:$0xff]  }
 0xa6f   : > { %12475 = vmatprep.subr.bf16.mxu0 %v18424_v29  ;;  %v18484_v29 = vld [vmem:[#allocation19 + $0x14] ss:$24 sps:$4 sm:$0xff]  }
 0xa70   : > { %v21212_v62 = vpack.c.bf16 %v21200_v40, %v10568_v25  ;;  %v18505_v40 = vld [vmem:[#allocation19 + $0x3cc] ss:$24 sps:$4 sm:$0xff]   ;;  %v18554_v25 = vld [vmem:[#allocation19 + $0x250] ss:$24 sps:$4 sm:$0xff]  }
 0xa71   : > { %12519 = vmatpush1.bf16.msra.mxu1 %v18425_v35  ;;  %v18502_v35 = vld [vmem:[#allocation19 + $0xa4] ss:$24 sps:$4 sm:$0xff]  }
 0xa72   : > { %12476 = vmatpush1.bf16.msra.mxu0 %v18422_v44  ;;  %12520 = vmatprep.subr.bf16.mxu1 %v18433_v6  ;;  %v18499_v44 = vld [vmem:[#allocation19 + $0x39c] ss:$24 sps:$4 sm:$0xff]  }
 0xa73   : > { %12477 = vmatprep.subr.bf16.mxu0 %v18430_v49  ;;  %v18500_v49 = vld [vmem:[#allocation19 + $0xa0] ss:$24 sps:$4 sm:$0xff]   ;;  %v18508_v6 = vld [vmem:[#allocation19 + $0xd4] ss:$24 sps:$4 sm:$0xff]  }
 0xa75   : > { %12521 = vmatpush1.bf16.msra.mxu1 %v18431_v4  ;;  %v18509_v4 = vld [vmem:[#allocation19 + $0x3f8] ss:$24 sps:$4 sm:$0xff]  }
 0xa76   : > { %12478 = vmatpush1.bf16.msra.mxu0 %v18428_v21  ;;  %12522 = vmatprep.subr.bf16.mxu1 %v18439_v42  ;;  %v18514_v21 = vld [vmem:[#allocation19 + $0x104] ss:$24 sps:$4 sm:$0xff]  }
 0xa77   : > { %12479 = vmatprep.subr.bf16.mxu0 %v18436_v55  ;;  %v18512_v55 = vld [vmem:[#allocation19 + $0x100] ss:$24 sps:$4 sm:$0xff]   ;;  %v18517_v42 = vld [vmem:[#allocation19 + $0x42c] ss:$24 sps:$4 sm:$0xff]  }
 0xa79   : > { %12523 = vmatpush1.bf16.msra.mxu1 %v18437_v5  ;;  %v18515_v5 = vld [vmem:[#allocation19 + $0x428] ss:$24 sps:$4 sm:$0xff]  }
 0xa7a   : > { %12480 = vmatpush1.bf16.msra.mxu0 %v18434_v58  ;;  %12524 = vmatprep.subr.bf16.mxu1 %v18445_v52  ;;  %v18520_v58 = vld [vmem:[#allocation19 + $0x134] ss:$24 sps:$4 sm:$0xff]  }
 0xa7b   : > { %12481 = vmatprep.subr.bf16.mxu0 %v18442_v60  ;;  %v18518_v60 = vld [vmem:[#allocation19 + $0x130] ss:$24 sps:$4 sm:$0xff]   ;;  %v18523_v52 = vld [vmem:[#allocation19 + $0x45c] ss:$24 sps:$4 sm:$0xff]  }
 0xa7d   : > { %12525 = vmatpush1.bf16.msra.mxu1 %v18443_v0  ;;  %v18521_v0 = vld [vmem:[#allocation19 + $0x458] ss:$24 sps:$4 sm:$0xff]  }
 0xa7e   : > { %12482 = vmatpush1.bf16.msra.mxu0 %v18440_v63  ;;  %12526 = vmatprep.subr.bf16.mxu1 %v18451_v61  ;;  %v18526_v63 = vld [vmem:[#allocation19 + $0x164] ss:$24 sps:$4 sm:$0xff]  }
 0xa7f   : > { %12483 = vmatprep.subr.bf16.mxu0 %v18448_v2  ;;  %v18524_v2 = vld [vmem:[#allocation19 + $0x160] ss:$24 sps:$4 sm:$0xff]   ;;  %v18529_v61 = vld [vmem:[#allocation19 + $0x48c] ss:$24 sps:$4 sm:$0xff]  }
 0xa81   : > { %12527 = vmatpush1.bf16.msra.mxu1 %v18449_v3  ;;  %v18527_v3 = vld [vmem:[#allocation19 + $0x488] ss:$24 sps:$4 sm:$0xff]  }
 0xa82   : > { %12484 = vmatpush1.bf16.msra.mxu0 %v18446_v18  ;;  %12528 = vmatprep.subr.bf16.mxu1 %v18457_v1  ;;  %v18532_v18 = vld [vmem:[#allocation19 + $0x194] ss:$24 sps:$4 sm:$0xff]  }
 0xa83   : > { %12485 = vmatprep.subr.bf16.mxu0 %v18454_v14  ;;  %v18530_v14 = vld [vmem:[#allocation19 + $0x190] ss:$24 sps:$4 sm:$0xff]   ;;  %v18535_v1 = vld [vmem:[#allocation19 + $0x4bc] ss:$24 sps:$4 sm:$0xff]  }
 0xa85   : > { %12529 = vmatpush1.bf16.msra.mxu1 %v18455_v33  ;;  %v18533_v33 = vld [vmem:[#allocation19 + $0x4b8] ss:$24 sps:$4 sm:$0xff]  }
 0xa86   : > { %12486 = vmatpush1.bf16.msra.mxu0 %v18452_v12  ;;  %12530 = vmatprep.subr.bf16.mxu1 %v18463_v13  ;;  %v18538_v12 = vld [vmem:[#allocation19 + $0x1c4] ss:$24 sps:$4 sm:$0xff]  }
 0xa87   : > { %12487 = vmatprep.subr.bf16.mxu0 %v18460_v17  ;;  %v18536_v17 = vld [vmem:[#allocation19 + $0x1c0] ss:$24 sps:$4 sm:$0xff]   ;;  %v18541_v13 = vld [vmem:[#allocation19 + $0x4ec] ss:$24 sps:$4 sm:$0xff]  }
 0xa89   : > { %12531 = vmatpush1.bf16.msra.mxu1 %v18461_v10  ;;  %v18539_v10 = vld [vmem:[#allocation19 + $0x4e8] ss:$24 sps:$4 sm:$0xff]  }
 0xa8a   : > { %12488 = vmatpush1.bf16.msra.mxu0 %v18458_v9  ;;  %12532 = vmatprep.subr.bf16.mxu1 %v18469_v46  ;;  %v18544_v9 = vld [vmem:[#allocation19 + $0x1f4] ss:$24 sps:$4 sm:$0xff]  }
 0xa8b   : > { %12489 = vmatprep.subr.bf16.mxu0 %v18466_v11  ;;  %v18542_v11 = vld [vmem:[#allocation19 + $0x1f0] ss:$24 sps:$4 sm:$0xff]   ;;  %v18547_v46 = vld [vmem:[#allocation19 + $0x51c] ss:$24 sps:$4 sm:$0xff]  }
 0xa8d   : > { %12533 = vmatpush1.bf16.msra.mxu1 %v18467_v20  ;;  %v18545_v20 = vld [vmem:[#allocation19 + $0x518] ss:$24 sps:$4 sm:$0xff]  }
 0xa8e   : > { %12490 = vmatpush1.bf16.msra.mxu0 %v18464_v38  ;;  %12534 = vmatprep.subr.bf16.mxu1 %v18475_v22  ;;  %v18550_v38 = vld [vmem:[#allocation19 + $0x224] ss:$24 sps:$4 sm:$0xff]  }
 0xa8f   : > { %12491 = vmatprep.subr.bf16.mxu0 %v18472_v24  ;;  %v18548_v24 = vld [vmem:[#allocation19 + $0x220] ss:$24 sps:$4 sm:$0xff]   ;;  %v18553_v22 = vld [vmem:[#allocation19 + $0x54c] ss:$24 sps:$4 sm:$0xff]  }
 0xa91   : > { %12535 = vmatpush1.bf16.msra.mxu1 %v18473_v28  ;;  %v18551_v28 = vld [vmem:[#allocation19 + $0x548] ss:$24 sps:$4 sm:$0xff]  }
 0xa92   : > { %12492 = vmatpush1.bf16.msra.mxu0 %v18470_v50  ;;  %12547 = vmatprep.subr.bf16.mxu1 %v18481_v19  ;;  %v18556_v50 = vld [vmem:[#allocation19 + $0x254] ss:$24 sps:$4 sm:$0xff]  }
 0xa93   : > { %12633 = vmatprep.subr.bf16.mxu0 %v18484_v29  ;;  %v18559_v19 = vld [vmem:[#allocation19 + $0x57c] ss:$24 sps:$4 sm:$0xff]  }
 0xa94   : > { %12537 = vmatmul.mubr.bf16.vlgmr.msra.gmra.mrb[4].mxu1 %v21186_v16  ;;  %v18562_v29 = vld [vmem:[#allocation19 + $0x284] ss:$24 sps:$4 sm:$0xff]  }
 0xa95   : > { %12494 = vmatmul.mubr.bf16.vlgmr.msra.gmra.mrb[0].mxu0 %v21212_v62  ;;  %12548 = vmatpush1.bf16.msra.mxu1 %v18479_v23  ;;  %v18557_v23 = vld [vmem:[#allocation19 + $0x578] ss:$24 sps:$4 sm:$0xff]  }
 0xa96   : > { %12634 = vmatpush1.bf16.msra.mxu0 %v18482_v26  ;;  %12549 = vmatprep.subr.bf16.mxu1 %v18487_v54  ;;  %v18560_v26 = vld [vmem:[#allocation19 + $0x280] ss:$24 sps:$4 sm:$0xff]   ;;  %v18565_v54 = vld [vmem:[#allocation19 + $0x5ac] ss:$24 sps:$4 sm:$0xff]  }
 0xa97   : > { %12635 = vmatprep.subr.bf16.mxu0 %v18490_v32  ;;  %12579 = vmatprep.mubr.bf16.mxu1 %v21183_v56  ;;  %v18568_v32 = vld [vmem:[#allocation19 + $0x2b4] ss:$24 sps:$4 sm:$0xff]  }
 0xa98   : > { %12665 = vmatprep.mubr.bf16.mxu0 %v21177_v15  ;;  %v18511_v15 = vld [vmem:[#allocation19 + $0x3fc] ss:$24 sps:$4 sm:$0xff]  }
 0xa99   : > { %12550 = vmatpush1.bf16.msra.mxu1 %v18485_v31  ;;  %v18563_v31 = vld [vmem:[#allocation19 + $0x5a8] ss:$24 sps:$4 sm:$0xff]  }
 0xa9a   : > { %12636 = vmatpush1.bf16.msra.mxu0 %v18488_v8  ;;  %12551 = vmatprep.subr.bf16.mxu1 %v18493_v39  ;;  %v18566_v8 = vld [vmem:[#allocation19 + $0x2b0] ss:$24 sps:$4 sm:$0xff]   ;;  %v18571_v39 = vld [vmem:[#allocation19 + $0x5dc] ss:$24 sps:$4 sm:$0xff]  }
 0xa9b   : > { %12637 = vmatprep.subr.bf16.mxu0 %v18496_v27  ;;  %v18574_v27 = vld [vmem:[#allocation19 + $0x2e4] ss:$24 sps:$4 sm:$0xff]  }
 0xa9d   : > { %12552 = vmatpush1.bf16.msra.mxu1 %v18491_v53  ;;  %v18569_v53 = vld [vmem:[#allocation19 + $0x5d8] ss:$24 sps:$4 sm:$0xff]  }
 0xa9e   : > { %12638 = vmatpush1.bf16.msra.mxu0 %v18494_v47  ;;  %12553 = vmatprep.subr.bf16.mxu1 %v18499_v44  ;;  %v18572_v47 = vld [vmem:[#allocation19 + $0x2e0] ss:$24 sps:$4 sm:$0xff]   ;;  %v18577_v44 = vld [vmem:[#allocation19 + $0x60c] ss:$24 sps:$4 sm:$0xff]  }
 0xa9f   : > { %12639 = vmatprep.subr.bf16.mxu0 %v18502_v35  ;;  %v18580_v35 = vld [vmem:[#allocation19 + $0x314] ss:$24 sps:$4 sm:$0xff]  }
 0xaa1   : > { %12554 = vmatpush1.bf16.msra.mxu1 %v18497_v36  ;;  %v18575_v36 = vld [vmem:[#allocation19 + $0x608] ss:$24 sps:$4 sm:$0xff]  }
 0xaa2   : > { %12640 = vmatpush1.bf16.msra.mxu0 %v18500_v49  ;;  %12555 = vmatprep.subr.bf16.mxu1 %v18505_v40  ;;  %v18578_v49 = vld [vmem:[#allocation19 + $0x310] ss:$24 sps:$4 sm:$0xff]   ;;  %v18583_v40 = vld [vmem:[#allocation19 + $0x63c] ss:$24 sps:$4 sm:$0xff]  }
 0xaa3   : > { %12641 = vmatprep.subr.bf16.mxu0 %v18508_v6  ;;  %v18586_v6 = vld [vmem:[#allocation19 + $0x344] ss:$24 sps:$4 sm:$0xff]  }
 0xaa5   : > { %12556 = vmatpush1.bf16.msra.mxu1 %v18503_v41  ;;  %v18581_v41 = vld [vmem:[#allocation19 + $0x638] ss:$24 sps:$4 sm:$0xff]  }
 0xaa6   : > { %12642 = vmatpush1.bf16.msra.mxu0 %v18506_v45  ;;  %12557 = vmatprep.subr.bf16.mxu1 %v18511_v15  ;;  %v18584_v45 = vld [vmem:[#allocation19 + $0x340] ss:$24 sps:$4 sm:$0xff]   ;;  %v18589_v15 = vld [vmem:[#allocation19 + $0x66c] ss:$24 sps:$4 sm:$0xff]  }
 0xaa7   : > { %12643 = vmatprep.subr.bf16.mxu0 %v18514_v21  ;;  %v18592_v21 = vld [vmem:[#allocation19 + $0x374] ss:$24 sps:$4 sm:$0xff]  }
 0xaa9   : > { %12558 = vmatpush1.bf16.msra.mxu1 %v18509_v4  ;;  %v18587_v4 = vld [vmem:[#allocation19 + $0x668] ss:$24 sps:$4 sm:$0xff]  }
 0xaaa   : > { %12644 = vmatpush1.bf16.msra.mxu0 %v18512_v55  ;;  %12559 = vmatprep.subr.bf16.mxu1 %v18517_v42  ;;  %v18590_v55 = vld [vmem:[#allocation19 + $0x370] ss:$24 sps:$4 sm:$0xff]   ;;  %v18595_v42 = vld [vmem:[#allocation19 + $0x69c] ss:$24 sps:$4 sm:$0xff]  }
 0xaab   : > { %12645 = vmatprep.subr.bf16.mxu0 %v18520_v58  ;;  %v18593_v58 = vld [vmem:[#allocation19 + $0x698] ss:$24 sps:$4 sm:$0xff]  }
 0xaad   : > { %12560 = vmatpush1.bf16.msra.mxu1 %v18515_v5  ;;  %v18596_v5 = vld [vmem:[#allocation19 + $0x3a0] ss:$24 sps:$4 sm:$0xff]  }
 0xaae   : > { %12646 = vmatpush1.bf16.msra.mxu0 %v18518_v60  ;;  %12561 = vmatprep.subr.bf16.mxu1 %v18523_v52  ;;  %v18601_v60 = vld [vmem:[#allocation19 + $0x6cc] ss:$24 sps:$4 sm:$0xff]  }
 0xaaf   : > { %12647 = vmatprep.subr.bf16.mxu0 %v18526_v63  ;;  %v18604_v52 = vld [vmem:[#allocation19 + $0x3d4] ss:$24 sps:$4 sm:$0xff]   ;;  %v18599_v63 = vld [vmem:[#allocation19 + $0x6c8] ss:$24 sps:$4 sm:$0xff]  }
 0xab1   : > { %12562 = vmatpush1.bf16.msra.mxu1 %v18521_v0  ;;  %v18607_v0 = vld [vmem:[#allocation19 + $0x6fc] ss:$24 sps:$4 sm:$0xff]  }
 0xab2   : > { %12648 = vmatpush1.bf16.msra.mxu0 %v18524_v2  ;;  %12563 = vmatprep.subr.bf16.mxu1 %v18529_v61  ;;  %v18610_v2 = vld [vmem:[#allocation19 + $0x404] ss:$24 sps:$4 sm:$0xff]   ;;  %v18605_v61 = vld [vmem:[#allocation19 + $0x6f8] ss:$24 sps:$4 sm:$0xff]  }
 0xab3   : > { %12649 = vmatprep.subr.bf16.mxu0 %v18532_v18  ;;  %v18608_v18 = vld [vmem:[#allocation19 + $0x400] ss:$24 sps:$4 sm:$0xff]  }
 0xab5   : > { %12564 = vmatpush1.bf16.msra.mxu1 %v18527_v3  ;;  %v18613_v3 = vld [vmem:[#allocation19 + $0x72c] ss:$24 sps:$4 sm:$0xff]  }
 0xab6   : > { %12650 = vmatpush1.bf16.msra.mxu0 %v18530_v14  ;;  %12565 = vmatprep.subr.bf16.mxu1 %v18535_v1  ;;  %v18616_v14 = vld [vmem:[#allocation19 + $0x434] ss:$24 sps:$4 sm:$0xff]   ;;  %v18611_v1 = vld [vmem:[#allocation19 + $0x728] ss:$24 sps:$4 sm:$0xff]  }
 0xab7   : > { %12651 = vmatprep.subr.bf16.mxu0 %v18538_v12  ;;  %v18614_v12 = vld [vmem:[#allocation19 + $0x430] ss:$24 sps:$4 sm:$0xff]  }
 0xab9   : > { %12566 = vmatpush1.bf16.msra.mxu1 %v18533_v33  ;;  %v18619_v33 = vld [vmem:[#allocation19 + $0x75c] ss:$24 sps:$4 sm:$0xff]  }
 0xaba   : > { %12652 = vmatpush1.bf16.msra.mxu0 %v18536_v17  ;;  %12567 = vmatprep.subr.bf16.mxu1 %v18541_v13  ;;  %v18622_v17 = vld [vmem:[#allocation19 + $0x464] ss:$24 sps:$4 sm:$0xff]   ;;  %v18617_v13 = vld [vmem:[#allocation19 + $0x758] ss:$24 sps:$4 sm:$0xff]  }
 0xabb   : > { %12653 = vmatprep.subr.bf16.mxu0 %v18544_v9  ;;  %v18620_v9 = vld [vmem:[#allocation19 + $0x460] ss:$24 sps:$4 sm:$0xff]  }
 0xabd   : > { %12568 = vmatpush1.bf16.msra.mxu1 %v18539_v10  ;;  %v18625_v10 = vld [vmem:[#allocation19 + $0x78c] ss:$24 sps:$4 sm:$0xff]  }
 0xabe   : > { %12654 = vmatpush1.bf16.msra.mxu0 %v18542_v11  ;;  %12569 = vmatprep.subr.bf16.mxu1 %v18547_v46  ;;  %v18628_v11 = vld [vmem:[#allocation19 + $0x494] ss:$24 sps:$4 sm:$0xff]   ;;  %v18623_v46 = vld [vmem:[#allocation19 + $0x788] ss:$24 sps:$4 sm:$0xff]  }
 0xabf   : > { %12655 = vmatprep.subr.bf16.mxu0 %v18550_v38  ;;  %v18626_v38 = vld [vmem:[#allocation19 + $0x490] ss:$24 sps:$4 sm:$0xff]  }
 0xac1   : > { %12570 = vmatpush1.bf16.msra.mxu1 %v18545_v20  ;;  %v18631_v20 = vld [vmem:[#allocation19 + $0x7bc] ss:$24 sps:$4 sm:$0xff]  }
 0xac2   : > { %12656 = vmatpush1.bf16.msra.mxu0 %v18548_v24  ;;  %12571 = vmatprep.subr.bf16.mxu1 %v18553_v22  ;;  %v18634_v24 = vld [vmem:[#allocation19 + $0x4c4] ss:$24 sps:$4 sm:$0xff]   ;;  %v18629_v22 = vld [vmem:[#allocation19 + $0x7b8] ss:$24 sps:$4 sm:$0xff]  }
 0xac3   : > { %12657 = vmatprep.subr.bf16.mxu0 %v18556_v50  ;;  %v18632_v50 = vld [vmem:[#allocation19 + $0x4c0] ss:$24 sps:$4 sm:$0xff]  }
 0xac5   : > { %12572 = vmatpush1.bf16.msra.mxu1 %v18551_v28  ;;  %v18637_v28 = vld [vmem:[#allocation19 + $0x7ec] ss:$24 sps:$4 sm:$0xff]  }
 0xac6   : > { %12658 = vmatpush1.bf16.msra.mxu0 %v18554_v25  ;;  %12573 = vmatprep.subr.bf16.mxu1 %v18559_v19  ;;  %v18640_v25 = vld [vmem:[#allocation19 + $0x4f4] ss:$24 sps:$4 sm:$0xff]   ;;  %v18635_v19 = vld [vmem:[#allocation19 + $0x7e8] ss:$24 sps:$4 sm:$0xff]  }
 0xac7   : > { %12659 = vmatprep.subr.bf16.mxu0 %v18562_v29  ;;  %v18638_v29 = vld [vmem:[#allocation19 + $0x4f0] ss:$24 sps:$4 sm:$0xff]  }
 0xac9   : > { %12574 = vmatpush1.bf16.msra.mxu1 %v18557_v23  ;;  %v18643_v23 = vld [vmem:[#allocation19 + $0x81c] ss:$24 sps:$4 sm:$0xff]  }
 0xaca   : > { %12660 = vmatpush1.bf16.msra.mxu0 %v18560_v26  ;;  %12575 = vmatprep.subr.bf16.mxu1 %v18565_v54  ;;  %v18646_v26 = vld [vmem:[#allocation19 + $0x524] ss:$24 sps:$4 sm:$0xff]   ;;  %v18641_v54 = vld [vmem:[#allocation19 + $0x818] ss:$24 sps:$4 sm:$0xff]  }
 0xacb   : > { %12661 = vmatprep.subr.bf16.mxu0 %v18568_v32  ;;  %v18644_v32 = vld [vmem:[#allocation19 + $0x520] ss:$24 sps:$4 sm:$0xff]  }
 0xacd   : > { %12576 = vmatpush1.bf16.msra.mxu1 %v18563_v31  ;;  %v18649_v31 = vld [vmem:[#allocation19 + $0x84c] ss:$24 sps:$4 sm:$0xff]  }
 0xace   : > { %12662 = vmatpush1.bf16.msra.mxu0 %v18566_v8  ;;  %12577 = vmatprep.subr.bf16.mxu1 %v18571_v39  ;;  %v18652_v8 = vld [vmem:[#allocation19 + $0x554] ss:$24 sps:$4 sm:$0xff]   ;;  %v18647_v39 = vld [vmem:[#allocation19 + $0x848] ss:$24 sps:$4 sm:$0xff]  }
 0xacf   : > { %12663 = vmatprep.subr.bf16.mxu0 %v18574_v27  ;;  %v18650_v27 = vld [vmem:[#allocation19 + $0x550] ss:$24 sps:$4 sm:$0xff]  }
 0xad1   : > { %12578 = vmatpush1.bf16.msra.mxu1 %v18569_v53  ;;  %v18655_v53 = vld [vmem:[#allocation19 + $0x87c] ss:$24 sps:$4 sm:$0xff]  }
 0xad2   : > { %12664 = vmatpush1.bf16.msra.mxu0 %v18572_v47  ;;  %12590 = vmatprep.subr.bf16.mxu1 %v18577_v44  ;;  %v18658_v47 = vld [vmem:[#allocation19 + $0x584] ss:$24 sps:$4 sm:$0xff]   ;;  %v18653_v44 = vld [vmem:[#allocation19 + $0x878] ss:$24 sps:$4 sm:$0xff]  }
 0xad3   : > { %12676 = vmatprep.subr.bf16.mxu0 %v18580_v35  ;;  %v18656_v35 = vld [vmem:[#allocation19 + $0x580] ss:$24 sps:$4 sm:$0xff]  }
 0xad4   : > { %12580 = vmatmul.mubr.bf16.vlgmr.msra.gmra.mrb[4].mxu1 %v21188_v30 }
 0xad5   : > { %12666 = vmatmul.mubr.bf16.vlgmr.msra.gmra.mrb[4].mxu0 %v21186_v16  ;;  %12591 = vmatpush1.bf16.msra.mxu1 %v18575_v36  ;;  %v18598_v16 = vld [vmem:[#allocation19 + $0x3a4] ss:$24 sps:$4 sm:$0xff]  }
 0xad6   : > { %12677 = vmatpush1.bf16.msra.mxu0 %v18578_v49  ;;  %12592 = vmatprep.subr.bf16.mxu1 %v18583_v40  ;;  %v18661_v36 = vld [vmem:[#allocation19 + $0x8ac] ss:$24 sps:$4 sm:$0xff]   ;;  %v18659_v40 = vld [vmem:[#allocation19 + $0x8a8] ss:$24 sps:$4 sm:$0xff]  }
 0xad7   : > { %12678 = vmatprep.subr.bf16.mxu0 %v18586_v6  ;;  %12622 = vmatprep.mubr.bf16.mxu1 %v21206_v7  ;;  %v18664_v49 = vld [vmem:[#allocation19 + $0x5b4] ss:$24 sps:$4 sm:$0xff]   ;;  %v18662_v6 = vld [vmem:[#allocation19 + $0x5b0] ss:$24 sps:$4 sm:$0xff]  }
 0xad8   : > { %12708 = vmatprep.mubr.bf16.mxu0 %v21183_v56  ;;  %v18602_v56 = vld [vmem:[#allocation19 + $0x3d0] ss:$24 sps:$4 sm:$0xff]  }
 0xad9   : > { %12593 = vmatpush1.bf16.msra.mxu1 %v18581_v41  ;;  %v18667_v41 = vld [vmem:[#allocation19 + $0x8dc] ss:$24 sps:$4 sm:$0xff]  }
 0xada   : > { %12679 = vmatpush1.bf16.msra.mxu0 %v18584_v45  ;;  %12594 = vmatprep.subr.bf16.mxu1 %v18589_v15  ;;  %v18670_v45 = vld [vmem:[#allocation19 + $0x5e4] ss:$24 sps:$4 sm:$0xff]   ;;  %v18665_v15 = vld [vmem:[#allocation19 + $0x8d8] ss:$24 sps:$4 sm:$0xff]  }
 0xadb   : > { %12680 = vmatprep.subr.bf16.mxu0 %v18592_v21  ;;  %v18668_v21 = vld [vmem:[#allocation19 + $0x5e0] ss:$24 sps:$4 sm:$0xff]  }
 0xadd   : > { %12595 = vmatpush1.bf16.msra.mxu1 %v18587_v4  ;;  %v18673_v4 = vld [vmem:[#allocation19 + $0x614] ss:$24 sps:$4 sm:$0xff]  }
 0xade   : > { %12681 = vmatpush1.bf16.msra.mxu0 %v18590_v55  ;;  %12596 = vmatprep.subr.bf16.mxu1 %v18595_v42  ;;  %v18671_v55 = vld [vmem:[#allocation19 + $0x610] ss:$24 sps:$4 sm:$0xff]   ;;  %v18676_v42 = vld [vmem:[#allocation19 + $0x644] ss:$24 sps:$4 sm:$0xff]  }
 0xadf   : > { %12682 = vmatprep.subr.bf16.mxu0 %v18598_v16  ;;  %v18674_v16 = vld [vmem:[#allocation19 + $0x640] ss:$24 sps:$4 sm:$0xff]  }
 0xae1   : > { %12597 = vmatpush1.bf16.msra.mxu1 %v18593_v58  ;;  %v18679_v58 = vld [vmem:[#allocation19 + $0x674] ss:$24 sps:$4 sm:$0xff]  }
 0xae2   : > { %12683 = vmatpush1.bf16.msra.mxu0 %v18596_v5  ;;  %12598 = vmatprep.subr.bf16.mxu1 %v18601_v60  ;;  %v18677_v5 = vld [vmem:[#allocation19 + $0x670] ss:$24 sps:$4 sm:$0xff]   ;;  %v18682_v60 = vld [vmem:[#allocation19 + $0x6a4] ss:$24 sps:$4 sm:$0xff]  }
 0xae3   : > { %12684 = vmatprep.subr.bf16.mxu0 %v18604_v52  ;;  %v18680_v52 = vld [vmem:[#allocation19 + $0x6a0] ss:$24 sps:$4 sm:$0xff]  }
 0xae5   : > { %12599 = vmatpush1.bf16.msra.mxu1 %v18599_v63  ;;  %v18685_v63 = vld [vmem:[#allocation19 + $0x6d4] ss:$24 sps:$4 sm:$0xff]  }
 0xae6   : > { %12685 = vmatpush1.bf16.msra.mxu0 %v18602_v56  ;;  %12600 = vmatprep.subr.bf16.mxu1 %v18607_v0  ;;  %v18683_v56 = vld [vmem:[#allocation19 + $0x6d0] ss:$24 sps:$4 sm:$0xff]   ;;  %v18688_v0 = vld [vmem:[#allocation19 + $0x704] ss:$24 sps:$4 sm:$0xff]  }
 0xae7   : > { %12686 = vmatprep.subr.bf16.mxu0 %v18610_v2  ;;  %v18691_v2 = vld [vmem:[#allocation19 + $0x734] ss:$24 sps:$4 sm:$0xff]  }
 0xae9   : > { %12601 = vmatpush1.bf16.msra.mxu1 %v18605_v61 }
 0xaea   : > { %12687 = vmatpush1.bf16.msra.mxu0 %v18608_v18  ;;  %12602 = vmatprep.subr.bf16.mxu1 %v18613_v3  ;;  %v18689_v18 = vld [vmem:[#allocation19 + $0x730] ss:$24 sps:$4 sm:$0xff]  }
 0xaeb   : > { %12688 = vmatprep.subr.bf16.mxu0 %v18616_v14  ;;  %v18694_v14 = vld [vmem:[#allocation19 + $0x764] ss:$24 sps:$4 sm:$0xff]  }
 0xaed   : > { %12603 = vmatpush1.bf16.msra.mxu1 %v18611_v1 }
 0xaee   : > { %12689 = vmatpush1.bf16.msra.mxu0 %v18614_v12  ;;  %12604 = vmatprep.subr.bf16.mxu1 %v18619_v33  ;;  %v18692_v12 = vld [vmem:[#allocation19 + $0x760] ss:$24 sps:$4 sm:$0xff]   ;;  %v18697_v33 = vld [vmem:[#allocation19 + $0x794] ss:$24 sps:$4 sm:$0xff]  }
 0xaef   : > { %12690 = vmatprep.subr.bf16.mxu0 %v18622_v17  ;;  %v18695_v17 = vld [vmem:[#allocation19 + $0x790] ss:$24 sps:$4 sm:$0xff]  }
 0xaf1   : > { %12605 = vmatpush1.bf16.msra.mxu1 %v18617_v13  ;;  %v18700_v13 = vld [vmem:[#allocation19 + $0x7c4] ss:$24 sps:$4 sm:$0xff]  }
 0xaf2   : > { %12691 = vmatpush1.bf16.msra.mxu0 %v18620_v9  ;;  %12606 = vmatprep.subr.bf16.mxu1 %v18625_v10  ;;  %v18698_v9 = vld [vmem:[#allocation19 + $0x7c0] ss:$24 sps:$4 sm:$0xff]   ;;  %v18703_v10 = vld [vmem:[#allocation19 + $0x7f4] ss:$24 sps:$4 sm:$0xff]  }
 0xaf3   : > { %12692 = vmatprep.subr.bf16.mxu0 %v18628_v11  ;;  %v18701_v11 = vld [vmem:[#allocation19 + $0x7f0] ss:$24 sps:$4 sm:$0xff]  }
 0xaf5   : > { %12607 = vmatpush1.bf16.msra.mxu1 %v18623_v46  ;;  %v18706_v46 = vld [vmem:[#allocation19 + $0x824] ss:$24 sps:$4 sm:$0xff]  }
 0xaf6   : > { %12693 = vmatpush1.bf16.msra.mxu0 %v18626_v38  ;;  %12608 = vmatprep.subr.bf16.mxu1 %v18631_v20  ;;  %v18704_v38 = vld [vmem:[#allocation19 + $0x820] ss:$24 sps:$4 sm:$0xff]   ;;  %v18709_v20 = vld [vmem:[#allocation19 + $0x854] ss:$24 sps:$4 sm:$0xff]  }
 0xaf7   : > { %12694 = vmatprep.subr.bf16.mxu0 %v18634_v24  ;;  %v18707_v24 = vld [vmem:[#allocation19 + $0x850] ss:$24 sps:$4 sm:$0xff]  }
 0xaf9   : > { %12609 = vmatpush1.bf16.msra.mxu1 %v18629_v22  ;;  %v18712_v22 = vld [vmem:[#allocation19 + $0x884] ss:$24 sps:$4 sm:$0xff]  }
 0xafa   : > { %12695 = vmatpush1.bf16.msra.mxu0 %v18632_v50  ;;  %12610 = vmatprep.subr.bf16.mxu1 %v18637_v28  ;;  %v18710_v50 = vld [vmem:[#allocation19 + $0x880] ss:$24 sps:$4 sm:$0xff]   ;;  %v18715_v28 = vld [vmem:[#allocation19 + $0x8b4] ss:$24 sps:$4 sm:$0xff]  }
 0xafb   : > { %12696 = vmatprep.subr.bf16.mxu0 %v18640_v25  ;;  %v18713_v25 = vld [vmem:[#allocation19 + $0x8b0] ss:$24 sps:$4 sm:$0xff]  }
 0xafd   : > { %12611 = vmatpush1.bf16.msra.mxu1 %v18635_v19  ;;  %v18718_v19 = vld [vmem:[#allocation19 + $0x8e4] ss:$24 sps:$4 sm:$0xff]  }
 0xafe   : > { %12697 = vmatpush1.bf16.msra.mxu0 %v18638_v29  ;;  %12612 = vmatprep.subr.bf16.mxu1 %v18643_v23  ;;  %v18716_v29 = vld [vmem:[#allocation19 + $0x8e0] ss:$24 sps:$4 sm:$0xff]  }
 0xaff   : > { %12698 = vmatprep.subr.bf16.mxu0 %v18646_v26  ;;  %v21226_v23 = vld [vmem:[#allocation20] sm:$0x3f] }
 0xb00   : > { %v10908_v26 = vrot.slane %v21226_v23, %v20323_v51 }
 0xb01   : > { %12613 = vmatpush1.bf16.msra.mxu1 %v18641_v54  ;;  %v10912_v54 = vrot.slane %v21226_v23, %v20330_v59 }
 0xb02   : > { %12699 = vmatpush1.bf16.msra.mxu0 %v18644_v32  ;;  %12614 = vmatprep.subr.bf16.mxu1 %v18649_v31 }
 0xb03   : > { %12700 = vmatprep.subr.bf16.mxu0 %v18652_v8 }
 0xb05   : > { %12615 = vmatpush1.bf16.msra.mxu1 %v18647_v39 }
 0xb06   : > { %12701 = vmatpush1.bf16.msra.mxu0 %v18650_v27  ;;  %12616 = vmatprep.subr.bf16.mxu1 %v18655_v53 }
 0xb07   : > { %12702 = vmatprep.subr.bf16.mxu0 %v18658_v47 }
 0xb09   : > { %12617 = vmatpush1.bf16.msra.mxu1 %v18653_v44 }
 0xb0a   : > { %12703 = vmatpush1.bf16.msra.mxu0 %v18656_v35  ;;  %12618 = vmatprep.subr.bf16.mxu1 %v18661_v36 }
 0xb0b   : > { %12704 = vmatprep.subr.bf16.mxu0 %v18664_v49 }
 0xb0d   : > { %12619 = vmatpush1.bf16.msra.mxu1 %v18659_v40 }
 0xb0e   : > { %12705 = vmatpush1.bf16.msra.mxu0 %v18662_v6  ;;  %12620 = vmatprep.subr.bf16.mxu1 %v18667_v41 }
 0xb0f   : > { %12706 = vmatprep.subr.bf16.mxu0 %v18670_v45 }
 0xb11   : > { %12621 = vmatpush1.bf16.msra.mxu1 %v18665_v15 }
 0xb12   : > { %12707 = vmatpush1.bf16.msra.mxu0 %v18668_v21 }
 0xb13   : > { %12719 = vmatprep.subr.bf16.mxu0 %v18673_v4 }
 0xb14   : > { %12623 = vmatmul.mubr.bf16.vlgmr.msra.gmra.mrb[4].mxu1 %v21212_v62 }
 0xb15   : > { %12709 = vmatmul.mubr.bf16.vlgmr.msra.gmra.mrb[4].mxu0 %v21188_v30  ;;  %v18686_v30 = vld [vmem:[#allocation19 + $0x700] ss:$24 sps:$4 sm:$0xff]  }
 0xb16   : > { %12720 = vmatpush1.bf16.msra.mxu0 %v18671_v55  ;;  %12751 = vmatprep.mubr.bf16.mxu0 %v21206_v7  ;;  %v10916_v55 = vrot.slane %v21226_v23, %v20494_v48 }
 0xb17   : > { %12721 = vmatprep.subr.bf16.mxu0 %v18676_v42  ;;  %v10920_v42 = vrot.slane %v21226_v23, %v20499_v57 }
 0xb1a   : > { %12722 = vmatpush1.bf16.msra.mxu0 %v18674_v16 }
 0xb1b   : > { %12723 = vmatprep.subr.bf16.mxu0 %v18679_v58 }
 0xb1e   : > { %12724 = vmatpush1.bf16.msra.mxu0 %v18677_v5 }
 0xb1f   : > { %12725 = vmatprep.subr.bf16.mxu0 %v18682_v60 }
 0xb22   : > { %12726 = vmatpush1.bf16.msra.mxu0 %v18680_v52 }
 0xb23   : > { %12727 = vmatprep.subr.bf16.mxu0 %v18685_v63 }
 0xb26   : > { %12728 = vmatpush1.bf16.msra.mxu0 %v18683_v56 }
 0xb27   : > { %12729 = vmatprep.subr.bf16.mxu0 %v18688_v0  ;;  %v12409_v61 = vpop.f32.mrb[0].mxu1 }
 0xb28   : > { %v12411_v7 = vpop.f32.mrb[1].mxu1  ;;  %v12410_v32 = vadd.f32 %v12409_v61, %v10908_v26 }
 0xb29   : > { %v12413_v3 = vpop.f32.mrb[2].mxu1  ;;  %v12412_v31 = vadd.f32 %v12411_v7, %v10912_v54 }
 0xb2a   : > { %12730 = vmatpush1.bf16.msra.mxu0 %v18686_v30  ;;  %v12415_v1 = vpop.f32.mrb[3].mxu1  ;;  %v12414_v39 = vadd.f32 %v12413_v3, %v10908_v26 }
 0xb2b   : > { %12731 = vmatprep.subr.bf16.mxu0 %v18691_v2  ;;  %v12416_v47 = vadd.f32 %v12415_v1, %v10912_v54 }
 0xb2e   : > { %12732 = vmatpush1.bf16.msra.mxu0 %v18689_v18 }
 0xb2f   : > { %12733 = vmatprep.subr.bf16.mxu0 %v18694_v14 }
 0xb32   : > { %12734 = vmatpush1.bf16.msra.mxu0 %v18692_v12 }
 0xb33   : > { %12735 = vmatprep.subr.bf16.mxu0 %v18697_v33 }
 0xb36   : > { %12736 = vmatpush1.bf16.msra.mxu0 %v18695_v17 }
 0xb37   : > { %12737 = vmatprep.subr.bf16.mxu0 %v18700_v13 }
 0xb3a   : > { %12738 = vmatpush1.bf16.msra.mxu0 %v18698_v9 }
 0xb3b   : > { %12739 = vmatprep.subr.bf16.mxu0 %v18703_v10 }
 0xb3e   : > { %12740 = vmatpush1.bf16.msra.mxu0 %v18701_v11 }
 0xb3f   : > { %12741 = vmatprep.subr.bf16.mxu0 %v18706_v46 }
 0xb42   : > { %12742 = vmatpush1.bf16.msra.mxu0 %v18704_v38 }
 0xb43   : > { %12743 = vmatprep.subr.bf16.mxu0 %v18709_v20 }
 0xb46   : > { %12744 = vmatpush1.bf16.msra.mxu0 %v18707_v24 }
 0xb47   : > { %12745 = vmatprep.subr.bf16.mxu0 %v18712_v22  ;;  %v12879_v22 = vld [vmem:[#allocation22] sm:$0x3f] }
 0xb4a   : > { %12746 = vmatpush1.bf16.msra.mxu0 %v18710_v50  ;;  %v12884_v50 = vrot.slane %v12879_v22, %v20323_v51 }
 0xb4b   : > { %12747 = vmatprep.subr.bf16.mxu0 %v18715_v28  ;;  %v12888_v28 = vrot.slane %v12879_v22, %v20330_v59 }
 0xb4e   : > { %12748 = vmatpush1.bf16.msra.mxu0 %v18713_v25  ;;  %v12892_v25 = vrot.slane %v12879_v22, %v20494_v48 }
 0xb4f   : > { %12749 = vmatprep.subr.bf16.mxu0 %v18718_v19  ;;  %v12896_v19 = vrot.slane %v12879_v22, %v20499_v57 }
 0xb51   : > { %v12906_v26 = vcombine.low %v12892_v25, %v12896_v19 }
 0xb52   : > { %12750 = vmatpush1.bf16.msra.mxu0 %v18716_v29  ;;  %v12905_v29 = vcombine.low %v12884_v50, %v12888_v28 }
 0xb54   : > { %v12913_v54 = vrot.slane %v12905_v29, %v20953_v43 }
 0xb55   : > { %12752 = vmatmul.mubr.bf16.vlgmr.msra.gmra.mrb[4].mxu0 %v21212_v62 }
 0xb68   : > { %v12495_v8 = vpop.f32.mrb[0].mxu0 }
 0xb69   : > { %v16139_v27 = vadd.f32 %v12495_v8, %v12410_v32  ;;  %v12497_v53 = vpop.f32.mrb[1].mxu0  ;;  %v12920_v32 = vrot.slane %v12906_v26, %v20953_v43 }
 0xb6a   : > { %v16141_v44 = vadd.f32 %v12497_v53, %v12412_v31  ;;  %v12499_v35 = vpop.f32.mrb[2].mxu0 }
 0xb6b   : > { %18719 = vtanh.f32 %v16139_v27  ;;  %v16143_v36 = vadd.f32 %v12499_v35, %v12414_v39  ;;  %v12501_v62 = vpop.f32.mrb[3].mxu0  ;;  %v12921_v31 = vcombine.low %v12913_v54, %v12920_v32 }
 0xb6c   : > { %18721 = vtanh.f32 %v16141_v44  ;;  %v16145_v49 = vadd.f32 %v12501_v62, %v12416_v47  ;;  %v12900_v47 = vrot.slane %v12879_v22, %v20592_v34  ;;  %v12904_v44 = vrot.slane %v12879_v22, %v20597_v37 }
 0xb6d   : > { %18723 = vtanh.f32 %v16143_v36  ;;  %v10924_v62 = vrot.slane %v21226_v23, %v20592_v34 }
 0xb6e   : > { %18725 = vtanh.f32 %v16145_v49 }
 0xb75   : > { %v18720_v40 = vpop.eup %18719 }
 0xb76   : > { %v18722_v6 = vpop.eup %18721 }
 0xb77   : > { %v18724_v41 = vpop.eup %18723  ;;  %v12786_v45 = vcombine.low %v18720_v40, %v18722_v6  ;;  %v12787_v15 = vcombine.high %v18720_v40, %v18722_v6 }
 0xb78   : > { %v18726_v21 = vpop.eup %18725 }
 0xb79   : > { %v12840_v4 = vcombine.low %v18724_v41, %v18726_v21  ;;  %v12796_v14 = vrot.slane %v12786_v45, %v20953_v43  ;;  %v12803_v1 = vrot.slane %v12787_v15, %v20953_v43  ;;  %v10928_v41 = vrot.slane %v21226_v23, %v20597_v37 }
 0xb7b   : > { %v12848_v13 = vrot.slane %v12840_v4, %v20953_v43 }
 0xbe7   : > { %v12624_v16 = vpop.f32.mrb[4].mxu1 }
 0xbe8   : > { %v16146_v58 = vadd.f32 %v12624_v16, %v10916_v55  ;;  %v12626_v5 = vpop.f32.mrb[5].mxu1 }
 0xbe9   : > { %v16147_v60 = vadd.f32 %v12626_v5, %v10920_v42  ;;  %v12628_v52 = vpop.f32.mrb[6].mxu1 }
 0xbea   : > { %18727 = vtanh.f32 %v16146_v58  ;;  %v16148_v63 = vadd.f32 %v12628_v52, %v10916_v55  ;;  %v12630_v56 = vpop.f32.mrb[7].mxu1  ;;  %v12922_v55 = vcombine.low %v12900_v47, %v12904_v44 }
 0xbeb   : > { %18729 = vtanh.f32 %v16147_v60  ;;  %v16149_v0 = vadd.f32 %v12630_v56, %v10920_v42 }
 0xbec   : > { %18731 = vtanh.f32 %v16148_v63 }
 0xbed   : > { %18733 = vtanh.f32 %v16149_v0 }
 0xbf4   : > { %v18728_v30 = vpop.eup %18727 }
 0xbf5   : > { %v18730_v2 = vpop.eup %18729 }
 0xbf6   : > { %v18732_v61 = vpop.eup %18731  ;;  %v12788_v7 = vcombine.low %v18728_v30, %v18730_v2  ;;  %v12789_v18 = vcombine.high %v18728_v30, %v18730_v2 }
 0xbf7   : > { %v18734_v3 = vpop.eup %18733 }
 0xbf8   : > { %v12810_v12 = vrot.slane %v12788_v7, %v20953_v43  ;;  %v12817_v33 = vrot.slane %v12789_v18, %v20953_v43  ;;  %v12841_v17 = vcombine.low %v18732_v61, %v18734_v3 }
 0xbfa   : > { %v12819_v9 = vcombine.high %v12796_v14, %v12810_v12  ;;  %v12820_v10 = vcombine.low %v12803_v1, %v12817_v33  ;;  %v12821_v11 = vcombine.high %v12803_v1, %v12817_v33  ;;  %v12855_v46 = vrot.slane %v12841_v17, %v20953_v43 }
 0xbfb   : > { %v12818_v38 = vcombine.low %v12796_v14, %v12810_v12 }
 0xbfc   : > { %v12857_v20 = vcombine.high %v12848_v13, %v12855_v46  ;;  %v12856_v24 = vcombine.low %v12848_v13, %v12855_v46  ;;  %v12934_v39 = vmul.f32 %v12921_v31, %v12819_v9  ;;  %v12936_v36 = vmul.f32 %v12921_v31, %v12820_v10 }
 0xbfd   : > { %v12932_v8 = vmul.f32 %v12921_v31, %v12818_v38  ;;  %v12938_v2 = vmul.f32 %v12921_v31, %v12821_v11 }
 0xbfe   : > { %v12940_v53 = vmul.f32 %v12921_v31, %v12856_v24  ;;  %v12988_v35 = vrot.slane %v12934_v39, %v20953_v43  ;;  %v12942_v6 = vmul.f32 %v12921_v31, %v12857_v20  ;;  %v12981_v15 = vcombine.high %v12934_v39, %v12934_v39 }
 0xbff   : > { %v12963_v27 = vrot.slane %v12932_v8, %v20953_v43  ;;  %v12956_v45 = vcombine.high %v12932_v8, %v12932_v8  ;;  %v13013_v16 = vrot.slane %v12936_v36, %v20953_v43  ;;  %v13006_v11 = vcombine.high %v12936_v36, %v12936_v36 }
 0xc00   : > { %v13063_v40 = vrot.slane %v12940_v53, %v20953_v43  ;;  %v13056_v21 = vcombine.high %v12940_v53, %v12940_v53  ;;  %v12996_v42 = vcombine.high %v12988_v35, %v12988_v35  ;;  %v13088_v63 = vrot.slane %v12942_v6, %v20953_v43 }
 0xc01   : > { %v12971_v49 = vcombine.high %v12963_v27, %v12963_v27  ;;  %v12970_v23 = vrot.slane %v12956_v45, %v20953_v43  ;;  %v12995_v30 = vrot.slane %v12981_v15, %v20953_v43  ;;  %v13143_v18 = vsel %vm13142_vm8, %v12963_v27, 0.0 }
 0xc02   : > { %v13071_v52 = vcombine.high %v13063_v40, %v13063_v40  ;;  %v13070_v3 = vrot.slane %v13056_v21, %v20953_v43  ;;  %v13157_v12 = vsel %vm13142_vm8, %v12996_v42, 0.0  ;;  %v13096_v17 = vcombine.high %v13088_v63, %v13088_v63 }
 0xc03   : > { %v13144_v60 = vsel %vm13142_vm8, %v12971_v49, 0.0  ;;  %v13021_v13 = vcombine.high %v13013_v16, %v13013_v16  ;;  %v12972_v9 = vcombine.high %v12970_v23, %v12970_v23  ;;  %v13081_v10 = vcombine.high %v12942_v6, %v12942_v6 }
 0xc04   : > { %v13145_v1 = vadd.f32 %v13144_v60, %v13143_v18  ;;  %v13196_v33 = vsel %vm13142_vm8, %v13071_v52, 0.0  ;;  %v13195_v46 = vsel %vm13142_vm8, %v13063_v40, 0.0  ;;  %v12997_v38 = vcombine.high %v12995_v30, %v12995_v30 }
 0xc05   : > { %v13156_v20 = vsel %vm13142_vm8, %v12988_v35, 0.0  ;;  %v13038_v24 = vrot.slane %v12938_v2, %v20953_v43  ;;  %v13146_v22 = vsel %vm13142_vm8, %v12970_v23, 0.0  ;;  %v13072_v50 = vcombine.high %v13070_v3, %v13070_v3 }
 0xc06   : > { %v13197_v28 = vadd.f32 %v13196_v33, %v13195_v46  ;;  %v13158_v25 = vadd.f32 %v13157_v12, %v13156_v20  ;;  %v13147_v19 = vadd.f32 %v13146_v22, %v13145_v1  ;;  %v13198_v29 = vsel %vm13142_vm8, %v13070_v3, 0.0 }
 0xc07   : > { %v13209_v26 = vsel %vm13142_vm8, %v13096_v17, 0.0  ;;  %v13170_v54 = vsel %vm13142_vm8, %v13021_v13, 0.0  ;;  %v13148_v32 = vsel %vm13142_vm8, %v12972_v9, 0.0  ;;  %v13095_v31 = vrot.slane %v13081_v10, %v20953_v43 }
 0xc08   : > { %v13020_v8 = vrot.slane %v13006_v11, %v20953_v43  ;;  %v13031_v39 = vcombine.high %v12938_v2, %v12938_v2  ;;  %v13159_v27 = vsel %vm13142_vm8, %v12995_v30, 0.0  ;;  %v13208_v53 = vsel %vm13142_vm8, %v13088_v63, 0.0 }
 0xc09   : > { %v13169_v47 = vsel %vm13142_vm8, %v13013_v16, 0.0  ;;  %v13046_v44 = vcombine.high %v13038_v24, %v13038_v24  ;;  %v13199_v35 = vadd.f32 %v13198_v29, %v13197_v28  ;;  %v13160_v36 = vadd.f32 %v13159_v27, %v13158_v25 }
 0xc0a   : > { %v13171_v49 = vadd.f32 %v13170_v54, %v13169_v47  ;;  %v12929_v6 = vrot.slane %v12922_v55, %v20953_v43  ;;  %v13200_v45 = vsel %vm13142_vm8, %v13072_v50, 0.0  ;;  %v13161_v15 = vsel %vm13142_vm8, %v12997_v38, 0.0 }
 0xc0b   : > { %v13211_v42 = vsel %vm13142_vm8, %v13095_v31, 0.0  ;;  %v13045_v16 = vrot.slane %v13031_v39, %v20953_v43  ;;  %v13172_v63 = vsel %vm13142_vm8, %v13020_v8, 0.0  ;;  %v13162_v23 = vadd.f32 %v13161_v15, %v13160_v36 }
 0xc0c   : > { %v13173_v2 = vadd.f32 %v13172_v63, %v13171_v49  ;;  %v13182_v3 = vsel %vm13142_vm8, %v13038_v24, 0.0 }
 0xc0d   : > { %v13047_v12 = vcombine.high %v13045_v16, %v13045_v16  ;;  %v13185_v20 = vsel %vm13142_vm8, %v13045_v16, 0.0 }
 0xc28   : > { %v12753_v4 = vpop.f32.mrb[4].mxu0 }
 0xc29   : > { %v16150_v58 = vadd.f32 %v12753_v4, %v10924_v62  ;;  %v12755_v5 = vpop.f32.mrb[5].mxu0  ;;  %v13097_v4 = vcombine.high %v13095_v31, %v13095_v31 }
 0xc2a   : > { %v16151_v56 = vadd.f32 %v12755_v5, %v10928_v41  ;;  %v12757_v0 = vpop.f32.mrb[6].mxu0 }
 0xc2b   : > { %18735 = vtanh.f32 %v16150_v58  ;;  %v16152_v61 = vadd.f32 %v12757_v0, %v10924_v62  ;;  %v12759_v7 = vpop.f32.mrb[7].mxu0  ;;  %v13210_v62 = vadd.f32 %v13209_v26, %v13208_v53  ;;  %v13022_v58 = vcombine.high %v13020_v8, %v13020_v8 }
 0xc2c   : > { %18737 = vtanh.f32 %v16151_v56  ;;  %v16153_v14 = vadd.f32 %v12759_v7, %v10928_v41  ;;  %v13149_v41 = vadd.f32 %v13148_v32, %v13147_v19  ;;  %v13183_v56 = vsel %vm13142_vm8, %v13046_v44, 0.0 }
 0xc2d   : > { %18739 = vtanh.f32 %v16152_v61  ;;  %v13201_v0 = vadd.f32 %v13200_v45, %v13199_v35  ;;  %v13212_v30 = vadd.f32 %v13211_v42, %v13210_v62  ;;  %v13174_v1 = vsel %vm13142_vm8, %v13022_v58, 0.0 }
 0xc2e   : > { %18741 = vtanh.f32 %v16153_v14  ;;  %v13213_v14 = vsel %vm13142_vm8, %v13097_v4, 0.0  ;;  %v13184_v33 = vadd.f32 %v13183_v56, %v13182_v3  ;;  %v13175_v46 = vadd.f32 %v13174_v1, %v13173_v2 }
 0xc2f   : > { %v13214_v11 = vadd.f32 %v13213_v14, %v13212_v30  ;;  %v13187_v26 = vsel %vm13142_vm8, %v13047_v12, 0.0 }
 0xc30   : > { %v13186_v29 = vadd.f32 %v13185_v20, %v13184_v33 }
 0xc35   : > { %v18736_v40 = vpop.eup %18735 }
 0xc36   : > { %v18738_v21 = vpop.eup %18737 }
 0xc37   : > { %v18740_v5 = vpop.eup %18739  ;;  %v12822_v60 = vcombine.low %v18736_v40, %v18738_v21  ;;  %v12823_v52 = vcombine.high %v18736_v40, %v18738_v21 }
 0xc38   : > { %v18742_v55 = vpop.eup %18741 }
 0xc39   : > { %v12830_v61 = vrot.slane %v12822_v60, %v20953_v43  ;;  %v12858_v7 = vcombine.low %v18740_v5, %v18742_v55  ;;  %v12837_v18 = vrot.slane %v12823_v52, %v20953_v43 }
 0xc3b   : > { %v12933_v17 = vmul.f32 %v12929_v6, %v12830_v61  ;;  %v12865_v13 = vrot.slane %v12858_v7, %v20953_v43  ;;  %v12838_v9 = vcombine.high %v12830_v61, %v12830_v61  ;;  %v12937_v10 = vmul.f32 %v12929_v6, %v12837_v18 }
 0xc3c   : > { %v12839_v38 = vcombine.high %v12837_v18, %v12837_v18 }
 0xc3d   : > { %v12979_v22 = vrot.slane %v12933_v17, %v20953_v43  ;;  %v12941_v50 = vmul.f32 %v12929_v6, %v12865_v13  ;;  %v12935_v24 = vmul.f32 %v12929_v6, %v12838_v9  ;;  %v12866_v28 = vcombine.high %v12865_v13, %v12865_v13 }
 0xc3e   : > { %v13029_v25 = vrot.slane %v12937_v10, %v20953_v43  ;;  %v12939_v19 = vmul.f32 %v12929_v6, %v12839_v38 }
 0xc3f   : > { %v12980_v54 = vcombine.high %v12979_v22, %v12979_v22  ;;  %v13150_v32 = vsel %vm13142_vm8, %v12979_v22, 0.0  ;;  %v13079_v31 = vrot.slane %v12941_v50, %v20953_v43  ;;  %v13004_v8 = vrot.slane %v12935_v24, %v20953_v43 }
 0xc40   : > { %v13151_v39 = vadd.f32 %v13150_v32, %v13149_v41  ;;  %v12943_v27 = vmul.f32 %v12929_v6, %v12866_v28  ;;  %v13030_v53 = vcombine.high %v13029_v25, %v13029_v25  ;;  %v13176_v47 = vsel %vm13142_vm8, %v13029_v25, 0.0 }
 0xc41   : > { %v13152_v44 = vsel %vm13142_vm8, %v12980_v54, 0.0  ;;  %v13080_v35 = vcombine.high %v13079_v31, %v13079_v31  ;;  %v13202_v36 = vsel %vm13142_vm8, %v13079_v31, 0.0  ;;  %v13005_v62 = vcombine.high %v13004_v8, %v13004_v8 }
 0xc42   : > { %v13153_v49 = vadd.f32 %v13152_v44, %v13151_v39  ;;  %v13203_v40 = vadd.f32 %v13202_v36, %v13201_v0  ;;  %v13163_v45 = vsel %vm13142_vm8, %v13004_v8, 0.0  ;;  %v13104_v15 = vrot.slane %v12943_v27, %v20953_v43 }
 0xc43   : > { %v13204_v21 = vsel %vm13142_vm8, %v13080_v35, 0.0  ;;  %v13164_v4 = vadd.f32 %v13163_v45, %v13162_v23  ;;  %v13165_v6 = vsel %vm13142_vm8, %v13005_v62, 0.0  ;;  %v13177_v41 = vadd.f32 %v13176_v47, %v13175_v46 }
 0xc44   : > { %13154 = vadd.xlane.f32.xlu0 %v13153_v49  ;;  %v13205_v42 = vadd.f32 %v13204_v21, %v13203_v40  ;;  %v13105_v58 = vcombine.high %v13104_v15, %v13104_v15  ;;  %v13215_v16 = vsel %vm13142_vm8, %v13104_v15, 0.0  ;;  %v13178_v5 = vsel %vm13142_vm8, %v13030_v53, 0.0 }
 0xc45   : > { %v13166_v60 = vadd.f32 %v13165_v6, %v13164_v4  ;;  %v13216_v52 = vadd.f32 %v13215_v16, %v13214_v11  ;;  %v13179_v63 = vadd.f32 %v13178_v5, %v13177_v41  ;;  %v13054_v56 = vrot.slane %v12939_v19, %v20953_v43  ;;  %v18757_v16 = vld [vmem:[#allocation3] sm:$0xff] }
 0xc46   : > { %13206 = vadd.xlane.f32.xlu1 %v13205_v42  ;;  %v13217_v55 = vsel %vm13142_vm8, %v13105_v58, 0.0  ;;  %v13188_v0 = vadd.f32 %v13187_v26, %v13186_v29  ;;  %v13268_v5 = vcombine.high %v18757_v16, %v18757_v16 }
 0xc47   : > { %v13218_v23 = vadd.f32 %v13217_v55, %v13216_v52  ;;  %v13055_v30 = vcombine.high %v13054_v56, %v13054_v56  ;;  %v13189_v2 = vsel %vm13142_vm8, %v13054_v56, 0.0  ;;  %v18758_v56 = vld [vmem:[#allocation3 + $0xc] sm:$0xff] }
 0xc48   : > { %13167 = vadd.xlane.f32.xlu0 %v13166_v60  ;;  %v13190_v61 = vadd.f32 %v13189_v2, %v13188_v0  ;;  %v13293_v55 = vcombine.high %v18758_v56, %v18758_v56  ;;  %v21340_v0 = vrot.slane %v18757_v16, %v20953_v43 }
 0xc49   : > { %v13191_v7 = vsel %vm13142_vm8, %v13055_v30, 0.0  ;;  %v18759_v30 = vld [vmem:[#allocation3 + $0x18] sm:$0xff] }
 0xc4a   : > { %13219 = vadd.xlane.f32.xlu1 %v13218_v23  ;;  %v13192_v18 = vadd.f32 %v13191_v7, %v13190_v61  ;;  %v21343_v23 = vrot.slane %v13268_v5, %v20953_v43  ;;  %v13318_v2 = vcombine.high %v18759_v30, %v18759_v30  ;;  %v18760_v61 = vld [vmem:[#allocation3 + $0x24] sm:$0xff] }
 0xc4b   : > { %v13343_v7 = vcombine.high %v18760_v61, %v18760_v61 }
 0xc4c   : > { %13180 = vadd.xlane.f32.xlu0 %v13179_v63 }
 0xc4e   : > { %13193 = vadd.xlane.f32.xlu1 %v13192_v18  ;;  %v18761_v18 = vld [vmem:[#allocation3 + $0x30] sm:$0xff] }
 0xcd1   : > { %v13155_v3 = vpop.xlane.xlu0 %13154 }
 0xcd2   : > { %v13221_v11 = vsel %vm13142_vm8, %v13155_v3, -inf }
 0xcd3   : > { %v13207_v14 = vpop.xlane.xlu1 %13206 }
 0xcd4   : > { %v13225_v33 = vsel %vm13142_vm8, %v13207_v14, -inf }
 0xcd5   : > { %v13168_v1 = vpop.xlane.xlu0 %13167  ;;  %v13226_v46 = vmax.f32 %v13221_v11, %v13225_v33  ;;  %v13307_v33 = vrot.slane %v13293_v55, %v20953_v43  ;;  %v13350_v11 = vrot.slane %v18760_v61, %v20953_v43 }
 0xcd6   : > { %v13222_v17 = vsel %vm13142_vm8, %v13168_v1, -inf }
 0xcd7   : > { %v13220_v12 = vpop.xlane.xlu1 %13219 }
 0xcd8   : > { %v13227_v13 = vsel %vm13142_vm8, %v13220_v12, -inf }
 0xcd9   : > { %v13228_v9 = vmax.f32 %v13222_v17, %v13227_v13  ;;  %v13181_v10 = vpop.xlane.xlu0 %13180  ;;  %v13283_v17 = vcombine.high %v21340_v0, %v21340_v0  ;;  %v13284_v13 = vcombine.high %v21343_v23, %v21343_v23 }
 0xcda   : > { %v13223_v20 = vsel %vm13142_vm8, %v13181_v10, -inf }
 0xcdb   : > { %v13194_v38 = vpop.xlane.xlu1 %13193  ;;  %v13229_v50 = vmax.f32 %v13226_v46, %v13228_v9  ;;  %v13325_v9 = vrot.slane %v18759_v30, %v20953_v43  ;;  %v13357_v46 = vrot.slane %v13343_v7, %v20953_v43 }
 0xcdc   : > { %v13224_v22 = vsel %vm13142_vm8, %v13194_v38, -inf }
 0xcdd   : > { %v13230_v24 = vmax.f32 %v13223_v20, %v13224_v22 }
 0xcdf   : > { %v13231_v28 = vmax.f32 %v13229_v50, %v13230_v24  ;;  %v18769_v24 = vld.sshfl [vmem:[#allocation3 + $0x8] sm:$0x33 pattern:$0x76325410] }
 0xce1   : > { %v13232_v25 = vsub.f32 %v13155_v3, %v13231_v28  ;;  %v13233_v19 = vsub.f32 %v13168_v1, %v13231_v28  ;;  %v13234_v29 = vsub.f32 %v13181_v10, %v13231_v28  ;;  %v13235_v26 = vsub.f32 %v13194_v38, %v13231_v28 }
 0xce2   : > { %v13236_v54 = vsub.f32 %v13207_v14, %v13231_v28  ;;  %v13237_v39 = vsub.f32 %v13220_v12, %v13231_v28  ;;  %v13368_v3 = vcombine.high %v18761_v18, %v18761_v18  ;;  %v18762_v14 = vld [vmem:[#allocation3 + $0x3c] sm:$0xff]  ;;  %v13300_v12 = vrot.slane %v18758_v56, %v20953_v43  ;;  %v18770_v28 = vld.sshfl [vmem:[#allocation3 + $0x14] sm:$0x33 pattern:$0x76325410] }
 0xce3   : > { %v13238_v32 = vmul.f32 1.442695, %v13232_v25  ;;  %v13240_v31 = vmul.f32 1.442695, %v13233_v19  ;;  %v13242_v8 = vmul.f32 1.442695, %v13234_v29  ;;  %v13393_v1 = vcombine.high %v18762_v14, %v18762_v14 }
 0xce4   : > { %v13244_v27 = vmul.f32 1.442695, %v13235_v26  ;;  %v13246_v53 = vmul.f32 1.442695, %v13236_v54  ;;  %v13248_v47 = vmul.f32 1.442695, %v13237_v39  ;;  %v13332_v10 = vrot.slane %v13318_v2, %v20953_v43 }
 0xce5   : > { %18743 = vpow2.f32 %v13238_v32  ;;  %v21356_v38 = vrot.slane %v18761_v18, %v20953_v43  ;;  %v21359_v20 = vrot.slane %v18762_v14, %v20953_v43  ;;  %v21362_v22 = vrot.slane %v13368_v3, %v20953_v43  ;;  %v18771_v29 = vld.sshfl [vmem:[#allocation3 + $0x20] sm:$0x33 pattern:$0x76325410] }
 0xce6   : > { %18745 = vpow2.f32 %v13240_v31  ;;  %v21365_v50 = vrot.slane %v13393_v1, %v20953_v43  ;;  %v13308_v25 = vcombine.high %v13300_v12, %v13300_v12  ;;  %v13309_v19 = vcombine.high %v13307_v33, %v13307_v33  ;;  %v18772_v26 = vld.sshfl [vmem:[#allocation3 + $0x2c] sm:$0x33 pattern:$0x76325410] }
 0xce7   : > { %18747 = vpow2.f32 %v13242_v8  ;;  %v13333_v54 = vcombine.high %v13325_v9, %v13325_v9  ;;  %v13334_v32 = vcombine.high %v13332_v10, %v13332_v10  ;;  %v18773_v31 = vld.sshfl [vmem:[#allocation3 + $0x38] sm:$0x33 pattern:$0x76325410]  ;;  %v13358_v39 = vcombine.high %v13350_v11, %v13350_v11 }
 0xce8   : > { %18749 = vpow2.f32 %v13244_v27  ;;  %v21367_v8 = vld.sshfl [vmem:[#allocation3 + $0x44] sm:$0x33 pattern:$0x76325410]  ;;  %v13359_v27 = vcombine.high %v13357_v46, %v13357_v46 }
 0xce9   : > { %18751 = vpow2.f32 %v13246_v53  ;;  %v13383_v53 = vcombine.high %v21356_v38, %v21356_v38 }
 0xcea   : > { %18753 = vpow2.f32 %v13248_v47  ;;  %v13408_v47 = vcombine.high %v21359_v20, %v21359_v20 }
 0xcef   : > { %v21318_v44 = vpop.eup %18743 }
 0xcf0   : > { %v21320_v35 = vpop.eup %18745  ;;  %v13250_v36 = vsel %vm13142_vm8, %v21318_v44, 0.0 }
 0xcf1   : > { %v21324_v62 = vpop.eup %18747  ;;  %v13251_v49 = vsel %vm13142_vm8, %v21320_v35, 0.0 }
 0xcf2   : > { %v18750_v40 = vpop.eup %18749  ;;  %v13252_v45 = vadd.f32 %v13251_v49, %v13250_v36  ;;  %v13253_v15 = vsel %vm13142_vm8, %v21324_v62, 0.0  ;;  %v21373_v36 = vld [vmem:[#allocation23] sm:$0x3f] }
 0xcf3   : > { %v21330_v21 = vpop.eup %18751  ;;  %v13255_v6 = vsel %vm13142_vm8, %v18750_v40, 0.0 }
 0xcf4   : > { %v13254_v4 = vadd.f32 %v13253_v15, %v13252_v45  ;;  %v21333_v41 = vpop.eup %18753  ;;  %v13257_v58 = vsel %vm13142_vm8, %v21330_v21, 0.0  ;;  %v13384_v45 = vcombine.high %v21362_v22, %v21362_v22  ;;  %v13409_v15 = vcombine.high %v21365_v50, %v21365_v50 }
 0xcf5   : > { %v13259_v52 = vsel %vm13142_vm8, %v21333_v41, 0.0 }
 0xcf6   : > { %v13256_v42 = vadd.f32 %v13255_v6, %v13254_v4  ;;  %v13292_v4 = vcombine.high %v18769_v24, %v18769_v24  ;;  %v13317_v6 = vcombine.high %v18770_v28, %v18770_v28 }
 0xcf8   : > { %v13258_v60 = vadd.f32 %v13257_v58, %v13256_v42  ;;  %v13342_v42 = vcombine.high %v18771_v29, %v18771_v29  ;;  %v13367_v58 = vcombine.high %v18772_v26, %v18772_v26 }
 0xcfa   : > { %v13260_v63 = vadd.f32 %v13259_v52, %v13258_v60  ;;  %v13392_v60 = vcombine.high %v18773_v31, %v18773_v31 }
 0xcfc   : > { %18755 = vrcp.f32 %v13260_v63 }
 0xd06   : > { %v18756_v49 = vpop.eup %18755 }
 0xd07   : > { %v13262_v16 = vmul.f32 %v18756_v49, %v21318_v44  ;;  %v13265_v5 = vmul.f32 %v18756_v49, %v18750_v40  ;;  %v13263_v55 = vmul.f32 %v18756_v49, %v21320_v35  ;;  %v13264_v30 = vmul.f32 %v18756_v49, %v21324_v62 }
 0xd08   : > { %v13266_v40 = vmul.f32 %v18756_v49, %v21330_v21  ;;  %v21394_v61 = vmul.f32 %v18756_v49, %v21333_v41 }
 0xd09   : > { %v13472_v7 = vmul.f32 %v13350_v11, %v13265_v5  ;;  %v13473_v18 = vmul.f32 %v13358_v39, %v13265_v5  ;;  %v13474_v3 = vmul.f32 %v13357_v46, %v13265_v5  ;;  %v21396_v14 = vmul.f32 %v13359_v27, %v13265_v5 }
 0xd0a   : > { %v13454_v35 = vmul.f32 %v21340_v0, %v13262_v16  ;;  %v13455_v1 = vmul.f32 %v13283_v17, %v13262_v16  ;;  %v13456_v62 = vmul.f32 %v21343_v23, %v13262_v16  ;;  %v13457_v52 = vmul.f32 %v13284_v13, %v13262_v16 }
 0xd0b   : > { %v13458_v2 = vmul.f32 %v18769_v24, %v13262_v16  ;;  %v21400_v63 = vmul.f32 %v13292_v4, %v13262_v16  ;;  %v13460_v44 = vmul.f32 %v13300_v12, %v13263_v55  ;;  %v13461_v56 = vmul.f32 %v13308_v25, %v13263_v55 }
 0xd0c   : > { %v13462_v21 = vmul.f32 %v13307_v33, %v13263_v55  ;;  %v13463_v37 = vmul.f32 %v13309_v19, %v13263_v55  ;;  %v13464_v41 = vmul.f32 %v18770_v28, %v13263_v55  ;;  %v21402_v49 = vmul.f32 %v13317_v6, %v13263_v55 }
 0xd0d   : > { %v13466_v11 = vmul.f32 %v13325_v9, %v13264_v30  ;;  %v13467_v46 = vmul.f32 %v13333_v54, %v13264_v30  ;;  %v13468_v39 = vmul.f32 %v13332_v10, %v13264_v30  ;;  %v13469_v27 = vmul.f32 %v13334_v32, %v13264_v30 }
 0xd0e   : > { %v13470_v34 = vmul.f32 %v18771_v29, %v13264_v30  ;;  %v21404_v0 = vmul.f32 %v13342_v42, %v13264_v30  ;;  %v13476_v17 = vmul.f32 %v18772_v26, %v13265_v5  ;;  %v21406_v23 = vmul.f32 %v13367_v58, %v13265_v5 }
 0xd0f   : > { %v13478_v13 = vmul.f32 %v21356_v38, %v13266_v40  ;;  %v13479_v24 = vmul.f32 %v13383_v53, %v13266_v40  ;;  %v13480_v12 = vmul.f32 %v21362_v22, %v13266_v40  ;;  %v13481_v33 = vmul.f32 %v13384_v45, %v13266_v40 }
 0xd10   : > { %v21410_v25 = vmul.f32 %v18773_v31, %v13266_v40  ;;  %v21412_v28 = vmul.f32 %v13392_v60, %v13266_v40  ;;  %v13484_v9 = vmul.f32 %v21359_v20, %v21394_v61  ;;  %v13485_v10 = vmul.f32 %v13408_v47, %v21394_v61 }
 0xd11   : > { %v13490_v19 = vsel %vm13142_vm8, %v13454_v35, 0.0  ;;  %v13491_v29 = vsel %vm13142_vm8, %v13460_v44, 0.0  ;;  %v13486_v38 = vmul.f32 %v21365_v50, %v21394_v61  ;;  %v13487_v26 = vmul.f32 %v13409_v15, %v21394_v61 }
 0xd12   : > { %v13492_v22 = vadd.f32 %v13491_v29, %v13490_v19  ;;  %v13501_v54 = vsel %vm13142_vm8, %v13455_v1, 0.0  ;;  %v13488_v32 = vmul.f32 %v21367_v8, %v21394_v61  ;;  %v13493_v31 = vsel %vm13142_vm8, %v13466_v11, 0.0 }
 0xd13   : > { %v13495_v20 = vsel %vm13142_vm8, %v13472_v7, 0.0  ;;  %v13502_v53 = vsel %vm13142_vm8, %v13461_v56, 0.0  ;;  %v13497_v45 = vsel %vm13142_vm8, %v13478_v13, 0.0  ;;  %v13512_v50 = vsel %vm13142_vm8, %v13456_v62, 0.0 }
 0xd14   : > { %v13494_v47 = vadd.f32 %v13493_v31, %v13492_v22  ;;  %v13503_v4 = vadd.f32 %v13502_v53, %v13501_v54  ;;  %v13499_v15 = vsel %vm13142_vm8, %v13484_v9, 0.0  ;;  %v13504_v6 = vsel %vm13142_vm8, %v13467_v46, 0.0 }
 0xd15   : > { %v13506_v42 = vsel %vm13142_vm8, %v13473_v18, 0.0  ;;  %v13513_v58 = vsel %vm13142_vm8, %v13462_v21, 0.0  ;;  %v13508_v60 = vsel %vm13142_vm8, %v13479_v24, 0.0  ;;  %v13510_v56 = vsel %vm13142_vm8, %v13485_v10, 0.0 }
 0xd16   : > { %v13496_v16 = vadd.f32 %v13495_v20, %v13494_v47  ;;  %v13505_v5 = vadd.f32 %v13504_v6, %v13503_v4  ;;  %v13514_v55 = vadd.f32 %v13513_v58, %v13512_v50  ;;  %v13515_v30 = vsel %vm13142_vm8, %v13468_v39, 0.0 }
 0xd17   : > { %v13523_v44 = vsel %vm13142_vm8, %v13457_v52, 0.0  ;;  %v13524_v40 = vsel %vm13142_vm8, %v13463_v37, 0.0  ;;  %v13517_v18 = vsel %vm13142_vm8, %v13474_v3, 0.0  ;;  %v13526_v21 = vsel %vm13142_vm8, %v13469_v27, 0.0 }
 0xd18   : > { %v13498_v7 = vadd.f32 %v13497_v45, %v13496_v16  ;;  %v13507_v35 = vadd.f32 %v13506_v42, %v13505_v5  ;;  %v13516_v1 = vadd.f32 %v13515_v30, %v13514_v55  ;;  %v13525_v62 = vadd.f32 %v13524_v40, %v13523_v44  ;;  %v21646_v30 = vld [vmem:[#allocation42_spill] sm:$0xff] }
 0xd19   : > { %v13534_v11 = vsel %vm13142_vm8, %v13458_v2, 0.0  ;;  %v13535_v46 = vsel %vm13142_vm8, %v13464_v41, 0.0  ;;  %v13519_v52 = vsel %vm13142_vm8, %v13480_v12, 0.0  ;;  %v13521_v37 = vsel %vm13142_vm8, %v13486_v38, 0.0 }
 0xd1a   : > { %v13500_v13 = vadd.f32 %v13499_v15, %v13498_v7  ;;  %v13509_v24 = vadd.f32 %v13508_v60, %v13507_v35  ;;  %v13518_v9 = vadd.f32 %v13517_v18, %v13516_v1  ;;  %v13527_v39 = vadd.f32 %v13526_v21, %v13525_v62  ;;  %v13593_v1 = vld [vmem:[#allocation7] sm:$0xff]  ;;  %v13557_v18 = vld [vmem:[#allocation2 + $0x8] sm:$0xf] }
 0xd1b   : > { %v13528_v10 = vsel %vm13142_vm8, %v21396_v14, 0.0  ;;  %v13536_v19 = vadd.f32 %v13535_v46, %v13534_v11  ;;  %v13537_v27 = vsel %vm13142_vm8, %v13470_v34, 0.0  ;;  %v13530_v2 = vsel %vm13142_vm8, %v13481_v33, 0.0 }
 0xd1c   : > { %v13511_v29 = vadd.f32 %v13510_v56, %v13509_v24  ;;  %v13520_v3 = vadd.f32 %v13519_v52, %v13518_v9  ;;  %v13529_v22 = vadd.f32 %v13528_v10, %v13527_v39  ;;  %v13545_v54 = vsel %vm13142_vm8, %v21400_v63, 0.0  ;;  %v21645_v56 = vld [vmem:[#allocation41_spill] sm:$0xff]  ;;  %v13594_v24 = vld [vmem:[#allocation7 + $0x8] sm:$0xf] }
 0xd1d   : > { %v13538_v41 = vadd.f32 %v13537_v27, %v13536_v19  ;;  %v13546_v12 = vsel %vm13142_vm8, %v21402_v49, 0.0  ;;  %v13539_v20 = vsel %vm13142_vm8, %v13476_v17, 0.0  ;;  %v13532_v53 = vsel %vm13142_vm8, %v13487_v26, 0.0 }
 0xd1e   : > { %v13522_v31 = vadd.f32 %v13521_v37, %v13520_v3  ;;  %v13531_v38 = vadd.f32 %v13530_v2, %v13529_v22  ;;  %v13547_v14 = vadd.f32 %v13546_v12, %v13545_v54  ;;  %v13548_v34 = vsel %vm13142_vm8, %v21404_v0, 0.0 }
 0xd1f   : > { %v13540_v47 = vadd.f32 %v13539_v20, %v13538_v41  ;;  %v13564_v45 = vcombine.low %v13500_v13, %v13511_v29  ;;  %v13541_v4 = vsel %vm13142_vm8, %v21410_v25, 0.0  ;;  %v21640_v49 = vrot.slane %v21373_v36, %v20330_v59 }
 0xd20   : > { %v13533_v33 = vadd.f32 %v13532_v53, %v13531_v38  ;;  %v13549_v63 = vadd.f32 %v13548_v34, %v13547_v14  ;;  %v21641_v50 = vrot.slane %v21373_v36, %v20323_v51  ;;  %v21642_v26 = vcombine.high %v21367_v8, %v21367_v8 }
 0xd21   : > { %v13542_v6 = vadd.f32 %v13541_v4, %v13540_v47  ;;  %v13550_v0 = vsel %vm13142_vm8, %v21406_v23, 0.0  ;;  %v21643_v25 = vrot.slane %v21373_v36, %v20499_v57  ;;  %v21644_v42 = vrot.slane %v21373_v36, %v20494_v48  ;;  %v13556_v57 = vld [vmem:[#allocation2] sm:$0xff] }
 0xd22   : > { %v13625_v17 = vcombine.low %v21641_v50, %v21640_v49  ;;  %v13489_v15 = vmul.f32 %v21642_v26, %v21394_v61  ;;  %v13543_v58 = vsel %vm13142_vm8, %v13488_v32, 0.0  ;;  %v13551_v51 = vadd.f32 %v13550_v0, %v13549_v63 }
 0xd23   : > { %v13626_v59 = vcombine.low %v21644_v42, %v21643_v25  ;;  %v13565_v16 = vcombine.low %v13522_v31, %v13533_v33  ;;  %v13572_v5 = vrot.slane %v13564_v45, %v20953_v43  ;;  %v13544_v60 = vadd.f32 %v13543_v58, %v13542_v6 }
 0xd24   : > { %v13552_v8 = vsel %vm13142_vm8, %v21412_v28, 0.0  ;;  %v13554_v55 = vsel %vm13142_vm8, %v13489_v15, 0.0  ;;  %v13620_v48 = vrot.slane %v21373_v36, %v21645_v56  ;;  %v13624_v32 = vrot.slane %v21373_v36, %v21646_v30 }
 0xd25   : > { %v13553_v61 = vadd.f32 %v13552_v8, %v13551_v51  ;;  %v13579_v23 = vrot.slane %v13565_v16, %v20953_v43  ;;  %v13633_v7 = vrot.slane %v13625_v17, %v20953_v43  ;;  %v13640_v35 = vrot.slane %v13626_v59, %v20953_v43 }
 0xd26   : > { %v13642_v13 = vcombine.low %v13620_v48, %v13624_v32 }
 0xd27   : > { %v13555_v44 = vadd.f32 %v13554_v55, %v13553_v61  ;;  %v13580_v40 = vcombine.low %v13572_v5, %v13579_v23  ;;  %v13641_v46 = vcombine.low %v13633_v7, %v13640_v35 }
 0xd28   : > { %v13649_v36 = vrot.slane %v13642_v13, %v20953_v43 }
 0xd29   : > { %v13581_v28 = vcombine.low %v13544_v60, %v13555_v44  ;;  %v13591_v62 = vadd.f32 %v13580_v40, %v13556_v57 }
 0xd2b   : > { %v13588_v21 = vrot.slane %v13581_v28, %v20953_v43  ;;  %v13595_v11 = vadd.f32 %v13593_v1, %v13591_v62 }
 0xd2d   : > { %v13592_v9 = vadd.f32 %v13588_v21, %v13557_v18  ;;  %v13597_v39 = vmax.f32 %v13595_v11, 0.0 }
 0xd2f   : > { %v13596_v52 = vadd.f32 %v13594_v24, %v13592_v9  ;;  %v13652_v37 = vmul.f32 %v13641_v46, %v13597_v39 }
 0xd31   : > { %v13598_v10 = vmax.f32 %v13596_v52, 0.0  ;;  %v13656_v19 = vcombine.high %v13652_v37, %v13652_v37  ;;  %v13663_v29 = vrot.slane %v13652_v37, %v20953_v43 }
 0xd33   : > { %v13653_v3 = vmul.f32 %v13649_v36, %v13598_v10  ;;  %v13670_v22 = vrot.slane %v13656_v19, %v20953_v43  ;;  %v13671_v27 = vcombine.high %v13663_v29, %v13663_v29  ;;  %v13687_v54 = vsel %vm13142_vm8, %v13663_v29, 0.0 }
 0xd35   : > { %v13672_v2 = vcombine.high %v13670_v22, %v13670_v22  ;;  %v13679_v41 = vrot.slane %v13653_v3, %v20953_v43  ;;  %v13688_v12 = vsel %vm13142_vm8, %v13671_v27, 0.0  ;;  %v13690_v38 = vsel %vm13142_vm8, %v13670_v22, 0.0  ;;  %v15990_v43 = vld [vmem:[#allocation4] ss:$0 sm:$0xff] }
 0xd36   : > { %v13689_v31 = vadd.f32 %v13688_v12, %v13687_v54 }
 0xd37   : > { %v13680_v14 = vcombine.high %v13679_v41, %v13679_v41  ;;  %v13692_v53 = vsel %vm13142_vm8, %v13672_v2, 0.0  ;;  %v13694_v34 = vsel %vm13142_vm8, %v13679_v41, 0.0 }
 0xd38   : > { %v13691_v20 = vadd.f32 %v13690_v38, %v13689_v31 }
 0xd39   : > { %v13696_v33 = vsel %vm13142_vm8, %v13680_v14, 0.0 }
 0xd3a   : > { %v13693_v47 = vadd.f32 %v13692_v53, %v13691_v20 }
 0xd3c   : > { %v13695_v45 = vadd.f32 %v13694_v34, %v13693_v47 }
 0xd3e   : > { %v13697_v4 = vadd.f32 %v13696_v33, %v13695_v45 }
 0xd40   : > { %13698 = vadd.xlane.f32.xlu0 %v13697_v4 }
 0xdcd   : > { %v13699_v63 = vpop.xlane.xlu0 %13698 }
 0xdce   : > { %v13707_v49 = vadd.f32 %v15990_v43, %v13699_v63 }
 0xdd0   : > { %13709 = vst.msk [vmem:[%s21647_s0] sm:$0x3] %vm13708_vm9, %v13707_v49 }
 0xdd1 PF: > { %s21648_s9 = sld [smem:[#allocation35_spill]]  ;;  %s21649_s17 = sld [smem:[#allocation40_spill]] }
 0xdd2   : > { %s21650_s18 = sld [smem:[#allocation37_spill]]  ;;  %s21651_s19 = sld [smem:[#allocation38_spill]] }
 0xdd3   : > { %s21652_s1 = smov %s19688_s15  ;;  %p34_p3 = scmp.ge.s32.totalorder %s19528_s26, 4  }
 0xdd4   : > { %s21653_s15 = smov %s19222_s16  ;;  %s21655_s13 = smov %s21652_s1 }
 0xdd5   : > { %s21656_s20 = smov %s19528_s26  ;;  %36 = sbr.rel (!%p34_p3) target bundleno = 23 (0x17), region = 203 }
 0xdd7   : > { %s21654_s16 = smov %s21648_s9 }
 0xddc   :  { %13721 = vsyncpa [#allocation6], 1 }
 0xddd   :  { %13723 = vsyncpa [#allocation6 + $0x1], 1 }
 0xdde   :  { %13724 = vsyncpa [#allocation8], 1 }
 0xddf   :  { %13725 = vsyncpa [#allocation12], 1 }
 0xde0   :  { %13726 = vsyncpa [#allocation15], 1 }
 0xde1   :  { %13728 = vsyncpa [#allocation15 + $0x1], 1 }
 0xde2   :  { %13729 = vsyncpa [#allocation18], 1 }
 0xde3   :  { %13731 = vsyncpa [#allocation18 + $0x1], 1 }
 0xde4   :  { %13732 = vsyncpa [#allocation21], 1 }
 0xde5   :  { %13733 = vsyncpa [#allocation24], 1 }

</bundles_post_ra>
